<compile_context>
chip_gen: v5e
topology: v5e:2x2
jax: 0.10.0
libtpu: 0.0.40
codegen_flags: <defaults>
</compile_context>

<pallas_src>
import functools

import jax
import jax.numpy as jnp
from jax.experimental import pallas as pl
from jax.experimental.pallas import tpu as pltpu

C1P = 4  # conv1 input channels padded 3 -> 4 (zero weights in the pad channel)


# ------------------------------ fused kernel --------------------------------

def _fe_kernel(xs_ref, w1_ref, b1_ref, w2_ref, b2_ref, w3_ref, b3_ref,
               w4_ref, b4_ref, fcw_ref, fcb_ref, cw1_ref, cb1_ref,
               cw2_ref, cb2_ref, feat_ref, cls_ref, a1_ref, a2_ref, a3_ref,
               *, eps):
    f32 = jnp.float32

    # ---- conv1: 8x8, stride 4, pad 1 -> 31x31x16.
    # Input is space-to-depth'd into 4x4 pixel blocks ([33,33,64]), so the conv
    # is a 2x2-block window at stride 1: 4 taps, each a contiguous slice.
    acc1 = None
    for t, (bi, bj) in enumerate(((0, 0), (0, 1), (1, 0), (1, 1))):
        xb = xs_ref[0, bi:bi + 32, bj:bj + 32, :]                # [32,32,64]
        xb = xb.reshape(32 * 32, 64)
        term = jnp.dot(xb, w1_ref[t], preferred_element_type=f32)
        acc1 = term if acc1 is None else acc1 + term
    y1 = jnp.maximum(acc1 + b1_ref[...], 0.0)                    # [1024,16]
    a1_ref[:, 0:32, :] = y1.reshape(32, 32, 16)                  # rows/cols 31 unused
    a1_ref[:, 32:40, :] = jnp.zeros((32, 8, 16), f32)            # read-pad region

    # ---- conv2: 4x4, stride 2 -> 14x14x32 (computed on a padded 14x16 grid).
    acc2 = None
    for i in range(4):
        for j in range(4):
            xb = a1_ref[pl.ds(i, 14, 2), pl.ds(j, 16, 2), :]     # [14,16,16]
            xb = xb.reshape(14 * 16, 16)
            term = jnp.dot(xb, w2_ref[i * 4 + j], preferred_element_type=f32)
            acc2 = term if acc2 is None else acc2 + term
    y2 = jnp.maximum(acc2 + b2_ref[...], 0.0)                    # [224,32]
    a2_ref[0:14, 0:16, :] = y2.reshape(14, 16, 32)
    a2_ref[14:16, :, :] = jnp.zeros((2, 24, 32), f32)
    a2_ref[:, 16:24, :] = jnp.zeros((16, 8, 32), f32)

    # ---- conv3: 3x3, stride 2 -> 6x6x64 (padded 6x8 grid).
    acc3 = None
    for i in range(3):
        for j in range(3):
            xb = a2_ref[pl.ds(i, 6, 2), pl.ds(j, 8, 2), :]       # [6,8,32]
            xb = xb.reshape(6 * 8, 32)
            term = jnp.dot(xb, w3_ref[i * 3 + j], preferred_element_type=f32)
            acc3 = term if acc3 is None else acc3 + term
    y3 = jnp.maximum(acc3 + b3_ref[...], 0.0)                    # [48,64]
    a3_ref[0:6, 0:8, :] = y3.reshape(6, 8, 64)
    a3_ref[6:8, :, :] = jnp.zeros((2, 24, 64), f32)
    a3_ref[:, 8:24, :] = jnp.zeros((8, 16, 64), f32)

    # ---- conv4: 3x3, stride 2 -> 2x2x64 (padded 2x8 grid).
    acc4 = None
    for i in range(3):
        for j in range(3):
            xb = a3_ref[pl.ds(i, 2, 2), pl.ds(j, 8, 2), :]       # [2,8,64]
            xb = xb.reshape(2 * 8, 64)
            term = jnp.dot(xb, w4_ref[i * 3 + j], preferred_element_type=f32)
            acc4 = term if acc4 is None else acc4 + term
    y4 = jnp.maximum(acc4 + b4_ref[...], 0.0)                    # [16,64]; valid rows 0,1,8,9

    # ---- fc + L2-normalize (torch NCHW Flatten order handled by weight packing).
    accf = None
    for t, r in enumerate((0, 1, 8, 9)):                         # (h,w)=(0,0),(0,1),(1,0),(1,1)
        term = jnp.dot(y4[r:r + 1, :], fcw_ref[t], preferred_element_type=f32)
        accf = term if accf is None else accf + term
    yf = accf + fcb_ref[...]                                     # [1, features_dim]
    ss = jnp.sum(yf * yf, axis=-1, keepdims=True)
    # yf * rsqrt(max(ss, eps^2)) == yf / max(||yf||, eps)   (F.normalize semantics)
    feat = yf * jax.lax.rsqrt(jnp.maximum(ss, eps * eps))
    feat_ref[0] = feat

    # ---- classifier head: Linear -> ReLU -> Linear -> Sigmoid.
    h = jnp.maximum(jnp.dot(feat, cw1_ref[...], preferred_element_type=f32)
                    + cb1_ref[...], 0.0)                         # [1,16]
    z = jnp.dot(h, cw2_ref[...], preferred_element_type=f32) + cb2_ref[...]
    cls_ref[0] = jax.nn.sigmoid(z)                               # [1,8]


# ------------------------------ forward glue ---------------------------------

def _space_to_depth_input(observations, n_input_channels):
    """[B,C,128,128] -> [B,33,33,16*C1P] f32: NHWC, conv pad(+alignment pad),
    4x4 space-to-depth so conv1 (k=8,s=4,p=1) becomes a 2x2-block stride-1 conv."""
    B = observations.shape[0]
    x = observations.reshape(B, n_input_channels, 128, 128)
    x = jnp.transpose(x, (0, 2, 3, 1))                           # NCHW -> NHWC
    x = jnp.pad(x, ((0, 0), (1, 3), (1, 3), (0, C1P - n_input_channels)))
    x = x.reshape(B, 33, 4, 33, 4, C1P).transpose(0, 1, 3, 2, 4, 5)
    return x.reshape(B, 33, 33, 16 * C1P).astype(jnp.float32)


def fe_class_forward(packed, observations, n_input_channels=3, features_dim=64,
                     eps=1e-12):
    """Returns (features [B, features_dim] L2-normalized, classes [B, 8] sigmoid)."""
    B = observations.shape[0]
    xs = _space_to_depth_input(observations, n_input_channels)   # [B,33,33,64]

    feat3, cls3 = pl.pallas_call(
        functools.partial(_fe_kernel, eps=eps),
        out_shape=(jax.ShapeDtypeStruct((B, 1, features_dim), jnp.float32),
                   jax.ShapeDtypeStruct((B, 1, 8), jnp.float32)),
        grid_spec=pltpu.PrefetchScalarGridSpec(
            num_scalar_prefetch=0,
            grid=(B,),
            in_specs=[
                pl.BlockSpec((1, 33, 33, 16 * C1P), lambda b: (b, 0, 0, 0)),
                pl.BlockSpec((4, 16 * C1P, 16), lambda b: (0, 0, 0)),      # conv1 W
                pl.BlockSpec((1, 16), lambda b: (0, 0)),                   # conv1 b
                pl.BlockSpec((16, 16, 32), lambda b: (0, 0, 0)),           # conv2 W
                pl.BlockSpec((1, 32), lambda b: (0, 0)),
                pl.BlockSpec((9, 32, 64), lambda b: (0, 0, 0)),            # conv3 W
                pl.BlockSpec((1, 64), lambda b: (0, 0)),
                pl.BlockSpec((9, 64, 64), lambda b: (0, 0, 0)),            # conv4 W
                pl.BlockSpec((1, 64), lambda b: (0, 0)),
                pl.BlockSpec((4, 64, features_dim), lambda b: (0, 0, 0)),  # fc W
                pl.BlockSpec((1, features_dim), lambda b: (0, 0)),
                pl.BlockSpec((features_dim, 16), lambda b: (0, 0)),        # clf1 W
                pl.BlockSpec((1, 16), lambda b: (0, 0)),
                pl.BlockSpec((16, 8), lambda b: (0, 0)),                   # clf2 W
                pl.BlockSpec((1, 8), lambda b: (0, 0)),
            ],
            out_specs=[
                pl.BlockSpec((1, 1, features_dim), lambda b: (b, 0, 0)),
                pl.BlockSpec((1, 1, 8), lambda b: (b, 0, 0)),
            ],
            scratch_shapes=[
                pltpu.VMEM((32, 40, 16), jnp.float32),   # conv1 activations
                pltpu.VMEM((16, 24, 32), jnp.float32),   # conv2 activations
                pltpu.VMEM((8, 24, 64), jnp.float32),    # conv3 activations
            ],
        ),
        compiler_params=pltpu.CompilerParams(dimension_semantics=("parallel",)),
    )(xs,
      packed["c1_w"], packed["c1_b"], packed["c2_w"], packed["c2_b"],
      packed["c3_w"], packed["c3_b"], packed["c4_w"], packed["c4_b"],
      packed["fc_w"], packed["fc_b"], packed["clf1_w"], packed["clf1_b"],
      packed["clf2_w"], packed["clf2_b"])
    return feat3.reshape(B, features_dim), cls3.reshape(B, 8)


# ------------------------------- parameters ----------------------------------

def init_params(key, n_input_channels=3, features_dim=64):
    """Torch-layout parameters (Conv2d: [Cout,Cin,kh,kw]; Linear stored as [in,out])."""
    keys = jax.random.split(key, 14)

    def uinit(k, shape, fan_in):
        bound = float(fan_in) ** -0.5
        return jax.random.uniform(k, shape, jnp.float32, -bound, bound)

    p = {}
    p["c1_w"] = uinit(keys[0], (16, n_input_channels, 8, 8), n_input_channels * 64)
    p["c1_b"] = uinit(keys[1], (1, 16), n_input_channels * 64)
    p["c2_w"] = uinit(keys[2], (32, 16, 4, 4), 16 * 16)
    p["c2_b"] = uinit(keys[3], (1, 32), 16 * 16)
    p["c3_w"] = uinit(keys[4], (64, 32, 3, 3), 32 * 9)
    p["c3_b"] = uinit(keys[5], (1, 64), 32 * 9)
    p["c4_w"] = uinit(keys[6], (64, 64, 3, 3), 64 * 9)
    p["c4_b"] = uinit(keys[7], (1, 64), 64 * 9)
    p["fc_w"] = uinit(keys[8], (256, features_dim), 256)          # n_flatten = 64*2*2
    p["fc_b"] = uinit(keys[9], (1, features_dim), 256)
    p["clf1_w"] = uinit(keys[10], (features_dim, 16), features_dim)
    p["clf1_b"] = uinit(keys[11], (1, 16), features_dim)
    p["clf2_w"] = uinit(keys[12], (16, 8), 16)
    p["clf2_b"] = uinit(keys[13], (1, 8), 16)
    return p


def pack_params(p, n_input_channels=3):
    """Pre-pack torch-layout params into dense per-tap f32 matmul operands."""
    q = {}

    # conv1: [Cout,Cin,8,8] -> [4 (bi*2+bj), 4*4*C1P (ri,rj,c), 16]
    w = p["c1_w"]
    cin = w.shape[1]
    w4 = jnp.transpose(w, (2, 3, 1, 0))                           # [8,8,cin,16]
    w4 = jnp.pad(w4, ((0, 0), (0, 0), (0, C1P - cin), (0, 0)))
    w4 = w4.reshape(2, 4, 2, 4, C1P, 16).transpose(0, 2, 1, 3, 4, 5)   # (bi,bj,ri,rj,c,co)
    q["c1_w"] = w4.reshape(4, 16 * C1P, 16).astype(jnp.float32)
    q["c1_b"] = p["c1_b"].astype(jnp.float32)

    def conv_taps(w):  # torch [Cout,Cin,kh,kw] -> [kh*kw, Cin, Cout]
        cout, cin_, kh, kw = w.shape
        return (jnp.transpose(w, (2, 3, 1, 0))
                .reshape(kh * kw, cin_, cout).astype(jnp.float32))

    q["c2_w"] = conv_taps(p["c2_w"]); q["c2_b"] = p["c2_b"].astype(jnp.float32)
    q["c3_w"] = conv_taps(p["c3_w"]); q["c3_b"] = p["c3_b"].astype(jnp.float32)
    q["c4_w"] = conv_taps(p["c4_w"]); q["c4_b"] = p["c4_b"].astype(jnp.float32)

    # fc: torch Flatten of NCHW [B,64,2,2] is (c,h,w)-ordered; regroup per (h,w).
    fd = p["fc_w"].shape[1]
    q["fc_w"] = (p["fc_w"].reshape(64, 2, 2, fd).transpose(1, 2, 0, 3)
                 .reshape(4, 64, fd).astype(jnp.float32))
    q["fc_b"] = p["fc_b"].astype(jnp.float32)

    q["clf1_w"] = p["clf1_w"].astype(jnp.float32)
    q["clf1_b"] = p["clf1_b"].astype(jnp.float32)
    q["clf2_w"] = p["clf2_w"].astype(jnp.float32)
    q["clf2_b"] = p["clf2_b"].astype(jnp.float32)
    return q


# -------------------------- pure-JAX reference check -------------------------

def fe_class_reference(p, observations, n_input_channels=3, eps=1e-12):
    B = observations.shape[0]
    x = observations.reshape(B, n_input_channels, 128, 128)

    def conv(x, w, b, stride, padding):
        y = jax.lax.conv_general_dilated(
            x, w, window_strides=(stride, stride),
            padding=[(padding, padding), (padding, padding)],
            dimension_numbers=("NCHW", "OIHW", "NCHW"),
            precision=jax.lax.Precision.HIGHEST)
        return jnp.maximum(y + b.reshape(1, -1, 1, 1), 0.0)

    x = conv(x, p["c1_w"], p["c1_b"], 4, 1)
    x = conv(x, p["c2_w"], p["c2_b"], 2, 0)
    x = conv(x, p["c3_w"], p["c3_b"], 2, 0)
    x = conv(x, p["c4_w"], p["c4_b"], 2, 0)
    xf = x.reshape(B, -1)                                         # NCHW flatten
    y = xf @ p["fc_w"] + p["fc_b"]
    feat = y / jnp.maximum(jnp.linalg.norm(y, axis=1, keepdims=True), eps)
    h = jnp.maximum(feat @ p["clf1_w"] + p["clf1_b"], 0.0)
    cls = jax.nn.sigmoid(h @ p["clf2_w"] + p["clf2_b"])
    return feat, cls


# ----------------------------------- main ------------------------------------

if __name__ == "__main__":
    key = jax.random.PRNGKey(0)
    pkey, xkey = jax.random.split(key)
    params = init_params(pkey)
    packed = pack_params(params)

    # Forward hardcodes a reshape to [B, 3, 128, 128]; use batch=2.
    observations = jax.random.uniform(xkey, (2, 3, 128, 128), jnp.float32)

    fwd = jax.jit(fe_class_forward)
    features, classes = fwd(packed, observations)
    jax.block_until_ready((features, classes))

    assert features.shape == (2, 64) and classes.shape == (2, 8)
    assert bool(jnp.all(jnp.isfinite(features))) and bool(jnp.all(jnp.isfinite(classes)))
    # features are L2-normalized along dim=1; classes come from a sigmoid
    assert bool(jnp.allclose(jnp.linalg.norm(features, axis=1), 1.0, atol=1e-3))
    assert bool(jnp.all((classes > 0.0) & (classes < 1.0)))

    # Cross-check against a pure-JAX reference of the torch module.
    ref_feat, ref_cls = fe_class_reference(params, observations)
    assert bool(jnp.allclose(features, ref_feat, atol=2e-2)), "features mismatch"
    assert bool(jnp.allclose(classes, ref_cls, atol=2e-2)), "classes mismatch"

    print("KERNEL_OK")
</pallas_src>

<mosaic_0001>
module attributes {stable_mosaic.version = 11 : i64} {
  func.func @_fe_kernel(%arg0: i32, %arg1: memref<1x33x33x64xf32, #tpu.memory_space<vmem>>, %arg2: memref<4x64x16xf32, #tpu.memory_space<vmem>>, %arg3: memref<1x16xf32, #tpu.memory_space<vmem>>, %arg4: memref<16x16x32xf32, #tpu.memory_space<vmem>>, %arg5: memref<1x32xf32, #tpu.memory_space<vmem>>, %arg6: memref<9x32x64xf32, #tpu.memory_space<vmem>>, %arg7: memref<1x64xf32, #tpu.memory_space<vmem>>, %arg8: memref<9x64x64xf32, #tpu.memory_space<vmem>>, %arg9: memref<1x64xf32, #tpu.memory_space<vmem>>, %arg10: memref<4x64x64xf32, #tpu.memory_space<vmem>>, %arg11: memref<1x64xf32, #tpu.memory_space<vmem>>, %arg12: memref<64x16xf32, #tpu.memory_space<vmem>>, %arg13: memref<1x16xf32, #tpu.memory_space<vmem>>, %arg14: memref<16x8xf32, #tpu.memory_space<vmem>>, %arg15: memref<1x8xf32, #tpu.memory_space<vmem>>, %arg16: memref<1x1x64xf32, #tpu.memory_space<vmem>>, %arg17: memref<1x1x8xf32, #tpu.memory_space<vmem>>, %arg18: memref<32x40x16xf32, #tpu.memory_space<vmem>>, %arg19: memref<16x24x32xf32, #tpu.memory_space<vmem>>, %arg20: memref<8x24x64xf32, #tpu.memory_space<vmem>>) attributes {dimension_semantics = [#tpu.dimension_semantics<parallel>], iteration_bounds = array<i64: 2>, scalar_prefetch = 0 : i64, scratch_operands = 3 : i64, tpu.core_type = #tpu.core_type<tc>, window_params = [{transform_indices = @transform_0, window_bounds = array<i64: 1, 33, 33, 64>}, {pipeline_mode = #tpu.pipeline_mode<synchronous>, transform_indices = @transform_1, window_bounds = array<i64: 4, 64, 16>}, {pipeline_mode = #tpu.pipeline_mode<synchronous>, transform_indices = @transform_2, window_bounds = array<i64: 1, 16>}, {pipeline_mode = #tpu.pipeline_mode<synchronous>, transform_indices = @transform_3, window_bounds = array<i64: 16, 16, 32>}, {pipeline_mode = #tpu.pipeline_mode<synchronous>, transform_indices = @transform_4, window_bounds = array<i64: 1, 32>}, {pipeline_mode = #tpu.pipeline_mode<synchronous>, transform_indices = @transform_5, window_bounds = array<i64: 9, 32, 64>}, {pipeline_mode = #tpu.pipeline_mode<synchronous>, transform_indices = @transform_6, window_bounds = array<i64: 1, 64>}, {pipeline_mode = #tpu.pipeline_mode<synchronous>, transform_indices = @transform_7, window_bounds = array<i64: 9, 64, 64>}, {pipeline_mode = #tpu.pipeline_mode<synchronous>, transform_indices = @transform_8, window_bounds = array<i64: 1, 64>}, {pipeline_mode = #tpu.pipeline_mode<synchronous>, transform_indices = @transform_9, window_bounds = array<i64: 4, 64, 64>}, {pipeline_mode = #tpu.pipeline_mode<synchronous>, transform_indices = @transform_10, window_bounds = array<i64: 1, 64>}, {pipeline_mode = #tpu.pipeline_mode<synchronous>, transform_indices = @transform_11, window_bounds = array<i64: 64, 16>}, {pipeline_mode = #tpu.pipeline_mode<synchronous>, transform_indices = @transform_12, window_bounds = array<i64: 1, 16>}, {pipeline_mode = #tpu.pipeline_mode<synchronous>, transform_indices = @transform_13, window_bounds = array<i64: 16, 8>}, {pipeline_mode = #tpu.pipeline_mode<synchronous>, transform_indices = @transform_14, window_bounds = array<i64: 1, 8>}, {transform_indices = @transform_15, window_bounds = array<i64: 1, 1, 64>}, {transform_indices = @transform_16, window_bounds = array<i64: 1, 1, 8>}]} {
    %c0 = arith.constant 0 : index
    %c0_0 = arith.constant 0 : index
    %c0_1 = arith.constant 0 : index
    %c0_2 = arith.constant 0 : index
    %0 = vector.load %arg1[%c0, %c0_0, %c0_1, %c0_2] : memref<1x33x33x64xf32, #tpu.memory_space<vmem>>, vector<1x32x32x64xf32>
    %1 = vector.shape_cast %0 : vector<1x32x32x64xf32> to vector<32x32x64xf32>
    %2 = vector.shape_cast %1 : vector<32x32x64xf32> to vector<1024x64xf32>
    %c0_3 = arith.constant 0 : index
    %c0_4 = arith.constant 0 : index
    %c0_5 = arith.constant 0 : index
    %3 = vector.load %arg2[%c0_3, %c0_4, %c0_5] : memref<4x64x16xf32, #tpu.memory_space<vmem>>, vector<1x64x16xf32>
    %4 = vector.shape_cast %3 : vector<1x64x16xf32> to vector<64x16xf32>
    %cst = arith.constant dense<0.000000e+00> : vector<1024x16xf32>
    %5 = tpu.matmul %2, %4, %cst {dimension_numbers = #tpu.dot_dimension_numbers<[1], [0], [0], [1], [0, 0, 1, 1], [], []>} : vector<1024x64xf32>, vector<64x16xf32>, vector<1024x16xf32> -> vector<1024x16xf32>
    %c0_6 = arith.constant 0 : index
    %c0_7 = arith.constant 0 : index
    %c1 = arith.constant 1 : index
    %c0_8 = arith.constant 0 : index
    %6 = vector.load %arg1[%c0_6, %c0_7, %c1, %c0_8] : memref<1x33x33x64xf32, #tpu.memory_space<vmem>>, vector<1x32x32x64xf32>
    %7 = vector.shape_cast %6 : vector<1x32x32x64xf32> to vector<32x32x64xf32>
    %8 = vector.shape_cast %7 : vector<32x32x64xf32> to vector<1024x64xf32>
    %c1_9 = arith.constant 1 : index
    %c0_10 = arith.constant 0 : index
    %c0_11 = arith.constant 0 : index
    %9 = vector.load %arg2[%c1_9, %c0_10, %c0_11] : memref<4x64x16xf32, #tpu.memory_space<vmem>>, vector<1x64x16xf32>
    %10 = vector.shape_cast %9 : vector<1x64x16xf32> to vector<64x16xf32>
    %cst_12 = arith.constant dense<0.000000e+00> : vector<1024x16xf32>
    %11 = tpu.matmul %8, %10, %cst_12 {dimension_numbers = #tpu.dot_dimension_numbers<[1], [0], [0], [1], [0, 0, 1, 1], [], []>} : vector<1024x64xf32>, vector<64x16xf32>, vector<1024x16xf32> -> vector<1024x16xf32>
    %12 = arith.addf %5, %11 : vector<1024x16xf32>
    %c0_13 = arith.constant 0 : index
    %c1_14 = arith.constant 1 : index
    %c0_15 = arith.constant 0 : index
    %c0_16 = arith.constant 0 : index
    %13 = vector.load %arg1[%c0_13, %c1_14, %c0_15, %c0_16] : memref<1x33x33x64xf32, #tpu.memory_space<vmem>>, vector<1x32x32x64xf32>
    %14 = vector.shape_cast %13 : vector<1x32x32x64xf32> to vector<32x32x64xf32>
    %15 = vector.shape_cast %14 : vector<32x32x64xf32> to vector<1024x64xf32>
    %c2 = arith.constant 2 : index
    %c0_17 = arith.constant 0 : index
    %c0_18 = arith.constant 0 : index
    %16 = vector.load %arg2[%c2, %c0_17, %c0_18] : memref<4x64x16xf32, #tpu.memory_space<vmem>>, vector<1x64x16xf32>
    %17 = vector.shape_cast %16 : vector<1x64x16xf32> to vector<64x16xf32>
    %cst_19 = arith.constant dense<0.000000e+00> : vector<1024x16xf32>
    %18 = tpu.matmul %15, %17, %cst_19 {dimension_numbers = #tpu.dot_dimension_numbers<[1], [0], [0], [1], [0, 0, 1, 1], [], []>} : vector<1024x64xf32>, vector<64x16xf32>, vector<1024x16xf32> -> vector<1024x16xf32>
    %19 = arith.addf %12, %18 : vector<1024x16xf32>
    %c0_20 = arith.constant 0 : index
    %c1_21 = arith.constant 1 : index
    %c1_22 = arith.constant 1 : index
    %c0_23 = arith.constant 0 : index
    %20 = vector.load %arg1[%c0_20, %c1_21, %c1_22, %c0_23] : memref<1x33x33x64xf32, #tpu.memory_space<vmem>>, vector<1x32x32x64xf32>
    %21 = vector.shape_cast %20 : vector<1x32x32x64xf32> to vector<32x32x64xf32>
    %22 = vector.shape_cast %21 : vector<32x32x64xf32> to vector<1024x64xf32>
    %c3 = arith.constant 3 : index
    %c0_24 = arith.constant 0 : index
    %c0_25 = arith.constant 0 : index
    %23 = vector.load %arg2[%c3, %c0_24, %c0_25] : memref<4x64x16xf32, #tpu.memory_space<vmem>>, vector<1x64x16xf32>
    %24 = vector.shape_cast %23 : vector<1x64x16xf32> to vector<64x16xf32>
    %cst_26 = arith.constant dense<0.000000e+00> : vector<1024x16xf32>
    %25 = tpu.matmul %22, %24, %cst_26 {dimension_numbers = #tpu.dot_dimension_numbers<[1], [0], [0], [1], [0, 0, 1, 1], [], []>} : vector<1024x64xf32>, vector<64x16xf32>, vector<1024x16xf32> -> vector<1024x16xf32>
    %26 = arith.addf %19, %25 : vector<1024x16xf32>
    %c0_27 = arith.constant 0 : index
    %c0_28 = arith.constant 0 : index
    %27 = vector.load %arg3[%c0_27, %c0_28] : memref<1x16xf32, #tpu.memory_space<vmem>>, vector<1x16xf32>
    %28 = vector.broadcast %27 : vector<1x16xf32> to vector<1024x16xf32>
    %29 = arith.addf %26, %28 : vector<1024x16xf32>
    %cst_29 = arith.constant 0.000000e+00 : f32
    %30 = vector.broadcast %cst_29 : f32 to vector<1024x16xf32>
    %31 = arith.maximumf %29, %30 : vector<1024x16xf32>
    %32 = vector.shape_cast %31 : vector<1024x16xf32> to vector<32x32x16xf32>
    %c0_30 = arith.constant 0 : index
    %c0_31 = arith.constant 0 : index
    %c0_32 = arith.constant 0 : index
    %33 = vector.load %arg18[%c0_30, %c0_31, %c0_32] : memref<32x40x16xf32, #tpu.memory_space<vmem>>, vector<32x32x16xf32>
    tpu.vector_store %arg18[%c0_30, %c0_31, %c0_32], %32 {strides = array<i32>} : memref<32x40x16xf32, #tpu.memory_space<vmem>>, vector<32x32x16xf32>,
    %cst_33 = arith.constant 0.000000e+00 : f32
    %34 = vector.broadcast %cst_33 : f32 to vector<32x8x16xf32>
    %c0_34 = arith.constant 0 : index
    %c32 = arith.constant 32 : index
    %c0_35 = arith.constant 0 : index
    %35 = vector.load %arg18[%c0_34, %c32, %c0_35] : memref<32x40x16xf32, #tpu.memory_space<vmem>>, vector<32x8x16xf32>
    tpu.vector_store %arg18[%c0_34, %c32, %c0_35], %34 {strides = array<i32>} : memref<32x40x16xf32, #tpu.memory_space<vmem>>, vector<32x8x16xf32>,
    %c0_36 = arith.constant 0 : index
    %c0_37 = arith.constant 0 : index
    %c0_38 = arith.constant 0 : index
    %36 = tpu.strided_load %arg18[%c0_36, %c0_37, %c0_38] {strides = array<i32: 2, 2, 1>} : memref<32x40x16xf32, #tpu.memory_space<vmem>>, vector<14x16x16xf32>
    %37 = vector.shape_cast %36 : vector<14x16x16xf32> to vector<224x16xf32>
    %c0_39 = arith.constant 0 : index
    %c0_40 = arith.constant 0 : index
    %c0_41 = arith.constant 0 : index
    %38 = vector.load %arg4[%c0_39, %c0_40, %c0_41] : memref<16x16x32xf32, #tpu.memory_space<vmem>>, vector<1x16x32xf32>
    %39 = vector.shape_cast %38 : vector<1x16x32xf32> to vector<16x32xf32>
    %cst_42 = arith.constant dense<0.000000e+00> : vector<224x32xf32>
    %40 = tpu.matmul %37, %39, %cst_42 {dimension_numbers = #tpu.dot_dimension_numbers<[1], [0], [0], [1], [0, 0, 1, 1], [], []>} : vector<224x16xf32>, vector<16x32xf32>, vector<224x32xf32> -> vector<224x32xf32>
    %c0_43 = arith.constant 0 : index
    %c1_44 = arith.constant 1 : index
    %c0_45 = arith.constant 0 : index
    %41 = tpu.strided_load %arg18[%c0_43, %c1_44, %c0_45] {strides = array<i32: 2, 2, 1>} : memref<32x40x16xf32, #tpu.memory_space<vmem>>, vector<14x16x16xf32>
    %42 = vector.shape_cast %41 : vector<14x16x16xf32> to vector<224x16xf32>
    %c1_46 = arith.constant 1 : index
    %c0_47 = arith.constant 0 : index
    %c0_48 = arith.constant 0 : index
    %43 = vector.load %arg4[%c1_46, %c0_47, %c0_48] : memref<16x16x32xf32, #tpu.memory_space<vmem>>, vector<1x16x32xf32>
    %44 = vector.shape_cast %43 : vector<1x16x32xf32> to vector<16x32xf32>
    %cst_49 = arith.constant dense<0.000000e+00> : vector<224x32xf32>
    %45 = tpu.matmul %42, %44, %cst_49 {dimension_numbers = #tpu.dot_dimension_numbers<[1], [0], [0], [1], [0, 0, 1, 1], [], []>} : vector<224x16xf32>, vector<16x32xf32>, vector<224x32xf32> -> vector<224x32xf32>
    %46 = arith.addf %40, %45 : vector<224x32xf32>
    %c0_50 = arith.constant 0 : index
    %c2_51 = arith.constant 2 : index
    %c0_52 = arith.constant 0 : index
    %47 = tpu.strided_load %arg18[%c0_50, %c2_51, %c0_52] {strides = array<i32: 2, 2, 1>} : memref<32x40x16xf32, #tpu.memory_space<vmem>>, vector<14x16x16xf32>
    %48 = vector.shape_cast %47 : vector<14x16x16xf32> to vector<224x16xf32>
    %c2_53 = arith.constant 2 : index
    %c0_54 = arith.constant 0 : index
    %c0_55 = arith.constant 0 : index
    %49 = vector.load %arg4[%c2_53, %c0_54, %c0_55] : memref<16x16x32xf32, #tpu.memory_space<vmem>>, vector<1x16x32xf32>
    %50 = vector.shape_cast %49 : vector<1x16x32xf32> to vector<16x32xf32>
    %cst_56 = arith.constant dense<0.000000e+00> : vector<224x32xf32>
    %51 = tpu.matmul %48, %50, %cst_56 {dimension_numbers = #tpu.dot_dimension_numbers<[1], [0], [0], [1], [0, 0, 1, 1], [], []>} : vector<224x16xf32>, vector<16x32xf32>, vector<224x32xf32> -> vector<224x32xf32>
    %52 = arith.addf %46, %51 : vector<224x32xf32>
    %c0_57 = arith.constant 0 : index
    %c3_58 = arith.constant 3 : index
    %c0_59 = arith.constant 0 : index
    %53 = tpu.strided_load %arg18[%c0_57, %c3_58, %c0_59] {strides = array<i32: 2, 2, 1>} : memref<32x40x16xf32, #tpu.memory_space<vmem>>, vector<14x16x16xf32>
    %54 = vector.shape_cast %53 : vector<14x16x16xf32> to vector<224x16xf32>
    %c3_60 = arith.constant 3 : index
    %c0_61 = arith.constant 0 : index
    %c0_62 = arith.constant 0 : index
    %55 = vector.load %arg4[%c3_60, %c0_61, %c0_62] : memref<16x16x32xf32, #tpu.memory_space<vmem>>, vector<1x16x32xf32>
    %56 = vector.shape_cast %55 : vector<1x16x32xf32> to vector<16x32xf32>
    %cst_63 = arith.constant dense<0.000000e+00> : vector<224x32xf32>
    %57 = tpu.matmul %54, %56, %cst_63 {dimension_numbers = #tpu.dot_dimension_numbers<[1], [0], [0], [1], [0, 0, 1, 1], [], []>} : vector<224x16xf32>, vector<16x32xf32>, vector<224x32xf32> -> vector<224x32xf32>
    %58 = arith.addf %52, %57 : vector<224x32xf32>
    %c1_64 = arith.constant 1 : index
    %c0_65 = arith.constant 0 : index
    %c0_66 = arith.constant 0 : index
    %59 = tpu.strided_load %arg18[%c1_64, %c0_65, %c0_66] {strides = array<i32: 2, 2, 1>} : memref<32x40x16xf32, #tpu.memory_space<vmem>>, vector<14x16x16xf32>
    %60 = vector.shape_cast %59 : vector<14x16x16xf32> to vector<224x16xf32>
    %c4 = arith.constant 4 : index
    %c0_67 = arith.constant 0 : index
    %c0_68 = arith.constant 0 : index
    %61 = vector.load %arg4[%c4, %c0_67, %c0_68] : memref<16x16x32xf32, #tpu.memory_space<vmem>>, vector<1x16x32xf32>
    %62 = vector.shape_cast %61 : vector<1x16x32xf32> to vector<16x32xf32>
    %cst_69 = arith.constant dense<0.000000e+00> : vector<224x32xf32>
    %63 = tpu.matmul %60, %62, %cst_69 {dimension_numbers = #tpu.dot_dimension_numbers<[1], [0], [0], [1], [0, 0, 1, 1], [], []>} : vector<224x16xf32>, vector<16x32xf32>, vector<224x32xf32> -> vector<224x32xf32>
    %64 = arith.addf %58, %63 : vector<224x32xf32>
    %c1_70 = arith.constant 1 : index
    %c1_71 = arith.constant 1 : index
    %c0_72 = arith.constant 0 : index
    %65 = tpu.strided_load %arg18[%c1_70, %c1_71, %c0_72] {strides = array<i32: 2, 2, 1>} : memref<32x40x16xf32, #tpu.memory_space<vmem>>, vector<14x16x16xf32>
    %66 = vector.shape_cast %65 : vector<14x16x16xf32> to vector<224x16xf32>
    %c5 = arith.constant 5 : index
    %c0_73 = arith.constant 0 : index
    %c0_74 = arith.constant 0 : index
    %67 = vector.load %arg4[%c5, %c0_73, %c0_74] : memref<16x16x32xf32, #tpu.memory_space<vmem>>, vector<1x16x32xf32>
    %68 = vector.shape_cast %67 : vector<1x16x32xf32> to vector<16x32xf32>
    %cst_75 = arith.constant dense<0.000000e+00> : vector<224x32xf32>
    %69 = tpu.matmul %66, %68, %cst_75 {dimension_numbers = #tpu.dot_dimension_numbers<[1], [0], [0], [1], [0, 0, 1, 1], [], []>} : vector<224x16xf32>, vector<16x32xf32>, vector<224x32xf32> -> vector<224x32xf32>
    %70 = arith.addf %64, %69 : vector<224x32xf32>
    %c1_76 = arith.constant 1 : index
    %c2_77 = arith.constant 2 : index
    %c0_78 = arith.constant 0 : index
    %71 = tpu.strided_load %arg18[%c1_76, %c2_77, %c0_78] {strides = array<i32: 2, 2, 1>} : memref<32x40x16xf32, #tpu.memory_space<vmem>>, vector<14x16x16xf32>
    %72 = vector.shape_cast %71 : vector<14x16x16xf32> to vector<224x16xf32>
    %c6 = arith.constant 6 : index
    %c0_79 = arith.constant 0 : index
    %c0_80 = arith.constant 0 : index
    %73 = vector.load %arg4[%c6, %c0_79, %c0_80] : memref<16x16x32xf32, #tpu.memory_space<vmem>>, vector<1x16x32xf32>
    %74 = vector.shape_cast %73 : vector<1x16x32xf32> to vector<16x32xf32>
    %cst_81 = arith.constant dense<0.000000e+00> : vector<224x32xf32>
    %75 = tpu.matmul %72, %74, %cst_81 {dimension_numbers = #tpu.dot_dimension_numbers<[1], [0], [0], [1], [0, 0, 1, 1], [], []>} : vector<224x16xf32>, vector<16x32xf32>, vector<224x32xf32> -> vector<224x32xf32>
    %76 = arith.addf %70, %75 : vector<224x32xf32>
    %c1_82 = arith.constant 1 : index
    %c3_83 = arith.constant 3 : index
    %c0_84 = arith.constant 0 : index
    %77 = tpu.strided_load %arg18[%c1_82, %c3_83, %c0_84] {strides = array<i32: 2, 2, 1>} : memref<32x40x16xf32, #tpu.memory_space<vmem>>, vector<14x16x16xf32>
    %78 = vector.shape_cast %77 : vector<14x16x16xf32> to vector<224x16xf32>
    %c7 = arith.constant 7 : index
    %c0_85 = arith.constant 0 : index
    %c0_86 = arith.constant 0 : index
    %79 = vector.load %arg4[%c7, %c0_85, %c0_86] : memref<16x16x32xf32, #tpu.memory_space<vmem>>, vector<1x16x32xf32>
    %80 = vector.shape_cast %79 : vector<1x16x32xf32> to vector<16x32xf32>
    %cst_87 = arith.constant dense<0.000000e+00> : vector<224x32xf32>
    %81 = tpu.matmul %78, %80, %cst_87 {dimension_numbers = #tpu.dot_dimension_numbers<[1], [0], [0], [1], [0, 0, 1, 1], [], []>} : vector<224x16xf32>, vector<16x32xf32>, vector<224x32xf32> -> vector<224x32xf32>
    %82 = arith.addf %76, %81 : vector<224x32xf32>
    %c2_88 = arith.constant 2 : index
    %c0_89 = arith.constant 0 : index
    %c0_90 = arith.constant 0 : index
    %83 = tpu.strided_load %arg18[%c2_88, %c0_89, %c0_90] {strides = array<i32: 2, 2, 1>} : memref<32x40x16xf32, #tpu.memory_space<vmem>>, vector<14x16x16xf32>
    %84 = vector.shape_cast %83 : vector<14x16x16xf32> to vector<224x16xf32>
    %c8 = arith.constant 8 : index
    %c0_91 = arith.constant 0 : index
    %c0_92 = arith.constant 0 : index
    %85 = vector.load %arg4[%c8, %c0_91, %c0_92] : memref<16x16x32xf32, #tpu.memory_space<vmem>>, vector<1x16x32xf32>
    %86 = vector.shape_cast %85 : vector<1x16x32xf32> to vector<16x32xf32>
    %cst_93 = arith.constant dense<0.000000e+00> : vector<224x32xf32>
    %87 = tpu.matmul %84, %86, %cst_93 {dimension_numbers = #tpu.dot_dimension_numbers<[1], [0], [0], [1], [0, 0, 1, 1], [], []>} : vector<224x16xf32>, vector<16x32xf32>, vector<224x32xf32> -> vector<224x32xf32>
    %88 = arith.addf %82, %87 : vector<224x32xf32>
    %c2_94 = arith.constant 2 : index
    %c1_95 = arith.constant 1 : index
    %c0_96 = arith.constant 0 : index
    %89 = tpu.strided_load %arg18[%c2_94, %c1_95, %c0_96] {strides = array<i32: 2, 2, 1>} : memref<32x40x16xf32, #tpu.memory_space<vmem>>, vector<14x16x16xf32>
    %90 = vector.shape_cast %89 : vector<14x16x16xf32> to vector<224x16xf32>
    %c9 = arith.constant 9 : index
    %c0_97 = arith.constant 0 : index
    %c0_98 = arith.constant 0 : index
    %91 = vector.load %arg4[%c9, %c0_97, %c0_98] : memref<16x16x32xf32, #tpu.memory_space<vmem>>, vector<1x16x32xf32>
    %92 = vector.shape_cast %91 : vector<1x16x32xf32> to vector<16x32xf32>
    %cst_99 = arith.constant dense<0.000000e+00> : vector<224x32xf32>
    %93 = tpu.matmul %90, %92, %cst_99 {dimension_numbers = #tpu.dot_dimension_numbers<[1], [0], [0], [1], [0, 0, 1, 1], [], []>} : vector<224x16xf32>, vector<16x32xf32>, vector<224x32xf32> -> vector<224x32xf32>
    %94 = arith.addf %88, %93 : vector<224x32xf32>
    %c2_100 = arith.constant 2 : index
    %c2_101 = arith.constant 2 : index
    %c0_102 = arith.constant 0 : index
    %95 = tpu.strided_load %arg18[%c2_100, %c2_101, %c0_102] {strides = array<i32: 2, 2, 1>} : memref<32x40x16xf32, #tpu.memory_space<vmem>>, vector<14x16x16xf32>
    %96 = vector.shape_cast %95 : vector<14x16x16xf32> to vector<224x16xf32>
    %c10 = arith.constant 10 : index
    %c0_103 = arith.constant 0 : index
    %c0_104 = arith.constant 0 : index
    %97 = vector.load %arg4[%c10, %c0_103, %c0_104] : memref<16x16x32xf32, #tpu.memory_space<vmem>>, vector<1x16x32xf32>
    %98 = vector.shape_cast %97 : vector<1x16x32xf32> to vector<16x32xf32>
    %cst_105 = arith.constant dense<0.000000e+00> : vector<224x32xf32>
    %99 = tpu.matmul %96, %98, %cst_105 {dimension_numbers = #tpu.dot_dimension_numbers<[1], [0], [0], [1], [0, 0, 1, 1], [], []>} : vector<224x16xf32>, vector<16x32xf32>, vector<224x32xf32> -> vector<224x32xf32>
    %100 = arith.addf %94, %99 : vector<224x32xf32>
    %c2_106 = arith.constant 2 : index
    %c3_107 = arith.constant 3 : index
    %c0_108 = arith.constant 0 : index
    %101 = tpu.strided_load %arg18[%c2_106, %c3_107, %c0_108] {strides = array<i32: 2, 2, 1>} : memref<32x40x16xf32, #tpu.memory_space<vmem>>, vector<14x16x16xf32>
    %102 = vector.shape_cast %101 : vector<14x16x16xf32> to vector<224x16xf32>
    %c11 = arith.constant 11 : index
    %c0_109 = arith.constant 0 : index
    %c0_110 = arith.constant 0 : index
    %103 = vector.load %arg4[%c11, %c0_109, %c0_110] : memref<16x16x32xf32, #tpu.memory_space<vmem>>, vector<1x16x32xf32>
    %104 = vector.shape_cast %103 : vector<1x16x32xf32> to vector<16x32xf32>
    %cst_111 = arith.constant dense<0.000000e+00> : vector<224x32xf32>
    %105 = tpu.matmul %102, %104, %cst_111 {dimension_numbers = #tpu.dot_dimension_numbers<[1], [0], [0], [1], [0, 0, 1, 1], [], []>} : vector<224x16xf32>, vector<16x32xf32>, vector<224x32xf32> -> vector<224x32xf32>
    %106 = arith.addf %100, %105 : vector<224x32xf32>
    %c3_112 = arith.constant 3 : index
    %c0_113 = arith.constant 0 : index
    %c0_114 = arith.constant 0 : index
    %107 = tpu.strided_load %arg18[%c3_112, %c0_113, %c0_114] {strides = array<i32: 2, 2, 1>} : memref<32x40x16xf32, #tpu.memory_space<vmem>>, vector<14x16x16xf32>
    %108 = vector.shape_cast %107 : vector<14x16x16xf32> to vector<224x16xf32>
    %c12 = arith.constant 12 : index
    %c0_115 = arith.constant 0 : index
    %c0_116 = arith.constant 0 : index
    %109 = vector.load %arg4[%c12, %c0_115, %c0_116] : memref<16x16x32xf32, #tpu.memory_space<vmem>>, vector<1x16x32xf32>
    %110 = vector.shape_cast %109 : vector<1x16x32xf32> to vector<16x32xf32>
    %cst_117 = arith.constant dense<0.000000e+00> : vector<224x32xf32>
    %111 = tpu.matmul %108, %110, %cst_117 {dimension_numbers = #tpu.dot_dimension_numbers<[1], [0], [0], [1], [0, 0, 1, 1], [], []>} : vector<224x16xf32>, vector<16x32xf32>, vector<224x32xf32> -> vector<224x32xf32>
    %112 = arith.addf %106, %111 : vector<224x32xf32>
    %c3_118 = arith.constant 3 : index
    %c1_119 = arith.constant 1 : index
    %c0_120 = arith.constant 0 : index
    %113 = tpu.strided_load %arg18[%c3_118, %c1_119, %c0_120] {strides = array<i32: 2, 2, 1>} : memref<32x40x16xf32, #tpu.memory_space<vmem>>, vector<14x16x16xf32>
    %114 = vector.shape_cast %113 : vector<14x16x16xf32> to vector<224x16xf32>
    %c13 = arith.constant 13 : index
    %c0_121 = arith.constant 0 : index
    %c0_122 = arith.constant 0 : index
    %115 = vector.load %arg4[%c13, %c0_121, %c0_122] : memref<16x16x32xf32, #tpu.memory_space<vmem>>, vector<1x16x32xf32>
    %116 = vector.shape_cast %115 : vector<1x16x32xf32> to vector<16x32xf32>
    %cst_123 = arith.constant dense<0.000000e+00> : vector<224x32xf32>
    %117 = tpu.matmul %114, %116, %cst_123 {dimension_numbers = #tpu.dot_dimension_numbers<[1], [0], [0], [1], [0, 0, 1, 1], [], []>} : vector<224x16xf32>, vector<16x32xf32>, vector<224x32xf32> -> vector<224x32xf32>
    %118 = arith.addf %112, %117 : vector<224x32xf32>
    %c3_124 = arith.constant 3 : index
    %c2_125 = arith.constant 2 : index
    %c0_126 = arith.constant 0 : index
    %119 = tpu.strided_load %arg18[%c3_124, %c2_125, %c0_126] {strides = array<i32: 2, 2, 1>} : memref<32x40x16xf32, #tpu.memory_space<vmem>>, vector<14x16x16xf32>
    %120 = vector.shape_cast %119 : vector<14x16x16xf32> to vector<224x16xf32>
    %c14 = arith.constant 14 : index
    %c0_127 = arith.constant 0 : index
    %c0_128 = arith.constant 0 : index
    %121 = vector.load %arg4[%c14, %c0_127, %c0_128] : memref<16x16x32xf32, #tpu.memory_space<vmem>>, vector<1x16x32xf32>
    %122 = vector.shape_cast %121 : vector<1x16x32xf32> to vector<16x32xf32>
    %cst_129 = arith.constant dense<0.000000e+00> : vector<224x32xf32>
    %123 = tpu.matmul %120, %122, %cst_129 {dimension_numbers = #tpu.dot_dimension_numbers<[1], [0], [0], [1], [0, 0, 1, 1], [], []>} : vector<224x16xf32>, vector<16x32xf32>, vector<224x32xf32> -> vector<224x32xf32>
    %124 = arith.addf %118, %123 : vector<224x32xf32>
    %c3_130 = arith.constant 3 : index
    %c3_131 = arith.constant 3 : index
    %c0_132 = arith.constant 0 : index
    %125 = tpu.strided_load %arg18[%c3_130, %c3_131, %c0_132] {strides = array<i32: 2, 2, 1>} : memref<32x40x16xf32, #tpu.memory_space<vmem>>, vector<14x16x16xf32>
    %126 = vector.shape_cast %125 : vector<14x16x16xf32> to vector<224x16xf32>
    %c15 = arith.constant 15 : index
    %c0_133 = arith.constant 0 : index
    %c0_134 = arith.constant 0 : index
    %127 = vector.load %arg4[%c15, %c0_133, %c0_134] : memref<16x16x32xf32, #tpu.memory_space<vmem>>, vector<1x16x32xf32>
    %128 = vector.shape_cast %127 : vector<1x16x32xf32> to vector<16x32xf32>
    %cst_135 = arith.constant dense<0.000000e+00> : vector<224x32xf32>
    %129 = tpu.matmul %126, %128, %cst_135 {dimension_numbers = #tpu.dot_dimension_numbers<[1], [0], [0], [1], [0, 0, 1, 1], [], []>} : vector<224x16xf32>, vector<16x32xf32>, vector<224x32xf32> -> vector<224x32xf32>
    %130 = arith.addf %124, %129 : vector<224x32xf32>
    %c0_136 = arith.constant 0 : index
    %c0_137 = arith.constant 0 : index
    %131 = vector.load %arg5[%c0_136, %c0_137] : memref<1x32xf32, #tpu.memory_space<vmem>>, vector<1x32xf32>
    %132 = vector.broadcast %131 : vector<1x32xf32> to vector<224x32xf32>
    %133 = arith.addf %130, %132 : vector<224x32xf32>
    %cst_138 = arith.constant 0.000000e+00 : f32
    %134 = vector.broadcast %cst_138 : f32 to vector<224x32xf32>
    %135 = arith.maximumf %133, %134 : vector<224x32xf32>
    %136 = vector.shape_cast %135 : vector<224x32xf32> to vector<14x16x32xf32>
    %c0_139 = arith.constant 0 : index
    %c0_140 = arith.constant 0 : index
    %c0_141 = arith.constant 0 : index
    %137 = vector.load %arg19[%c0_139, %c0_140, %c0_141] : memref<16x24x32xf32, #tpu.memory_space<vmem>>, vector<14x16x32xf32>
    tpu.vector_store %arg19[%c0_139, %c0_140, %c0_141], %136 {strides = array<i32>} : memref<16x24x32xf32, #tpu.memory_space<vmem>>, vector<14x16x32xf32>,
    %cst_142 = arith.constant 0.000000e+00 : f32
    %138 = vector.broadcast %cst_142 : f32 to vector<2x24x32xf32>
    %c14_143 = arith.constant 14 : index
    %c0_144 = arith.constant 0 : index
    %c0_145 = arith.constant 0 : index
    %139 = vector.load %arg19[%c14_143, %c0_144, %c0_145] : memref<16x24x32xf32, #tpu.memory_space<vmem>>, vector<2x24x32xf32>
    tpu.vector_store %arg19[%c14_143, %c0_144, %c0_145], %138 {strides = array<i32>} : memref<16x24x32xf32, #tpu.memory_space<vmem>>, vector<2x24x32xf32>,
    %cst_146 = arith.constant 0.000000e+00 : f32
    %140 = vector.broadcast %cst_146 : f32 to vector<16x8x32xf32>
    %c0_147 = arith.constant 0 : index
    %c16 = arith.constant 16 : index
    %c0_148 = arith.constant 0 : index
    %141 = vector.load %arg19[%c0_147, %c16, %c0_148] : memref<16x24x32xf32, #tpu.memory_space<vmem>>, vector<16x8x32xf32>
    tpu.vector_store %arg19[%c0_147, %c16, %c0_148], %140 {strides = array<i32>} : memref<16x24x32xf32, #tpu.memory_space<vmem>>, vector<16x8x32xf32>,
    %c0_149 = arith.constant 0 : index
    %c0_150 = arith.constant 0 : index
    %c0_151 = arith.constant 0 : index
    %142 = tpu.strided_load %arg19[%c0_149, %c0_150, %c0_151] {strides = array<i32: 2, 2, 1>} : memref<16x24x32xf32, #tpu.memory_space<vmem>>, vector<6x8x32xf32>
    %143 = vector.shape_cast %142 : vector<6x8x32xf32> to vector<48x32xf32>
    %c0_152 = arith.constant 0 : index
    %c0_153 = arith.constant 0 : index
    %c0_154 = arith.constant 0 : index
    %144 = vector.load %arg6[%c0_152, %c0_153, %c0_154] : memref<9x32x64xf32, #tpu.memory_space<vmem>>, vector<1x32x64xf32>
    %145 = vector.shape_cast %144 : vector<1x32x64xf32> to vector<32x64xf32>
    %cst_155 = arith.constant dense<0.000000e+00> : vector<48x64xf32>
    %146 = tpu.matmul %143, %145, %cst_155 {dimension_numbers = #tpu.dot_dimension_numbers<[1], [0], [0], [1], [0, 0, 1, 1], [], []>} : vector<48x32xf32>, vector<32x64xf32>, vector<48x64xf32> -> vector<48x64xf32>
    %c0_156 = arith.constant 0 : index
    %c1_157 = arith.constant 1 : index
    %c0_158 = arith.constant 0 : index
    %147 = tpu.strided_load %arg19[%c0_156, %c1_157, %c0_158] {strides = array<i32: 2, 2, 1>} : memref<16x24x32xf32, #tpu.memory_space<vmem>>, vector<6x8x32xf32>
    %148 = vector.shape_cast %147 : vector<6x8x32xf32> to vector<48x32xf32>
    %c1_159 = arith.constant 1 : index
    %c0_160 = arith.constant 0 : index
    %c0_161 = arith.constant 0 : index
    %149 = vector.load %arg6[%c1_159, %c0_160, %c0_161] : memref<9x32x64xf32, #tpu.memory_space<vmem>>, vector<1x32x64xf32>
    %150 = vector.shape_cast %149 : vector<1x32x64xf32> to vector<32x64xf32>
    %cst_162 = arith.constant dense<0.000000e+00> : vector<48x64xf32>
    %151 = tpu.matmul %148, %150, %cst_162 {dimension_numbers = #tpu.dot_dimension_numbers<[1], [0], [0], [1], [0, 0, 1, 1], [], []>} : vector<48x32xf32>, vector<32x64xf32>, vector<48x64xf32> -> vector<48x64xf32>
    %152 = arith.addf %146, %151 : vector<48x64xf32>
    %c0_163 = arith.constant 0 : index
    %c2_164 = arith.constant 2 : index
    %c0_165 = arith.constant 0 : index
    %153 = tpu.strided_load %arg19[%c0_163, %c2_164, %c0_165] {strides = array<i32: 2, 2, 1>} : memref<16x24x32xf32, #tpu.memory_space<vmem>>, vector<6x8x32xf32>
    %154 = vector.shape_cast %153 : vector<6x8x32xf32> to vector<48x32xf32>
    %c2_166 = arith.constant 2 : index
    %c0_167 = arith.constant 0 : index
    %c0_168 = arith.constant 0 : index
    %155 = vector.load %arg6[%c2_166, %c0_167, %c0_168] : memref<9x32x64xf32, #tpu.memory_space<vmem>>, vector<1x32x64xf32>
    %156 = vector.shape_cast %155 : vector<1x32x64xf32> to vector<32x64xf32>
    %cst_169 = arith.constant dense<0.000000e+00> : vector<48x64xf32>
    %157 = tpu.matmul %154, %156, %cst_169 {dimension_numbers = #tpu.dot_dimension_numbers<[1], [0], [0], [1], [0, 0, 1, 1], [], []>} : vector<48x32xf32>, vector<32x64xf32>, vector<48x64xf32> -> vector<48x64xf32>
    %158 = arith.addf %152, %157 : vector<48x64xf32>
    %c1_170 = arith.constant 1 : index
    %c0_171 = arith.constant 0 : index
    %c0_172 = arith.constant 0 : index
    %159 = tpu.strided_load %arg19[%c1_170, %c0_171, %c0_172] {strides = array<i32: 2, 2, 1>} : memref<16x24x32xf32, #tpu.memory_space<vmem>>, vector<6x8x32xf32>
    %160 = vector.shape_cast %159 : vector<6x8x32xf32> to vector<48x32xf32>
    %c3_173 = arith.constant 3 : index
    %c0_174 = arith.constant 0 : index
    %c0_175 = arith.constant 0 : index
    %161 = vector.load %arg6[%c3_173, %c0_174, %c0_175] : memref<9x32x64xf32, #tpu.memory_space<vmem>>, vector<1x32x64xf32>
    %162 = vector.shape_cast %161 : vector<1x32x64xf32> to vector<32x64xf32>
    %cst_176 = arith.constant dense<0.000000e+00> : vector<48x64xf32>
    %163 = tpu.matmul %160, %162, %cst_176 {dimension_numbers = #tpu.dot_dimension_numbers<[1], [0], [0], [1], [0, 0, 1, 1], [], []>} : vector<48x32xf32>, vector<32x64xf32>, vector<48x64xf32> -> vector<48x64xf32>
    %164 = arith.addf %158, %163 : vector<48x64xf32>
    %c1_177 = arith.constant 1 : index
    %c1_178 = arith.constant 1 : index
    %c0_179 = arith.constant 0 : index
    %165 = tpu.strided_load %arg19[%c1_177, %c1_178, %c0_179] {strides = array<i32: 2, 2, 1>} : memref<16x24x32xf32, #tpu.memory_space<vmem>>, vector<6x8x32xf32>
    %166 = vector.shape_cast %165 : vector<6x8x32xf32> to vector<48x32xf32>
    %c4_180 = arith.constant 4 : index
    %c0_181 = arith.constant 0 : index
    %c0_182 = arith.constant 0 : index
    %167 = vector.load %arg6[%c4_180, %c0_181, %c0_182] : memref<9x32x64xf32, #tpu.memory_space<vmem>>, vector<1x32x64xf32>
    %168 = vector.shape_cast %167 : vector<1x32x64xf32> to vector<32x64xf32>
    %cst_183 = arith.constant dense<0.000000e+00> : vector<48x64xf32>
    %169 = tpu.matmul %166, %168, %cst_183 {dimension_numbers = #tpu.dot_dimension_numbers<[1], [0], [0], [1], [0, 0, 1, 1], [], []>} : vector<48x32xf32>, vector<32x64xf32>, vector<48x64xf32> -> vector<48x64xf32>
    %170 = arith.addf %164, %169 : vector<48x64xf32>
    %c1_184 = arith.constant 1 : index
    %c2_185 = arith.constant 2 : index
    %c0_186 = arith.constant 0 : index
    %171 = tpu.strided_load %arg19[%c1_184, %c2_185, %c0_186] {strides = array<i32: 2, 2, 1>} : memref<16x24x32xf32, #tpu.memory_space<vmem>>, vector<6x8x32xf32>
    %172 = vector.shape_cast %171 : vector<6x8x32xf32> to vector<48x32xf32>
    %c5_187 = arith.constant 5 : index
    %c0_188 = arith.constant 0 : index
    %c0_189 = arith.constant 0 : index
    %173 = vector.load %arg6[%c5_187, %c0_188, %c0_189] : memref<9x32x64xf32, #tpu.memory_space<vmem>>, vector<1x32x64xf32>
    %174 = vector.shape_cast %173 : vector<1x32x64xf32> to vector<32x64xf32>
    %cst_190 = arith.constant dense<0.000000e+00> : vector<48x64xf32>
    %175 = tpu.matmul %172, %174, %cst_190 {dimension_numbers = #tpu.dot_dimension_numbers<[1], [0], [0], [1], [0, 0, 1, 1], [], []>} : vector<48x32xf32>, vector<32x64xf32>, vector<48x64xf32> -> vector<48x64xf32>
    %176 = arith.addf %170, %175 : vector<48x64xf32>
    %c2_191 = arith.constant 2 : index
    %c0_192 = arith.constant 0 : index
    %c0_193 = arith.constant 0 : index
    %177 = tpu.strided_load %arg19[%c2_191, %c0_192, %c0_193] {strides = array<i32: 2, 2, 1>} : memref<16x24x32xf32, #tpu.memory_space<vmem>>, vector<6x8x32xf32>
    %178 = vector.shape_cast %177 : vector<6x8x32xf32> to vector<48x32xf32>
    %c6_194 = arith.constant 6 : index
    %c0_195 = arith.constant 0 : index
    %c0_196 = arith.constant 0 : index
    %179 = vector.load %arg6[%c6_194, %c0_195, %c0_196] : memref<9x32x64xf32, #tpu.memory_space<vmem>>, vector<1x32x64xf32>
    %180 = vector.shape_cast %179 : vector<1x32x64xf32> to vector<32x64xf32>
    %cst_197 = arith.constant dense<0.000000e+00> : vector<48x64xf32>
    %181 = tpu.matmul %178, %180, %cst_197 {dimension_numbers = #tpu.dot_dimension_numbers<[1], [0], [0], [1], [0, 0, 1, 1], [], []>} : vector<48x32xf32>, vector<32x64xf32>, vector<48x64xf32> -> vector<48x64xf32>
    %182 = arith.addf %176, %181 : vector<48x64xf32>
    %c2_198 = arith.constant 2 : index
    %c1_199 = arith.constant 1 : index
    %c0_200 = arith.constant 0 : index
    %183 = tpu.strided_load %arg19[%c2_198, %c1_199, %c0_200] {strides = array<i32: 2, 2, 1>} : memref<16x24x32xf32, #tpu.memory_space<vmem>>, vector<6x8x32xf32>
    %184 = vector.shape_cast %183 : vector<6x8x32xf32> to vector<48x32xf32>
    %c7_201 = arith.constant 7 : index
    %c0_202 = arith.constant 0 : index
    %c0_203 = arith.constant 0 : index
    %185 = vector.load %arg6[%c7_201, %c0_202, %c0_203] : memref<9x32x64xf32, #tpu.memory_space<vmem>>, vector<1x32x64xf32>
    %186 = vector.shape_cast %185 : vector<1x32x64xf32> to vector<32x64xf32>
    %cst_204 = arith.constant dense<0.000000e+00> : vector<48x64xf32>
    %187 = tpu.matmul %184, %186, %cst_204 {dimension_numbers = #tpu.dot_dimension_numbers<[1], [0], [0], [1], [0, 0, 1, 1], [], []>} : vector<48x32xf32>, vector<32x64xf32>, vector<48x64xf32> -> vector<48x64xf32>
    %188 = arith.addf %182, %187 : vector<48x64xf32>
    %c2_205 = arith.constant 2 : index
    %c2_206 = arith.constant 2 : index
    %c0_207 = arith.constant 0 : index
    %189 = tpu.strided_load %arg19[%c2_205, %c2_206, %c0_207] {strides = array<i32: 2, 2, 1>} : memref<16x24x32xf32, #tpu.memory_space<vmem>>, vector<6x8x32xf32>
    %190 = vector.shape_cast %189 : vector<6x8x32xf32> to vector<48x32xf32>
    %c8_208 = arith.constant 8 : index
    %c0_209 = arith.constant 0 : index
    %c0_210 = arith.constant 0 : index
    %191 = vector.load %arg6[%c8_208, %c0_209, %c0_210] : memref<9x32x64xf32, #tpu.memory_space<vmem>>, vector<1x32x64xf32>
    %192 = vector.shape_cast %191 : vector<1x32x64xf32> to vector<32x64xf32>
    %cst_211 = arith.constant dense<0.000000e+00> : vector<48x64xf32>
    %193 = tpu.matmul %190, %192, %cst_211 {dimension_numbers = #tpu.dot_dimension_numbers<[1], [0], [0], [1], [0, 0, 1, 1], [], []>} : vector<48x32xf32>, vector<32x64xf32>, vector<48x64xf32> -> vector<48x64xf32>
    %194 = arith.addf %188, %193 : vector<48x64xf32>
    %c0_212 = arith.constant 0 : index
    %c0_213 = arith.constant 0 : index
    %195 = vector.load %arg7[%c0_212, %c0_213] : memref<1x64xf32, #tpu.memory_space<vmem>>, vector<1x64xf32>
    %196 = vector.broadcast %195 : vector<1x64xf32> to vector<48x64xf32>
    %197 = arith.addf %194, %196 : vector<48x64xf32>
    %cst_214 = arith.constant 0.000000e+00 : f32
    %198 = vector.broadcast %cst_214 : f32 to vector<48x64xf32>
    %199 = arith.maximumf %197, %198 : vector<48x64xf32>
    %200 = vector.shape_cast %199 : vector<48x64xf32> to vector<6x8x64xf32>
    %c0_215 = arith.constant 0 : index
    %c0_216 = arith.constant 0 : index
    %c0_217 = arith.constant 0 : index
    %201 = vector.load %arg20[%c0_215, %c0_216, %c0_217] : memref<8x24x64xf32, #tpu.memory_space<vmem>>, vector<6x8x64xf32>
    tpu.vector_store %arg20[%c0_215, %c0_216, %c0_217], %200 {strides = array<i32>} : memref<8x24x64xf32, #tpu.memory_space<vmem>>, vector<6x8x64xf32>,
    %cst_218 = arith.constant 0.000000e+00 : f32
    %202 = vector.broadcast %cst_218 : f32 to vector<2x24x64xf32>
    %c6_219 = arith.constant 6 : index
    %c0_220 = arith.constant 0 : index
    %c0_221 = arith.constant 0 : index
    %203 = vector.load %arg20[%c6_219, %c0_220, %c0_221] : memref<8x24x64xf32, #tpu.memory_space<vmem>>, vector<2x24x64xf32>
    tpu.vector_store %arg20[%c6_219, %c0_220, %c0_221], %202 {strides = array<i32>} : memref<8x24x64xf32, #tpu.memory_space<vmem>>, vector<2x24x64xf32>,
    %cst_222 = arith.constant 0.000000e+00 : f32
    %204 = vector.broadcast %cst_222 : f32 to vector<8x16x64xf32>
    %c0_223 = arith.constant 0 : index
    %c8_224 = arith.constant 8 : index
    %c0_225 = arith.constant 0 : index
    %205 = vector.load %arg20[%c0_223, %c8_224, %c0_225] : memref<8x24x64xf32, #tpu.memory_space<vmem>>, vector<8x16x64xf32>
    tpu.vector_store %arg20[%c0_223, %c8_224, %c0_225], %204 {strides = array<i32>} : memref<8x24x64xf32, #tpu.memory_space<vmem>>, vector<8x16x64xf32>,
    %c0_226 = arith.constant 0 : index
    %c0_227 = arith.constant 0 : index
    %c0_228 = arith.constant 0 : index
    %206 = tpu.strided_load %arg20[%c0_226, %c0_227, %c0_228] {strides = array<i32: 2, 2, 1>} : memref<8x24x64xf32, #tpu.memory_space<vmem>>, vector<2x8x64xf32>
    %207 = vector.shape_cast %206 : vector<2x8x64xf32> to vector<16x64xf32>
    %c0_229 = arith.constant 0 : index
    %c0_230 = arith.constant 0 : index
    %c0_231 = arith.constant 0 : index
    %208 = vector.load %arg8[%c0_229, %c0_230, %c0_231] : memref<9x64x64xf32, #tpu.memory_space<vmem>>, vector<1x64x64xf32>
    %209 = vector.shape_cast %208 : vector<1x64x64xf32> to vector<64x64xf32>
    %cst_232 = arith.constant dense<0.000000e+00> : vector<16x64xf32>
    %210 = tpu.matmul %207, %209, %cst_232 {dimension_numbers = #tpu.dot_dimension_numbers<[1], [0], [0], [1], [0, 0, 1, 1], [], []>} : vector<16x64xf32>, vector<64x64xf32>, vector<16x64xf32> -> vector<16x64xf32>
    %c0_233 = arith.constant 0 : index
    %c1_234 = arith.constant 1 : index
    %c0_235 = arith.constant 0 : index
    %211 = tpu.strided_load %arg20[%c0_233, %c1_234, %c0_235] {strides = array<i32: 2, 2, 1>} : memref<8x24x64xf32, #tpu.memory_space<vmem>>, vector<2x8x64xf32>
    %212 = vector.shape_cast %211 : vector<2x8x64xf32> to vector<16x64xf32>
    %c1_236 = arith.constant 1 : index
    %c0_237 = arith.constant 0 : index
    %c0_238 = arith.constant 0 : index
    %213 = vector.load %arg8[%c1_236, %c0_237, %c0_238] : memref<9x64x64xf32, #tpu.memory_space<vmem>>, vector<1x64x64xf32>
    %214 = vector.shape_cast %213 : vector<1x64x64xf32> to vector<64x64xf32>
    %cst_239 = arith.constant dense<0.000000e+00> : vector<16x64xf32>
    %215 = tpu.matmul %212, %214, %cst_239 {dimension_numbers = #tpu.dot_dimension_numbers<[1], [0], [0], [1], [0, 0, 1, 1], [], []>} : vector<16x64xf32>, vector<64x64xf32>, vector<16x64xf32> -> vector<16x64xf32>
    %216 = arith.addf %210, %215 : vector<16x64xf32>
    %c0_240 = arith.constant 0 : index
    %c2_241 = arith.constant 2 : index
    %c0_242 = arith.constant 0 : index
    %217 = tpu.strided_load %arg20[%c0_240, %c2_241, %c0_242] {strides = array<i32: 2, 2, 1>} : memref<8x24x64xf32, #tpu.memory_space<vmem>>, vector<2x8x64xf32>
    %218 = vector.shape_cast %217 : vector<2x8x64xf32> to vector<16x64xf32>
    %c2_243 = arith.constant 2 : index
    %c0_244 = arith.constant 0 : index
    %c0_245 = arith.constant 0 : index
    %219 = vector.load %arg8[%c2_243, %c0_244, %c0_245] : memref<9x64x64xf32, #tpu.memory_space<vmem>>, vector<1x64x64xf32>
    %220 = vector.shape_cast %219 : vector<1x64x64xf32> to vector<64x64xf32>
    %cst_246 = arith.constant dense<0.000000e+00> : vector<16x64xf32>
    %221 = tpu.matmul %218, %220, %cst_246 {dimension_numbers = #tpu.dot_dimension_numbers<[1], [0], [0], [1], [0, 0, 1, 1], [], []>} : vector<16x64xf32>, vector<64x64xf32>, vector<16x64xf32> -> vector<16x64xf32>
    %222 = arith.addf %216, %221 : vector<16x64xf32>
    %c1_247 = arith.constant 1 : index
    %c0_248 = arith.constant 0 : index
    %c0_249 = arith.constant 0 : index
    %223 = tpu.strided_load %arg20[%c1_247, %c0_248, %c0_249] {strides = array<i32: 2, 2, 1>} : memref<8x24x64xf32, #tpu.memory_space<vmem>>, vector<2x8x64xf32>
    %224 = vector.shape_cast %223 : vector<2x8x64xf32> to vector<16x64xf32>
    %c3_250 = arith.constant 3 : index
    %c0_251 = arith.constant 0 : index
    %c0_252 = arith.constant 0 : index
    %225 = vector.load %arg8[%c3_250, %c0_251, %c0_252] : memref<9x64x64xf32, #tpu.memory_space<vmem>>, vector<1x64x64xf32>
    %226 = vector.shape_cast %225 : vector<1x64x64xf32> to vector<64x64xf32>
    %cst_253 = arith.constant dense<0.000000e+00> : vector<16x64xf32>
    %227 = tpu.matmul %224, %226, %cst_253 {dimension_numbers = #tpu.dot_dimension_numbers<[1], [0], [0], [1], [0, 0, 1, 1], [], []>} : vector<16x64xf32>, vector<64x64xf32>, vector<16x64xf32> -> vector<16x64xf32>
    %228 = arith.addf %222, %227 : vector<16x64xf32>
    %c1_254 = arith.constant 1 : index
    %c1_255 = arith.constant 1 : index
    %c0_256 = arith.constant 0 : index
    %229 = tpu.strided_load %arg20[%c1_254, %c1_255, %c0_256] {strides = array<i32: 2, 2, 1>} : memref<8x24x64xf32, #tpu.memory_space<vmem>>, vector<2x8x64xf32>
    %230 = vector.shape_cast %229 : vector<2x8x64xf32> to vector<16x64xf32>
    %c4_257 = arith.constant 4 : index
    %c0_258 = arith.constant 0 : index
    %c0_259 = arith.constant 0 : index
    %231 = vector.load %arg8[%c4_257, %c0_258, %c0_259] : memref<9x64x64xf32, #tpu.memory_space<vmem>>, vector<1x64x64xf32>
    %232 = vector.shape_cast %231 : vector<1x64x64xf32> to vector<64x64xf32>
    %cst_260 = arith.constant dense<0.000000e+00> : vector<16x64xf32>
    %233 = tpu.matmul %230, %232, %cst_260 {dimension_numbers = #tpu.dot_dimension_numbers<[1], [0], [0], [1], [0, 0, 1, 1], [], []>} : vector<16x64xf32>, vector<64x64xf32>, vector<16x64xf32> -> vector<16x64xf32>
    %234 = arith.addf %228, %233 : vector<16x64xf32>
    %c1_261 = arith.constant 1 : index
    %c2_262 = arith.constant 2 : index
    %c0_263 = arith.constant 0 : index
    %235 = tpu.strided_load %arg20[%c1_261, %c2_262, %c0_263] {strides = array<i32: 2, 2, 1>} : memref<8x24x64xf32, #tpu.memory_space<vmem>>, vector<2x8x64xf32>
    %236 = vector.shape_cast %235 : vector<2x8x64xf32> to vector<16x64xf32>
    %c5_264 = arith.constant 5 : index
    %c0_265 = arith.constant 0 : index
    %c0_266 = arith.constant 0 : index
    %237 = vector.load %arg8[%c5_264, %c0_265, %c0_266] : memref<9x64x64xf32, #tpu.memory_space<vmem>>, vector<1x64x64xf32>
    %238 = vector.shape_cast %237 : vector<1x64x64xf32> to vector<64x64xf32>
    %cst_267 = arith.constant dense<0.000000e+00> : vector<16x64xf32>
    %239 = tpu.matmul %236, %238, %cst_267 {dimension_numbers = #tpu.dot_dimension_numbers<[1], [0], [0], [1], [0, 0, 1, 1], [], []>} : vector<16x64xf32>, vector<64x64xf32>, vector<16x64xf32> -> vector<16x64xf32>
    %240 = arith.addf %234, %239 : vector<16x64xf32>
    %c2_268 = arith.constant 2 : index
    %c0_269 = arith.constant 0 : index
    %c0_270 = arith.constant 0 : index
    %241 = tpu.strided_load %arg20[%c2_268, %c0_269, %c0_270] {strides = array<i32: 2, 2, 1>} : memref<8x24x64xf32, #tpu.memory_space<vmem>>, vector<2x8x64xf32>
    %242 = vector.shape_cast %241 : vector<2x8x64xf32> to vector<16x64xf32>
    %c6_271 = arith.constant 6 : index
    %c0_272 = arith.constant 0 : index
    %c0_273 = arith.constant 0 : index
    %243 = vector.load %arg8[%c6_271, %c0_272, %c0_273] : memref<9x64x64xf32, #tpu.memory_space<vmem>>, vector<1x64x64xf32>
    %244 = vector.shape_cast %243 : vector<1x64x64xf32> to vector<64x64xf32>
    %cst_274 = arith.constant dense<0.000000e+00> : vector<16x64xf32>
    %245 = tpu.matmul %242, %244, %cst_274 {dimension_numbers = #tpu.dot_dimension_numbers<[1], [0], [0], [1], [0, 0, 1, 1], [], []>} : vector<16x64xf32>, vector<64x64xf32>, vector<16x64xf32> -> vector<16x64xf32>
    %246 = arith.addf %240, %245 : vector<16x64xf32>
    %c2_275 = arith.constant 2 : index
    %c1_276 = arith.constant 1 : index
    %c0_277 = arith.constant 0 : index
    %247 = tpu.strided_load %arg20[%c2_275, %c1_276, %c0_277] {strides = array<i32: 2, 2, 1>} : memref<8x24x64xf32, #tpu.memory_space<vmem>>, vector<2x8x64xf32>
    %248 = vector.shape_cast %247 : vector<2x8x64xf32> to vector<16x64xf32>
    %c7_278 = arith.constant 7 : index
    %c0_279 = arith.constant 0 : index
    %c0_280 = arith.constant 0 : index
    %249 = vector.load %arg8[%c7_278, %c0_279, %c0_280] : memref<9x64x64xf32, #tpu.memory_space<vmem>>, vector<1x64x64xf32>
    %250 = vector.shape_cast %249 : vector<1x64x64xf32> to vector<64x64xf32>
    %cst_281 = arith.constant dense<0.000000e+00> : vector<16x64xf32>
    %251 = tpu.matmul %248, %250, %cst_281 {dimension_numbers = #tpu.dot_dimension_numbers<[1], [0], [0], [1], [0, 0, 1, 1], [], []>} : vector<16x64xf32>, vector<64x64xf32>, vector<16x64xf32> -> vector<16x64xf32>
    %252 = arith.addf %246, %251 : vector<16x64xf32>
    %c2_282 = arith.constant 2 : index
    %c2_283 = arith.constant 2 : index
    %c0_284 = arith.constant 0 : index
    %253 = tpu.strided_load %arg20[%c2_282, %c2_283, %c0_284] {strides = array<i32: 2, 2, 1>} : memref<8x24x64xf32, #tpu.memory_space<vmem>>, vector<2x8x64xf32>
    %254 = vector.shape_cast %253 : vector<2x8x64xf32> to vector<16x64xf32>
    %c8_285 = arith.constant 8 : index
    %c0_286 = arith.constant 0 : index
    %c0_287 = arith.constant 0 : index
    %255 = vector.load %arg8[%c8_285, %c0_286, %c0_287] : memref<9x64x64xf32, #tpu.memory_space<vmem>>, vector<1x64x64xf32>
    %256 = vector.shape_cast %255 : vector<1x64x64xf32> to vector<64x64xf32>
    %cst_288 = arith.constant dense<0.000000e+00> : vector<16x64xf32>
    %257 = tpu.matmul %254, %256, %cst_288 {dimension_numbers = #tpu.dot_dimension_numbers<[1], [0], [0], [1], [0, 0, 1, 1], [], []>} : vector<16x64xf32>, vector<64x64xf32>, vector<16x64xf32> -> vector<16x64xf32>
    %258 = arith.addf %252, %257 : vector<16x64xf32>
    %c0_289 = arith.constant 0 : index
    %c0_290 = arith.constant 0 : index
    %259 = vector.load %arg9[%c0_289, %c0_290] : memref<1x64xf32, #tpu.memory_space<vmem>>, vector<1x64xf32>
    %260 = vector.broadcast %259 : vector<1x64xf32> to vector<16x64xf32>
    %261 = arith.addf %258, %260 : vector<16x64xf32>
    %cst_291 = arith.constant 0.000000e+00 : f32
    %262 = vector.broadcast %cst_291 : f32 to vector<16x64xf32>
    %263 = arith.maximumf %261, %262 : vector<16x64xf32>
    %264 = vector.extract_strided_slice %263 {offsets = [0, 0], sizes = [1, 64], strides = [1, 1]} : vector<16x64xf32> to vector<1x64xf32>
    %c0_292 = arith.constant 0 : index
    %c0_293 = arith.constant 0 : index
    %c0_294 = arith.constant 0 : index
    %265 = vector.load %arg10[%c0_292, %c0_293, %c0_294] : memref<4x64x64xf32, #tpu.memory_space<vmem>>, vector<1x64x64xf32>
    %266 = vector.shape_cast %265 : vector<1x64x64xf32> to vector<64x64xf32>
    %cst_295 = arith.constant dense<0.000000e+00> : vector<1x64xf32>
    %267 = tpu.matmul %264, %266, %cst_295 {dimension_numbers = #tpu.dot_dimension_numbers<[1], [0], [0], [1], [0, 0, 1, 1], [], []>} : vector<1x64xf32>, vector<64x64xf32>, vector<1x64xf32> -> vector<1x64xf32>
    %268 = vector.extract_strided_slice %263 {offsets = [1, 0], sizes = [1, 64], strides = [1, 1]} : vector<16x64xf32> to vector<1x64xf32>
    %c1_296 = arith.constant 1 : index
    %c0_297 = arith.constant 0 : index
    %c0_298 = arith.constant 0 : index
    %269 = vector.load %arg10[%c1_296, %c0_297, %c0_298] : memref<4x64x64xf32, #tpu.memory_space<vmem>>, vector<1x64x64xf32>
    %270 = vector.shape_cast %269 : vector<1x64x64xf32> to vector<64x64xf32>
    %cst_299 = arith.constant dense<0.000000e+00> : vector<1x64xf32>
    %271 = tpu.matmul %268, %270, %cst_299 {dimension_numbers = #tpu.dot_dimension_numbers<[1], [0], [0], [1], [0, 0, 1, 1], [], []>} : vector<1x64xf32>, vector<64x64xf32>, vector<1x64xf32> -> vector<1x64xf32>
    %272 = arith.addf %267, %271 : vector<1x64xf32>
    %273 = vector.extract_strided_slice %263 {offsets = [8, 0], sizes = [1, 64], strides = [1, 1]} : vector<16x64xf32> to vector<1x64xf32>
    %c2_300 = arith.constant 2 : index
    %c0_301 = arith.constant 0 : index
    %c0_302 = arith.constant 0 : index
    %274 = vector.load %arg10[%c2_300, %c0_301, %c0_302] : memref<4x64x64xf32, #tpu.memory_space<vmem>>, vector<1x64x64xf32>
    %275 = vector.shape_cast %274 : vector<1x64x64xf32> to vector<64x64xf32>
    %cst_303 = arith.constant dense<0.000000e+00> : vector<1x64xf32>
    %276 = tpu.matmul %273, %275, %cst_303 {dimension_numbers = #tpu.dot_dimension_numbers<[1], [0], [0], [1], [0, 0, 1, 1], [], []>} : vector<1x64xf32>, vector<64x64xf32>, vector<1x64xf32> -> vector<1x64xf32>
    %277 = arith.addf %272, %276 : vector<1x64xf32>
    %278 = vector.extract_strided_slice %263 {offsets = [9, 0], sizes = [1, 64], strides = [1, 1]} : vector<16x64xf32> to vector<1x64xf32>
    %c3_304 = arith.constant 3 : index
    %c0_305 = arith.constant 0 : index
    %c0_306 = arith.constant 0 : index
    %279 = vector.load %arg10[%c3_304, %c0_305, %c0_306] : memref<4x64x64xf32, #tpu.memory_space<vmem>>, vector<1x64x64xf32>
    %280 = vector.shape_cast %279 : vector<1x64x64xf32> to vector<64x64xf32>
    %cst_307 = arith.constant dense<0.000000e+00> : vector<1x64xf32>
    %281 = tpu.matmul %278, %280, %cst_307 {dimension_numbers = #tpu.dot_dimension_numbers<[1], [0], [0], [1], [0, 0, 1, 1], [], []>} : vector<1x64xf32>, vector<64x64xf32>, vector<1x64xf32> -> vector<1x64xf32>
    %282 = arith.addf %277, %281 : vector<1x64xf32>
    %c0_308 = arith.constant 0 : index
    %c0_309 = arith.constant 0 : index
    %283 = vector.load %arg11[%c0_308, %c0_309] : memref<1x64xf32, #tpu.memory_space<vmem>>, vector<1x64xf32>
    %284 = arith.addf %282, %283 : vector<1x64xf32>
    %285 = arith.mulf %284, %284 : vector<1x64xf32>
    %cst_310 = arith.constant dense<0.000000e+00> : vector<1xf32>
    %286 = vector.multi_reduction <add>, %285, %cst_310 [1] : vector<1x64xf32> to vector<1xf32>
    %287 = vector.shape_cast %286 : vector<1xf32> to vector<1x1xf32>
    %cst_311 = arith.constant 1.000000e-24 : f32
    %288 = vector.broadcast %cst_311 : f32 to vector<1x1xf32>
    %289 = arith.maximumf %287, %288 : vector<1x1xf32>
    %290 = math.rsqrt %289 : vector<1x1xf32>
    %291 = vector.broadcast %290 : vector<1x1xf32> to vector<1x64xf32>
    %292 = arith.mulf %284, %291 : vector<1x64xf32>
    %c0_312 = arith.constant 0 : index
    %c0_313 = arith.constant 0 : index
    %c0_314 = arith.constant 0 : index
    %293 = vector.load %arg16[%c0_312, %c0_313, %c0_314] : memref<1x1x64xf32, #tpu.memory_space<vmem>>, vector<1x1x64xf32>
    %294 = vector.shape_cast %293 : vector<1x1x64xf32> to vector<1x64xf32>
    %295 = vector.shape_cast %292 : vector<1x64xf32> to vector<1x1x64xf32>
    tpu.vector_store %arg16[%c0_312, %c0_313, %c0_314], %295 {strides = array<i32>} : memref<1x1x64xf32, #tpu.memory_space<vmem>>, vector<1x1x64xf32>,
    %c0_315 = arith.constant 0 : index
    %c0_316 = arith.constant 0 : index
    %296 = vector.load %arg12[%c0_315, %c0_316] : memref<64x16xf32, #tpu.memory_space<vmem>>, vector<64x16xf32>
    %cst_317 = arith.constant dense<0.000000e+00> : vector<1x16xf32>
    %297 = tpu.matmul %292, %296, %cst_317 {dimension_numbers = #tpu.dot_dimension_numbers<[1], [0], [0], [1], [0, 0, 1, 1], [], []>} : vector<1x64xf32>, vector<64x16xf32>, vector<1x16xf32> -> vector<1x16xf32>
    %c0_318 = arith.constant 0 : index
    %c0_319 = arith.constant 0 : index
    %298 = vector.load %arg13[%c0_318, %c0_319] : memref<1x16xf32, #tpu.memory_space<vmem>>, vector<1x16xf32>
    %299 = arith.addf %297, %298 : vector<1x16xf32>
    %cst_320 = arith.constant 0.000000e+00 : f32
    %300 = vector.broadcast %cst_320 : f32 to vector<1x16xf32>
    %301 = arith.maximumf %299, %300 : vector<1x16xf32>
    %c0_321 = arith.constant 0 : index
    %c0_322 = arith.constant 0 : index
    %302 = vector.load %arg14[%c0_321, %c0_322] : memref<16x8xf32, #tpu.memory_space<vmem>>, vector<16x8xf32>
    %cst_323 = arith.constant dense<0.000000e+00> : vector<1x8xf32>
    %303 = tpu.matmul %301, %302, %cst_323 {dimension_numbers = #tpu.dot_dimension_numbers<[1], [0], [0], [1], [0, 0, 1, 1], [], []>} : vector<1x16xf32>, vector<16x8xf32>, vector<1x8xf32> -> vector<1x8xf32>
    %c0_324 = arith.constant 0 : index
    %c0_325 = arith.constant 0 : index
    %304 = vector.load %arg15[%c0_324, %c0_325] : memref<1x8xf32, #tpu.memory_space<vmem>>, vector<1x8xf32>
    %305 = arith.addf %303, %304 : vector<1x8xf32>
    %306 = arith.negf %305 : vector<1x8xf32>
    %307 = math.exp %306 : vector<1x8xf32>
    %cst_326 = arith.constant 1.000000e+00 : f32
    %308 = vector.broadcast %cst_326 : f32 to vector<1x8xf32>
    %309 = arith.addf %308, %307 : vector<1x8xf32>
    %310 = arith.divf %308, %309 : vector<1x8xf32>
    %c0_327 = arith.constant 0 : index
    %c0_328 = arith.constant 0 : index
    %c0_329 = arith.constant 0 : index
    %311 = vector.load %arg17[%c0_327, %c0_328, %c0_329] : memref<1x1x8xf32, #tpu.memory_space<vmem>>, vector<1x1x8xf32>
    %312 = vector.shape_cast %311 : vector<1x1x8xf32> to vector<1x8xf32>
    %313 = vector.shape_cast %310 : vector<1x8xf32> to vector<1x1x8xf32>
    tpu.vector_store %arg17[%c0_327, %c0_328, %c0_329], %313 {strides = array<i32>} : memref<1x1x8xf32, #tpu.memory_space<vmem>>, vector<1x1x8xf32>,
    return
  }
  func.func @transform_0(%arg0: i32) -> (i32, i32, i32, i32) {
    %c0_i32 = arith.constant 0 : i32
    %c0_i32_0 = arith.constant 0 : i32
    %c0_i32_1 = arith.constant 0 : i32
    %c0_i32_2 = arith.constant 0 : i32
    return %arg0, %c0_i32, %c0_i32_0, %c0_i32_1 : i32, i32, i32, i32
  }
  func.func @transform_1(%arg0: i32) -> (i32, i32, i32) {
    %c0_i32 = arith.constant 0 : i32
    %c0_i32_0 = arith.constant 0 : i32
    %c0_i32_1 = arith.constant 0 : i32
    %c0_i32_2 = arith.constant 0 : i32
    return %c0_i32, %c0_i32_0, %c0_i32_1 : i32, i32, i32
  }
  func.func @transform_2(%arg0: i32) -> (i32, i32) {
    %c0_i32 = arith.constant 0 : i32
    %c0_i32_0 = arith.constant 0 : i32
    %c0_i32_1 = arith.constant 0 : i32
    return %c0_i32, %c0_i32_0 : i32, i32
  }
  func.func @transform_3(%arg0: i32) -> (i32, i32, i32) {
    %c0_i32 = arith.constant 0 : i32
    %c0_i32_0 = arith.constant 0 : i32
    %c0_i32_1 = arith.constant 0 : i32
    %c0_i32_2 = arith.constant 0 : i32
    return %c0_i32, %c0_i32_0, %c0_i32_1 : i32, i32, i32
  }
  func.func @transform_4(%arg0: i32) -> (i32, i32) {
    %c0_i32 = arith.constant 0 : i32
    %c0_i32_0 = arith.constant 0 : i32
    %c0_i32_1 = arith.constant 0 : i32
    return %c0_i32, %c0_i32_0 : i32, i32
  }
  func.func @transform_5(%arg0: i32) -> (i32, i32, i32) {
    %c0_i32 = arith.constant 0 : i32
    %c0_i32_0 = arith.constant 0 : i32
    %c0_i32_1 = arith.constant 0 : i32
    %c0_i32_2 = arith.constant 0 : i32
    return %c0_i32, %c0_i32_0, %c0_i32_1 : i32, i32, i32
  }
  func.func @transform_6(%arg0: i32) -> (i32, i32) {
    %c0_i32 = arith.constant 0 : i32
    %c0_i32_0 = arith.constant 0 : i32
    %c0_i32_1 = arith.constant 0 : i32
    return %c0_i32, %c0_i32_0 : i32, i32
  }
  func.func @transform_7(%arg0: i32) -> (i32, i32, i32) {
    %c0_i32 = arith.constant 0 : i32
    %c0_i32_0 = arith.constant 0 : i32
    %c0_i32_1 = arith.constant 0 : i32
    %c0_i32_2 = arith.constant 0 : i32
    return %c0_i32, %c0_i32_0, %c0_i32_1 : i32, i32, i32
  }
  func.func @transform_8(%arg0: i32) -> (i32, i32) {
    %c0_i32 = arith.constant 0 : i32
    %c0_i32_0 = arith.constant 0 : i32
    %c0_i32_1 = arith.constant 0 : i32
    return %c0_i32, %c0_i32_0 : i32, i32
  }
  func.func @transform_9(%arg0: i32) -> (i32, i32, i32) {
    %c0_i32 = arith.constant 0 : i32
    %c0_i32_0 = arith.constant 0 : i32
    %c0_i32_1 = arith.constant 0 : i32
    %c0_i32_2 = arith.constant 0 : i32
    return %c0_i32, %c0_i32_0, %c0_i32_1 : i32, i32, i32
  }
  func.func @transform_10(%arg0: i32) -> (i32, i32) {
    %c0_i32 = arith.constant 0 : i32
    %c0_i32_0 = arith.constant 0 : i32
    %c0_i32_1 = arith.constant 0 : i32
    return %c0_i32, %c0_i32_0 : i32, i32
  }
  func.func @transform_11(%arg0: i32) -> (i32, i32) {
    %c0_i32 = arith.constant 0 : i32
    %c0_i32_0 = arith.constant 0 : i32
    %c0_i32_1 = arith.constant 0 : i32
    return %c0_i32, %c0_i32_0 : i32, i32
  }
  func.func @transform_12(%arg0: i32) -> (i32, i32) {
    %c0_i32 = arith.constant 0 : i32
    %c0_i32_0 = arith.constant 0 : i32
    %c0_i32_1 = arith.constant 0 : i32
    return %c0_i32, %c0_i32_0 : i32, i32
  }
  func.func @transform_13(%arg0: i32) -> (i32, i32) {
    %c0_i32 = arith.constant 0 : i32
    %c0_i32_0 = arith.constant 0 : i32
    %c0_i32_1 = arith.constant 0 : i32
    return %c0_i32, %c0_i32_0 : i32, i32
  }
  func.func @transform_14(%arg0: i32) -> (i32, i32) {
    %c0_i32 = arith.constant 0 : i32
    %c0_i32_0 = arith.constant 0 : i32
    %c0_i32_1 = arith.constant 0 : i32
    return %c0_i32, %c0_i32_0 : i32, i32
  }
  func.func @transform_15(%arg0: i32) -> (i32, i32, i32) {
    %c0_i32 = arith.constant 0 : i32
    %c0_i32_0 = arith.constant 0 : i32
    %c0_i32_1 = arith.constant 0 : i32
    return %arg0, %c0_i32, %c0_i32_0 : i32, i32, i32
  }
  func.func @transform_16(%arg0: i32) -> (i32, i32, i32) {
    %c0_i32 = arith.constant 0 : i32
    %c0_i32_0 = arith.constant 0 : i32
    %c0_i32_1 = arith.constant 0 : i32
    return %arg0, %c0_i32, %c0_i32_0 : i32, i32, i32
  }
}

</mosaic_0001>

<bundles_post_ra>
// kernel: fe_class_forward.1
= control target key start
LH: loop header
LB: loop body
LE: loop exit
PB: predicated region body
PF: predicated region fallthrough
CT: control target
= control target key end

     0   :  { %s16539_s0 = inlined_call_operand.vmem [shape: f32[2,33,33,64], index: 0, kind: input, shape index: {}]   ;;  %s16540_s1 = inlined_call_operand.vmem [shape: f32[4,64,16], index: 1, kind: input, shape index: {}]   ;;  %s16541_s2 = inlined_call_operand.vmem [shape: f32[1,16], index: 2, kind: input, shape index: {}]   ;;  %s16542_s3 = inlined_call_operand.vmem [shape: f32[16,16,32], index: 3, kind: input, shape index: {}]   ;;  %s16543_s4 = inlined_call_operand.vmem [shape: f32[1,32], index: 4, kind: input, shape index: {}]   ;;  %s16544_s5 = inlined_call_operand.vmem [shape: f32[9,32,64], index: 5, kind: input, shape index: {}]   ;;  %s16545_s6 = inlined_call_operand.vmem [shape: f32[1,64], index: 6, kind: input, shape index: {}]   ;;  %s16546_s7 = inlined_call_operand.vmem [shape: f32[9,64,64], index: 7, kind: input, shape index: {}]   ;;  %s16547_s8 = inlined_call_operand.vmem [shape: f32[1,64], index: 8, kind: input, shape index: {}]   ;;  %s16548_s9 = inlined_call_operand.vmem [shape: f32[4,64,64], index: 9, kind: input, shape index: {}]   ;;  %s16549_s10 = inlined_call_operand.vmem [shape: f32[1,64], index: 10, kind: input, shape index: {}]   ;;  %s16550_s11 = inlined_call_operand.vmem [shape: f32[64,16], index: 11, kind: input, shape index: {}]   ;;  %s16551_s12 = inlined_call_operand.vmem [shape: f32[1,16], index: 12, kind: input, shape index: {}]   ;;  %s16552_s13 = inlined_call_operand.vmem [shape: f32[16,8], index: 13, kind: input, shape index: {}]   ;;  %s16553_s14 = inlined_call_operand.vmem [shape: f32[1,8], index: 14, kind: input, shape index: {}]   ;;  %s16554_s15 = inlined_call_operand.hbm [shape: f32[2,1,64], index: 15, kind: output, shape index: {0}]   ;;  %s16555_s16 = inlined_call_operand.hbm [shape: f32[2,1,8], index: 16, kind: output, shape index: {1}]  }
   0x1   :  { %16563 = sst [smem:[#allocation17_spill]] %s16539_s0 }
   0x2   :  { %16564 = sst [smem:[#allocation18_spill]] %s16540_s1 }
   0x3   :  { %16565 = sst [smem:[#allocation19_spill]] %s16541_s2 }
   0x4   :  { %16566 = sst [smem:[#allocation20_spill]] %s16555_s16 }
   0x5   :  { %22 = vsyncpa [#allocation6], 0 }
   0x6   :  { %24 = vsyncpa [#allocation6 + $0x1], 0 }
   0x7   :  { %25 = vsyncpa [#allocation8], 0 }
   0x8   :  { %27 = vsyncpa [#allocation8 + $0x1], 0  ;;  %s12853_s21 = smov 0   ;;  %s12855_s22 = smov 0  }
   0x9   :  { %s12857_s23 = smov 0   ;;  %s12859_s24 = smov 0  }
   0xa LB: > { %16567 = sst [smem:[#allocation11_spill]] %s12753_s21  ;;  %s12874_s25 = sadd.s32 4294967295, %s12765_s24   ;;  %s12765_s24 = sphi %s12859_s24, %s16582_s24   ;;  %s12761_s23 = sphi %s12857_s23, %s16584_s23   ;;  %s12757_s22 = sphi %s12855_s22, %s16586_s22   ;;  %s12753_s21 = sphi %s12853_s21, %s16585_s21  }
   0xb   : > { %16568 = sst [smem:[#allocation12_spill]] %s12761_s23  ;;  %s11133_s26 = sadd.s32 4294967294, %s12765_s24  }
   0xc   : > { %16569 = sst [smem:[#allocation13_spill]] %s12765_s24  ;;  %s12878_s27 = sadd.s32 1, %s12765_s24  }
   0xd   : > { %16570 = sst [smem:[#allocation14_spill]] %s12878_s27  ;;  %s360_s28 = sadd.s32 1, %s12761_s23 }
   0xe   : > { %s357_s29 = ssub.s32 %s12765_s24, %s12878_s27  ;;  %p370_p0 = scmp.ne.s32.totalorder %s12761_s23, %s12757_s22 }
   0xf   : > { %p358_p1 = scmp.eq.s32.totalorder %s357_s29, 0  ;;  %p371_p2 = scmp.eq.s32.totalorder %s12874_s25, 1 }
  0x10   : > { %p376_p3 = scmp.ne.s32.totalorder %s12757_s22, %s12753_s21  ;;  %p377_p4 = scmp.eq.s32.totalorder %s11133_s26, 1 }
  0x11   : > { %s12889_s30 = scalar_select %p358_p1, %s12761_s23, %s360_s28  }
  0x12   : > { %p12891_p5 = por %p371_p2, %p370_p0  ;;  %p12895_p6 = por %p377_p4, %p376_p3 }
  0x13   : > { %16571 = sst [smem:[#allocation15_spill]] %s12889_s30  ;;  %p11136_p7 = scmp.ge.s32.totalorder %s12765_s24, 1 }
  0x14   : > { %s16573_s17 = scalar_select %p12895_p6, 1, 0 }
  0x15   : > { %p471_p8 = scmp.lt.s32.totalorder %s12765_s24, 3 }
  0x16   : > { %16574 = sst [smem:[#allocation16_spill]] %s16573_s17 }
  0x17   : > { %p472_p9 = pnand %p11136_p7, %p471_p8 }
  0x18   : > { %s16575_s1 = sld [smem:[#allocation18_spill]] (!%p472_p9)  ;;  %p524_p10 = scmp.lt.s32.totalorder (!%p472_p9), %s12874_s25, 1 }
  0x19   : > { %475 = sbr.rel (%p472_p9) target bundleno = 3021 (0xbcd), region = 80  ;;  %s16576_s24 = sld [smem:[#allocation17_spill]] (!%p472_p9) }
  0x1a   : > { %s16577_s2 = sld [smem:[#allocation19_spill]] (!%p472_p9)  ;;  %s16476_s19 = sand.u32 (!%p472_p9), 1, %s12757_s22  }
  0x1b   : > { %s10644_s30 = scalar_lea.sflag (!%p472_p9), [#allocation6], %s16476_s19  ;;  %s12691_s21 = scalar_lea.hbm (!%p472_p9), %s16554_s15, 2 }
  0x1e   : > { %v11145_v0 = vld [vmem:[%s16575_s1 + $0x78] sm:$0xff]  ;;  %v11144_v4 = vld [vmem:[%s16575_s1 + $0x70] sm:$0xff]  ;;  %v11143_v8 = vld [vmem:[%s16575_s1 + $0x68] sm:$0xff]  ;;  %s12941_s17 = scalar_select %p524_p10, %s12874_s25, 1  ;;  %vm802_vm0 = vcmask 523264   ;;  %vm4734_vm1 = vcmask 130048  }
  0x1f   : > { %v664_v1 = vld [vmem:[%s16575_s1 + $0x38] sm:$0xff]  ;;  %1195 = vmatpush.msra.mxu0 %v11145_v0  ;;  %v663_v5 = vld [vmem:[%s16575_s1 + $0x30] sm:$0xff]  ;;  %v662_v9 = vld [vmem:[%s16575_s1 + $0x28] sm:$0xff]  ;;  %vm9249_vm2 = vcmask 261120   ;;  %vm10546_vm3 = vcmask 516096  }
  0x20   : > { %v11537_v2 = vld [vmem:[%s16575_s1 + $0xb8] sm:$0xff]  ;;  %1980 = vmatpush.msra.mxu1 %v664_v1  ;;  %v11536_v6 = vld [vmem:[%s16575_s1 + $0xb0] sm:$0xff]  ;;  %v11535_v10 = vld [vmem:[%s16575_s1 + $0xa8] sm:$0xff]  ;;  %s12611_s20 = smul.u32 1320, %s12941_s17  ;;  %s517_s17 = scalar_lea.vmem [#allocation5], %s16476_s19 }
  0x21   : > { %v11801_v3 = vld [vmem:[%s16575_s1 + $0xf8] sm:$0xff]  ;;  %2903 = vmatpush.msra.mxu2 %v11537_v2  ;;  %v11800_v7 = vld [vmem:[%s16575_s1 + $0xf0] sm:$0xff]  ;;  %1196 = vmatpush.msra.mxu0 %v11144_v4  ;;  %v11799_v11 = vld [vmem:[%s16575_s1 + $0xe8] sm:$0xff] }
  0x22   : > { %3953 = vmatpush.msra.mxu3 %v11801_v3  ;;  %1981 = vmatpush.msra.mxu1 %v663_v5  ;;  %v11142_v12 = vld [vmem:[%s16575_s1 + $0x60] sm:$0xff]  ;;  %v11141_v16 = vld [vmem:[%s16575_s1 + $0x58] sm:$0xff]  ;;  %v11140_v20 = vld [vmem:[%s16575_s1 + $0x50] sm:$0xff]  ;;  %s12995_s16 = scalar_lea.vmem %s16576_s24, %s12611_s20  ;;  %s10656_s24 = scalar_lea.hbm %s16554_s15, %s12874_s25 }
  0x23   : > { %2904 = vmatpush.msra.mxu2 %v11536_v6  ;;  %v661_v13 = vld [vmem:[%s16575_s1 + $0x20] sm:$0xff]  ;;  %1197 = vmatpush.msra.mxu0 %v11143_v8  ;;  %v660_v17 = vld [vmem:[%s16575_s1 + $0x18] sm:$0xff]  ;;  %v659_v21 = vld [vmem:[%s16575_s1 + $0x10] sm:$0xff]  ;;  %s10658_s20 = sshll.u32 %s517_s17, 4  ;;  %s10660_s23 = sshll.u32 %s10656_s24, 4  ;;  %s10659_s20 = int_to_ptr.vmem [resolvable:$true] %s10658_s20  ;;  %s10661_s23 = int_to_ptr.hbm [resolvable:$true] %s10660_s23 }
  0x24   : > { %3954 = vmatpush.msra.mxu3 %v11800_v7  ;;  %1982 = vmatpush.msra.mxu1 %v662_v9  ;;  %v11534_v14 = vld [vmem:[%s16575_s1 + $0xa0] sm:$0xff]  ;;  %v11533_v18 = vld [vmem:[%s16575_s1 + $0x98] sm:$0xff]  ;;  %v11532_v22 = vld [vmem:[%s16575_s1 + $0x90] sm:$0xff]  ;;  %s12685_s18 = sshra.s32 %s10661_s23, 4  ;;  %s12686_s18 = int_to_ptr.hbm [resolvable:$true] %s12685_s18 }
  0x25   : > { %v11798_v15 = vld [vmem:[%s16575_s1 + $0xe0] sm:$0xff]  ;;  %2905 = vmatpush.msra.mxu2 %v11535_v10  ;;  %1198 = vmatpush.msra.mxu0 %v11142_v12  ;;  %v11797_v19 = vld [vmem:[%s16575_s1 + $0xd8] sm:$0xff]  ;;  %v11796_v23 = vld [vmem:[%s16575_s1 + $0xd0] sm:$0xff]  ;;  %s12687_s27 = scalar_lea.hbm %s12686_s18, 1  ;;  %p12692_p0 = scmp.lt.s32.totalorder %s12686_s18, %s16554_s15 }
  0x26   : > { %3955 = vmatpush.msra.mxu3 %v11799_v11  ;;  %1983 = vmatpush.msra.mxu1 %v661_v13  ;;  %v11139_v24 = vld [vmem:[%s16575_s1 + $0x48] sm:$0xff]  ;;  %v11138_v28 = vld [vmem:[%s16575_s1 + $0x40] sm:$0xff]  ;;  %v11931_v36 = vld [vmem:[%s16542_s3 + $0x18] sm:$0xff]  ;;  %p12688_p11 = scmp.ne.s32.totalorder %s12686_s18, %s12687_s27  ;;  %p12693_p1 = scmp.lt.s32.totalorder %s12691_s21, %s12687_s27 }
  0x27   : > { %2906 = vmatpush.msra.mxu2 %v11534_v14  ;;  %1199 = vmatpush.msra.mxu0 %v11141_v16  ;;  %v658_v25 = vld [vmem:[%s16575_s1 + $0x8] sm:$0xff]  ;;  %v657_v29 = vld [vmem:[%s16575_s1] sm:$0xff]  ;;  %v12019_v37 = vld [vmem:[%s16542_s3 + $0x38] sm:$0xff] }
  0x28   : > { %3956 = vmatpush.msra.mxu3 %v11798_v15  ;;  %1984 = vmatpush.msra.mxu1 %v660_v17  ;;  %v11531_v26 = vld [vmem:[%s16575_s1 + $0x88] sm:$0xff]  ;;  %v11530_v30 = vld [vmem:[%s16575_s1 + $0x80] sm:$0xff]  ;;  %v11403_v41 = vld [vmem:[%s12995_s16 + $0x30] sm:$0xff]  ;;  %p12689_p12 = pnand %p12688_p11, %p12891_p5  ;;  %p12694_p2 = por %p12693_p1, %p12692_p0 }
  0x29   : > { %2907 = vmatpush.msra.mxu2 %v11533_v18  ;;  %1200 = vmatpush.msra.mxu0 %v11140_v20  ;;  %v11795_v27 = vld [vmem:[%s16575_s1 + $0xc8] sm:$0xff]  ;;  %v11794_v31 = vld [vmem:[%s16575_s1 + $0xc0] sm:$0xff]  ;;  %v11667_v42 = vld [vmem:[%s12995_s16 + $0x31] sm:$0xff] }
  0x2a   : > { %3957 = vmatpush.msra.mxu3 %v11797_v19  ;;  %1985 = vmatpush.msra.mxu1 %v659_v21  ;;  %v665_v32 = vld [vmem:[%s12995_s16 + $0x1] sm:$0xff]  ;;  %v11666_v35 = vld [vmem:[%s12995_s16 + $0x29] sm:$0xff]  ;;  %v667_v43 = vld [vmem:[%s12995_s16 + $0x11] sm:$0xff]  ;;  %p12690_p13 = pneg %p12689_p12 }
  0x2b   : > { %2908 = vmatpush.msra.mxu2 %v11532_v22  ;;  %1201 = vmatpush.msra.mxu0 %v11139_v24  ;;  %v529_v33 = vld [vmem:[%s12995_s16] sm:$0xff]  ;;  %v11402_v34 = vld [vmem:[%s12995_s16 + $0x28] sm:$0xff]  ;;  %v531_v44 = vld [vmem:[%s12995_s16 + $0x10] sm:$0xff]  ;;  %v12767_v22 = vmov 0.0  }
  0x2c   : > { %3958 = vmatpush.msra.mxu3 %v11796_v23  ;;  %1986 = vmatpush.msra.mxu1 %v658_v25  ;;  %v4951_v38 = vld [vmem:[%s16542_s3 + $0x8] sm:$0xff]  ;;  %v11404_v45 = vld [vmem:[%s12995_s16 + $0x38] sm:$0xff]  ;;  %v11405_v49 = vld [vmem:[%s12995_s16 + $0x40] sm:$0xff]  ;;  %4863 = vst.msk [vmem:[#allocation2 + $0x20] sm:$0xff] %vm4734_vm1, %v12767_v22  ;;  %p12695_p3 = pnand %p12694_p2, %p12690_p13 }
  0x2d   : > { %2909 = vmatpush.msra.mxu2 %v11531_v26  ;;  %1202 = vmatpush.msra.mxu0 %v11138_v28  ;;  %v666_v39 = vld [vmem:[%s12995_s16 + $0x9] sm:$0xff]  ;;  %v11668_v46 = vld [vmem:[%s12995_s16 + $0x39] sm:$0xff]  ;;  %v11669_v50 = vld [vmem:[%s12995_s16 + $0x41] sm:$0xff]  ;;  %4864 = vst.msk [vmem:[#allocation2 + $0x48] sm:$0xff] %vm4734_vm1, %v12767_v22 }
  0x2e   : > { %3959 = vmatpush.msra.mxu3 %v11795_v27  ;;  %1987 = vmatpush.msra.mxu1 %v657_v29  ;;  %v530_v40 = vld [vmem:[%s12995_s16 + $0x8] sm:$0xff]  ;;  %v668_v47 = vld [vmem:[%s12995_s16 + $0x19] sm:$0xff]  ;;  %v11406_v51 = vld [vmem:[%s12995_s16 + $0x50] sm:$0xff]  ;;  %4865 = vst.msk [vmem:[#allocation2 + $0x70] sm:$0xff] %vm4734_vm1, %v12767_v22 }
  0x2f   : > { %2910 = vmatpush.msra.mxu2 %v11530_v30  ;;  %11146 = vmatmul.msk.f32.vlgmr.msra.gmra.mxu0 %vm802_vm0, %v665_v32  ;;  %v532_v48 = vld [vmem:[%s12995_s16 + $0x18] sm:$0xff]  ;;  %v11408_v55 = vld [vmem:[%s12995_s16 + $0x60] sm:$0xff]  ;;  %v11409_v57 = vld [vmem:[%s12995_s16 + $0x68] sm:$0xff]  ;;  %4866 = vst.msk [vmem:[#allocation2 + $0x98] sm:$0xff] %vm4734_vm1, %v12767_v22 }
  0x30   : > { %3960 = vmatpush.msra.mxu3 %v11794_v31  ;;  %11274 = vmatmul.msk.f32.vlgmr.msra.gmra.mxu1 %vm802_vm0, %v529_v33  ;;  %v11670_v52 = vld [vmem:[%s12995_s16 + $0x51] sm:$0xff]  ;;  %v11671_v54 = vld [vmem:[%s12995_s16 + $0x59] sm:$0xff]  ;;  %v11672_v56 = vld [vmem:[%s12995_s16 + $0x61] sm:$0xff]  ;;  %4867 = vst.msk [vmem:[#allocation2 + $0xc0] sm:$0xff] %vm4734_vm1, %v12767_v22 }
  0x31   : > { %11538 = vmatmul.msk.f32.vlgmr.msra.gmra.mxu2 %vm802_vm0, %v11402_v34  ;;  %11802 = vmatmul.msk.f32.vlgmr.msra.gmra.mxu3 %vm802_vm0, %v11666_v35  ;;  %v11407_v53 = vld [vmem:[%s12995_s16 + $0x58] sm:$0xff]  ;;  %v11673_v58 = vld [vmem:[%s12995_s16 + $0x69] sm:$0xff]  ;;  %v11411_v61 = vld [vmem:[%s12995_s16 + $0x80] sm:$0xff]  ;;  %4868 = vst.msk [vmem:[#allocation2 + $0xe8] sm:$0xff] %vm4734_vm1, %v12767_v22 }
  0x32   : > { %12609 = vmatpush.msrb.mxu2 %v11931_v36  ;;  %5810 = vmatpush.msrb.mxu3 %v12019_v37  ;;  %v11410_v59 = vld [vmem:[%s12995_s16 + $0x78] sm:$0xff]  ;;  %v11675_v62 = vld [vmem:[%s12995_s16 + $0x81] sm:$0xff]  ;;  %v11676_v0 = vld [vmem:[%s12995_s16 + $0x89] sm:$0xff]  ;;  %4869 = vst.msk [vmem:[#allocation2 + $0x110] sm:$0xff] %vm4734_vm1, %v12767_v22 }
  0x33   : > { %5294 = vmatpush.msrb.mxu1 %v4951_v38  ;;  %5109 = vmatpush.msrb.mxu0 %v11931_v36  ;;  %v11674_v60 = vld [vmem:[%s12995_s16 + $0x79] sm:$0xff]  ;;  %v11412_v63 = vld [vmem:[%s12995_s16 + $0x88] sm:$0xff]  ;;  %v11413_v1 = vld [vmem:[%s12995_s16 + $0x90] sm:$0xff]  ;;  %4870 = vst.msk [vmem:[#allocation2 + $0x138] sm:$0xff] %vm4734_vm1, %v12767_v22 }
  0x34   : > { %v11677_v2 = vld [vmem:[%s12995_s16 + $0x91] sm:$0xff]  ;;  %v11414_v3 = vld [vmem:[%s12995_s16 + $0xa0] sm:$0xff]  ;;  %v11415_v5 = vld [vmem:[%s12995_s16 + $0xa8] sm:$0xff]  ;;  %4871 = vst.msk [vmem:[#allocation2 + $0x160] sm:$0xff] %vm4734_vm1, %v12767_v22 }
  0x35   : > { %v11678_v4 = vld [vmem:[%s12995_s16 + $0xa1] sm:$0xff]  ;;  %v11679_v6 = vld [vmem:[%s12995_s16 + $0xa9] sm:$0xff]  ;;  %v11680_v8 = vld [vmem:[%s12995_s16 + $0xb1] sm:$0xff]  ;;  %4872 = vst.msk [vmem:[#allocation2 + $0x188] sm:$0xff] %vm4734_vm1, %v12767_v22 }
  0x36   : > { %v11416_v7 = vld [vmem:[%s12995_s16 + $0xb0] sm:$0xff]  ;;  %v13117_v9 = vld [vmem:[%s12995_s16 + $0xb8] sm:$0xff]  ;;  %v13129_v13 = vld [vmem:[%s12995_s16 + $0xc8] sm:$0xff]  ;;  %4873 = vst.msk [vmem:[#allocation2 + $0x1b0] sm:$0xff] %vm4734_vm1, %v12767_v22 }
  0x37   : > { %11147 = vmatmul.msk.f32.gmra.mxu0 %vm802_vm0, %v666_v39  ;;  %v13120_v10 = vld [vmem:[%s12995_s16 + $0xb9] sm:$0xff]  ;;  %v13132_v14 = vld [vmem:[%s12995_s16 + $0xc9] sm:$0xff]  ;;  %v13151_v24 = vld [vmem:[%s12995_s16 + $0xd1] sm:$0xff]  ;;  %4874 = vst.msk [vmem:[#allocation2 + $0x1d8] sm:$0xff] %vm4734_vm1, %v12767_v22 }
  0x38   : > { %11275 = vmatmul.msk.f32.gmra.mxu1 %vm802_vm0, %v530_v40  ;;  %v13143_v19 = vld [vmem:[%s16577_s2] ss:$0 sm:$0xff]  ;;  %v13148_v23 = vld [vmem:[%s12995_s16 + $0xd0] sm:$0xff]  ;;  %4875 = vst.msk [vmem:[#allocation2 + $0x200] sm:$0xff] %vm4734_vm1, %v12767_v22 }
  0x39   : > { %11539 = vmatmul.msk.f32.gmra.mxu2 %vm802_vm0, %v11403_v41  ;;  %11803 = vmatmul.msk.f32.gmra.mxu3 %vm802_vm0, %v11667_v42  ;;  %4876 = vst.msk [vmem:[#allocation2 + $0x228] sm:$0xff] %vm4734_vm1, %v12767_v22 }
  0x3a   : > { %4877 = vst.msk [vmem:[#allocation2 + $0x250] sm:$0xff] %vm4734_vm1, %v12767_v22 }
  0x3b   : > { %4878 = vst.msk [vmem:[#allocation2 + $0x278] sm:$0xff] %vm4734_vm1, %v12767_v22 }
  0x3c   : > { %4879 = vst.msk [vmem:[#allocation2 + $0x2a0] sm:$0xff] %vm4734_vm1, %v12767_v22 }
  0x3d   : > { %4880 = vst.msk [vmem:[#allocation2 + $0x2c8] sm:$0xff] %vm4734_vm1, %v12767_v22 }
  0x3e   : > { %4881 = vst.msk [vmem:[#allocation2 + $0x2f0] sm:$0xff] %vm4734_vm1, %v12767_v22 }
  0x3f   : > { %11148 = vmatmul.msk.f32.gmra.mxu0 %vm802_vm0, %v667_v43  ;;  %4882 = vst.msk [vmem:[#allocation2 + $0x318] sm:$0xff] %vm4734_vm1, %v12767_v22 }
  0x40   : > { %11276 = vmatmul.msk.f32.gmra.mxu1 %vm802_vm0, %v531_v44  ;;  %4883 = vst.msk [vmem:[#allocation2 + $0x340] sm:$0xff] %vm4734_vm1, %v12767_v22 }
  0x41   : > { %11540 = vmatmul.msk.f32.gmra.mxu2 %vm802_vm0, %v11404_v45  ;;  %11804 = vmatmul.msk.f32.gmra.mxu3 %vm802_vm0, %v11668_v46  ;;  %4884 = vst.msk [vmem:[#allocation2 + $0x368] sm:$0xff] %vm4734_vm1, %v12767_v22 }
  0x42   : > { %4885 = vst.msk [vmem:[#allocation2 + $0x390] sm:$0xff] %vm4734_vm1, %v12767_v22 }
  0x43   : > { %4886 = vst.msk [vmem:[#allocation2 + $0x3b8] sm:$0xff] %vm4734_vm1, %v12767_v22 }
  0x44   : > { %4887 = vst.msk [vmem:[#allocation2 + $0x3e0] sm:$0xff] %vm4734_vm1, %v12767_v22 }
  0x45   : > { %4888 = vst.msk [vmem:[#allocation2 + $0x408] sm:$0xff] %vm4734_vm1, %v12767_v22 }
  0x46   : > { %4889 = vst.msk [vmem:[#allocation2 + $0x430] sm:$0xff] %vm4734_vm1, %v12767_v22 }
  0x47   : > { %11149 = vmatmul.msk.f32.gmra.mxu0 %vm802_vm0, %v668_v47  ;;  %4890 = vst.msk [vmem:[#allocation2 + $0x458] sm:$0xff] %vm4734_vm1, %v12767_v22 }
  0x48   : > { %11277 = vmatmul.msk.f32.gmra.mxu1 %vm802_vm0, %v532_v48  ;;  %4891 = vst.msk [vmem:[#allocation2 + $0x480] sm:$0xff] %vm4734_vm1, %v12767_v22 }
  0x49   : > { %11541 = vmatmul.msk.f32.gmra.mxu2 %vm802_vm0, %v11405_v49  ;;  %11805 = vmatmul.msk.f32.gmra.mxu3 %vm802_vm0, %v11669_v50  ;;  %4892 = vst.msk [vmem:[#allocation2 + $0x4a8] sm:$0xff] %vm4734_vm1, %v12767_v22 }
  0x4a   : > { %10000 = vst.msk [vmem:[#allocation4 + $0x8] sm:$0xff] %vm802_vm0, %v12767_v22 }
  0x4b   : > { %10001 = vst.msk [vmem:[#allocation4 + $0x10] sm:$0xff] %vm802_vm0, %v12767_v22 }
  0x4c   : > { %10002 = vst.msk [vmem:[#allocation4 + $0x20] sm:$0xff] %vm802_vm0, %v12767_v22 }
  0x4d   : > { %10003 = vst.msk [vmem:[#allocation4 + $0x28] sm:$0xff] %vm802_vm0, %v12767_v22 }
  0x4e   : > { %10004 = vst.msk [vmem:[#allocation4 + $0x38] sm:$0xff] %vm802_vm0, %v12767_v22 }
  0x4f   : > { %11150 = vmatmul.msk.f32.gmra.mxu0 %vm802_vm0, %v11666_v35  ;;  %v13179_v35 = vld [vmem:[%s12995_s16 + $0xd9] sm:$0xff]  ;;  %10005 = vst.msk [vmem:[#allocation4 + $0x40] sm:$0xff] %vm802_vm0, %v12767_v22 }
  0x50   : > { %11278 = vmatmul.msk.f32.gmra.mxu1 %vm802_vm0, %v11402_v34  ;;  %v13176_v34 = vld [vmem:[%s12995_s16 + $0xd8] sm:$0xff]  ;;  %10006 = vst.msk [vmem:[#allocation4 + $0x50] sm:$0xff] %vm802_vm0, %v12767_v22 }
  0x51   : > { %11542 = vmatmul.msk.f32.gmra.mxu2 %vm802_vm0, %v11406_v51  ;;  %11806 = vmatmul.msk.f32.gmra.mxu3 %vm802_vm0, %v11670_v52  ;;  %10007 = vst.msk [vmem:[#allocation4 + $0x58] sm:$0xff] %vm802_vm0, %v12767_v22 }
  0x52   : > { %10008 = vst.msk [vmem:[#allocation4 + $0x68] sm:$0xff] %vm802_vm0, %v12767_v22 }
  0x53   : > { %10009 = vst.msk [vmem:[#allocation4 + $0x70] sm:$0xff] %vm802_vm0, %v12767_v22 }
  0x54   : > { %9285 = vst.msk [vmem:[#allocation3 + $0x10] sm:$0xff] %vm9249_vm2, %v12767_v22 }
  0x55   : > { %9286 = vst.msk [vmem:[#allocation3 + $0x28] sm:$0xff] %vm9249_vm2, %v12767_v22 }
  0x56   : > { %9287 = vst.msk [vmem:[#allocation3 + $0x40] sm:$0xff] %vm9249_vm2, %v12767_v22 }
  0x57   : > { %11151 = vmatmul.msk.f32.gmra.mxu0 %vm802_vm0, %v11667_v42  ;;  %9288 = vst.msk [vmem:[#allocation3 + $0x58] sm:$0xff] %vm9249_vm2, %v12767_v22 }
  0x58   : > { %11279 = vmatmul.msk.f32.gmra.mxu1 %vm802_vm0, %v11403_v41  ;;  %9289 = vst.msk [vmem:[#allocation3 + $0x70] sm:$0xff] %vm9249_vm2, %v12767_v22 }
  0x59   : > { %11543 = vmatmul.msk.f32.gmra.mxu2 %vm802_vm0, %v11407_v53  ;;  %11807 = vmatmul.msk.f32.gmra.mxu3 %vm802_vm0, %v11671_v54  ;;  %9290 = vst.msk [vmem:[#allocation3 + $0x88] sm:$0xff] %vm9249_vm2, %v12767_v22 }
  0x5a   : > { %9291 = vst.msk [vmem:[#allocation3 + $0xa0] sm:$0xff] %vm9249_vm2, %v12767_v22 }
  0x5b   : > { %9292 = vst.msk [vmem:[#allocation3 + $0xb8] sm:$0xff] %vm9249_vm2, %v12767_v22 }
  0x5c   : > { %9293 = vst.msk [vmem:[#allocation3 + $0xd0] sm:$0xff] %vm9249_vm2, %v12767_v22 }
  0x5d   : > { %9294 = vst.msk [vmem:[#allocation3 + $0xe8] sm:$0xff] %vm9249_vm2, %v12767_v22 }
  0x5e   : > { %9295 = vst.msk [vmem:[#allocation3 + $0x100] sm:$0xff] %vm9249_vm2, %v12767_v22 }
  0x5f   : > { %11152 = vmatmul.msk.f32.gmra.mxu0 %vm802_vm0, %v11668_v46  ;;  %v13207_v46 = vld [vmem:[%s12995_s16 + $0xe1] sm:$0xff]  ;;  %9296 = vst.msk [vmem:[#allocation3 + $0x118] sm:$0xff] %vm9249_vm2, %v12767_v22 }
  0x60   : > { %11280 = vmatmul.msk.f32.gmra.mxu1 %vm802_vm0, %v11404_v45  ;;  %v13204_v45 = vld [vmem:[%s12995_s16 + $0xe0] sm:$0xff]  ;;  %9297 = vst.msk [vmem:[#allocation3 + $0x130] sm:$0xff] %vm9249_vm2, %v12767_v22 }
  0x61   : > { %11544 = vmatmul.msk.f32.gmra.mxu2 %vm802_vm0, %v11408_v55  ;;  %11808 = vmatmul.msk.f32.gmra.mxu3 %vm802_vm0, %v11672_v56 }
  0x67   : > { %11153 = vmatmul.msk.f32.gmra.mxu0 %vm802_vm0, %v11669_v50 }
  0x68   : > { %11281 = vmatmul.msk.f32.gmra.mxu1 %vm802_vm0, %v11405_v49 }
  0x69   : > { %11545 = vmatmul.msk.f32.gmra.mxu2 %vm802_vm0, %v11409_v57  ;;  %11809 = vmatmul.msk.f32.gmra.mxu3 %vm802_vm0, %v11673_v58 }
  0x6f   : > { %11154 = vmatmul.msk.f32.gmra.mxu0 %vm802_vm0, %v11670_v52 }
  0x70   : > { %11282 = vmatmul.msk.f32.gmra.mxu1 %vm802_vm0, %v11406_v51 }
  0x71   : > { %11546 = vmatmul.msk.f32.gmra.mxu2 %vm802_vm0, %v11410_v59  ;;  %11810 = vmatmul.msk.f32.gmra.mxu3 %vm802_vm0, %v11674_v60 }
  0x77   : > { %11155 = vmatmul.msk.f32.gmra.mxu0 %vm802_vm0, %v11671_v54 }
  0x78   : > { %11283 = vmatmul.msk.f32.gmra.mxu1 %vm802_vm0, %v11407_v53 }
  0x79   : > { %11547 = vmatmul.msk.f32.gmra.mxu2 %vm802_vm0, %v11411_v61  ;;  %11811 = vmatmul.msk.f32.gmra.mxu3 %vm802_vm0, %v11675_v62 }
  0x7f   : > { %11156 = vmatmul.msk.f32.gmra.mxu0 %vm802_vm0, %v11672_v56  ;;  %v13234_v56 = vld [vmem:[%s12995_s16 + $0xf0] sm:$0xff] }
  0x80   : > { %11284 = vmatmul.msk.f32.gmra.mxu1 %vm802_vm0, %v11408_v55 }
  0x81   : > { %11548 = vmatmul.msk.f32.gmra.mxu2 %vm802_vm0, %v11412_v63  ;;  %11812 = vmatmul.msk.f32.gmra.mxu3 %vm802_vm0, %v11676_v0 }
  0x87   : > { %11157 = vmatmul.msk.f32.gmra.mxu0 %vm802_vm0, %v11673_v58 }
  0x88   : > { %11285 = vmatmul.msk.f32.gmra.mxu1 %vm802_vm0, %v11409_v57  ;;  %v13237_v57 = vld [vmem:[%s12995_s16 + $0xf1] sm:$0xff] }
  0x89   : > { %11549 = vmatmul.msk.f32.gmra.mxu2 %vm802_vm0, %v11413_v1  ;;  %11813 = vmatmul.msk.f32.gmra.mxu3 %vm802_vm0, %v11677_v2 }
  0x8f   : > { %11158 = vmatmul.msk.f32.gmra.mxu0 %vm802_vm0, %v11674_v60 }
  0x90   : > { %11286 = vmatmul.msk.f32.gmra.mxu1 %vm802_vm0, %v11410_v59 }
  0x91   : > { %11550 = vmatmul.msk.f32.gmra.mxu2 %vm802_vm0, %v11414_v3  ;;  %11814 = vmatmul.msk.f32.gmra.mxu3 %vm802_vm0, %v11678_v4 }
  0x97   : > { %11159 = vmatmul.msk.f32.gmra.mxu0 %vm802_vm0, %v11675_v62 }
  0x98   : > { %11287 = vmatmul.msk.f32.gmra.mxu1 %vm802_vm0, %v11411_v61 }
  0x99   : > { %11551 = vmatmul.msk.f32.gmra.mxu2 %vm802_vm0, %v11415_v5  ;;  %11815 = vmatmul.msk.f32.gmra.mxu3 %vm802_vm0, %v11679_v6 }
  0x9f   : > { %11160 = vmatmul.msk.f32.gmra.mxu0 %vm802_vm0, %v11676_v0 }
  0xa0   : > { %11288 = vmatmul.msk.f32.gmra.mxu1 %vm802_vm0, %v11412_v63 }
  0xa1   : > { %11552 = vmatmul.msk.f32.gmra.mxu2 %vm802_vm0, %v11416_v7  ;;  %11816 = vmatmul.msk.f32.gmra.mxu3 %vm802_vm0, %v11680_v8 }
  0xa7   : > { %11161 = vmatmul.msk.f32.gmra.mxu0 %vm802_vm0, %v11677_v2 }
  0xa8   : > { %11289 = vmatmul.msk.f32.gmra.mxu1 %vm802_vm0, %v11413_v1 }
  0xa9   : > { %11553 = vmatmul.msk.f32.gmra.mxu2 %vm802_vm0, %v13117_v9  ;;  %11817 = vmatmul.msk.f32.gmra.mxu3 %vm802_vm0, %v13120_v10 }
  0xac   : > { %v1204_v11 = vpop.f32.mrf.mxu0 }
  0xad   : > { %v1989_v12 = vpop.f32.mrf.mxu1 }
  0xae   : > { %v1990_v15 = vadd.f32 %v1989_v12, %v1204_v11 }
  0xaf   : > { %11162 = vmatmul.msk.f32.gmra.mxu0 %vm802_vm0, %v11678_v4  ;;  %v13267_v4 = vld [vmem:[%s12995_s16 + $0xf9] sm:$0xff] }
  0xb0   : > { %11290 = vmatmul.msk.f32.gmra.mxu1 %vm802_vm0, %v11414_v3  ;;  %v13264_v3 = vld [vmem:[%s12995_s16 + $0xf8] sm:$0xff] }
  0xb1   : > { %11554 = vmatmul.msk.f32.gmra.mxu2 %vm802_vm0, %v13129_v13  ;;  %11818 = vmatmul.msk.f32.gmra.mxu3 %vm802_vm0, %v13132_v14 }
  0xb4   : > { %v2912_v16 = vpop.f32.mrf.mxu2  ;;  %v3962_v17 = vpop.f32.mrf.mxu3 }
  0xb5   : > { %v3296_v18 = vadd.f32 %v2912_v16, %v1990_v15  ;;  %v1207_v20 = vpop.f32.mrf.mxu0  ;;  %v1992_v21 = vpop.f32.mrf.mxu1  ;;  %v13285_v15 = vld [vmem:[%s12995_s16 + $0x101] sm:$0xff] }
  0xb6   : > { %v1993_v27 = vadd.f32 %v1992_v21, %v1207_v20 }
  0xb7   : > { %v4346_v25 = vadd.f32 %v3962_v17, %v3296_v18  ;;  %11163 = vmatmul.msk.f32.gmra.mxu0 %vm802_vm0, %v11679_v6 }
  0xb8   : > { %11291 = vmatmul.msk.f32.gmra.mxu1 %vm802_vm0, %v11415_v5 }
  0xb9   : > { %v4478_v26 = vadd.f32 %v13143_v19, %v4346_v25  ;;  %11555 = vmatmul.msk.f32.gmra.mxu2 %vm802_vm0, %v13148_v23  ;;  %11819 = vmatmul.msk.f32.gmra.mxu3 %vm802_vm0, %v13151_v24 }
  0xbb   : > { %v4606_v28 = vmax.f32 %v4478_v26, 0.0 }
  0xbc   : > { %v2915_v29 = vpop.f32.mrf.mxu2  ;;  %v3965_v30 = vpop.f32.mrf.mxu3 }
  0xbd   : > { %4735 = vst.msk [vmem:[#allocation2] sm:$0xff] %vm4734_vm1, %v4606_v28  ;;  %v3297_v31 = vadd.f32 %v2915_v29, %v1993_v27  ;;  %v1210_v32 = vpop.f32.mrf.mxu0  ;;  %v1995_v33 = vpop.f32.mrf.mxu1  ;;  %v13306_v27 = vld [vmem:[%s12995_s16 + $0x108] sm:$0xff] }
  0xbe   : > { %v1996_v38 = vadd.f32 %v1995_v33, %v1210_v32  ;;  %v13309_v28 = vld [vmem:[%s12995_s16 + $0x109] sm:$0xff] }
  0xbf   : > { %v4347_v36 = vadd.f32 %v3965_v30, %v3297_v31  ;;  %11164 = vmatmul.msk.f32.gmra.mxu0 %vm802_vm0, %v11680_v8 }
  0xc0   : > { %11292 = vmatmul.msk.f32.gmra.mxu1 %vm802_vm0, %v11416_v7 }
  0xc1   : > { %v4479_v37 = vadd.f32 %v13143_v19, %v4347_v36  ;;  %11556 = vmatmul.msk.f32.gmra.mxu2 %vm802_vm0, %v13176_v34  ;;  %11820 = vmatmul.msk.f32.gmra.mxu3 %vm802_vm0, %v13179_v35 }
  0xc3   : > { %v4607_v39 = vmax.f32 %v4479_v37, 0.0 }
  0xc4   : > { %v2918_v40 = vpop.f32.mrf.mxu2  ;;  %v3968_v41 = vpop.f32.mrf.mxu3 }
  0xc5   : > { %4736 = vst.msk [vmem:[#allocation2 + $0x8] sm:$0xff] %vm4734_vm1, %v4607_v39  ;;  %v3298_v42 = vadd.f32 %v2918_v40, %v1996_v38  ;;  %v1213_v43 = vpop.f32.mrf.mxu0  ;;  %v1998_v44 = vpop.f32.mrf.mxu1  ;;  %v13334_v38 = vld [vmem:[%s12995_s16 + $0x118] sm:$0xff] }
  0xc6   : > { %v1999_v49 = vadd.f32 %v1998_v44, %v1213_v43  ;;  %v13337_v39 = vld [vmem:[%s12995_s16 + $0x119] sm:$0xff] }
  0xc7   : > { %v4348_v47 = vadd.f32 %v3968_v41, %v3298_v42  ;;  %11165 = vmatmul.msk.f32.gmra.mxu0 %vm802_vm0, %v13120_v10 }
  0xc8   : > { %11293 = vmatmul.msk.f32.gmra.mxu1 %vm802_vm0, %v13117_v9 }
  0xc9   : > { %v4480_v48 = vadd.f32 %v13143_v19, %v4348_v47  ;;  %11557 = vmatmul.msk.f32.gmra.mxu2 %vm802_vm0, %v13204_v45  ;;  %11821 = vmatmul.msk.f32.gmra.mxu3 %vm802_vm0, %v13207_v46 }
  0xcb   : > { %v4608_v50 = vmax.f32 %v4480_v48, 0.0 }
  0xcc   : > { %v2921_v51 = vpop.f32.mrf.mxu2  ;;  %v3971_v52 = vpop.f32.mrf.mxu3 }
  0xcd   : > { %4737 = vst.msk [vmem:[#allocation2 + $0x10] sm:$0xff] %vm4734_vm1, %v4608_v50  ;;  %v3299_v53 = vadd.f32 %v2921_v51, %v1999_v49  ;;  %v1216_v54 = vpop.f32.mrf.mxu0  ;;  %v2001_v55 = vpop.f32.mrf.mxu1  ;;  %v13350_v49 = vld [vmem:[%s12995_s16 + $0x120] sm:$0xff] }
  0xce   : > { %v2002_v60 = vadd.f32 %v2001_v55, %v1216_v54  ;;  %v13353_v50 = vld [vmem:[%s12995_s16 + $0x121] sm:$0xff] }
  0xcf   : > { %v4349_v58 = vadd.f32 %v3971_v52, %v3299_v53  ;;  %11166 = vmatmul.msk.f32.gmra.mxu0 %vm802_vm0, %v13132_v14  ;;  %v13282_v14 = vld [vmem:[%s12995_s16 + $0x100] sm:$0xff] }
  0xd0   : > { %11294 = vmatmul.msk.f32.gmra.mxu1 %vm802_vm0, %v13129_v13 }
  0xd1   : > { %v4481_v59 = vadd.f32 %v13143_v19, %v4349_v58  ;;  %11558 = vmatmul.msk.f32.gmra.mxu2 %vm802_vm0, %v13234_v56  ;;  %11822 = vmatmul.msk.f32.gmra.mxu3 %vm802_vm0, %v13237_v57 }
  0xd3   : > { %v4609_v61 = vmax.f32 %v4481_v59, 0.0 }
  0xd4   : > { %v2924_v62 = vpop.f32.mrf.mxu2  ;;  %v3974_v63 = vpop.f32.mrf.mxu3 }
  0xd5   : > { %4738 = vst.msk [vmem:[#allocation2 + $0x18] sm:$0xff] %vm4734_vm1, %v4609_v61  ;;  %v3300_v0 = vadd.f32 %v2924_v62, %v2002_v60  ;;  %v1219_v1 = vpop.f32.mrf.mxu0  ;;  %v2004_v2 = vpop.f32.mrf.mxu1  ;;  %v13366_v60 = vld [vmem:[%s12995_s16 + $0x128] sm:$0xff] }
  0xd6   : > { %v2005_v7 = vadd.f32 %v2004_v2, %v1219_v1  ;;  %v13369_v61 = vld [vmem:[%s12995_s16 + $0x129] sm:$0xff] }
  0xd7   : > { %v4350_v5 = vadd.f32 %v3974_v63, %v3300_v0  ;;  %11167 = vmatmul.msk.f32.gmra.mxu0 %vm802_vm0, %v13151_v24 }
  0xd8   : > { %11295 = vmatmul.msk.f32.gmra.mxu1 %vm802_vm0, %v13148_v23 }
  0xd9   : > { %v4482_v6 = vadd.f32 %v13143_v19, %v4350_v5  ;;  %11559 = vmatmul.msk.f32.gmra.mxu2 %vm802_vm0, %v13264_v3  ;;  %11823 = vmatmul.msk.f32.gmra.mxu3 %vm802_vm0, %v13267_v4 }
  0xdb   : > { %v4610_v8 = vmax.f32 %v4482_v6, 0.0 }
  0xdc   : > { %v2927_v9 = vpop.f32.mrf.mxu2  ;;  %v3977_v10 = vpop.f32.mrf.mxu3 }
  0xdd   : > { %4739 = vst.msk [vmem:[#allocation2 + $0x28] sm:$0xff] %vm4734_vm1, %v4610_v8  ;;  %v3301_v11 = vadd.f32 %v2927_v9, %v2005_v7  ;;  %v1222_v12 = vpop.f32.mrf.mxu0  ;;  %v2007_v13 = vpop.f32.mrf.mxu1  ;;  %v13382_v7 = vld [vmem:[%s12995_s16 + $0x130] sm:$0xff] }
  0xde   : > { %v2008_v18 = vadd.f32 %v2007_v13, %v1222_v12  ;;  %v13385_v8 = vld [vmem:[%s12995_s16 + $0x131] sm:$0xff] }
  0xdf   : > { %v4351_v16 = vadd.f32 %v3977_v10, %v3301_v11  ;;  %11168 = vmatmul.msk.f32.gmra.mxu0 %vm802_vm0, %v13179_v35 }
  0xe0   : > { %11296 = vmatmul.msk.f32.gmra.mxu1 %vm802_vm0, %v13176_v34 }
  0xe1   : > { %v4483_v17 = vadd.f32 %v13143_v19, %v4351_v16  ;;  %11560 = vmatmul.msk.f32.gmra.mxu2 %vm802_vm0, %v13282_v14  ;;  %11824 = vmatmul.msk.f32.gmra.mxu3 %vm802_vm0, %v13285_v15 }
  0xe3   : > { %v4611_v20 = vmax.f32 %v4483_v17, 0.0 }
  0xe4   : > { %v2930_v21 = vpop.f32.mrf.mxu2  ;;  %v3980_v23 = vpop.f32.mrf.mxu3 }
  0xe5   : > { %4740 = vst.msk [vmem:[#allocation2 + $0x30] sm:$0xff] %vm4734_vm1, %v4611_v20  ;;  %v3302_v24 = vadd.f32 %v2930_v21, %v2008_v18  ;;  %v1225_v25 = vpop.f32.mrf.mxu0  ;;  %v2010_v26 = vpop.f32.mrf.mxu1  ;;  %v13398_v18 = vld [vmem:[%s12995_s16 + $0x140] sm:$0xff] }
  0xe6   : > { %v2011_v31 = vadd.f32 %v2010_v26, %v1225_v25  ;;  %v13401_v20 = vld [vmem:[%s12995_s16 + $0x141] sm:$0xff] }
  0xe7   : > { %v4352_v29 = vadd.f32 %v3980_v23, %v3302_v24  ;;  %11169 = vmatmul.msk.f32.gmra.mxu0 %vm802_vm0, %v13207_v46 }
  0xe8   : > { %11297 = vmatmul.msk.f32.gmra.mxu1 %vm802_vm0, %v13204_v45 }
  0xe9   : > { %v4484_v30 = vadd.f32 %v13143_v19, %v4352_v29  ;;  %11561 = vmatmul.msk.f32.gmra.mxu2 %vm802_vm0, %v13306_v27  ;;  %11825 = vmatmul.msk.f32.gmra.mxu3 %vm802_vm0, %v13309_v28 }
  0xeb   : > { %v4612_v32 = vmax.f32 %v4484_v30, 0.0 }
  0xec   : > { %v2933_v33 = vpop.f32.mrf.mxu2  ;;  %v3983_v34 = vpop.f32.mrf.mxu3 }
  0xed   : > { %4741 = vst.msk [vmem:[#allocation2 + $0x38] sm:$0xff] %vm4734_vm1, %v4612_v32  ;;  %v3303_v35 = vadd.f32 %v2933_v33, %v2011_v31  ;;  %v1228_v36 = vpop.f32.mrf.mxu0  ;;  %v2013_v37 = vpop.f32.mrf.mxu1  ;;  %v13414_v31 = vld [vmem:[%s12995_s16 + $0x148] sm:$0xff] }
  0xee   : > { %v2014_v42 = vadd.f32 %v2013_v37, %v1228_v36  ;;  %v13417_v32 = vld [vmem:[%s12995_s16 + $0x149] sm:$0xff] }
  0xef   : > { %v4353_v40 = vadd.f32 %v3983_v34, %v3303_v35  ;;  %11170 = vmatmul.msk.f32.gmra.mxu0 %vm802_vm0, %v13237_v57 }
  0xf0   : > { %11298 = vmatmul.msk.f32.gmra.mxu1 %vm802_vm0, %v13234_v56 }
  0xf1   : > { %v4485_v41 = vadd.f32 %v13143_v19, %v4353_v40  ;;  %11562 = vmatmul.msk.f32.gmra.mxu2 %vm802_vm0, %v13334_v38  ;;  %11826 = vmatmul.msk.f32.gmra.mxu3 %vm802_vm0, %v13337_v39 }
  0xf3   : > { %v4613_v43 = vmax.f32 %v4485_v41, 0.0 }
  0xf4   : > { %v2936_v44 = vpop.f32.mrf.mxu2  ;;  %v3986_v45 = vpop.f32.mrf.mxu3 }
  0xf5   : > { %4742 = vst.msk [vmem:[#allocation2 + $0x40] sm:$0xff] %vm4734_vm1, %v4613_v43  ;;  %v3304_v46 = vadd.f32 %v2936_v44, %v2014_v42  ;;  %v1231_v47 = vpop.f32.mrf.mxu0  ;;  %v2016_v48 = vpop.f32.mrf.mxu1  ;;  %v13430_v42 = vld [vmem:[%s12995_s16 + $0x150] sm:$0xff] }
  0xf6   : > { %v2017_v53 = vadd.f32 %v2016_v48, %v1231_v47  ;;  %v13433_v43 = vld [vmem:[%s12995_s16 + $0x151] sm:$0xff] }
  0xf7   : > { %v4354_v51 = vadd.f32 %v3986_v45, %v3304_v46  ;;  %11171 = vmatmul.msk.f32.gmra.mxu0 %vm802_vm0, %v13267_v4 }
  0xf8   : > { %11299 = vmatmul.msk.f32.gmra.mxu1 %vm802_vm0, %v13264_v3 }
  0xf9   : > { %v4486_v52 = vadd.f32 %v13143_v19, %v4354_v51  ;;  %11563 = vmatmul.msk.f32.gmra.mxu2 %vm802_vm0, %v13350_v49  ;;  %11827 = vmatmul.msk.f32.gmra.mxu3 %vm802_vm0, %v13353_v50 }
  0xfb   : > { %v4614_v54 = vmax.f32 %v4486_v52, 0.0 }
  0xfc   : > { %v2939_v55 = vpop.f32.mrf.mxu2  ;;  %v3989_v56 = vpop.f32.mrf.mxu3 }
  0xfd   : > { %4743 = vst.msk [vmem:[#allocation2 + $0x50] sm:$0xff] %vm4734_vm1, %v4614_v54  ;;  %v3305_v57 = vadd.f32 %v2939_v55, %v2017_v53  ;;  %v1234_v58 = vpop.f32.mrf.mxu0  ;;  %v2019_v59 = vpop.f32.mrf.mxu1  ;;  %v13446_v53 = vld [vmem:[%s12995_s16 + $0x158] sm:$0xff] }
  0xfe   : > { %v2020_v0 = vadd.f32 %v2019_v59, %v1234_v58  ;;  %v13449_v54 = vld [vmem:[%s12995_s16 + $0x159] sm:$0xff] }
  0xff   : > { %v4355_v62 = vadd.f32 %v3989_v56, %v3305_v57  ;;  %11172 = vmatmul.msk.f32.gmra.mxu0 %vm802_vm0, %v13285_v15 }
 0x100   : > { %11300 = vmatmul.msk.f32.gmra.mxu1 %vm802_vm0, %v13282_v14 }
 0x101   : > { %v4487_v63 = vadd.f32 %v13143_v19, %v4355_v62  ;;  %11564 = vmatmul.msk.f32.gmra.mxu2 %vm802_vm0, %v13366_v60  ;;  %11828 = vmatmul.msk.f32.gmra.mxu3 %vm802_vm0, %v13369_v61 }
 0x103   : > { %v4615_v1 = vmax.f32 %v4487_v63, 0.0 }
 0x104   : > { %v2942_v2 = vpop.f32.mrf.mxu2  ;;  %v3992_v3 = vpop.f32.mrf.mxu3 }
 0x105   : > { %4744 = vst.msk [vmem:[#allocation2 + $0x58] sm:$0xff] %vm4734_vm1, %v4615_v1  ;;  %v3306_v4 = vadd.f32 %v2942_v2, %v2020_v0  ;;  %v1237_v5 = vpop.f32.mrf.mxu0  ;;  %v2022_v6 = vpop.f32.mrf.mxu1  ;;  %v13462_v0 = vld [vmem:[%s12995_s16 + $0x168] sm:$0xff] }
 0x106   : > { %v2023_v11 = vadd.f32 %v2022_v6, %v1237_v5  ;;  %v13465_v1 = vld [vmem:[%s12995_s16 + $0x169] sm:$0xff] }
 0x107   : > { %v4356_v9 = vadd.f32 %v3992_v3, %v3306_v4  ;;  %11173 = vmatmul.msk.f32.gmra.mxu0 %vm802_vm0, %v13309_v28 }
 0x108   : > { %11301 = vmatmul.msk.f32.gmra.mxu1 %vm802_vm0, %v13306_v27 }
 0x109   : > { %v4488_v10 = vadd.f32 %v13143_v19, %v4356_v9  ;;  %11565 = vmatmul.msk.f32.gmra.mxu2 %vm802_vm0, %v13382_v7  ;;  %11829 = vmatmul.msk.f32.gmra.mxu3 %vm802_vm0, %v13385_v8 }
 0x10b   : > { %v4616_v12 = vmax.f32 %v4488_v10, 0.0 }
 0x10c   : > { %v2945_v13 = vpop.f32.mrf.mxu2  ;;  %v3995_v14 = vpop.f32.mrf.mxu3 }
 0x10d   : > { %4745 = vst.msk [vmem:[#allocation2 + $0x60] sm:$0xff] %vm4734_vm1, %v4616_v12  ;;  %v3307_v15 = vadd.f32 %v2945_v13, %v2023_v11  ;;  %v1240_v16 = vpop.f32.mrf.mxu0  ;;  %v2025_v17 = vpop.f32.mrf.mxu1  ;;  %v13478_v11 = vld [vmem:[%s12995_s16 + $0x170] sm:$0xff] }
 0x10e   : > { %v2026_v24 = vadd.f32 %v2025_v17, %v1240_v16  ;;  %v13481_v12 = vld [vmem:[%s12995_s16 + $0x171] sm:$0xff] }
 0x10f   : > { %v4357_v21 = vadd.f32 %v3995_v14, %v3307_v15  ;;  %11174 = vmatmul.msk.f32.gmra.mxu0 %vm802_vm0, %v13337_v39 }
 0x110   : > { %11302 = vmatmul.msk.f32.gmra.mxu1 %vm802_vm0, %v13334_v38 }
 0x111   : > { %v4489_v23 = vadd.f32 %v13143_v19, %v4357_v21  ;;  %11566 = vmatmul.msk.f32.gmra.mxu2 %vm802_vm0, %v13398_v18  ;;  %11830 = vmatmul.msk.f32.gmra.mxu3 %vm802_vm0, %v13401_v20 }
 0x113   : > { %v4617_v25 = vmax.f32 %v4489_v23, 0.0 }
 0x114   : > { %v2948_v26 = vpop.f32.mrf.mxu2  ;;  %v3998_v27 = vpop.f32.mrf.mxu3 }
 0x115   : > { %4746 = vst.msk [vmem:[#allocation2 + $0x68] sm:$0xff] %vm4734_vm1, %v4617_v25  ;;  %v3308_v28 = vadd.f32 %v2948_v26, %v2026_v24  ;;  %v1243_v29 = vpop.f32.mrf.mxu0  ;;  %v2028_v30 = vpop.f32.mrf.mxu1  ;;  %v13494_v24 = vld [vmem:[%s12995_s16 + $0x178] sm:$0xff] }
 0x116   : > { %v2029_v35 = vadd.f32 %v2028_v30, %v1243_v29  ;;  %v13497_v25 = vld [vmem:[%s12995_s16 + $0x179] sm:$0xff] }
 0x117   : > { %v4358_v33 = vadd.f32 %v3998_v27, %v3308_v28  ;;  %11175 = vmatmul.msk.f32.gmra.mxu0 %vm802_vm0, %v13353_v50 }
 0x118   : > { %11303 = vmatmul.msk.f32.gmra.mxu1 %vm802_vm0, %v13350_v49 }
 0x119   : > { %v4490_v34 = vadd.f32 %v13143_v19, %v4358_v33  ;;  %11567 = vmatmul.msk.f32.gmra.mxu2 %vm802_vm0, %v13414_v31  ;;  %11831 = vmatmul.msk.f32.gmra.mxu3 %vm802_vm0, %v13417_v32 }
 0x11b   : > { %v4618_v36 = vmax.f32 %v4490_v34, 0.0 }
 0x11c   : > { %v2951_v37 = vpop.f32.mrf.mxu2  ;;  %v4001_v38 = vpop.f32.mrf.mxu3 }
 0x11d   : > { %4747 = vst.msk [vmem:[#allocation2 + $0x78] sm:$0xff] %vm4734_vm1, %v4618_v36  ;;  %v3309_v39 = vadd.f32 %v2951_v37, %v2029_v35  ;;  %v1246_v40 = vpop.f32.mrf.mxu0  ;;  %v2031_v41 = vpop.f32.mrf.mxu1  ;;  %v13510_v35 = vld [vmem:[%s12995_s16 + $0x180] sm:$0xff] }
 0x11e   : > { %v2032_v46 = vadd.f32 %v2031_v41, %v1246_v40  ;;  %v13513_v36 = vld [vmem:[%s12995_s16 + $0x181] sm:$0xff] }
 0x11f   : > { %v4359_v44 = vadd.f32 %v4001_v38, %v3309_v39  ;;  %11176 = vmatmul.msk.f32.gmra.mxu0 %vm802_vm0, %v13369_v61 }
 0x120   : > { %11304 = vmatmul.msk.f32.gmra.mxu1 %vm802_vm0, %v13366_v60 }
 0x121   : > { %v4491_v45 = vadd.f32 %v13143_v19, %v4359_v44  ;;  %11568 = vmatmul.msk.f32.gmra.mxu2 %vm802_vm0, %v13430_v42  ;;  %11832 = vmatmul.msk.f32.gmra.mxu3 %vm802_vm0, %v13433_v43 }
 0x123   : > { %v4619_v47 = vmax.f32 %v4491_v45, 0.0 }
 0x124   : > { %v2954_v48 = vpop.f32.mrf.mxu2  ;;  %v4004_v49 = vpop.f32.mrf.mxu3 }
 0x125   : > { %4748 = vst.msk [vmem:[#allocation2 + $0x80] sm:$0xff] %vm4734_vm1, %v4619_v47  ;;  %v3310_v50 = vadd.f32 %v2954_v48, %v2032_v46  ;;  %v1249_v51 = vpop.f32.mrf.mxu0  ;;  %v2034_v52 = vpop.f32.mrf.mxu1  ;;  %v13526_v46 = vld [vmem:[%s12995_s16 + $0x190] sm:$0xff] }
 0x126   : > { %v2035_v57 = vadd.f32 %v2034_v52, %v1249_v51  ;;  %v13529_v47 = vld [vmem:[%s12995_s16 + $0x191] sm:$0xff] }
 0x127   : > { %v4360_v55 = vadd.f32 %v4004_v49, %v3310_v50  ;;  %11177 = vmatmul.msk.f32.gmra.mxu0 %vm802_vm0, %v13385_v8 }
 0x128   : > { %11305 = vmatmul.msk.f32.gmra.mxu1 %vm802_vm0, %v13382_v7 }
 0x129   : > { %v4492_v56 = vadd.f32 %v13143_v19, %v4360_v55  ;;  %11569 = vmatmul.msk.f32.gmra.mxu2 %vm802_vm0, %v13446_v53  ;;  %11833 = vmatmul.msk.f32.gmra.mxu3 %vm802_vm0, %v13449_v54 }
 0x12b   : > { %v4620_v58 = vmax.f32 %v4492_v56, 0.0 }
 0x12c   : > { %v2957_v59 = vpop.f32.mrf.mxu2  ;;  %v4007_v60 = vpop.f32.mrf.mxu3 }
 0x12d   : > { %4749 = vst.msk [vmem:[#allocation2 + $0x88] sm:$0xff] %vm4734_vm1, %v4620_v58  ;;  %v3311_v61 = vadd.f32 %v2957_v59, %v2035_v57  ;;  %v1252_v62 = vpop.f32.mrf.mxu0  ;;  %v2037_v63 = vpop.f32.mrf.mxu1  ;;  %v13542_v57 = vld [vmem:[%s12995_s16 + $0x198] sm:$0xff] }
 0x12e   : > { %v2038_v4 = vadd.f32 %v2037_v63, %v1252_v62  ;;  %v13545_v58 = vld [vmem:[%s12995_s16 + $0x199] sm:$0xff] }
 0x12f   : > { %v4361_v2 = vadd.f32 %v4007_v60, %v3311_v61  ;;  %11178 = vmatmul.msk.f32.gmra.mxu0 %vm802_vm0, %v13401_v20 }
 0x130   : > { %11306 = vmatmul.msk.f32.gmra.mxu1 %vm802_vm0, %v13398_v18 }
 0x131   : > { %v4493_v3 = vadd.f32 %v13143_v19, %v4361_v2  ;;  %11570 = vmatmul.msk.f32.gmra.mxu2 %vm802_vm0, %v13462_v0  ;;  %11834 = vmatmul.msk.f32.gmra.mxu3 %vm802_vm0, %v13465_v1 }
 0x133   : > { %v4621_v5 = vmax.f32 %v4493_v3, 0.0 }
 0x134   : > { %v2960_v6 = vpop.f32.mrf.mxu2  ;;  %v4010_v7 = vpop.f32.mrf.mxu3 }
 0x135   : > { %4750 = vst.msk [vmem:[#allocation2 + $0x90] sm:$0xff] %vm4734_vm1, %v4621_v5  ;;  %v3312_v8 = vadd.f32 %v2960_v6, %v2038_v4  ;;  %v1255_v9 = vpop.f32.mrf.mxu0  ;;  %v2040_v10 = vpop.f32.mrf.mxu1  ;;  %v13558_v4 = vld [vmem:[%s12995_s16 + $0x1a0] sm:$0xff] }
 0x136   : > { %v2041_v15 = vadd.f32 %v2040_v10, %v1255_v9  ;;  %v13561_v5 = vld [vmem:[%s12995_s16 + $0x1a1] sm:$0xff] }
 0x137   : > { %v4362_v13 = vadd.f32 %v4010_v7, %v3312_v8  ;;  %11179 = vmatmul.msk.f32.gmra.mxu0 %vm802_vm0, %v13417_v32 }
 0x138   : > { %11307 = vmatmul.msk.f32.gmra.mxu1 %vm802_vm0, %v13414_v31 }
 0x139   : > { %v4494_v14 = vadd.f32 %v13143_v19, %v4362_v13  ;;  %11571 = vmatmul.msk.f32.gmra.mxu2 %vm802_vm0, %v13478_v11  ;;  %11835 = vmatmul.msk.f32.gmra.mxu3 %vm802_vm0, %v13481_v12 }
 0x13b   : > { %v4622_v16 = vmax.f32 %v4494_v14, 0.0 }
 0x13c   : > { %v2963_v17 = vpop.f32.mrf.mxu2  ;;  %v4013_v18 = vpop.f32.mrf.mxu3 }
 0x13d   : > { %4751 = vst.msk [vmem:[#allocation2 + $0xa0] sm:$0xff] %vm4734_vm1, %v4622_v16  ;;  %v3313_v20 = vadd.f32 %v2963_v17, %v2041_v15  ;;  %v1258_v21 = vpop.f32.mrf.mxu0  ;;  %v2043_v23 = vpop.f32.mrf.mxu1  ;;  %v13574_v15 = vld [vmem:[%s12995_s16 + $0x1a8] sm:$0xff] }
 0x13e   : > { %v2044_v28 = vadd.f32 %v2043_v23, %v1258_v21  ;;  %v13577_v16 = vld [vmem:[%s12995_s16 + $0x1a9] sm:$0xff] }
 0x13f   : > { %v4363_v26 = vadd.f32 %v4013_v18, %v3313_v20  ;;  %11180 = vmatmul.msk.f32.gmra.mxu0 %vm802_vm0, %v13433_v43 }
 0x140   : > { %11308 = vmatmul.msk.f32.gmra.mxu1 %vm802_vm0, %v13430_v42 }
 0x141   : > { %v4495_v27 = vadd.f32 %v13143_v19, %v4363_v26  ;;  %11572 = vmatmul.msk.f32.gmra.mxu2 %vm802_vm0, %v13494_v24  ;;  %11836 = vmatmul.msk.f32.gmra.mxu3 %vm802_vm0, %v13497_v25 }
 0x143   : > { %v4623_v29 = vmax.f32 %v4495_v27, 0.0 }
 0x144   : > { %v2966_v30 = vpop.f32.mrf.mxu2  ;;  %v4016_v31 = vpop.f32.mrf.mxu3 }
 0x145   : > { %4752 = vst.msk [vmem:[#allocation2 + $0xa8] sm:$0xff] %vm4734_vm1, %v4623_v29  ;;  %v3314_v32 = vadd.f32 %v2966_v30, %v2044_v28  ;;  %v1261_v33 = vpop.f32.mrf.mxu0  ;;  %v2046_v34 = vpop.f32.mrf.mxu1  ;;  %v13590_v28 = vld [vmem:[%s12995_s16 + $0x1b8] sm:$0xff] }
 0x146   : > { %v2047_v39 = vadd.f32 %v2046_v34, %v1261_v33  ;;  %v13593_v29 = vld [vmem:[%s12995_s16 + $0x1b9] sm:$0xff] }
 0x147   : > { %v4364_v37 = vadd.f32 %v4016_v31, %v3314_v32  ;;  %11181 = vmatmul.msk.f32.gmra.mxu0 %vm802_vm0, %v13449_v54 }
 0x148   : > { %11309 = vmatmul.msk.f32.gmra.mxu1 %vm802_vm0, %v13446_v53 }
 0x149   : > { %v4496_v38 = vadd.f32 %v13143_v19, %v4364_v37  ;;  %11573 = vmatmul.msk.f32.gmra.mxu2 %vm802_vm0, %v13510_v35  ;;  %11837 = vmatmul.msk.f32.gmra.mxu3 %vm802_vm0, %v13513_v36 }
 0x14b   : > { %v4624_v40 = vmax.f32 %v4496_v38, 0.0 }
 0x14c   : > { %v2969_v41 = vpop.f32.mrf.mxu2  ;;  %v4019_v42 = vpop.f32.mrf.mxu3 }
 0x14d   : > { %4753 = vst.msk [vmem:[#allocation2 + $0xb0] sm:$0xff] %vm4734_vm1, %v4624_v40  ;;  %v3315_v43 = vadd.f32 %v2969_v41, %v2047_v39  ;;  %v1264_v44 = vpop.f32.mrf.mxu0  ;;  %v2049_v45 = vpop.f32.mrf.mxu1  ;;  %v13606_v39 = vld [vmem:[%s12995_s16 + $0x1c0] sm:$0xff] }
 0x14e   : > { %v2050_v50 = vadd.f32 %v2049_v45, %v1264_v44  ;;  %v13609_v40 = vld [vmem:[%s12995_s16 + $0x1c1] sm:$0xff] }
 0x14f   : > { %v4365_v48 = vadd.f32 %v4019_v42, %v3315_v43  ;;  %11182 = vmatmul.msk.f32.gmra.mxu0 %vm802_vm0, %v13465_v1 }
 0x150   : > { %11310 = vmatmul.msk.f32.gmra.mxu1 %vm802_vm0, %v13462_v0 }
 0x151   : > { %v4497_v49 = vadd.f32 %v13143_v19, %v4365_v48  ;;  %11574 = vmatmul.msk.f32.gmra.mxu2 %vm802_vm0, %v13526_v46  ;;  %11838 = vmatmul.msk.f32.gmra.mxu3 %vm802_vm0, %v13529_v47 }
 0x153   : > { %v4625_v51 = vmax.f32 %v4497_v49, 0.0 }
 0x154   : > { %v2972_v52 = vpop.f32.mrf.mxu2  ;;  %v4022_v53 = vpop.f32.mrf.mxu3 }
 0x155   : > { %4754 = vst.msk [vmem:[#allocation2 + $0xb8] sm:$0xff] %vm4734_vm1, %v4625_v51  ;;  %v3316_v54 = vadd.f32 %v2972_v52, %v2050_v50  ;;  %v1267_v55 = vpop.f32.mrf.mxu0  ;;  %v2052_v56 = vpop.f32.mrf.mxu1  ;;  %v13622_v50 = vld [vmem:[%s12995_s16 + $0x1c8] sm:$0xff] }
 0x156   : > { %v2053_v61 = vadd.f32 %v2052_v56, %v1267_v55  ;;  %v13625_v51 = vld [vmem:[%s12995_s16 + $0x1c9] sm:$0xff] }
 0x157   : > { %v4366_v59 = vadd.f32 %v4022_v53, %v3316_v54  ;;  %11183 = vmatmul.msk.f32.gmra.mxu0 %vm802_vm0, %v13481_v12 }
 0x158   : > { %11311 = vmatmul.msk.f32.gmra.mxu1 %vm802_vm0, %v13478_v11 }
 0x159   : > { %v4498_v60 = vadd.f32 %v13143_v19, %v4366_v59  ;;  %11575 = vmatmul.msk.f32.gmra.mxu2 %vm802_vm0, %v13542_v57  ;;  %11839 = vmatmul.msk.f32.gmra.mxu3 %vm802_vm0, %v13545_v58 }
 0x15b   : > { %v4626_v62 = vmax.f32 %v4498_v60, 0.0 }
 0x15c   : > { %v2975_v63 = vpop.f32.mrf.mxu2  ;;  %v4025_v0 = vpop.f32.mrf.mxu3 }
 0x15d   : > { %4755 = vst.msk [vmem:[#allocation2 + $0xc8] sm:$0xff] %vm4734_vm1, %v4626_v62  ;;  %v3317_v1 = vadd.f32 %v2975_v63, %v2053_v61  ;;  %v1270_v2 = vpop.f32.mrf.mxu0  ;;  %v2055_v3 = vpop.f32.mrf.mxu1  ;;  %v13638_v61 = vld [vmem:[%s12995_s16 + $0x1d0] sm:$0xff] }
 0x15e   : > { %v2056_v8 = vadd.f32 %v2055_v3, %v1270_v2  ;;  %v13641_v62 = vld [vmem:[%s12995_s16 + $0x1d1] sm:$0xff] }
 0x15f   : > { %v4367_v6 = vadd.f32 %v4025_v0, %v3317_v1  ;;  %11184 = vmatmul.msk.f32.gmra.mxu0 %vm802_vm0, %v13497_v25 }
 0x160   : > { %11312 = vmatmul.msk.f32.gmra.mxu1 %vm802_vm0, %v13494_v24 }
 0x161   : > { %v4499_v7 = vadd.f32 %v13143_v19, %v4367_v6  ;;  %11576 = vmatmul.msk.f32.gmra.mxu2 %vm802_vm0, %v13558_v4  ;;  %11840 = vmatmul.msk.f32.gmra.mxu3 %vm802_vm0, %v13561_v5 }
 0x163   : > { %v4627_v9 = vmax.f32 %v4499_v7, 0.0 }
 0x164   : > { %v2978_v10 = vpop.f32.mrf.mxu2  ;;  %v4028_v11 = vpop.f32.mrf.mxu3 }
 0x165   : > { %4756 = vst.msk [vmem:[#allocation2 + $0xd0] sm:$0xff] %vm4734_vm1, %v4627_v9  ;;  %v3318_v12 = vadd.f32 %v2978_v10, %v2056_v8  ;;  %v1273_v13 = vpop.f32.mrf.mxu0  ;;  %v2058_v14 = vpop.f32.mrf.mxu1  ;;  %v13654_v8 = vld [vmem:[%s12995_s16 + $0x1e0] sm:$0xff] }
 0x166   : > { %v2059_v20 = vadd.f32 %v2058_v14, %v1273_v13  ;;  %v13657_v9 = vld [vmem:[%s12995_s16 + $0x1e1] sm:$0xff] }
 0x167   : > { %v4368_v17 = vadd.f32 %v4028_v11, %v3318_v12  ;;  %11185 = vmatmul.msk.f32.gmra.mxu0 %vm802_vm0, %v13513_v36 }
 0x168   : > { %11313 = vmatmul.msk.f32.gmra.mxu1 %vm802_vm0, %v13510_v35 }
 0x169   : > { %v4500_v18 = vadd.f32 %v13143_v19, %v4368_v17  ;;  %11577 = vmatmul.msk.f32.gmra.mxu2 %vm802_vm0, %v13574_v15  ;;  %11841 = vmatmul.msk.f32.gmra.mxu3 %vm802_vm0, %v13577_v16 }
 0x16b   : > { %v4628_v21 = vmax.f32 %v4500_v18, 0.0 }
 0x16c   : > { %v2981_v23 = vpop.f32.mrf.mxu2  ;;  %v4031_v24 = vpop.f32.mrf.mxu3 }
 0x16d   : > { %4757 = vst.msk [vmem:[#allocation2 + $0xd8] sm:$0xff] %vm4734_vm1, %v4628_v21  ;;  %v3319_v25 = vadd.f32 %v2981_v23, %v2059_v20  ;;  %v1276_v26 = vpop.f32.mrf.mxu0  ;;  %v2061_v27 = vpop.f32.mrf.mxu1  ;;  %v13670_v20 = vld [vmem:[%s12995_s16 + $0x1e8] sm:$0xff] }
 0x16e   : > { %v2062_v32 = vadd.f32 %v2061_v27, %v1276_v26  ;;  %v13673_v21 = vld [vmem:[%s12995_s16 + $0x1e9] sm:$0xff] }
 0x16f   : > { %v4369_v30 = vadd.f32 %v4031_v24, %v3319_v25  ;;  %11186 = vmatmul.msk.f32.gmra.mxu0 %vm802_vm0, %v13529_v47 }
 0x170   : > { %11314 = vmatmul.msk.f32.gmra.mxu1 %vm802_vm0, %v13526_v46 }
 0x171   : > { %v4501_v31 = vadd.f32 %v13143_v19, %v4369_v30  ;;  %11578 = vmatmul.msk.f32.gmra.mxu2 %vm802_vm0, %v13590_v28  ;;  %11842 = vmatmul.msk.f32.gmra.mxu3 %vm802_vm0, %v13593_v29 }
 0x173   : > { %v4629_v33 = vmax.f32 %v4501_v31, 0.0 }
 0x174   : > { %v2984_v34 = vpop.f32.mrf.mxu2  ;;  %v4034_v35 = vpop.f32.mrf.mxu3 }
 0x175   : > { %4758 = vst.msk [vmem:[#allocation2 + $0xe0] sm:$0xff] %vm4734_vm1, %v4629_v33  ;;  %v3320_v36 = vadd.f32 %v2984_v34, %v2062_v32  ;;  %v1279_v37 = vpop.f32.mrf.mxu0  ;;  %v2064_v38 = vpop.f32.mrf.mxu1  ;;  %v13686_v32 = vld [vmem:[%s12995_s16 + $0x1f0] sm:$0xff]  ;;  %v13698_v34 = vld [vmem:[%s16577_s2] ss:$0 sm:$0xff] }
 0x176   : > { %v2065_v43 = vadd.f32 %v2064_v38, %v1279_v37  ;;  %v13689_v33 = vld [vmem:[%s12995_s16 + $0x1f1] sm:$0xff] }
 0x177   : > { %v4370_v41 = vadd.f32 %v4034_v35, %v3320_v36  ;;  %11187 = vmatmul.msk.f32.gmra.mxu0 %vm802_vm0, %v13545_v58 }
 0x178   : > { %11315 = vmatmul.msk.f32.gmra.mxu1 %vm802_vm0, %v13542_v57 }
 0x179   : > { %v4502_v42 = vadd.f32 %v13143_v19, %v4370_v41  ;;  %11579 = vmatmul.msk.f32.gmra.mxu2 %vm802_vm0, %v13606_v39  ;;  %11843 = vmatmul.msk.f32.gmra.mxu3 %vm802_vm0, %v13609_v40 }
 0x17b   : > { %v4630_v44 = vmax.f32 %v4502_v42, 0.0 }
 0x17c   : > { %v2987_v45 = vpop.f32.mrf.mxu2  ;;  %v4037_v46 = vpop.f32.mrf.mxu3 }
 0x17d   : > { %4759 = vst.msk [vmem:[#allocation2 + $0xf0] sm:$0xff] %vm4734_vm1, %v4630_v44  ;;  %v3321_v47 = vadd.f32 %v2987_v45, %v2065_v43  ;;  %v1282_v48 = vpop.f32.mrf.mxu0  ;;  %v2067_v49 = vpop.f32.mrf.mxu1  ;;  %v13707_v43 = vld [vmem:[%s12995_s16 + $0x1f8] sm:$0xff] }
 0x17e   : > { %v2068_v54 = vadd.f32 %v2067_v49, %v1282_v48  ;;  %v13710_v44 = vld [vmem:[%s12995_s16 + $0x1f9] sm:$0xff] }
 0x17f   : > { %v4371_v52 = vadd.f32 %v4037_v46, %v3321_v47  ;;  %11188 = vmatmul.msk.f32.gmra.mxu0 %vm802_vm0, %v13561_v5 }
 0x180   : > { %11316 = vmatmul.msk.f32.gmra.mxu1 %vm802_vm0, %v13558_v4 }
 0x181   : > { %v4503_v53 = vadd.f32 %v13143_v19, %v4371_v52  ;;  %11580 = vmatmul.msk.f32.gmra.mxu2 %vm802_vm0, %v13622_v50  ;;  %11844 = vmatmul.msk.f32.gmra.mxu3 %vm802_vm0, %v13625_v51 }
 0x183   : > { %v4631_v55 = vmax.f32 %v4503_v53, 0.0 }
 0x184   : > { %v2990_v56 = vpop.f32.mrf.mxu2  ;;  %v4040_v57 = vpop.f32.mrf.mxu3 }
 0x185   : > { %4760 = vst.msk [vmem:[#allocation2 + $0xf8] sm:$0xff] %vm4734_vm1, %v4631_v55  ;;  %v3322_v58 = vadd.f32 %v2990_v56, %v2068_v54  ;;  %v1285_v59 = vpop.f32.mrf.mxu0  ;;  %v2070_v60 = vpop.f32.mrf.mxu1  ;;  %v13723_v54 = vld [vmem:[%s12995_s16 + $0x208] sm:$0xff] }
 0x186   : > { %v2071_v1 = vadd.f32 %v2070_v60, %v1285_v59  ;;  %v13726_v55 = vld [vmem:[%s12995_s16 + $0x209] sm:$0xff] }
 0x187   : > { %v4372_v63 = vadd.f32 %v4040_v57, %v3322_v58  ;;  %11189 = vmatmul.msk.f32.gmra.mxu0 %vm802_vm0, %v13577_v16 }
 0x188   : > { %11317 = vmatmul.msk.f32.gmra.mxu1 %vm802_vm0, %v13574_v15 }
 0x189   : > { %v4504_v0 = vadd.f32 %v13143_v19, %v4372_v63  ;;  %11581 = vmatmul.msk.f32.gmra.mxu2 %vm802_vm0, %v13638_v61  ;;  %11845 = vmatmul.msk.f32.gmra.mxu3 %vm802_vm0, %v13641_v62 }
 0x18b   : > { %v4632_v2 = vmax.f32 %v4504_v0, 0.0 }
 0x18c   : > { %v2993_v3 = vpop.f32.mrf.mxu2  ;;  %v4043_v4 = vpop.f32.mrf.mxu3 }
 0x18d   : > { %4761 = vst.msk [vmem:[#allocation2 + $0x100] sm:$0xff] %vm4734_vm1, %v4632_v2  ;;  %v3323_v5 = vadd.f32 %v2993_v3, %v2071_v1  ;;  %v1288_v6 = vpop.f32.mrf.mxu0  ;;  %v2073_v7 = vpop.f32.mrf.mxu1  ;;  %v13739_v1 = vld [vmem:[%s12995_s16 + $0x210] sm:$0xff] }
 0x18e   : > { %v2074_v12 = vadd.f32 %v2073_v7, %v1288_v6  ;;  %v13742_v2 = vld [vmem:[%s12995_s16 + $0x211] sm:$0xff] }
 0x18f   : > { %v4373_v10 = vadd.f32 %v4043_v4, %v3323_v5  ;;  %11190 = vmatmul.msk.f32.gmra.mxu0 %vm802_vm0, %v13593_v29 }
 0x190   : > { %11318 = vmatmul.msk.f32.gmra.mxu1 %vm802_vm0, %v13590_v28 }
 0x191   : > { %v4505_v11 = vadd.f32 %v13143_v19, %v4373_v10  ;;  %11582 = vmatmul.msk.f32.gmra.mxu2 %vm802_vm0, %v13654_v8  ;;  %11846 = vmatmul.msk.f32.gmra.mxu3 %vm802_vm0, %v13657_v9 }
 0x193   : > { %v4633_v13 = vmax.f32 %v4505_v11, 0.0 }
 0x194   : > { %v2996_v14 = vpop.f32.mrf.mxu2  ;;  %v4046_v15 = vpop.f32.mrf.mxu3 }
 0x195   : > { %4762 = vst.msk [vmem:[#allocation2 + $0x108] sm:$0xff] %vm4734_vm1, %v4633_v13  ;;  %v3324_v16 = vadd.f32 %v2996_v14, %v2074_v12  ;;  %v1291_v17 = vpop.f32.mrf.mxu0  ;;  %v2076_v18 = vpop.f32.mrf.mxu1  ;;  %v13755_v12 = vld [vmem:[%s12995_s16 + $0x218] sm:$0xff] }
 0x196   : > { %v2077_v25 = vadd.f32 %v2076_v18, %v1291_v17  ;;  %v13758_v13 = vld [vmem:[%s12995_s16 + $0x219] sm:$0xff] }
 0x197   : > { %v4374_v23 = vadd.f32 %v4046_v15, %v3324_v16  ;;  %11191 = vmatmul.msk.f32.gmra.mxu0 %vm802_vm0, %v13609_v40 }
 0x198   : > { %11319 = vmatmul.msk.f32.gmra.mxu1 %vm802_vm0, %v13606_v39 }
 0x199   : > { %v4506_v24 = vadd.f32 %v13143_v19, %v4374_v23  ;;  %11583 = vmatmul.msk.f32.gmra.mxu2 %vm802_vm0, %v13670_v20  ;;  %11847 = vmatmul.msk.f32.gmra.mxu3 %vm802_vm0, %v13673_v21 }
 0x19b   : > { %v4634_v26 = vmax.f32 %v4506_v24, 0.0 }
 0x19c   : > { %v2999_v27 = vpop.f32.mrf.mxu2  ;;  %v4049_v28 = vpop.f32.mrf.mxu3 }
 0x19d   : > { %4763 = vst.msk [vmem:[#allocation2 + $0x118] sm:$0xff] %vm4734_vm1, %v4634_v26  ;;  %v3325_v29 = vadd.f32 %v2999_v27, %v2077_v25  ;;  %v1294_v30 = vpop.f32.mrf.mxu0  ;;  %v2079_v31 = vpop.f32.mrf.mxu1  ;;  %v13771_v25 = vld [vmem:[%s12995_s16 + $0x220] sm:$0xff] }
 0x19e   : > { %v2080_v36 = vadd.f32 %v2079_v31, %v1294_v30  ;;  %v13774_v26 = vld [vmem:[%s12995_s16 + $0x221] sm:$0xff] }
 0x19f   : > { %v4375_v19 = vadd.f32 %v4049_v28, %v3325_v29  ;;  %11192 = vmatmul.msk.f32.gmra.mxu0 %vm802_vm0, %v13625_v51 }
 0x1a0   : > { %11320 = vmatmul.msk.f32.gmra.mxu1 %vm802_vm0, %v13622_v50 }
 0x1a1   : > { %v4507_v35 = vadd.f32 %v13698_v34, %v4375_v19  ;;  %11584 = vmatmul.msk.f32.gmra.mxu2 %vm802_vm0, %v13686_v32  ;;  %11848 = vmatmul.msk.f32.gmra.mxu3 %vm802_vm0, %v13689_v33 }
 0x1a3   : > { %v4635_v37 = vmax.f32 %v4507_v35, 0.0 }
 0x1a4   : > { %v3002_v38 = vpop.f32.mrf.mxu2  ;;  %v4052_v39 = vpop.f32.mrf.mxu3 }
 0x1a5   : > { %4764 = vst.msk [vmem:[#allocation2 + $0x120] sm:$0xff] %vm4734_vm1, %v4635_v37  ;;  %v3326_v40 = vadd.f32 %v3002_v38, %v2080_v36  ;;  %v1297_v41 = vpop.f32.mrf.mxu0  ;;  %v2082_v42 = vpop.f32.mrf.mxu1  ;;  %v13787_v36 = vld [vmem:[%s12995_s16 + $0x230] sm:$0xff] }
 0x1a6   : > { %v2083_v47 = vadd.f32 %v2082_v42, %v1297_v41  ;;  %v13790_v37 = vld [vmem:[%s12995_s16 + $0x231] sm:$0xff] }
 0x1a7   : > { %v4376_v45 = vadd.f32 %v4052_v39, %v3326_v40  ;;  %11193 = vmatmul.msk.f32.gmra.mxu0 %vm802_vm0, %v13641_v62 }
 0x1a8   : > { %11321 = vmatmul.msk.f32.gmra.mxu1 %vm802_vm0, %v13638_v61 }
 0x1a9   : > { %v4508_v46 = vadd.f32 %v13698_v34, %v4376_v45  ;;  %11585 = vmatmul.msk.f32.gmra.mxu2 %vm802_vm0, %v13707_v43  ;;  %11849 = vmatmul.msk.f32.gmra.mxu3 %vm802_vm0, %v13710_v44 }
 0x1ab   : > { %v4636_v48 = vmax.f32 %v4508_v46, 0.0 }
 0x1ac   : > { %v3005_v49 = vpop.f32.mrf.mxu2  ;;  %v4055_v50 = vpop.f32.mrf.mxu3 }
 0x1ad   : > { %4765 = vst.msk [vmem:[#allocation2 + $0x128] sm:$0xff] %vm4734_vm1, %v4636_v48  ;;  %v3327_v51 = vadd.f32 %v3005_v49, %v2083_v47  ;;  %v1300_v52 = vpop.f32.mrf.mxu0  ;;  %v2085_v53 = vpop.f32.mrf.mxu1  ;;  %v13803_v47 = vld [vmem:[%s12995_s16 + $0x238] sm:$0xff] }
 0x1ae   : > { %v2086_v58 = vadd.f32 %v2085_v53, %v1300_v52  ;;  %v13806_v48 = vld [vmem:[%s12995_s16 + $0x239] sm:$0xff] }
 0x1af   : > { %v4377_v56 = vadd.f32 %v4055_v50, %v3327_v51  ;;  %11194 = vmatmul.msk.f32.gmra.mxu0 %vm802_vm0, %v13657_v9 }
 0x1b0   : > { %11322 = vmatmul.msk.f32.gmra.mxu1 %vm802_vm0, %v13654_v8 }
 0x1b1   : > { %v4509_v57 = vadd.f32 %v13698_v34, %v4377_v56  ;;  %11586 = vmatmul.msk.f32.gmra.mxu2 %vm802_vm0, %v13723_v54  ;;  %11850 = vmatmul.msk.f32.gmra.mxu3 %vm802_vm0, %v13726_v55 }
 0x1b3   : > { %v4637_v59 = vmax.f32 %v4509_v57, 0.0 }
 0x1b4   : > { %v3008_v60 = vpop.f32.mrf.mxu2  ;;  %v4058_v61 = vpop.f32.mrf.mxu3 }
 0x1b5   : > { %4766 = vst.msk [vmem:[#allocation2 + $0x130] sm:$0xff] %vm4734_vm1, %v4637_v59  ;;  %v3328_v62 = vadd.f32 %v3008_v60, %v2086_v58  ;;  %v1303_v63 = vpop.f32.mrf.mxu0  ;;  %v2088_v0 = vpop.f32.mrf.mxu1  ;;  %v13819_v58 = vld [vmem:[%s12995_s16 + $0x240] sm:$0xff] }
 0x1b6   : > { %v2089_v5 = vadd.f32 %v2088_v0, %v1303_v63  ;;  %v13822_v59 = vld [vmem:[%s12995_s16 + $0x241] sm:$0xff] }
 0x1b7   : > { %v4378_v3 = vadd.f32 %v4058_v61, %v3328_v62  ;;  %11195 = vmatmul.msk.f32.gmra.mxu0 %vm802_vm0, %v13673_v21 }
 0x1b8   : > { %11323 = vmatmul.msk.f32.gmra.mxu1 %vm802_vm0, %v13670_v20 }
 0x1b9   : > { %v4510_v4 = vadd.f32 %v13698_v34, %v4378_v3  ;;  %11587 = vmatmul.msk.f32.gmra.mxu2 %vm802_vm0, %v13739_v1  ;;  %11851 = vmatmul.msk.f32.gmra.mxu3 %vm802_vm0, %v13742_v2 }
 0x1bb   : > { %v4638_v6 = vmax.f32 %v4510_v4, 0.0 }
 0x1bc   : > { %v3011_v7 = vpop.f32.mrf.mxu2  ;;  %v4061_v8 = vpop.f32.mrf.mxu3 }
 0x1bd   : > { %4767 = vst.msk [vmem:[#allocation2 + $0x140] sm:$0xff] %vm4734_vm1, %v4638_v6  ;;  %v3329_v9 = vadd.f32 %v3011_v7, %v2089_v5  ;;  %v1306_v10 = vpop.f32.mrf.mxu0  ;;  %v2091_v11 = vpop.f32.mrf.mxu1  ;;  %v13835_v5 = vld [vmem:[%s12995_s16 + $0x248] sm:$0xff] }
 0x1be   : > { %v2092_v16 = vadd.f32 %v2091_v11, %v1306_v10  ;;  %v13838_v6 = vld [vmem:[%s12995_s16 + $0x249] sm:$0xff] }
 0x1bf   : > { %v4379_v14 = vadd.f32 %v4061_v8, %v3329_v9  ;;  %11196 = vmatmul.msk.f32.gmra.mxu0 %vm802_vm0, %v13689_v33 }
 0x1c0   : > { %11324 = vmatmul.msk.f32.gmra.mxu1 %vm802_vm0, %v13686_v32 }
 0x1c1   : > { %v4511_v15 = vadd.f32 %v13698_v34, %v4379_v14  ;;  %11588 = vmatmul.msk.f32.gmra.mxu2 %vm802_vm0, %v13755_v12  ;;  %11852 = vmatmul.msk.f32.gmra.mxu3 %vm802_vm0, %v13758_v13 }
 0x1c3   : > { %v4639_v17 = vmax.f32 %v4511_v15, 0.0 }
 0x1c4   : > { %v3014_v18 = vpop.f32.mrf.mxu2  ;;  %v4064_v20 = vpop.f32.mrf.mxu3 }
 0x1c5   : > { %4768 = vst.msk [vmem:[#allocation2 + $0x148] sm:$0xff] %vm4734_vm1, %v4639_v17  ;;  %v3330_v21 = vadd.f32 %v3014_v18, %v2092_v16  ;;  %v1309_v23 = vpop.f32.mrf.mxu0  ;;  %v2094_v24 = vpop.f32.mrf.mxu1  ;;  %v13851_v16 = vld [vmem:[%s12995_s16 + $0x258] sm:$0xff] }
 0x1c6   : > { %v2095_v29 = vadd.f32 %v2094_v24, %v1309_v23  ;;  %v13854_v17 = vld [vmem:[%s12995_s16 + $0x259] sm:$0xff] }
 0x1c7   : > { %v4380_v27 = vadd.f32 %v4064_v20, %v3330_v21  ;;  %11197 = vmatmul.msk.f32.gmra.mxu0 %vm802_vm0, %v13710_v44 }
 0x1c8   : > { %11325 = vmatmul.msk.f32.gmra.mxu1 %vm802_vm0, %v13707_v43 }
 0x1c9   : > { %v4512_v28 = vadd.f32 %v13698_v34, %v4380_v27  ;;  %11589 = vmatmul.msk.f32.gmra.mxu2 %vm802_vm0, %v13771_v25  ;;  %11853 = vmatmul.msk.f32.gmra.mxu3 %vm802_vm0, %v13774_v26 }
 0x1cb   : > { %v4640_v30 = vmax.f32 %v4512_v28, 0.0 }
 0x1cc   : > { %v3017_v31 = vpop.f32.mrf.mxu2  ;;  %v4067_v32 = vpop.f32.mrf.mxu3 }
 0x1cd   : > { %4769 = vst.msk [vmem:[#allocation2 + $0x150] sm:$0xff] %vm4734_vm1, %v4640_v30  ;;  %v3331_v33 = vadd.f32 %v3017_v31, %v2095_v29  ;;  %v1312_v19 = vpop.f32.mrf.mxu0  ;;  %v2097_v35 = vpop.f32.mrf.mxu1  ;;  %v13867_v29 = vld [vmem:[%s12995_s16 + $0x260] sm:$0xff] }
 0x1ce   : > { %v2098_v40 = vadd.f32 %v2097_v35, %v1312_v19  ;;  %v13870_v30 = vld [vmem:[%s12995_s16 + $0x261] sm:$0xff] }
 0x1cf   : > { %v4381_v38 = vadd.f32 %v4067_v32, %v3331_v33  ;;  %11198 = vmatmul.msk.f32.gmra.mxu0 %vm802_vm0, %v13726_v55 }
 0x1d0   : > { %11326 = vmatmul.msk.f32.gmra.mxu1 %vm802_vm0, %v13723_v54 }
 0x1d1   : > { %v4513_v39 = vadd.f32 %v13698_v34, %v4381_v38  ;;  %11590 = vmatmul.msk.f32.gmra.mxu2 %vm802_vm0, %v13787_v36  ;;  %11854 = vmatmul.msk.f32.gmra.mxu3 %vm802_vm0, %v13790_v37 }
 0x1d3   : > { %v4641_v41 = vmax.f32 %v4513_v39, 0.0 }
 0x1d4   : > { %v3020_v42 = vpop.f32.mrf.mxu2  ;;  %v4070_v43 = vpop.f32.mrf.mxu3 }
 0x1d5   : > { %4770 = vst.msk [vmem:[#allocation2 + $0x158] sm:$0xff] %vm4734_vm1, %v4641_v41  ;;  %v3332_v44 = vadd.f32 %v3020_v42, %v2098_v40  ;;  %v1315_v45 = vpop.f32.mrf.mxu0  ;;  %v2100_v46 = vpop.f32.mrf.mxu1  ;;  %v13883_v40 = vld [vmem:[%s12995_s16 + $0x268] sm:$0xff] }
 0x1d6   : > { %v2101_v51 = vadd.f32 %v2100_v46, %v1315_v45  ;;  %v13886_v41 = vld [vmem:[%s12995_s16 + $0x269] sm:$0xff] }
 0x1d7   : > { %v4382_v49 = vadd.f32 %v4070_v43, %v3332_v44  ;;  %11199 = vmatmul.msk.f32.gmra.mxu0 %vm802_vm0, %v13742_v2 }
 0x1d8   : > { %11327 = vmatmul.msk.f32.gmra.mxu1 %vm802_vm0, %v13739_v1 }
 0x1d9   : > { %v4514_v50 = vadd.f32 %v13698_v34, %v4382_v49  ;;  %11591 = vmatmul.msk.f32.gmra.mxu2 %vm802_vm0, %v13803_v47  ;;  %11855 = vmatmul.msk.f32.gmra.mxu3 %vm802_vm0, %v13806_v48 }
 0x1db   : > { %v4642_v52 = vmax.f32 %v4514_v50, 0.0 }
 0x1dc   : > { %v3023_v53 = vpop.f32.mrf.mxu2  ;;  %v4073_v54 = vpop.f32.mrf.mxu3 }
 0x1dd   : > { %4771 = vst.msk [vmem:[#allocation2 + $0x168] sm:$0xff] %vm4734_vm1, %v4642_v52  ;;  %v3333_v55 = vadd.f32 %v3023_v53, %v2101_v51  ;;  %v1318_v56 = vpop.f32.mrf.mxu0  ;;  %v2103_v57 = vpop.f32.mrf.mxu1  ;;  %v13899_v51 = vld [vmem:[%s12995_s16 + $0x270] sm:$0xff] }
 0x1de   : > { %v2104_v62 = vadd.f32 %v2103_v57, %v1318_v56  ;;  %v13902_v52 = vld [vmem:[%s12995_s16 + $0x271] sm:$0xff] }
 0x1df   : > { %v4383_v60 = vadd.f32 %v4073_v54, %v3333_v55  ;;  %11200 = vmatmul.msk.f32.gmra.mxu0 %vm802_vm0, %v13758_v13 }
 0x1e0   : > { %11328 = vmatmul.msk.f32.gmra.mxu1 %vm802_vm0, %v13755_v12 }
 0x1e1   : > { %v4515_v61 = vadd.f32 %v13698_v34, %v4383_v60  ;;  %11592 = vmatmul.msk.f32.gmra.mxu2 %vm802_vm0, %v13819_v58  ;;  %11856 = vmatmul.msk.f32.gmra.mxu3 %vm802_vm0, %v13822_v59 }
 0x1e3   : > { %v4643_v63 = vmax.f32 %v4515_v61, 0.0 }
 0x1e4   : > { %v3026_v0 = vpop.f32.mrf.mxu2  ;;  %v4076_v1 = vpop.f32.mrf.mxu3 }
 0x1e5   : > { %4772 = vst.msk [vmem:[#allocation2 + $0x170] sm:$0xff] %vm4734_vm1, %v4643_v63  ;;  %v3334_v2 = vadd.f32 %v3026_v0, %v2104_v62  ;;  %v1321_v3 = vpop.f32.mrf.mxu0  ;;  %v2106_v4 = vpop.f32.mrf.mxu1  ;;  %v13915_v62 = vld [vmem:[%s12995_s16 + $0x280] sm:$0xff] }
 0x1e6   : > { %v2107_v9 = vadd.f32 %v2106_v4, %v1321_v3  ;;  %v13918_v63 = vld [vmem:[%s12995_s16 + $0x281] sm:$0xff] }
 0x1e7   : > { %v4384_v7 = vadd.f32 %v4076_v1, %v3334_v2  ;;  %11201 = vmatmul.msk.f32.gmra.mxu0 %vm802_vm0, %v13774_v26 }
 0x1e8   : > { %11329 = vmatmul.msk.f32.gmra.mxu1 %vm802_vm0, %v13771_v25 }
 0x1e9   : > { %v4516_v8 = vadd.f32 %v13698_v34, %v4384_v7  ;;  %11593 = vmatmul.msk.f32.gmra.mxu2 %vm802_vm0, %v13835_v5  ;;  %11857 = vmatmul.msk.f32.gmra.mxu3 %vm802_vm0, %v13838_v6 }
 0x1eb   : > { %v4644_v10 = vmax.f32 %v4516_v8, 0.0 }
 0x1ec   : > { %v3029_v11 = vpop.f32.mrf.mxu2  ;;  %v4079_v12 = vpop.f32.mrf.mxu3 }
 0x1ed   : > { %4773 = vst.msk [vmem:[#allocation2 + $0x178] sm:$0xff] %vm4734_vm1, %v4644_v10  ;;  %v3335_v13 = vadd.f32 %v3029_v11, %v2107_v9  ;;  %v1324_v14 = vpop.f32.mrf.mxu0  ;;  %v2109_v15 = vpop.f32.mrf.mxu1  ;;  %v11930_v9 = vld [vmem:[%s16542_s3 + $0x10] sm:$0xff]  ;;  %v13934_v10 = vld [vmem:[%s12995_s16 + $0x288] sm:$0xff] }
 0x1ee   : > { %v2110_v21 = vadd.f32 %v2109_v15, %v1324_v14  ;;  %v13937_v11 = vld [vmem:[%s12995_s16 + $0x289] sm:$0xff]  ;;  %12610 = vmatpush.msrb.mxu2 %v11930_v9  ;;  %5110 = vmatpush.msrb.mxu0 %v11930_v9 }
 0x1ef   : > { %v4385_v18 = vadd.f32 %v4079_v12, %v3335_v13  ;;  %11202 = vmatmul.msk.f32.gmra.mxu0 %vm802_vm0, %v13790_v37 }
 0x1f0   : > { %11330 = vmatmul.msk.f32.gmra.mxu1 %vm802_vm0, %v13787_v36 }
 0x1f1   : > { %v4517_v20 = vadd.f32 %v13698_v34, %v4385_v18  ;;  %11594 = vmatmul.msk.f32.gmra.mxu2 %vm802_vm0, %v13851_v16  ;;  %11858 = vmatmul.msk.f32.gmra.mxu3 %vm802_vm0, %v13854_v17 }
 0x1f3   : > { %v4645_v23 = vmax.f32 %v4517_v20, 0.0 }
 0x1f4   : > { %v3032_v24 = vpop.f32.mrf.mxu2  ;;  %v4082_v25 = vpop.f32.mrf.mxu3 }
 0x1f5   : > { %4774 = vst.msk [vmem:[#allocation2 + $0x180] sm:$0xff] %vm4734_vm1, %v4645_v23  ;;  %v3336_v26 = vadd.f32 %v3032_v24, %v2110_v21  ;;  %v1327_v27 = vpop.f32.mrf.mxu0  ;;  %v2112_v28 = vpop.f32.mrf.mxu1  ;;  %v12018_v23 = vld [vmem:[%s16542_s3 + $0x30] sm:$0xff] }
 0x1f6   : > { %v2113_v33 = vadd.f32 %v2112_v28, %v1327_v27  ;;  %v13953_v24 = vld [vmem:[%s12995_s16 + $0x290] sm:$0xff]  ;;  %5811 = vmatpush.msrb.mxu3 %v12018_v23 }
 0x1f7   : > { %v4386_v31 = vadd.f32 %v4082_v25, %v3336_v26  ;;  %11203 = vmatmul.msk.f32.gmra.mxu0 %vm802_vm0, %v13806_v48  ;;  %v13956_v25 = vld [vmem:[%s12995_s16 + $0x291] sm:$0xff] }
 0x1f8   : > { %11331 = vmatmul.msk.f32.gmra.mxu1 %vm802_vm0, %v13803_v47 }
 0x1f9   : > { %v4518_v32 = vadd.f32 %v13698_v34, %v4386_v31  ;;  %11595 = vmatmul.msk.f32.gmra.mxu2 %vm802_vm0, %v13867_v29  ;;  %11859 = vmatmul.msk.f32.gmra.mxu3 %vm802_vm0, %v13870_v30 }
 0x1fb   : > { %v4646_v19 = vmax.f32 %v4518_v32, 0.0 }
 0x1fc   : > { %v3035_v35 = vpop.f32.mrf.mxu2  ;;  %v4085_v36 = vpop.f32.mrf.mxu3 }
 0x1fd   : > { %4775 = vst.msk [vmem:[#allocation2 + $0x190] sm:$0xff] %vm4734_vm1, %v4646_v19  ;;  %v3337_v37 = vadd.f32 %v3035_v35, %v2113_v33  ;;  %v1330_v38 = vpop.f32.mrf.mxu0  ;;  %v2115_v39 = vpop.f32.mrf.mxu1  ;;  %v4950_v35 = vld [vmem:[%s16542_s3] sm:$0xff] }
 0x1fe   : > { %v2116_v44 = vadd.f32 %v2115_v39, %v1330_v38  ;;  %5295 = vmatpush.msrb.mxu1 %v4950_v35 }
 0x1ff   : > { %v4387_v42 = vadd.f32 %v4085_v36, %v3337_v37  ;;  %11204 = vmatmul.msk.f32.gmra.mxu0 %vm802_vm0, %v13822_v59  ;;  %v13972_v36 = vld [vmem:[%s12995_s16 + $0x298] sm:$0xff] }
 0x200   : > { %11332 = vmatmul.msk.f32.gmra.mxu1 %vm802_vm0, %v13819_v58  ;;  %v13975_v37 = vld [vmem:[%s12995_s16 + $0x299] sm:$0xff] }
 0x201   : > { %v4519_v43 = vadd.f32 %v13698_v34, %v4387_v42  ;;  %11596 = vmatmul.msk.f32.gmra.mxu2 %vm802_vm0, %v13883_v40  ;;  %11860 = vmatmul.msk.f32.gmra.mxu3 %vm802_vm0, %v13886_v41 }
 0x203   : > { %v4647_v45 = vmax.f32 %v4519_v43, 0.0 }
 0x204   : > { %v3038_v46 = vpop.f32.mrf.mxu2  ;;  %v4088_v47 = vpop.f32.mrf.mxu3 }
 0x205   : > { %4776 = vst.msk [vmem:[#allocation2 + $0x198] sm:$0xff] %vm4734_vm1, %v4647_v45  ;;  %v3338_v48 = vadd.f32 %v3038_v46, %v2116_v44  ;;  %v1333_v49 = vpop.f32.mrf.mxu0  ;;  %v2118_v50 = vpop.f32.mrf.mxu1 }
 0x206   : > { %v2119_v55 = vadd.f32 %v2118_v50, %v1333_v49 }
 0x207   : > { %v4388_v53 = vadd.f32 %v4088_v47, %v3338_v48  ;;  %11205 = vmatmul.msk.f32.gmra.mxu0 %vm802_vm0, %v13838_v6  ;;  %v13988_v47 = vld [vmem:[%s12995_s16 + $0x2a8] sm:$0xff] }
 0x208   : > { %11333 = vmatmul.msk.f32.gmra.mxu1 %vm802_vm0, %v13835_v5  ;;  %v13991_v48 = vld [vmem:[%s12995_s16 + $0x2a9] sm:$0xff] }
 0x209   : > { %v4520_v54 = vadd.f32 %v13698_v34, %v4388_v53  ;;  %11597 = vmatmul.msk.f32.gmra.mxu2 %vm802_vm0, %v13899_v51  ;;  %11861 = vmatmul.msk.f32.gmra.mxu3 %vm802_vm0, %v13902_v52 }
 0x20b   : > { %v4648_v56 = vmax.f32 %v4520_v54, 0.0 }
 0x20c   : > { %v3041_v57 = vpop.f32.mrf.mxu2  ;;  %v4091_v58 = vpop.f32.mrf.mxu3 }
 0x20d   : > { %4777 = vst.msk [vmem:[#allocation2 + $0x1a0] sm:$0xff] %vm4734_vm1, %v4648_v56  ;;  %v3339_v59 = vadd.f32 %v3041_v57, %v2119_v55  ;;  %v1336_v60 = vpop.f32.mrf.mxu0  ;;  %v2121_v61 = vpop.f32.mrf.mxu1 }
 0x20e   : > { %v2122_v2 = vadd.f32 %v2121_v61, %v1336_v60 }
 0x20f   : > { %v4389_v0 = vadd.f32 %v4091_v58, %v3339_v59  ;;  %11206 = vmatmul.msk.f32.gmra.mxu0 %vm802_vm0, %v13854_v17  ;;  %v14004_v58 = vld [vmem:[%s12995_s16 + $0x2b0] sm:$0xff] }
 0x210   : > { %11334 = vmatmul.msk.f32.gmra.mxu1 %vm802_vm0, %v13851_v16  ;;  %v14007_v59 = vld [vmem:[%s12995_s16 + $0x2b1] sm:$0xff] }
 0x211   : > { %v4521_v1 = vadd.f32 %v13698_v34, %v4389_v0  ;;  %11598 = vmatmul.msk.f32.gmra.mxu2 %vm802_vm0, %v13915_v62  ;;  %11862 = vmatmul.msk.f32.gmra.mxu3 %vm802_vm0, %v13918_v63 }
 0x213   : > { %v4649_v3 = vmax.f32 %v4521_v1, 0.0 }
 0x214   : > { %v3044_v4 = vpop.f32.mrf.mxu2  ;;  %v4094_v5 = vpop.f32.mrf.mxu3 }
 0x215   : > { %4778 = vst.msk [vmem:[#allocation2 + $0x1a8] sm:$0xff] %vm4734_vm1, %v4649_v3  ;;  %v3340_v6 = vadd.f32 %v3044_v4, %v2122_v2  ;;  %v1339_v7 = vpop.f32.mrf.mxu0  ;;  %v2124_v8 = vpop.f32.mrf.mxu1 }
 0x216   : > { %v2125_v14 = vadd.f32 %v2124_v8, %v1339_v7 }
 0x217   : > { %v4390_v12 = vadd.f32 %v4094_v5, %v3340_v6  ;;  %11207 = vmatmul.msk.f32.gmra.mxu0 %vm802_vm0, %v13870_v30  ;;  %v14020_v5 = vld [vmem:[%s12995_s16 + $0x2b8] sm:$0xff] }
 0x218   : > { %11335 = vmatmul.msk.f32.gmra.mxu1 %vm802_vm0, %v13867_v29  ;;  %v14023_v6 = vld [vmem:[%s12995_s16 + $0x2b9] sm:$0xff] }
 0x219   : > { %v4522_v13 = vadd.f32 %v13698_v34, %v4390_v12  ;;  %11599 = vmatmul.msk.f32.gmra.mxu2 %vm802_vm0, %v13934_v10  ;;  %11863 = vmatmul.msk.f32.gmra.mxu3 %vm802_vm0, %v13937_v11 }
 0x21b   : > { %v4650_v15 = vmax.f32 %v4522_v13, 0.0 }
 0x21c   : > { %v3047_v16 = vpop.f32.mrf.mxu2  ;;  %v4097_v17 = vpop.f32.mrf.mxu3 }
 0x21d   : > { %4779 = vst.msk [vmem:[#allocation2 + $0x1b8] sm:$0xff] %vm4734_vm1, %v4650_v15  ;;  %v3341_v18 = vadd.f32 %v3047_v16, %v2125_v14  ;;  %v1342_v20 = vpop.f32.mrf.mxu0  ;;  %v2127_v21 = vpop.f32.mrf.mxu1  ;;  %v14036_v16 = vld [vmem:[%s12995_s16 + $0x2c0] sm:$0xff] }
 0x21e   : > { %v2128_v28 = vadd.f32 %v2127_v21, %v1342_v20 }
 0x21f   : > { %v4391_v26 = vadd.f32 %v4097_v17, %v3341_v18  ;;  %11208 = vmatmul.msk.f32.gmra.mxu0 %vm802_vm0, %v13886_v41  ;;  %v14039_v17 = vld [vmem:[%s12995_s16 + $0x2c1] sm:$0xff] }
 0x220   : > { %11336 = vmatmul.msk.f32.gmra.mxu1 %vm802_vm0, %v13883_v40 }
 0x221   : > { %v4523_v27 = vadd.f32 %v13698_v34, %v4391_v26  ;;  %11600 = vmatmul.msk.f32.gmra.mxu2 %vm802_vm0, %v13953_v24  ;;  %11864 = vmatmul.msk.f32.gmra.mxu3 %vm802_vm0, %v13956_v25 }
 0x223   : > { %v4651_v29 = vmax.f32 %v4523_v27, 0.0 }
 0x224   : > { %v3050_v30 = vpop.f32.mrf.mxu2  ;;  %v4100_v31 = vpop.f32.mrf.mxu3 }
 0x225   : > { %4780 = vst.msk [vmem:[#allocation2 + $0x1c0] sm:$0xff] %vm4734_vm1, %v4651_v29  ;;  %v3342_v32 = vadd.f32 %v3050_v30, %v2128_v28  ;;  %v1345_v33 = vpop.f32.mrf.mxu0  ;;  %v2130_v19 = vpop.f32.mrf.mxu1  ;;  %v14052_v29 = vld [vmem:[%s12995_s16 + $0x2d0] sm:$0xff] }
 0x226   : > { %v2131_v40 = vadd.f32 %v2130_v19, %v1345_v33  ;;  %v14055_v30 = vld [vmem:[%s12995_s16 + $0x2d1] sm:$0xff] }
 0x227   : > { %v4392_v38 = vadd.f32 %v4100_v31, %v3342_v32  ;;  %11209 = vmatmul.msk.f32.gmra.mxu0 %vm802_vm0, %v13902_v52 }
 0x228   : > { %11337 = vmatmul.msk.f32.gmra.mxu1 %vm802_vm0, %v13899_v51 }
 0x229   : > { %v4524_v39 = vadd.f32 %v13698_v34, %v4392_v38  ;;  %11601 = vmatmul.msk.f32.gmra.mxu2 %vm802_vm0, %v13972_v36  ;;  %11865 = vmatmul.msk.f32.gmra.mxu3 %vm802_vm0, %v13975_v37 }
 0x22b   : > { %v4652_v41 = vmax.f32 %v4524_v39, 0.0 }
 0x22c   : > { %v3053_v42 = vpop.f32.mrf.mxu2  ;;  %v4103_v43 = vpop.f32.mrf.mxu3 }
 0x22d   : > { %4781 = vst.msk [vmem:[#allocation2 + $0x1c8] sm:$0xff] %vm4734_vm1, %v4652_v41  ;;  %v3343_v44 = vadd.f32 %v3053_v42, %v2131_v40  ;;  %v1348_v45 = vpop.f32.mrf.mxu0  ;;  %v2133_v46 = vpop.f32.mrf.mxu1  ;;  %v14068_v40 = vld [vmem:[%s12995_s16 + $0x2d8] sm:$0xff] }
 0x22e   : > { %v2134_v51 = vadd.f32 %v2133_v46, %v1348_v45  ;;  %v14071_v41 = vld [vmem:[%s12995_s16 + $0x2d9] sm:$0xff] }
 0x22f   : > { %v4393_v49 = vadd.f32 %v4103_v43, %v3343_v44  ;;  %11210 = vmatmul.msk.f32.gmra.mxu0 %vm802_vm0, %v13918_v63 }
 0x230   : > { %11338 = vmatmul.msk.f32.gmra.mxu1 %vm802_vm0, %v13915_v62 }
 0x231   : > { %v4525_v50 = vadd.f32 %v13698_v34, %v4393_v49  ;;  %11602 = vmatmul.msk.f32.gmra.mxu2 %vm802_vm0, %v13988_v47  ;;  %11866 = vmatmul.msk.f32.gmra.mxu3 %vm802_vm0, %v13991_v48 }
 0x233   : > { %v4653_v52 = vmax.f32 %v4525_v50, 0.0 }
 0x234   : > { %v3056_v53 = vpop.f32.mrf.mxu2  ;;  %v4106_v54 = vpop.f32.mrf.mxu3 }
 0x235   : > { %4782 = vst.msk [vmem:[#allocation2 + $0x1d0] sm:$0xff] %vm4734_vm1, %v4653_v52  ;;  %v3344_v55 = vadd.f32 %v3056_v53, %v2134_v51  ;;  %v1351_v56 = vpop.f32.mrf.mxu0  ;;  %v2136_v57 = vpop.f32.mrf.mxu1  ;;  %v14084_v51 = vld [vmem:[%s12995_s16 + $0x2e0] sm:$0xff] }
 0x236   : > { %v2137_v62 = vadd.f32 %v2136_v57, %v1351_v56  ;;  %v14087_v52 = vld [vmem:[%s12995_s16 + $0x2e1] sm:$0xff] }
 0x237   : > { %v4394_v60 = vadd.f32 %v4106_v54, %v3344_v55  ;;  %11211 = vmatmul.msk.f32.gmra.mxu0 %vm802_vm0, %v13937_v11 }
 0x238   : > { %11339 = vmatmul.msk.f32.gmra.mxu1 %vm802_vm0, %v13934_v10 }
 0x239   : > { %v4526_v61 = vadd.f32 %v13698_v34, %v4394_v60  ;;  %11603 = vmatmul.msk.f32.gmra.mxu2 %vm802_vm0, %v14004_v58  ;;  %11867 = vmatmul.msk.f32.gmra.mxu3 %vm802_vm0, %v14007_v59 }
 0x23b   : > { %v4654_v63 = vmax.f32 %v4526_v61, 0.0 }
 0x23c   : > { %v3059_v0 = vpop.f32.mrf.mxu2  ;;  %v4109_v1 = vpop.f32.mrf.mxu3 }
 0x23d   : > { %4783 = vst.msk [vmem:[#allocation2 + $0x1e0] sm:$0xff] %vm4734_vm1, %v4654_v63  ;;  %v3345_v2 = vadd.f32 %v3059_v0, %v2137_v62  ;;  %v1354_v3 = vpop.f32.mrf.mxu0  ;;  %v2139_v4 = vpop.f32.mrf.mxu1  ;;  %v14100_v62 = vld [vmem:[%s12995_s16 + $0x2e8] sm:$0xff] }
 0x23e   : > { %v2140_v9 = vadd.f32 %v2139_v4, %v1354_v3  ;;  %v14103_v63 = vld [vmem:[%s12995_s16 + $0x2e9] sm:$0xff] }
 0x23f   : > { %v4395_v7 = vadd.f32 %v4109_v1, %v3345_v2  ;;  %11212 = vmatmul.msk.f32.gmra.mxu0 %vm802_vm0, %v13956_v25 }
 0x240   : > { %11340 = vmatmul.msk.f32.gmra.mxu1 %vm802_vm0, %v13953_v24 }
 0x241   : > { %v4527_v8 = vadd.f32 %v13698_v34, %v4395_v7  ;;  %11604 = vmatmul.msk.f32.gmra.mxu2 %vm802_vm0, %v14020_v5  ;;  %11868 = vmatmul.msk.f32.gmra.mxu3 %vm802_vm0, %v14023_v6 }
 0x243   : > { %v4655_v10 = vmax.f32 %v4527_v8, 0.0 }
 0x244   : > { %v3062_v11 = vpop.f32.mrf.mxu2  ;;  %v4112_v12 = vpop.f32.mrf.mxu3 }
 0x245   : > { %4784 = vst.msk [vmem:[#allocation2 + $0x1e8] sm:$0xff] %vm4734_vm1, %v4655_v10  ;;  %v3346_v13 = vadd.f32 %v3062_v11, %v2140_v9  ;;  %v1357_v14 = vpop.f32.mrf.mxu0  ;;  %v2142_v15 = vpop.f32.mrf.mxu1  ;;  %v14116_v9 = vld [vmem:[%s12995_s16 + $0x2f8] sm:$0xff] }
 0x246   : > { %v2143_v21 = vadd.f32 %v2142_v15, %v1357_v14  ;;  %v14119_v10 = vld [vmem:[%s12995_s16 + $0x2f9] sm:$0xff] }
 0x247   : > { %v4396_v18 = vadd.f32 %v4112_v12, %v3346_v13  ;;  %11213 = vmatmul.msk.f32.gmra.mxu0 %vm802_vm0, %v13975_v37 }
 0x248   : > { %11341 = vmatmul.msk.f32.gmra.mxu1 %vm802_vm0, %v13972_v36 }
 0x249   : > { %v4528_v20 = vadd.f32 %v13698_v34, %v4396_v18  ;;  %11605 = vmatmul.msk.f32.gmra.mxu2 %vm802_vm0, %v14036_v16  ;;  %11869 = vmatmul.msk.f32.gmra.mxu3 %vm802_vm0, %v14039_v17 }
 0x24b   : > { %v4656_v23 = vmax.f32 %v4528_v20, 0.0 }
 0x24c   : > { %v3065_v24 = vpop.f32.mrf.mxu2  ;;  %v4115_v25 = vpop.f32.mrf.mxu3 }
 0x24d   : > { %4785 = vst.msk [vmem:[#allocation2 + $0x1f0] sm:$0xff] %vm4734_vm1, %v4656_v23  ;;  %v3347_v26 = vadd.f32 %v3065_v24, %v2143_v21  ;;  %v1360_v27 = vpop.f32.mrf.mxu0  ;;  %v2145_v28 = vpop.f32.mrf.mxu1  ;;  %v14132_v21 = vld [vmem:[%s12995_s16 + $0x300] sm:$0xff] }
 0x24e   : > { %v2146_v33 = vadd.f32 %v2145_v28, %v1360_v27  ;;  %v14135_v23 = vld [vmem:[%s12995_s16 + $0x301] sm:$0xff] }
 0x24f   : > { %v4397_v31 = vadd.f32 %v4115_v25, %v3347_v26  ;;  %11214 = vmatmul.msk.f32.gmra.mxu0 %vm802_vm0, %v13991_v48 }
 0x250   : > { %11342 = vmatmul.msk.f32.gmra.mxu1 %vm802_vm0, %v13988_v47 }
 0x251   : > { %v4529_v32 = vadd.f32 %v13698_v34, %v4397_v31  ;;  %11606 = vmatmul.msk.f32.gmra.mxu2 %vm802_vm0, %v14052_v29  ;;  %11870 = vmatmul.msk.f32.gmra.mxu3 %vm802_vm0, %v14055_v30 }
 0x253   : > { %v4657_v19 = vmax.f32 %v4529_v32, 0.0 }
 0x254   : > { %v3068_v35 = vpop.f32.mrf.mxu2  ;;  %v4118_v36 = vpop.f32.mrf.mxu3 }
 0x255   : > { %4786 = vst.msk [vmem:[#allocation2 + $0x1f8] sm:$0xff] %vm4734_vm1, %v4657_v19  ;;  %v3348_v37 = vadd.f32 %v3068_v35, %v2146_v33  ;;  %v1363_v38 = vpop.f32.mrf.mxu0  ;;  %v2148_v39 = vpop.f32.mrf.mxu1  ;;  %v14148_v33 = vld [vmem:[%s12995_s16 + $0x308] sm:$0xff] }
 0x256   : > { %v2149_v44 = vadd.f32 %v2148_v39, %v1363_v38  ;;  %v14151_v19 = vld [vmem:[%s12995_s16 + $0x309] sm:$0xff] }
 0x257   : > { %v4398_v42 = vadd.f32 %v4118_v36, %v3348_v37  ;;  %11215 = vmatmul.msk.f32.gmra.mxu0 %vm802_vm0, %v14007_v59 }
 0x258   : > { %11343 = vmatmul.msk.f32.gmra.mxu1 %vm802_vm0, %v14004_v58 }
 0x259   : > { %v4530_v43 = vadd.f32 %v13698_v34, %v4398_v42  ;;  %11607 = vmatmul.msk.f32.gmra.mxu2 %vm802_vm0, %v14068_v40  ;;  %11871 = vmatmul.msk.f32.gmra.mxu3 %vm802_vm0, %v14071_v41 }
 0x25b   : > { %v4658_v45 = vmax.f32 %v4530_v43, 0.0 }
 0x25c   : > { %v3071_v46 = vpop.f32.mrf.mxu2  ;;  %v4121_v47 = vpop.f32.mrf.mxu3 }
 0x25d   : > { %4787 = vst.msk [vmem:[#allocation2 + $0x208] sm:$0xff] %vm4734_vm1, %v4658_v45  ;;  %v3349_v48 = vadd.f32 %v3071_v46, %v2149_v44  ;;  %v1366_v49 = vpop.f32.mrf.mxu0  ;;  %v2151_v50 = vpop.f32.mrf.mxu1  ;;  %v14164_v44 = vld [vmem:[%s12995_s16 + $0x310] sm:$0xff] }
 0x25e   : > { %v2152_v55 = vadd.f32 %v2151_v50, %v1366_v49  ;;  %v14167_v45 = vld [vmem:[%s12995_s16 + $0x311] sm:$0xff] }
 0x25f   : > { %v4399_v53 = vadd.f32 %v4121_v47, %v3349_v48  ;;  %11216 = vmatmul.msk.f32.gmra.mxu0 %vm802_vm0, %v14023_v6 }
 0x260   : > { %11344 = vmatmul.msk.f32.gmra.mxu1 %vm802_vm0, %v14020_v5 }
 0x261   : > { %v4531_v54 = vadd.f32 %v13698_v34, %v4399_v53  ;;  %11608 = vmatmul.msk.f32.gmra.mxu2 %vm802_vm0, %v14084_v51  ;;  %11872 = vmatmul.msk.f32.gmra.mxu3 %vm802_vm0, %v14087_v52 }
 0x263   : > { %v4659_v56 = vmax.f32 %v4531_v54, 0.0 }
 0x264   : > { %v3074_v57 = vpop.f32.mrf.mxu2  ;;  %v4124_v58 = vpop.f32.mrf.mxu3 }
 0x265   : > { %4788 = vst.msk [vmem:[#allocation2 + $0x210] sm:$0xff] %vm4734_vm1, %v4659_v56  ;;  %v3350_v59 = vadd.f32 %v3074_v57, %v2152_v55  ;;  %v1369_v60 = vpop.f32.mrf.mxu0  ;;  %v2154_v61 = vpop.f32.mrf.mxu1  ;;  %v14180_v55 = vld [vmem:[%s12995_s16 + $0x320] sm:$0xff] }
 0x266   : > { %v2155_v2 = vadd.f32 %v2154_v61, %v1369_v60  ;;  %v14183_v56 = vld [vmem:[%s12995_s16 + $0x321] sm:$0xff] }
 0x267   : > { %v4400_v0 = vadd.f32 %v4124_v58, %v3350_v59  ;;  %11217 = vmatmul.msk.f32.gmra.mxu0 %vm802_vm0, %v14039_v17 }
 0x268   : > { %11345 = vmatmul.msk.f32.gmra.mxu1 %vm802_vm0, %v14036_v16 }
 0x269   : > { %v4532_v1 = vadd.f32 %v13698_v34, %v4400_v0  ;;  %11609 = vmatmul.msk.f32.gmra.mxu2 %vm802_vm0, %v14100_v62  ;;  %11873 = vmatmul.msk.f32.gmra.mxu3 %vm802_vm0, %v14103_v63 }
 0x26b   : > { %v4660_v3 = vmax.f32 %v4532_v1, 0.0 }
 0x26c   : > { %v3077_v4 = vpop.f32.mrf.mxu2  ;;  %v4127_v5 = vpop.f32.mrf.mxu3 }
 0x26d   : > { %4789 = vst.msk [vmem:[#allocation2 + $0x218] sm:$0xff] %vm4734_vm1, %v4660_v3  ;;  %v3351_v6 = vadd.f32 %v3077_v4, %v2155_v2  ;;  %v1372_v7 = vpop.f32.mrf.mxu0  ;;  %v2157_v8 = vpop.f32.mrf.mxu1  ;;  %v14196_v2 = vld [vmem:[%s12995_s16 + $0x328] sm:$0xff] }
 0x26e   : > { %v2158_v13 = vadd.f32 %v2157_v8, %v1372_v7  ;;  %v14199_v3 = vld [vmem:[%s12995_s16 + $0x329] sm:$0xff] }
 0x26f   : > { %v4401_v11 = vadd.f32 %v4127_v5, %v3351_v6  ;;  %11218 = vmatmul.msk.f32.gmra.mxu0 %vm802_vm0, %v14055_v30 }
 0x270   : > { %11346 = vmatmul.msk.f32.gmra.mxu1 %vm802_vm0, %v14052_v29 }
 0x271   : > { %v4533_v12 = vadd.f32 %v13698_v34, %v4401_v11  ;;  %11610 = vmatmul.msk.f32.gmra.mxu2 %vm802_vm0, %v14116_v9  ;;  %11874 = vmatmul.msk.f32.gmra.mxu3 %vm802_vm0, %v14119_v10 }
 0x273   : > { %v4661_v14 = vmax.f32 %v4533_v12, 0.0 }
 0x274   : > { %v3080_v15 = vpop.f32.mrf.mxu2  ;;  %v4130_v16 = vpop.f32.mrf.mxu3 }
 0x275   : > { %4790 = vst.msk [vmem:[#allocation2 + $0x220] sm:$0xff] %vm4734_vm1, %v4661_v14  ;;  %v3352_v17 = vadd.f32 %v3080_v15, %v2158_v13  ;;  %v1375_v18 = vpop.f32.mrf.mxu0  ;;  %v2160_v20 = vpop.f32.mrf.mxu1  ;;  %v14212_v13 = vld [vmem:[%s12995_s16 + $0x330] sm:$0xff]  ;;  %v14224_v15 = vld [vmem:[%s16577_s2] ss:$0 sm:$0xff] }
 0x276   : > { %v2161_v26 = vadd.f32 %v2160_v20, %v1375_v18  ;;  %v14215_v14 = vld [vmem:[%s12995_s16 + $0x331] sm:$0xff] }
 0x277   : > { %v4402_v24 = vadd.f32 %v4130_v16, %v3352_v17  ;;  %11219 = vmatmul.msk.f32.gmra.mxu0 %vm802_vm0, %v14071_v41 }
 0x278   : > { %11347 = vmatmul.msk.f32.gmra.mxu1 %vm802_vm0, %v14068_v40 }
 0x279   : > { %v4534_v25 = vadd.f32 %v13698_v34, %v4402_v24  ;;  %11611 = vmatmul.msk.f32.gmra.mxu2 %vm802_vm0, %v14132_v21  ;;  %11875 = vmatmul.msk.f32.gmra.mxu3 %vm802_vm0, %v14135_v23 }
 0x27b   : > { %v4662_v27 = vmax.f32 %v4534_v25, 0.0 }
 0x27c   : > { %v3083_v28 = vpop.f32.mrf.mxu2  ;;  %v4133_v29 = vpop.f32.mrf.mxu3 }
 0x27d   : > { %4791 = vst.msk [vmem:[#allocation2 + $0x230] sm:$0xff] %vm4734_vm1, %v4662_v27  ;;  %v3353_v30 = vadd.f32 %v3083_v28, %v2161_v26  ;;  %v1378_v31 = vpop.f32.mrf.mxu0  ;;  %v2163_v32 = vpop.f32.mrf.mxu1  ;;  %v14233_v26 = vld [vmem:[%s12995_s16 + $0x338] sm:$0xff] }
 0x27e   : > { %v2164_v37 = vadd.f32 %v2163_v32, %v1378_v31  ;;  %v14236_v27 = vld [vmem:[%s12995_s16 + $0x339] sm:$0xff] }
 0x27f   : > { %v4403_v35 = vadd.f32 %v4133_v29, %v3353_v30  ;;  %11220 = vmatmul.msk.f32.gmra.mxu0 %vm802_vm0, %v14087_v52 }
 0x280   : > { %11348 = vmatmul.msk.f32.gmra.mxu1 %vm802_vm0, %v14084_v51 }
 0x281   : > { %v4535_v36 = vadd.f32 %v13698_v34, %v4403_v35  ;;  %11612 = vmatmul.msk.f32.gmra.mxu2 %vm802_vm0, %v14148_v33  ;;  %11876 = vmatmul.msk.f32.gmra.mxu3 %vm802_vm0, %v14151_v19 }
 0x283   : > { %v4663_v38 = vmax.f32 %v4535_v36, 0.0 }
 0x284   : > { %v3086_v39 = vpop.f32.mrf.mxu2  ;;  %v4136_v40 = vpop.f32.mrf.mxu3 }
 0x285   : > { %4792 = vst.msk [vmem:[#allocation2 + $0x238] sm:$0xff] %vm4734_vm1, %v4663_v38  ;;  %v3354_v41 = vadd.f32 %v3086_v39, %v2164_v37  ;;  %v1381_v42 = vpop.f32.mrf.mxu0  ;;  %v2166_v43 = vpop.f32.mrf.mxu1  ;;  %v14249_v37 = vld [vmem:[%s12995_s16 + $0x348] sm:$0xff] }
 0x286   : > { %v2167_v48 = vadd.f32 %v2166_v43, %v1381_v42  ;;  %v14252_v38 = vld [vmem:[%s12995_s16 + $0x349] sm:$0xff] }
 0x287   : > { %v4404_v46 = vadd.f32 %v4136_v40, %v3354_v41  ;;  %11221 = vmatmul.msk.f32.gmra.mxu0 %vm802_vm0, %v14103_v63 }
 0x288   : > { %11349 = vmatmul.msk.f32.gmra.mxu1 %vm802_vm0, %v14100_v62 }
 0x289   : > { %v4536_v47 = vadd.f32 %v13698_v34, %v4404_v46  ;;  %11613 = vmatmul.msk.f32.gmra.mxu2 %vm802_vm0, %v14164_v44  ;;  %11877 = vmatmul.msk.f32.gmra.mxu3 %vm802_vm0, %v14167_v45 }
 0x28b   : > { %v4664_v49 = vmax.f32 %v4536_v47, 0.0 }
 0x28c   : > { %v3089_v50 = vpop.f32.mrf.mxu2  ;;  %v4139_v51 = vpop.f32.mrf.mxu3 }
 0x28d   : > { %4793 = vst.msk [vmem:[#allocation2 + $0x240] sm:$0xff] %vm4734_vm1, %v4664_v49  ;;  %v3355_v52 = vadd.f32 %v3089_v50, %v2167_v48  ;;  %v1384_v53 = vpop.f32.mrf.mxu0  ;;  %v2169_v54 = vpop.f32.mrf.mxu1  ;;  %v14265_v48 = vld [vmem:[%s12995_s16 + $0x350] sm:$0xff] }
 0x28e   : > { %v2170_v59 = vadd.f32 %v2169_v54, %v1384_v53  ;;  %v14268_v49 = vld [vmem:[%s12995_s16 + $0x351] sm:$0xff] }
 0x28f   : > { %v4405_v57 = vadd.f32 %v4139_v51, %v3355_v52  ;;  %11222 = vmatmul.msk.f32.gmra.mxu0 %vm802_vm0, %v14119_v10 }
 0x290   : > { %11350 = vmatmul.msk.f32.gmra.mxu1 %vm802_vm0, %v14116_v9 }
 0x291   : > { %v4537_v58 = vadd.f32 %v13698_v34, %v4405_v57  ;;  %11614 = vmatmul.msk.f32.gmra.mxu2 %vm802_vm0, %v14180_v55  ;;  %11878 = vmatmul.msk.f32.gmra.mxu3 %vm802_vm0, %v14183_v56 }
 0x293   : > { %v4665_v60 = vmax.f32 %v4537_v58, 0.0 }
 0x294   : > { %v3092_v61 = vpop.f32.mrf.mxu2  ;;  %v4142_v62 = vpop.f32.mrf.mxu3 }
 0x295   : > { %4794 = vst.msk [vmem:[#allocation2 + $0x248] sm:$0xff] %vm4734_vm1, %v4665_v60  ;;  %v3356_v63 = vadd.f32 %v3092_v61, %v2170_v59  ;;  %v1387_v0 = vpop.f32.mrf.mxu0  ;;  %v2172_v1 = vpop.f32.mrf.mxu1  ;;  %v14281_v59 = vld [vmem:[%s12995_s16 + $0x358] sm:$0xff] }
 0x296   : > { %v2173_v6 = vadd.f32 %v2172_v1, %v1387_v0  ;;  %v14284_v60 = vld [vmem:[%s12995_s16 + $0x359] sm:$0xff] }
 0x297   : > { %v4406_v4 = vadd.f32 %v4142_v62, %v3356_v63  ;;  %11223 = vmatmul.msk.f32.gmra.mxu0 %vm802_vm0, %v14135_v23 }
 0x298   : > { %11351 = vmatmul.msk.f32.gmra.mxu1 %vm802_vm0, %v14132_v21 }
 0x299   : > { %v4538_v5 = vadd.f32 %v13698_v34, %v4406_v4  ;;  %11615 = vmatmul.msk.f32.gmra.mxu2 %vm802_vm0, %v14196_v2  ;;  %11879 = vmatmul.msk.f32.gmra.mxu3 %vm802_vm0, %v14199_v3 }
 0x29b   : > { %v4666_v7 = vmax.f32 %v4538_v5, 0.0 }
 0x29c   : > { %v3095_v8 = vpop.f32.mrf.mxu2  ;;  %v4145_v9 = vpop.f32.mrf.mxu3 }
 0x29d   : > { %4795 = vst.msk [vmem:[#allocation2 + $0x258] sm:$0xff] %vm4734_vm1, %v4666_v7  ;;  %v3357_v10 = vadd.f32 %v3095_v8, %v2173_v6  ;;  %v1390_v11 = vpop.f32.mrf.mxu0  ;;  %v2175_v12 = vpop.f32.mrf.mxu1  ;;  %v14297_v6 = vld [vmem:[%s12995_s16 + $0x360] sm:$0xff] }
 0x29e   : > { %v2176_v17 = vadd.f32 %v2175_v12, %v1390_v11  ;;  %v14300_v7 = vld [vmem:[%s12995_s16 + $0x361] sm:$0xff] }
 0x29f   : > { %v4407_v34 = vadd.f32 %v4145_v9, %v3357_v10  ;;  %11224 = vmatmul.msk.f32.gmra.mxu0 %vm802_vm0, %v14151_v19 }
 0x2a0   : > { %11352 = vmatmul.msk.f32.gmra.mxu1 %vm802_vm0, %v14148_v33 }
 0x2a1   : > { %v4539_v16 = vadd.f32 %v14224_v15, %v4407_v34  ;;  %11616 = vmatmul.msk.f32.gmra.mxu2 %vm802_vm0, %v14212_v13  ;;  %11880 = vmatmul.msk.f32.gmra.mxu3 %vm802_vm0, %v14215_v14 }
 0x2a3   : > { %v4667_v18 = vmax.f32 %v4539_v16, 0.0 }
 0x2a4   : > { %v3098_v20 = vpop.f32.mrf.mxu2  ;;  %v4148_v21 = vpop.f32.mrf.mxu3 }
 0x2a5   : > { %4796 = vst.msk [vmem:[#allocation2 + $0x260] sm:$0xff] %vm4734_vm1, %v4667_v18  ;;  %v3358_v23 = vadd.f32 %v3098_v20, %v2176_v17  ;;  %v1393_v24 = vpop.f32.mrf.mxu0  ;;  %v2178_v25 = vpop.f32.mrf.mxu1  ;;  %v14313_v17 = vld [vmem:[%s12995_s16 + $0x370] sm:$0xff] }
 0x2a6   : > { %v2179_v30 = vadd.f32 %v2178_v25, %v1393_v24  ;;  %v14316_v18 = vld [vmem:[%s12995_s16 + $0x371] sm:$0xff] }
 0x2a7   : > { %v4408_v28 = vadd.f32 %v4148_v21, %v3358_v23  ;;  %11225 = vmatmul.msk.f32.gmra.mxu0 %vm802_vm0, %v14167_v45 }
 0x2a8   : > { %11353 = vmatmul.msk.f32.gmra.mxu1 %vm802_vm0, %v14164_v44 }
 0x2a9   : > { %v4540_v29 = vadd.f32 %v14224_v15, %v4408_v28  ;;  %11617 = vmatmul.msk.f32.gmra.mxu2 %vm802_vm0, %v14233_v26  ;;  %11881 = vmatmul.msk.f32.gmra.mxu3 %vm802_vm0, %v14236_v27 }
 0x2ab   : > { %v4668_v31 = vmax.f32 %v4540_v29, 0.0 }
 0x2ac   : > { %v3101_v32 = vpop.f32.mrf.mxu2  ;;  %v4151_v33 = vpop.f32.mrf.mxu3 }
 0x2ad   : > { %4797 = vst.msk [vmem:[#allocation2 + $0x268] sm:$0xff] %vm4734_vm1, %v4668_v31  ;;  %v3359_v19 = vadd.f32 %v3101_v32, %v2179_v30  ;;  %v1396_v35 = vpop.f32.mrf.mxu0  ;;  %v2181_v36 = vpop.f32.mrf.mxu1  ;;  %v14329_v30 = vld [vmem:[%s12995_s16 + $0x378] sm:$0xff] }
 0x2ae   : > { %v2182_v41 = vadd.f32 %v2181_v36, %v1396_v35  ;;  %v14332_v31 = vld [vmem:[%s12995_s16 + $0x379] sm:$0xff] }
 0x2af   : > { %v4409_v39 = vadd.f32 %v4151_v33, %v3359_v19  ;;  %11226 = vmatmul.msk.f32.gmra.mxu0 %vm802_vm0, %v14183_v56 }
 0x2b0   : > { %11354 = vmatmul.msk.f32.gmra.mxu1 %vm802_vm0, %v14180_v55 }
 0x2b1   : > { %v4541_v40 = vadd.f32 %v14224_v15, %v4409_v39  ;;  %11618 = vmatmul.msk.f32.gmra.mxu2 %vm802_vm0, %v14249_v37  ;;  %11882 = vmatmul.msk.f32.gmra.mxu3 %vm802_vm0, %v14252_v38 }
 0x2b3   : > { %v4669_v42 = vmax.f32 %v4541_v40, 0.0 }
 0x2b4   : > { %v3104_v43 = vpop.f32.mrf.mxu2  ;;  %v4154_v44 = vpop.f32.mrf.mxu3 }
 0x2b5   : > { %4798 = vst.msk [vmem:[#allocation2 + $0x270] sm:$0xff] %vm4734_vm1, %v4669_v42  ;;  %v3360_v45 = vadd.f32 %v3104_v43, %v2182_v41  ;;  %v1399_v46 = vpop.f32.mrf.mxu0  ;;  %v2184_v47 = vpop.f32.mrf.mxu1  ;;  %v14345_v41 = vld [vmem:[%s12995_s16 + $0x380] sm:$0xff] }
 0x2b6   : > { %v2185_v52 = vadd.f32 %v2184_v47, %v1399_v46  ;;  %v14348_v42 = vld [vmem:[%s12995_s16 + $0x381] sm:$0xff] }
 0x2b7   : > { %v4410_v50 = vadd.f32 %v4154_v44, %v3360_v45  ;;  %11227 = vmatmul.msk.f32.gmra.mxu0 %vm802_vm0, %v14199_v3 }
 0x2b8   : > { %11355 = vmatmul.msk.f32.gmra.mxu1 %vm802_vm0, %v14196_v2 }
 0x2b9   : > { %v4542_v51 = vadd.f32 %v14224_v15, %v4410_v50  ;;  %11619 = vmatmul.msk.f32.gmra.mxu2 %vm802_vm0, %v14265_v48  ;;  %11883 = vmatmul.msk.f32.gmra.mxu3 %vm802_vm0, %v14268_v49 }
 0x2bb   : > { %v4670_v53 = vmax.f32 %v4542_v51, 0.0 }
 0x2bc   : > { %v3107_v54 = vpop.f32.mrf.mxu2  ;;  %v4157_v55 = vpop.f32.mrf.mxu3 }
 0x2bd   : > { %4799 = vst.msk [vmem:[#allocation2 + $0x280] sm:$0xff] %vm4734_vm1, %v4670_v53  ;;  %v3361_v56 = vadd.f32 %v3107_v54, %v2185_v52  ;;  %v1402_v57 = vpop.f32.mrf.mxu0  ;;  %v2187_v58 = vpop.f32.mrf.mxu1  ;;  %v14361_v52 = vld [vmem:[%s12995_s16 + $0x388] sm:$0xff] }
 0x2be   : > { %v2188_v63 = vadd.f32 %v2187_v58, %v1402_v57  ;;  %v14364_v53 = vld [vmem:[%s12995_s16 + $0x389] sm:$0xff] }
 0x2bf   : > { %v4411_v61 = vadd.f32 %v4157_v55, %v3361_v56  ;;  %11228 = vmatmul.msk.f32.gmra.mxu0 %vm802_vm0, %v14215_v14 }
 0x2c0   : > { %11356 = vmatmul.msk.f32.gmra.mxu1 %vm802_vm0, %v14212_v13 }
 0x2c1   : > { %v4543_v62 = vadd.f32 %v14224_v15, %v4411_v61  ;;  %11620 = vmatmul.msk.f32.gmra.mxu2 %vm802_vm0, %v14281_v59  ;;  %11884 = vmatmul.msk.f32.gmra.mxu3 %vm802_vm0, %v14284_v60 }
 0x2c3   : > { %v4671_v0 = vmax.f32 %v4543_v62, 0.0 }
 0x2c4   : > { %v3110_v1 = vpop.f32.mrf.mxu2  ;;  %v4160_v2 = vpop.f32.mrf.mxu3 }
 0x2c5   : > { %4800 = vst.msk [vmem:[#allocation2 + $0x288] sm:$0xff] %vm4734_vm1, %v4671_v0  ;;  %v3362_v3 = vadd.f32 %v3110_v1, %v2188_v63  ;;  %v1405_v4 = vpop.f32.mrf.mxu0  ;;  %v2190_v5 = vpop.f32.mrf.mxu1  ;;  %v14377_v63 = vld [vmem:[%s12995_s16 + $0x398] sm:$0xff] }
 0x2c6   : > { %v2191_v10 = vadd.f32 %v2190_v5, %v1405_v4  ;;  %v14380_v0 = vld [vmem:[%s12995_s16 + $0x399] sm:$0xff] }
 0x2c7   : > { %v4412_v8 = vadd.f32 %v4160_v2, %v3362_v3  ;;  %11229 = vmatmul.msk.f32.gmra.mxu0 %vm802_vm0, %v14236_v27 }
 0x2c8   : > { %11357 = vmatmul.msk.f32.gmra.mxu1 %vm802_vm0, %v14233_v26 }
 0x2c9   : > { %v4544_v9 = vadd.f32 %v14224_v15, %v4412_v8  ;;  %11621 = vmatmul.msk.f32.gmra.mxu2 %vm802_vm0, %v14297_v6  ;;  %11885 = vmatmul.msk.f32.gmra.mxu3 %vm802_vm0, %v14300_v7 }
 0x2cb   : > { %v4672_v11 = vmax.f32 %v4544_v9, 0.0 }
 0x2cc   : > { %v3113_v12 = vpop.f32.mrf.mxu2  ;;  %v4163_v13 = vpop.f32.mrf.mxu3 }
 0x2cd   : > { %4801 = vst.msk [vmem:[#allocation2 + $0x290] sm:$0xff] %vm4734_vm1, %v4672_v11  ;;  %v3363_v14 = vadd.f32 %v3113_v12, %v2191_v10  ;;  %v1408_v34 = vpop.f32.mrf.mxu0  ;;  %v2193_v16 = vpop.f32.mrf.mxu1  ;;  %v14393_v10 = vld [vmem:[%s12995_s16 + $0x3a0] sm:$0xff] }
 0x2ce   : > { %v2194_v23 = vadd.f32 %v2193_v16, %v1408_v34  ;;  %v14396_v11 = vld [vmem:[%s12995_s16 + $0x3a1] sm:$0xff] }
 0x2cf   : > { %v4413_v20 = vadd.f32 %v4163_v13, %v3363_v14  ;;  %11230 = vmatmul.msk.f32.gmra.mxu0 %vm802_vm0, %v14252_v38 }
 0x2d0   : > { %11358 = vmatmul.msk.f32.gmra.mxu1 %vm802_vm0, %v14249_v37 }
 0x2d1   : > { %v4545_v21 = vadd.f32 %v14224_v15, %v4413_v20  ;;  %11622 = vmatmul.msk.f32.gmra.mxu2 %vm802_vm0, %v14313_v17  ;;  %11886 = vmatmul.msk.f32.gmra.mxu3 %vm802_vm0, %v14316_v18 }
 0x2d3   : > { %v4673_v24 = vmax.f32 %v4545_v21, 0.0 }
 0x2d4   : > { %v3116_v25 = vpop.f32.mrf.mxu2  ;;  %v4166_v26 = vpop.f32.mrf.mxu3 }
 0x2d5   : > { %4802 = vst.msk [vmem:[#allocation2 + $0x298] sm:$0xff] %vm4734_vm1, %v4673_v24  ;;  %v3364_v27 = vadd.f32 %v3116_v25, %v2194_v23  ;;  %v1411_v28 = vpop.f32.mrf.mxu0  ;;  %v2196_v29 = vpop.f32.mrf.mxu1  ;;  %v14409_v23 = vld [vmem:[%s12995_s16 + $0x3a8] sm:$0xff] }
 0x2d6   : > { %v2197_v19 = vadd.f32 %v2196_v29, %v1411_v28  ;;  %v14412_v24 = vld [vmem:[%s12995_s16 + $0x3a9] sm:$0xff] }
 0x2d7   : > { %v4414_v32 = vadd.f32 %v4166_v26, %v3364_v27  ;;  %11231 = vmatmul.msk.f32.gmra.mxu0 %vm802_vm0, %v14268_v49 }
 0x2d8   : > { %11359 = vmatmul.msk.f32.gmra.mxu1 %vm802_vm0, %v14265_v48 }
 0x2d9   : > { %v4546_v33 = vadd.f32 %v14224_v15, %v4414_v32  ;;  %11623 = vmatmul.msk.f32.gmra.mxu2 %vm802_vm0, %v14329_v30  ;;  %11887 = vmatmul.msk.f32.gmra.mxu3 %vm802_vm0, %v14332_v31 }
 0x2db   : > { %v4674_v35 = vmax.f32 %v4546_v33, 0.0 }
 0x2dc   : > { %v3119_v36 = vpop.f32.mrf.mxu2  ;;  %v4169_v37 = vpop.f32.mrf.mxu3 }
 0x2dd   : > { %4803 = vst.msk [vmem:[#allocation2 + $0x2a8] sm:$0xff] %vm4734_vm1, %v4674_v35  ;;  %v3365_v38 = vadd.f32 %v3119_v36, %v2197_v19  ;;  %v1414_v39 = vpop.f32.mrf.mxu0  ;;  %v2199_v40 = vpop.f32.mrf.mxu1  ;;  %v14425_v19 = vld [vmem:[%s12995_s16 + $0x3b0] sm:$0xff] }
 0x2de   : > { %v2200_v45 = vadd.f32 %v2199_v40, %v1414_v39  ;;  %v14428_v35 = vld [vmem:[%s12995_s16 + $0x3b1] sm:$0xff] }
 0x2df   : > { %v4415_v43 = vadd.f32 %v4169_v37, %v3365_v38  ;;  %11232 = vmatmul.msk.f32.gmra.mxu0 %vm802_vm0, %v14284_v60 }
 0x2e0   : > { %11360 = vmatmul.msk.f32.gmra.mxu1 %vm802_vm0, %v14281_v59 }
 0x2e1   : > { %v4547_v44 = vadd.f32 %v14224_v15, %v4415_v43  ;;  %11624 = vmatmul.msk.f32.gmra.mxu2 %vm802_vm0, %v14345_v41  ;;  %11888 = vmatmul.msk.f32.gmra.mxu3 %vm802_vm0, %v14348_v42 }
 0x2e3   : > { %v4675_v46 = vmax.f32 %v4547_v44, 0.0 }
 0x2e4   : > { %v3122_v47 = vpop.f32.mrf.mxu2  ;;  %v4172_v48 = vpop.f32.mrf.mxu3 }
 0x2e5   : > { %4804 = vst.msk [vmem:[#allocation2 + $0x2b0] sm:$0xff] %vm4734_vm1, %v4675_v46  ;;  %v3366_v49 = vadd.f32 %v3122_v47, %v2200_v45  ;;  %v1417_v50 = vpop.f32.mrf.mxu0  ;;  %v2202_v51 = vpop.f32.mrf.mxu1  ;;  %v14441_v45 = vld [vmem:[%s12995_s16 + $0x3c0] sm:$0xff] }
 0x2e6   : > { %v2203_v56 = vadd.f32 %v2202_v51, %v1417_v50  ;;  %v14444_v46 = vld [vmem:[%s12995_s16 + $0x3c1] sm:$0xff] }
 0x2e7   : > { %v4416_v54 = vadd.f32 %v4172_v48, %v3366_v49  ;;  %11233 = vmatmul.msk.f32.gmra.mxu0 %vm802_vm0, %v14300_v7 }
 0x2e8   : > { %11361 = vmatmul.msk.f32.gmra.mxu1 %vm802_vm0, %v14297_v6 }
 0x2e9   : > { %v4548_v55 = vadd.f32 %v14224_v15, %v4416_v54  ;;  %11625 = vmatmul.msk.f32.gmra.mxu2 %vm802_vm0, %v14361_v52  ;;  %11889 = vmatmul.msk.f32.gmra.mxu3 %vm802_vm0, %v14364_v53 }
 0x2eb   : > { %v4676_v57 = vmax.f32 %v4548_v55, 0.0 }
 0x2ec   : > { %v3125_v58 = vpop.f32.mrf.mxu2  ;;  %v4175_v59 = vpop.f32.mrf.mxu3 }
 0x2ed   : > { %4805 = vst.msk [vmem:[#allocation2 + $0x2b8] sm:$0xff] %vm4734_vm1, %v4676_v57  ;;  %v3367_v60 = vadd.f32 %v3125_v58, %v2203_v56  ;;  %v1420_v61 = vpop.f32.mrf.mxu0  ;;  %v2205_v62 = vpop.f32.mrf.mxu1  ;;  %v14457_v56 = vld [vmem:[%s12995_s16 + $0x3c8] sm:$0xff] }
 0x2ee   : > { %v2206_v3 = vadd.f32 %v2205_v62, %v1420_v61  ;;  %v14460_v57 = vld [vmem:[%s12995_s16 + $0x3c9] sm:$0xff] }
 0x2ef   : > { %v4417_v1 = vadd.f32 %v4175_v59, %v3367_v60  ;;  %11234 = vmatmul.msk.f32.gmra.mxu0 %vm802_vm0, %v14316_v18 }
 0x2f0   : > { %11362 = vmatmul.msk.f32.gmra.mxu1 %vm802_vm0, %v14313_v17 }
 0x2f1   : > { %v4549_v2 = vadd.f32 %v14224_v15, %v4417_v1  ;;  %11626 = vmatmul.msk.f32.gmra.mxu2 %vm802_vm0, %v14377_v63  ;;  %11890 = vmatmul.msk.f32.gmra.mxu3 %vm802_vm0, %v14380_v0 }
 0x2f3   : > { %v4677_v4 = vmax.f32 %v4549_v2, 0.0 }
 0x2f4   : > { %v3128_v5 = vpop.f32.mrf.mxu2  ;;  %v4178_v6 = vpop.f32.mrf.mxu3 }
 0x2f5   : > { %4806 = vst.msk [vmem:[#allocation2 + $0x2c0] sm:$0xff] %vm4734_vm1, %v4677_v4  ;;  %v3368_v7 = vadd.f32 %v3128_v5, %v2206_v3  ;;  %v1423_v8 = vpop.f32.mrf.mxu0  ;;  %v2208_v9 = vpop.f32.mrf.mxu1  ;;  %v14473_v3 = vld [vmem:[%s12995_s16 + $0x3d0] sm:$0xff] }
 0x2f6   : > { %v2209_v14 = vadd.f32 %v2208_v9, %v1423_v8  ;;  %v14476_v4 = vld [vmem:[%s12995_s16 + $0x3d1] sm:$0xff] }
 0x2f7   : > { %v4418_v12 = vadd.f32 %v4178_v6, %v3368_v7  ;;  %11235 = vmatmul.msk.f32.gmra.mxu0 %vm802_vm0, %v14332_v31 }
 0x2f8   : > { %11363 = vmatmul.msk.f32.gmra.mxu1 %vm802_vm0, %v14329_v30 }
 0x2f9   : > { %v4550_v13 = vadd.f32 %v14224_v15, %v4418_v12  ;;  %11627 = vmatmul.msk.f32.gmra.mxu2 %vm802_vm0, %v14393_v10  ;;  %11891 = vmatmul.msk.f32.gmra.mxu3 %vm802_vm0, %v14396_v11 }
 0x2fb   : > { %v4678_v34 = vmax.f32 %v4550_v13, 0.0 }
 0x2fc   : > { %v3131_v16 = vpop.f32.mrf.mxu2  ;;  %v4181_v17 = vpop.f32.mrf.mxu3 }
 0x2fd   : > { %4807 = vst.msk [vmem:[#allocation2 + $0x2d0] sm:$0xff] %vm4734_vm1, %v4678_v34  ;;  %v3369_v18 = vadd.f32 %v3131_v16, %v2209_v14  ;;  %v1426_v20 = vpop.f32.mrf.mxu0  ;;  %v2211_v21 = vpop.f32.mrf.mxu1  ;;  %v14489_v14 = vld [vmem:[%s12995_s16 + $0x3d8] sm:$0xff] }
 0x2fe   : > { %v2212_v27 = vadd.f32 %v2211_v21, %v1426_v20  ;;  %v14492_v34 = vld [vmem:[%s12995_s16 + $0x3d9] sm:$0xff] }
 0x2ff   : > { %v4419_v25 = vadd.f32 %v4181_v17, %v3369_v18  ;;  %11236 = vmatmul.msk.f32.gmra.mxu0 %vm802_vm0, %v14348_v42 }
 0x300   : > { %11364 = vmatmul.msk.f32.gmra.mxu1 %vm802_vm0, %v14345_v41 }
 0x301   : > { %v4551_v26 = vadd.f32 %v14224_v15, %v4419_v25  ;;  %11628 = vmatmul.msk.f32.gmra.mxu2 %vm802_vm0, %v14409_v23  ;;  %11892 = vmatmul.msk.f32.gmra.mxu3 %vm802_vm0, %v14412_v24 }
 0x303   : > { %v4679_v28 = vmax.f32 %v4551_v26, 0.0 }
 0x304   : > { %v3134_v29 = vpop.f32.mrf.mxu2  ;;  %v4184_v30 = vpop.f32.mrf.mxu3 }
 0x305   : > { %4808 = vst.msk [vmem:[#allocation2 + $0x2d8] sm:$0xff] %vm4734_vm1, %v4679_v28  ;;  %v3370_v31 = vadd.f32 %v3134_v29, %v2212_v27  ;;  %v1429_v32 = vpop.f32.mrf.mxu0  ;;  %v2214_v33 = vpop.f32.mrf.mxu1  ;;  %v14505_v27 = vld [vmem:[%s12995_s16 + $0x3e8] sm:$0xff] }
 0x306   : > { %v2215_v38 = vadd.f32 %v2214_v33, %v1429_v32  ;;  %v14508_v28 = vld [vmem:[%s12995_s16 + $0x3e9] sm:$0xff] }
 0x307   : > { %v4420_v36 = vadd.f32 %v4184_v30, %v3370_v31  ;;  %11237 = vmatmul.msk.f32.gmra.mxu0 %vm802_vm0, %v14364_v53 }
 0x308   : > { %11365 = vmatmul.msk.f32.gmra.mxu1 %vm802_vm0, %v14361_v52 }
 0x309   : > { %v4552_v37 = vadd.f32 %v14224_v15, %v4420_v36  ;;  %11629 = vmatmul.msk.f32.gmra.mxu2 %vm802_vm0, %v14425_v19  ;;  %11893 = vmatmul.msk.f32.gmra.mxu3 %vm802_vm0, %v14428_v35 }
 0x30b   : > { %v4680_v39 = vmax.f32 %v4552_v37, 0.0 }
 0x30c   : > { %v3137_v40 = vpop.f32.mrf.mxu2  ;;  %v4187_v41 = vpop.f32.mrf.mxu3 }
 0x30d   : > { %4809 = vst.msk [vmem:[#allocation2 + $0x2e0] sm:$0xff] %vm4734_vm1, %v4680_v39  ;;  %v3371_v42 = vadd.f32 %v3137_v40, %v2215_v38  ;;  %v1432_v43 = vpop.f32.mrf.mxu0  ;;  %v2217_v44 = vpop.f32.mrf.mxu1  ;;  %v14521_v38 = vld [vmem:[%s12995_s16 + $0x3f0] sm:$0xff] }
 0x30e   : > { %v2218_v49 = vadd.f32 %v2217_v44, %v1432_v43  ;;  %v14524_v39 = vld [vmem:[%s12995_s16 + $0x3f1] sm:$0xff] }
 0x30f   : > { %v4421_v47 = vadd.f32 %v4187_v41, %v3371_v42  ;;  %11238 = vmatmul.msk.f32.gmra.mxu0 %vm802_vm0, %v14380_v0 }
 0x310   : > { %11366 = vmatmul.msk.f32.gmra.mxu1 %vm802_vm0, %v14377_v63 }
 0x311   : > { %v4553_v48 = vadd.f32 %v14224_v15, %v4421_v47  ;;  %11630 = vmatmul.msk.f32.gmra.mxu2 %vm802_vm0, %v14441_v45  ;;  %11894 = vmatmul.msk.f32.gmra.mxu3 %vm802_vm0, %v14444_v46 }
 0x313   : > { %v4681_v50 = vmax.f32 %v4553_v48, 0.0 }
 0x314   : > { %v3140_v51 = vpop.f32.mrf.mxu2  ;;  %v4190_v52 = vpop.f32.mrf.mxu3 }
 0x315   : > { %4810 = vst.msk [vmem:[#allocation2 + $0x2e8] sm:$0xff] %vm4734_vm1, %v4681_v50  ;;  %v3372_v53 = vadd.f32 %v3140_v51, %v2218_v49  ;;  %v1435_v54 = vpop.f32.mrf.mxu0  ;;  %v2220_v55 = vpop.f32.mrf.mxu1  ;;  %v14537_v49 = vld [vmem:[%s12995_s16 + $0x3f8] sm:$0xff] }
 0x316   : > { %v2221_v60 = vadd.f32 %v2220_v55, %v1435_v54  ;;  %v14540_v50 = vld [vmem:[%s12995_s16 + $0x3f9] sm:$0xff] }
 0x317   : > { %v4422_v58 = vadd.f32 %v4190_v52, %v3372_v53  ;;  %11239 = vmatmul.msk.f32.gmra.mxu0 %vm802_vm0, %v14396_v11 }
 0x318   : > { %11367 = vmatmul.msk.f32.gmra.mxu1 %vm802_vm0, %v14393_v10 }
 0x319   : > { %v4554_v59 = vadd.f32 %v14224_v15, %v4422_v58  ;;  %11631 = vmatmul.msk.f32.gmra.mxu2 %vm802_vm0, %v14457_v56  ;;  %11895 = vmatmul.msk.f32.gmra.mxu3 %vm802_vm0, %v14460_v57 }
 0x31b   : > { %v4682_v61 = vmax.f32 %v4554_v59, 0.0 }
 0x31c   : > { %v3143_v62 = vpop.f32.mrf.mxu2  ;;  %v4193_v63 = vpop.f32.mrf.mxu3 }
 0x31d   : > { %4811 = vst.msk [vmem:[#allocation2 + $0x2f8] sm:$0xff] %vm4734_vm1, %v4682_v61  ;;  %v3373_v0 = vadd.f32 %v3143_v62, %v2221_v60  ;;  %v1438_v1 = vpop.f32.mrf.mxu0  ;;  %v2223_v2 = vpop.f32.mrf.mxu1  ;;  %v14553_v60 = vld [vmem:[%s12995_s16 + $0x400] sm:$0xff] }
 0x31e   : > { %v2224_v7 = vadd.f32 %v2223_v2, %v1438_v1  ;;  %v14556_v61 = vld [vmem:[%s12995_s16 + $0x401] sm:$0xff] }
 0x31f   : > { %v4423_v5 = vadd.f32 %v4193_v63, %v3373_v0  ;;  %11240 = vmatmul.msk.f32.gmra.mxu0 %vm802_vm0, %v14412_v24 }
 0x320   : > { %11368 = vmatmul.msk.f32.gmra.mxu1 %vm802_vm0, %v14409_v23 }
 0x321   : > { %v4555_v6 = vadd.f32 %v14224_v15, %v4423_v5  ;;  %11632 = vmatmul.msk.f32.gmra.mxu2 %vm802_vm0, %v14473_v3  ;;  %11896 = vmatmul.msk.f32.gmra.mxu3 %vm802_vm0, %v14476_v4 }
 0x323   : > { %v4683_v8 = vmax.f32 %v4555_v6, 0.0 }
 0x324   : > { %v3146_v9 = vpop.f32.mrf.mxu2  ;;  %v4196_v10 = vpop.f32.mrf.mxu3 }
 0x325   : > { %4812 = vst.msk [vmem:[#allocation2 + $0x300] sm:$0xff] %vm4734_vm1, %v4683_v8  ;;  %v3374_v11 = vadd.f32 %v3146_v9, %v2224_v7  ;;  %v1441_v12 = vpop.f32.mrf.mxu0  ;;  %v2226_v13 = vpop.f32.mrf.mxu1  ;;  %v14569_v7 = vld [vmem:[%s12995_s16 + $0x410] sm:$0xff] }
 0x326   : > { %v2227_v18 = vadd.f32 %v2226_v13, %v1441_v12  ;;  %v14572_v8 = vld [vmem:[%s12995_s16 + $0x411] sm:$0xff] }
 0x327   : > { %v4424_v16 = vadd.f32 %v4196_v10, %v3374_v11  ;;  %11241 = vmatmul.msk.f32.gmra.mxu0 %vm802_vm0, %v14428_v35 }
 0x328   : > { %11369 = vmatmul.msk.f32.gmra.mxu1 %vm802_vm0, %v14425_v19 }
 0x329   : > { %v4556_v17 = vadd.f32 %v14224_v15, %v4424_v16  ;;  %11633 = vmatmul.msk.f32.gmra.mxu2 %vm802_vm0, %v14489_v14  ;;  %11897 = vmatmul.msk.f32.gmra.mxu3 %vm802_vm0, %v14492_v34 }
 0x32b   : > { %v4684_v20 = vmax.f32 %v4556_v17, 0.0 }
 0x32c   : > { %v3149_v21 = vpop.f32.mrf.mxu2  ;;  %v4199_v23 = vpop.f32.mrf.mxu3 }
 0x32d   : > { %4813 = vst.msk [vmem:[#allocation2 + $0x308] sm:$0xff] %vm4734_vm1, %v4684_v20  ;;  %v3375_v24 = vadd.f32 %v3149_v21, %v2227_v18  ;;  %v1444_v25 = vpop.f32.mrf.mxu0  ;;  %v2229_v26 = vpop.f32.mrf.mxu1  ;;  %v14585_v18 = vld [vmem:[%s12995_s16 + $0x418] sm:$0xff] }
 0x32e   : > { %v2230_v31 = vadd.f32 %v2229_v26, %v1444_v25  ;;  %v14588_v20 = vld [vmem:[%s12995_s16 + $0x419] sm:$0xff] }
 0x32f   : > { %v4425_v29 = vadd.f32 %v4199_v23, %v3375_v24  ;;  %11242 = vmatmul.msk.f32.gmra.mxu0 %vm802_vm0, %v14444_v46 }
 0x330   : > { %11370 = vmatmul.msk.f32.gmra.mxu1 %vm802_vm0, %v14441_v45 }
 0x331   : > { %v4557_v30 = vadd.f32 %v14224_v15, %v4425_v29  ;;  %11634 = vmatmul.msk.f32.gmra.mxu2 %vm802_vm0, %v14505_v27  ;;  %11898 = vmatmul.msk.f32.gmra.mxu3 %vm802_vm0, %v14508_v28 }
 0x333   : > { %v4685_v32 = vmax.f32 %v4557_v30, 0.0 }
 0x334   : > { %v3152_v33 = vpop.f32.mrf.mxu2  ;;  %v4202_v19 = vpop.f32.mrf.mxu3 }
 0x335   : > { %4814 = vst.msk [vmem:[#allocation2 + $0x310] sm:$0xff] %vm4734_vm1, %v4685_v32  ;;  %v3376_v35 = vadd.f32 %v3152_v33, %v2230_v31  ;;  %v1447_v36 = vpop.f32.mrf.mxu0  ;;  %v2232_v37 = vpop.f32.mrf.mxu1  ;;  %v14601_v31 = vld [vmem:[%s12995_s16 + $0x420] sm:$0xff] }
 0x336   : > { %v2233_v42 = vadd.f32 %v2232_v37, %v1447_v36  ;;  %v14604_v32 = vld [vmem:[%s12995_s16 + $0x421] sm:$0xff] }
 0x337   : > { %v4426_v40 = vadd.f32 %v4202_v19, %v3376_v35  ;;  %11243 = vmatmul.msk.f32.gmra.mxu0 %vm802_vm0, %v14460_v57 }
 0x338   : > { %11371 = vmatmul.msk.f32.gmra.mxu1 %vm802_vm0, %v14457_v56 }
 0x339   : > { %v4558_v41 = vadd.f32 %v14224_v15, %v4426_v40  ;;  %11635 = vmatmul.msk.f32.gmra.mxu2 %vm802_vm0, %v14521_v38  ;;  %11899 = vmatmul.msk.f32.gmra.mxu3 %vm802_vm0, %v14524_v39 }
 0x33b   : > { %v4686_v43 = vmax.f32 %v4558_v41, 0.0 }
 0x33c   : > { %v3155_v44 = vpop.f32.mrf.mxu2  ;;  %v4205_v45 = vpop.f32.mrf.mxu3 }
 0x33d   : > { %4815 = vst.msk [vmem:[#allocation2 + $0x320] sm:$0xff] %vm4734_vm1, %v4686_v43  ;;  %v3377_v46 = vadd.f32 %v3155_v44, %v2233_v42  ;;  %v1450_v47 = vpop.f32.mrf.mxu0  ;;  %v2235_v48 = vpop.f32.mrf.mxu1  ;;  %v14617_v42 = vld [vmem:[%s12995_s16 + $0x428] sm:$0xff] }
 0x33e   : > { %v2236_v53 = vadd.f32 %v2235_v48, %v1450_v47  ;;  %v14620_v43 = vld [vmem:[%s12995_s16 + $0x429] sm:$0xff] }
 0x33f   : > { %v4427_v51 = vadd.f32 %v4205_v45, %v3377_v46  ;;  %11244 = vmatmul.msk.f32.gmra.mxu0 %vm802_vm0, %v14476_v4 }
 0x340   : > { %11372 = vmatmul.msk.f32.gmra.mxu1 %vm802_vm0, %v14473_v3 }
 0x341   : > { %v4559_v52 = vadd.f32 %v14224_v15, %v4427_v51  ;;  %11636 = vmatmul.msk.f32.gmra.mxu2 %vm802_vm0, %v14537_v49  ;;  %11900 = vmatmul.msk.f32.gmra.mxu3 %vm802_vm0, %v14540_v50 }
 0x343   : > { %v4687_v54 = vmax.f32 %v4559_v52, 0.0 }
 0x344   : > { %v3158_v55 = vpop.f32.mrf.mxu2  ;;  %v4208_v56 = vpop.f32.mrf.mxu3 }
 0x345   : > { %4816 = vst.msk [vmem:[#allocation2 + $0x328] sm:$0xff] %vm4734_vm1, %v4687_v54  ;;  %v3378_v57 = vadd.f32 %v3158_v55, %v2236_v53  ;;  %v1453_v58 = vpop.f32.mrf.mxu0  ;;  %v2238_v59 = vpop.f32.mrf.mxu1  ;;  %v14633_v53 = vld [vmem:[%s12995_s16 + $0x438] sm:$0xff] }
 0x346   : > { %v2239_v0 = vadd.f32 %v2238_v59, %v1453_v58  ;;  %v14636_v54 = vld [vmem:[%s12995_s16 + $0x439] sm:$0xff] }
 0x347   : > { %v4428_v62 = vadd.f32 %v4208_v56, %v3378_v57  ;;  %11245 = vmatmul.msk.f32.gmra.mxu0 %vm802_vm0, %v14492_v34 }
 0x348   : > { %11373 = vmatmul.msk.f32.gmra.mxu1 %vm802_vm0, %v14489_v14 }
 0x349   : > { %v4560_v63 = vadd.f32 %v14224_v15, %v4428_v62  ;;  %11637 = vmatmul.msk.f32.gmra.mxu2 %vm802_vm0, %v14553_v60  ;;  %11901 = vmatmul.msk.f32.gmra.mxu3 %vm802_vm0, %v14556_v61 }
 0x34b   : > { %v4688_v1 = vmax.f32 %v4560_v63, 0.0 }
 0x34c   : > { %v3161_v2 = vpop.f32.mrf.mxu2  ;;  %v4211_v3 = vpop.f32.mrf.mxu3 }
 0x34d   : > { %4817 = vst.msk [vmem:[#allocation2 + $0x330] sm:$0xff] %vm4734_vm1, %v4688_v1  ;;  %v3379_v4 = vadd.f32 %v3161_v2, %v2239_v0  ;;  %v1456_v5 = vpop.f32.mrf.mxu0  ;;  %v2241_v6 = vpop.f32.mrf.mxu1  ;;  %v14649_v0 = vld [vmem:[%s12995_s16 + $0x440] sm:$0xff] }
 0x34e   : > { %v2242_v11 = vadd.f32 %v2241_v6, %v1456_v5  ;;  %v14652_v1 = vld [vmem:[%s12995_s16 + $0x441] sm:$0xff] }
 0x34f   : > { %v4429_v9 = vadd.f32 %v4211_v3, %v3379_v4  ;;  %11246 = vmatmul.msk.f32.gmra.mxu0 %vm802_vm0, %v14508_v28 }
 0x350   : > { %11374 = vmatmul.msk.f32.gmra.mxu1 %vm802_vm0, %v14505_v27 }
 0x351   : > { %v4561_v10 = vadd.f32 %v14224_v15, %v4429_v9  ;;  %11638 = vmatmul.msk.f32.gmra.mxu2 %vm802_vm0, %v14569_v7  ;;  %11902 = vmatmul.msk.f32.gmra.mxu3 %vm802_vm0, %v14572_v8 }
 0x353   : > { %v4689_v12 = vmax.f32 %v4561_v10, 0.0 }
 0x354   : > { %v3164_v13 = vpop.f32.mrf.mxu2  ;;  %v4214_v14 = vpop.f32.mrf.mxu3 }
 0x355   : > { %4818 = vst.msk [vmem:[#allocation2 + $0x338] sm:$0xff] %vm4734_vm1, %v4689_v12  ;;  %v3380_v34 = vadd.f32 %v3164_v13, %v2242_v11  ;;  %v1459_v16 = vpop.f32.mrf.mxu0  ;;  %v2244_v17 = vpop.f32.mrf.mxu1  ;;  %v14665_v11 = vld [vmem:[%s12995_s16 + $0x448] sm:$0xff] }
 0x356   : > { %v2245_v24 = vadd.f32 %v2244_v17, %v1459_v16  ;;  %v14668_v12 = vld [vmem:[%s12995_s16 + $0x449] sm:$0xff] }
 0x357   : > { %v4430_v21 = vadd.f32 %v4214_v14, %v3380_v34  ;;  %11247 = vmatmul.msk.f32.gmra.mxu0 %vm802_vm0, %v14524_v39 }
 0x358   : > { %11375 = vmatmul.msk.f32.gmra.mxu1 %vm802_vm0, %v14521_v38 }
 0x359   : > { %v4562_v23 = vadd.f32 %v14224_v15, %v4430_v21  ;;  %11639 = vmatmul.msk.f32.gmra.mxu2 %vm802_vm0, %v14585_v18  ;;  %11903 = vmatmul.msk.f32.gmra.mxu3 %vm802_vm0, %v14588_v20 }
 0x35b   : > { %v4690_v25 = vmax.f32 %v4562_v23, 0.0 }
 0x35c   : > { %v3167_v26 = vpop.f32.mrf.mxu2  ;;  %v4217_v27 = vpop.f32.mrf.mxu3 }
 0x35d   : > { %4819 = vst.msk [vmem:[#allocation2 + $0x348] sm:$0xff] %vm4734_vm1, %v4690_v25  ;;  %v3381_v28 = vadd.f32 %v3167_v26, %v2245_v24  ;;  %v1462_v29 = vpop.f32.mrf.mxu0  ;;  %v2247_v30 = vpop.f32.mrf.mxu1  ;;  %v14681_v24 = vld [vmem:[%s12995_s16 + $0x450] sm:$0xff] }
 0x35e   : > { %v2248_v35 = vadd.f32 %v2247_v30, %v1462_v29  ;;  %v14684_v25 = vld [vmem:[%s12995_s16 + $0x451] sm:$0xff] }
 0x35f   : > { %v4431_v33 = vadd.f32 %v4217_v27, %v3381_v28  ;;  %11248 = vmatmul.msk.f32.gmra.mxu0 %vm802_vm0, %v14540_v50 }
 0x360   : > { %11376 = vmatmul.msk.f32.gmra.mxu1 %vm802_vm0, %v14537_v49 }
 0x361   : > { %v4563_v19 = vadd.f32 %v14224_v15, %v4431_v33  ;;  %11640 = vmatmul.msk.f32.gmra.mxu2 %vm802_vm0, %v14601_v31  ;;  %11904 = vmatmul.msk.f32.gmra.mxu3 %vm802_vm0, %v14604_v32 }
 0x363   : > { %v4691_v36 = vmax.f32 %v4563_v19, 0.0 }
 0x364   : > { %v3170_v37 = vpop.f32.mrf.mxu2  ;;  %v4220_v38 = vpop.f32.mrf.mxu3 }
 0x365   : > { %4820 = vst.msk [vmem:[#allocation2 + $0x350] sm:$0xff] %vm4734_vm1, %v4691_v36  ;;  %v3382_v39 = vadd.f32 %v3170_v37, %v2248_v35  ;;  %v1465_v40 = vpop.f32.mrf.mxu0  ;;  %v2250_v41 = vpop.f32.mrf.mxu1  ;;  %v14697_v35 = vld [vmem:[%s12995_s16 + $0x460] sm:$0xff] }
 0x366   : > { %v2251_v46 = vadd.f32 %v2250_v41, %v1465_v40  ;;  %v14700_v36 = vld [vmem:[%s12995_s16 + $0x461] sm:$0xff] }
 0x367   : > { %v4432_v44 = vadd.f32 %v4220_v38, %v3382_v39  ;;  %11249 = vmatmul.msk.f32.gmra.mxu0 %vm802_vm0, %v14556_v61 }
 0x368   : > { %11377 = vmatmul.msk.f32.gmra.mxu1 %vm802_vm0, %v14553_v60 }
 0x369   : > { %v4564_v45 = vadd.f32 %v14224_v15, %v4432_v44  ;;  %11641 = vmatmul.msk.f32.gmra.mxu2 %vm802_vm0, %v14617_v42  ;;  %11905 = vmatmul.msk.f32.gmra.mxu3 %vm802_vm0, %v14620_v43 }
 0x36b   : > { %v4692_v47 = vmax.f32 %v4564_v45, 0.0 }
 0x36c   : > { %v3173_v48 = vpop.f32.mrf.mxu2  ;;  %v4223_v49 = vpop.f32.mrf.mxu3 }
 0x36d   : > { %4821 = vst.msk [vmem:[#allocation2 + $0x358] sm:$0xff] %vm4734_vm1, %v4692_v47  ;;  %v3383_v50 = vadd.f32 %v3173_v48, %v2251_v46  ;;  %v1468_v51 = vpop.f32.mrf.mxu0  ;;  %v2253_v52 = vpop.f32.mrf.mxu1  ;;  %v14713_v46 = vld [vmem:[%s12995_s16 + $0x468] sm:$0xff] }
 0x36e   : > { %v2254_v57 = vadd.f32 %v2253_v52, %v1468_v51  ;;  %v14716_v47 = vld [vmem:[%s12995_s16 + $0x469] sm:$0xff] }
 0x36f   : > { %v4433_v55 = vadd.f32 %v4223_v49, %v3383_v50  ;;  %11250 = vmatmul.msk.f32.gmra.mxu0 %vm802_vm0, %v14572_v8 }
 0x370   : > { %11378 = vmatmul.msk.f32.gmra.mxu1 %vm802_vm0, %v14569_v7 }
 0x371   : > { %v4565_v56 = vadd.f32 %v14224_v15, %v4433_v55  ;;  %11642 = vmatmul.msk.f32.gmra.mxu2 %vm802_vm0, %v14633_v53  ;;  %11906 = vmatmul.msk.f32.gmra.mxu3 %vm802_vm0, %v14636_v54 }
 0x373   : > { %v4693_v58 = vmax.f32 %v4565_v56, 0.0 }
 0x374   : > { %v3176_v59 = vpop.f32.mrf.mxu2  ;;  %v4226_v60 = vpop.f32.mrf.mxu3 }
 0x375   : > { %4822 = vst.msk [vmem:[#allocation2 + $0x360] sm:$0xff] %vm4734_vm1, %v4693_v58  ;;  %v3384_v61 = vadd.f32 %v3176_v59, %v2254_v57  ;;  %v1471_v62 = vpop.f32.mrf.mxu0  ;;  %v2256_v63 = vpop.f32.mrf.mxu1  ;;  %v14729_v57 = vld [vmem:[%s12995_s16 + $0x470] sm:$0xff]  ;;  %v14741_v59 = vld [vmem:[%s16577_s2] ss:$0 sm:$0xff] }
 0x376   : > { %v2257_v4 = vadd.f32 %v2256_v63, %v1471_v62  ;;  %v14732_v58 = vld [vmem:[%s12995_s16 + $0x471] sm:$0xff] }
 0x377   : > { %v4434_v2 = vadd.f32 %v4226_v60, %v3384_v61  ;;  %11251 = vmatmul.msk.f32.gmra.mxu0 %vm802_vm0, %v14588_v20 }
 0x378   : > { %11379 = vmatmul.msk.f32.gmra.mxu1 %vm802_vm0, %v14585_v18 }
 0x379   : > { %v4566_v3 = vadd.f32 %v14224_v15, %v4434_v2  ;;  %11643 = vmatmul.msk.f32.gmra.mxu2 %vm802_vm0, %v14649_v0  ;;  %11907 = vmatmul.msk.f32.gmra.mxu3 %vm802_vm0, %v14652_v1 }
 0x37b   : > { %v4694_v5 = vmax.f32 %v4566_v3, 0.0 }
 0x37c   : > { %v3179_v6 = vpop.f32.mrf.mxu2  ;;  %v4229_v7 = vpop.f32.mrf.mxu3 }
 0x37d   : > { %4823 = vst.msk [vmem:[#allocation2 + $0x370] sm:$0xff] %vm4734_vm1, %v4694_v5  ;;  %v3385_v8 = vadd.f32 %v3179_v6, %v2257_v4  ;;  %v1474_v9 = vpop.f32.mrf.mxu0  ;;  %v2259_v10 = vpop.f32.mrf.mxu1  ;;  %v14750_v4 = vld [vmem:[%s12995_s16 + $0x478] sm:$0xff] }
 0x37e   : > { %v2260_v34 = vadd.f32 %v2259_v10, %v1474_v9  ;;  %v14753_v5 = vld [vmem:[%s12995_s16 + $0x479] sm:$0xff] }
 0x37f   : > { %v4435_v13 = vadd.f32 %v4229_v7, %v3385_v8  ;;  %11252 = vmatmul.msk.f32.gmra.mxu0 %vm802_vm0, %v14604_v32 }
 0x380   : > { %11380 = vmatmul.msk.f32.gmra.mxu1 %vm802_vm0, %v14601_v31 }
 0x381   : > { %v4567_v14 = vadd.f32 %v14224_v15, %v4435_v13  ;;  %11644 = vmatmul.msk.f32.gmra.mxu2 %vm802_vm0, %v14665_v11  ;;  %11908 = vmatmul.msk.f32.gmra.mxu3 %vm802_vm0, %v14668_v12 }
 0x383   : > { %v4695_v16 = vmax.f32 %v4567_v14, 0.0 }
 0x384   : > { %v3182_v17 = vpop.f32.mrf.mxu2  ;;  %v4232_v18 = vpop.f32.mrf.mxu3 }
 0x385   : > { %4824 = vst.msk [vmem:[#allocation2 + $0x378] sm:$0xff] %vm4734_vm1, %v4695_v16  ;;  %v3386_v20 = vadd.f32 %v3182_v17, %v2260_v34  ;;  %v1477_v21 = vpop.f32.mrf.mxu0  ;;  %v2262_v23 = vpop.f32.mrf.mxu1  ;;  %v14766_v34 = vld [vmem:[%s12995_s16 + $0x488] sm:$0xff] }
 0x386   : > { %v2263_v28 = vadd.f32 %v2262_v23, %v1477_v21  ;;  %v14769_v16 = vld [vmem:[%s12995_s16 + $0x489] sm:$0xff] }
 0x387   : > { %v4436_v26 = vadd.f32 %v4232_v18, %v3386_v20  ;;  %11253 = vmatmul.msk.f32.gmra.mxu0 %vm802_vm0, %v14620_v43 }
 0x388   : > { %11381 = vmatmul.msk.f32.gmra.mxu1 %vm802_vm0, %v14617_v42 }
 0x389   : > { %v4568_v27 = vadd.f32 %v14224_v15, %v4436_v26  ;;  %11645 = vmatmul.msk.f32.gmra.mxu2 %vm802_vm0, %v14681_v24  ;;  %11909 = vmatmul.msk.f32.gmra.mxu3 %vm802_vm0, %v14684_v25 }
 0x38b   : > { %v4696_v29 = vmax.f32 %v4568_v27, 0.0 }
 0x38c   : > { %v3185_v30 = vpop.f32.mrf.mxu2  ;;  %v4235_v31 = vpop.f32.mrf.mxu3 }
 0x38d   : > { %4825 = vst.msk [vmem:[#allocation2 + $0x380] sm:$0xff] %vm4734_vm1, %v4696_v29  ;;  %v3387_v32 = vadd.f32 %v3185_v30, %v2263_v28  ;;  %v1480_v33 = vpop.f32.mrf.mxu0  ;;  %v2265_v19 = vpop.f32.mrf.mxu1  ;;  %v14782_v28 = vld [vmem:[%s12995_s16 + $0x490] sm:$0xff] }
 0x38e   : > { %v2266_v39 = vadd.f32 %v2265_v19, %v1480_v33  ;;  %v14785_v29 = vld [vmem:[%s12995_s16 + $0x491] sm:$0xff] }
 0x38f   : > { %v4437_v37 = vadd.f32 %v4235_v31, %v3387_v32  ;;  %11254 = vmatmul.msk.f32.gmra.mxu0 %vm802_vm0, %v14636_v54 }
 0x390   : > { %11382 = vmatmul.msk.f32.gmra.mxu1 %vm802_vm0, %v14633_v53 }
 0x391   : > { %v4569_v38 = vadd.f32 %v14224_v15, %v4437_v37  ;;  %11646 = vmatmul.msk.f32.gmra.mxu2 %vm802_vm0, %v14697_v35  ;;  %11910 = vmatmul.msk.f32.gmra.mxu3 %vm802_vm0, %v14700_v36 }
 0x393   : > { %v4697_v40 = vmax.f32 %v4569_v38, 0.0 }
 0x394   : > { %v3188_v41 = vpop.f32.mrf.mxu2  ;;  %v4238_v42 = vpop.f32.mrf.mxu3 }
 0x395   : > { %4826 = vst.msk [vmem:[#allocation2 + $0x388] sm:$0xff] %vm4734_vm1, %v4697_v40  ;;  %v3388_v43 = vadd.f32 %v3188_v41, %v2266_v39  ;;  %v1483_v44 = vpop.f32.mrf.mxu0  ;;  %v2268_v45 = vpop.f32.mrf.mxu1  ;;  %v14798_v39 = vld [vmem:[%s12995_s16 + $0x498] sm:$0xff] }
 0x396   : > { %v2269_v50 = vadd.f32 %v2268_v45, %v1483_v44  ;;  %v14801_v40 = vld [vmem:[%s12995_s16 + $0x499] sm:$0xff] }
 0x397   : > { %v4438_v48 = vadd.f32 %v4238_v42, %v3388_v43  ;;  %11255 = vmatmul.msk.f32.gmra.mxu0 %vm802_vm0, %v14652_v1 }
 0x398   : > { %11383 = vmatmul.msk.f32.gmra.mxu1 %vm802_vm0, %v14649_v0 }
 0x399   : > { %v4570_v49 = vadd.f32 %v14224_v15, %v4438_v48  ;;  %11647 = vmatmul.msk.f32.gmra.mxu2 %vm802_vm0, %v14713_v46  ;;  %11911 = vmatmul.msk.f32.gmra.mxu3 %vm802_vm0, %v14716_v47 }
 0x39b   : > { %v4698_v51 = vmax.f32 %v4570_v49, 0.0 }
 0x39c   : > { %v3191_v52 = vpop.f32.mrf.mxu2  ;;  %v4241_v53 = vpop.f32.mrf.mxu3 }
 0x39d   : > { %4827 = vst.msk [vmem:[#allocation2 + $0x398] sm:$0xff] %vm4734_vm1, %v4698_v51  ;;  %v3389_v54 = vadd.f32 %v3191_v52, %v2269_v50  ;;  %v1486_v55 = vpop.f32.mrf.mxu0  ;;  %v2271_v56 = vpop.f32.mrf.mxu1  ;;  %v14814_v50 = vld [vmem:[%s12995_s16 + $0x4a0] sm:$0xff] }
 0x39e   : > { %v2272_v61 = vadd.f32 %v2271_v56, %v1486_v55  ;;  %v14817_v51 = vld [vmem:[%s12995_s16 + $0x4a1] sm:$0xff] }
 0x39f   : > { %v4439_v15 = vadd.f32 %v4241_v53, %v3389_v54  ;;  %11256 = vmatmul.msk.f32.gmra.mxu0 %vm802_vm0, %v14668_v12 }
 0x3a0   : > { %11384 = vmatmul.msk.f32.gmra.mxu1 %vm802_vm0, %v14665_v11 }
 0x3a1   : > { %v4571_v60 = vadd.f32 %v14741_v59, %v4439_v15  ;;  %11648 = vmatmul.msk.f32.gmra.mxu2 %vm802_vm0, %v14729_v57  ;;  %11912 = vmatmul.msk.f32.gmra.mxu3 %vm802_vm0, %v14732_v58 }
 0x3a3   : > { %v4699_v62 = vmax.f32 %v4571_v60, 0.0 }
 0x3a4   : > { %v3194_v63 = vpop.f32.mrf.mxu2  ;;  %v4244_v0 = vpop.f32.mrf.mxu3 }
 0x3a5   : > { %4828 = vst.msk [vmem:[#allocation2 + $0x3a0] sm:$0xff] %vm4734_vm1, %v4699_v62  ;;  %v3390_v1 = vadd.f32 %v3194_v63, %v2272_v61  ;;  %v1489_v2 = vpop.f32.mrf.mxu0  ;;  %v2274_v3 = vpop.f32.mrf.mxu1  ;;  %v14830_v61 = vld [vmem:[%s12995_s16 + $0x4b0] sm:$0xff] }
 0x3a6   : > { %v2275_v8 = vadd.f32 %v2274_v3, %v1489_v2  ;;  %v14833_v62 = vld [vmem:[%s12995_s16 + $0x4b1] sm:$0xff] }
 0x3a7   : > { %v4440_v6 = vadd.f32 %v4244_v0, %v3390_v1  ;;  %11257 = vmatmul.msk.f32.gmra.mxu0 %vm802_vm0, %v14684_v25 }
 0x3a8   : > { %11385 = vmatmul.msk.f32.gmra.mxu1 %vm802_vm0, %v14681_v24 }
 0x3a9   : > { %v4572_v7 = vadd.f32 %v14741_v59, %v4440_v6  ;;  %11649 = vmatmul.msk.f32.gmra.mxu2 %vm802_vm0, %v14750_v4  ;;  %11913 = vmatmul.msk.f32.gmra.mxu3 %vm802_vm0, %v14753_v5 }
 0x3ab   : > { %v4700_v9 = vmax.f32 %v4572_v7, 0.0 }
 0x3ac   : > { %v3197_v10 = vpop.f32.mrf.mxu2  ;;  %v4247_v11 = vpop.f32.mrf.mxu3 }
 0x3ad   : > { %4829 = vst.msk [vmem:[#allocation2 + $0x3a8] sm:$0xff] %vm4734_vm1, %v4700_v9  ;;  %v3391_v12 = vadd.f32 %v3197_v10, %v2275_v8  ;;  %v1492_v13 = vpop.f32.mrf.mxu0  ;;  %v2277_v14 = vpop.f32.mrf.mxu1  ;;  %v14846_v8 = vld [vmem:[%s12995_s16 + $0x4b8] sm:$0xff] }
 0x3ae   : > { %v2278_v20 = vadd.f32 %v2277_v14, %v1492_v13  ;;  %v14849_v9 = vld [vmem:[%s12995_s16 + $0x4b9] sm:$0xff] }
 0x3af   : > { %v4441_v17 = vadd.f32 %v4247_v11, %v3391_v12  ;;  %11258 = vmatmul.msk.f32.gmra.mxu0 %vm802_vm0, %v14700_v36 }
 0x3b0   : > { %11386 = vmatmul.msk.f32.gmra.mxu1 %vm802_vm0, %v14697_v35 }
 0x3b1   : > { %v4573_v18 = vadd.f32 %v14741_v59, %v4441_v17  ;;  %11650 = vmatmul.msk.f32.gmra.mxu2 %vm802_vm0, %v14766_v34  ;;  %11914 = vmatmul.msk.f32.gmra.mxu3 %vm802_vm0, %v14769_v16 }
 0x3b3   : > { %v4701_v21 = vmax.f32 %v4573_v18, 0.0 }
 0x3b4   : > { %v3200_v23 = vpop.f32.mrf.mxu2  ;;  %v4250_v24 = vpop.f32.mrf.mxu3 }
 0x3b5   : > { %4830 = vst.msk [vmem:[#allocation2 + $0x3b0] sm:$0xff] %vm4734_vm1, %v4701_v21  ;;  %v3392_v25 = vadd.f32 %v3200_v23, %v2278_v20  ;;  %v1495_v26 = vpop.f32.mrf.mxu0  ;;  %v2280_v27 = vpop.f32.mrf.mxu1  ;;  %v14862_v20 = vld [vmem:[%s12995_s16 + $0x4c0] sm:$0xff] }
 0x3b6   : > { %v2281_v32 = vadd.f32 %v2280_v27, %v1495_v26  ;;  %v14865_v21 = vld [vmem:[%s12995_s16 + $0x4c1] sm:$0xff] }
 0x3b7   : > { %v4442_v30 = vadd.f32 %v4250_v24, %v3392_v25  ;;  %11259 = vmatmul.msk.f32.gmra.mxu0 %vm802_vm0, %v14716_v47 }
 0x3b8   : > { %11387 = vmatmul.msk.f32.gmra.mxu1 %vm802_vm0, %v14713_v46 }
 0x3b9   : > { %v4574_v31 = vadd.f32 %v14741_v59, %v4442_v30  ;;  %11651 = vmatmul.msk.f32.gmra.mxu2 %vm802_vm0, %v14782_v28  ;;  %11915 = vmatmul.msk.f32.gmra.mxu3 %vm802_vm0, %v14785_v29 }
 0x3bb   : > { %v4702_v33 = vmax.f32 %v4574_v31, 0.0 }
 0x3bc   : > { %v3203_v19 = vpop.f32.mrf.mxu2  ;;  %v4253_v35 = vpop.f32.mrf.mxu3 }
 0x3bd   : > { %4831 = vst.msk [vmem:[#allocation2 + $0x3c0] sm:$0xff] %vm4734_vm1, %v4702_v33  ;;  %v3393_v36 = vadd.f32 %v3203_v19, %v2281_v32  ;;  %v1498_v37 = vpop.f32.mrf.mxu0  ;;  %v2283_v38 = vpop.f32.mrf.mxu1  ;;  %v14878_v32 = vld [vmem:[%s12995_s16 + $0x4c8] sm:$0xff] }
 0x3be   : > { %v2284_v43 = vadd.f32 %v2283_v38, %v1498_v37  ;;  %v14881_v33 = vld [vmem:[%s12995_s16 + $0x4c9] sm:$0xff] }
 0x3bf   : > { %v4443_v41 = vadd.f32 %v4253_v35, %v3393_v36  ;;  %11260 = vmatmul.msk.f32.gmra.mxu0 %vm802_vm0, %v14732_v58 }
 0x3c0   : > { %11388 = vmatmul.msk.f32.gmra.mxu1 %vm802_vm0, %v14729_v57 }
 0x3c1   : > { %v4575_v42 = vadd.f32 %v14741_v59, %v4443_v41  ;;  %11652 = vmatmul.msk.f32.gmra.mxu2 %vm802_vm0, %v14798_v39  ;;  %11916 = vmatmul.msk.f32.gmra.mxu3 %vm802_vm0, %v14801_v40 }
 0x3c3   : > { %v4703_v44 = vmax.f32 %v4575_v42, 0.0 }
 0x3c4   : > { %v3206_v45 = vpop.f32.mrf.mxu2  ;;  %v4256_v46 = vpop.f32.mrf.mxu3 }
 0x3c5   : > { %4832 = vst.msk [vmem:[#allocation2 + $0x3c8] sm:$0xff] %vm4734_vm1, %v4703_v44  ;;  %v3394_v47 = vadd.f32 %v3206_v45, %v2284_v43  ;;  %v1501_v48 = vpop.f32.mrf.mxu0  ;;  %v2286_v49 = vpop.f32.mrf.mxu1  ;;  %v14894_v43 = vld [vmem:[%s12995_s16 + $0x4d8] sm:$0xff] }
 0x3c6   : > { %v2287_v54 = vadd.f32 %v2286_v49, %v1501_v48  ;;  %v14897_v44 = vld [vmem:[%s12995_s16 + $0x4d9] sm:$0xff] }
 0x3c7   : > { %v4444_v52 = vadd.f32 %v4256_v46, %v3394_v47  ;;  %11261 = vmatmul.msk.f32.gmra.mxu0 %vm802_vm0, %v14753_v5 }
 0x3c8   : > { %11389 = vmatmul.msk.f32.gmra.mxu1 %vm802_vm0, %v14750_v4 }
 0x3c9   : > { %v4576_v53 = vadd.f32 %v14741_v59, %v4444_v52  ;;  %11653 = vmatmul.msk.f32.gmra.mxu2 %vm802_vm0, %v14814_v50  ;;  %11917 = vmatmul.msk.f32.gmra.mxu3 %vm802_vm0, %v14817_v51 }
 0x3cb   : > { %v4704_v55 = vmax.f32 %v4576_v53, 0.0 }
 0x3cc   : > { %v3209_v56 = vpop.f32.mrf.mxu2  ;;  %v4259_v57 = vpop.f32.mrf.mxu3 }
 0x3cd   : > { %4833 = vst.msk [vmem:[#allocation2 + $0x3d0] sm:$0xff] %vm4734_vm1, %v4704_v55  ;;  %v3395_v58 = vadd.f32 %v3209_v56, %v2287_v54  ;;  %v1504_v15 = vpop.f32.mrf.mxu0  ;;  %v2289_v60 = vpop.f32.mrf.mxu1  ;;  %v14910_v54 = vld [vmem:[%s12995_s16 + $0x4e0] sm:$0xff] }
 0x3ce   : > { %v2290_v1 = vadd.f32 %v2289_v60, %v1504_v15  ;;  %v14913_v55 = vld [vmem:[%s12995_s16 + $0x4e1] sm:$0xff] }
 0x3cf   : > { %v4445_v63 = vadd.f32 %v4259_v57, %v3395_v58  ;;  %11262 = vmatmul.msk.f32.gmra.mxu0 %vm802_vm0, %v14769_v16 }
 0x3d0   : > { %11390 = vmatmul.msk.f32.gmra.mxu1 %vm802_vm0, %v14766_v34 }
 0x3d1   : > { %v4577_v0 = vadd.f32 %v14741_v59, %v4445_v63  ;;  %11654 = vmatmul.msk.f32.gmra.mxu2 %vm802_vm0, %v14830_v61  ;;  %11918 = vmatmul.msk.f32.gmra.mxu3 %vm802_vm0, %v14833_v62 }
 0x3d3   : > { %v4705_v2 = vmax.f32 %v4577_v0, 0.0 }
 0x3d4   : > { %v3212_v3 = vpop.f32.mrf.mxu2  ;;  %v4262_v4 = vpop.f32.mrf.mxu3 }
 0x3d5   : > { %4834 = vst.msk [vmem:[#allocation2 + $0x3d8] sm:$0xff] %vm4734_vm1, %v4705_v2  ;;  %v3396_v5 = vadd.f32 %v3212_v3, %v2290_v1  ;;  %v1507_v6 = vpop.f32.mrf.mxu0  ;;  %v2292_v7 = vpop.f32.mrf.mxu1  ;;  %v14926_v1 = vld [vmem:[%s12995_s16 + $0x4e8] sm:$0xff] }
 0x3d6   : > { %v2293_v12 = vadd.f32 %v2292_v7, %v1507_v6  ;;  %v14929_v2 = vld [vmem:[%s12995_s16 + $0x4e9] sm:$0xff] }
 0x3d7   : > { %v4446_v10 = vadd.f32 %v4262_v4, %v3396_v5  ;;  %11263 = vmatmul.msk.f32.gmra.mxu0 %vm802_vm0, %v14785_v29 }
 0x3d8   : > { %11391 = vmatmul.msk.f32.gmra.mxu1 %vm802_vm0, %v14782_v28 }
 0x3d9   : > { %v4578_v11 = vadd.f32 %v14741_v59, %v4446_v10  ;;  %11655 = vmatmul.msk.f32.gmra.mxu2 %vm802_vm0, %v14846_v8  ;;  %11919 = vmatmul.msk.f32.gmra.mxu3 %vm802_vm0, %v14849_v9 }
 0x3db   : > { %v4706_v13 = vmax.f32 %v4578_v11, 0.0 }
 0x3dc   : > { %v3215_v14 = vpop.f32.mrf.mxu2  ;;  %v4265_v34 = vpop.f32.mrf.mxu3 }
 0x3dd   : > { %4835 = vst.msk [vmem:[#allocation2 + $0x3e8] sm:$0xff] %vm4734_vm1, %v4706_v13  ;;  %v3397_v16 = vadd.f32 %v3215_v14, %v2293_v12  ;;  %v1510_v17 = vpop.f32.mrf.mxu0  ;;  %v2295_v18 = vpop.f32.mrf.mxu1  ;;  %v14942_v12 = vld [vmem:[%s12995_s16 + $0x4f0] sm:$0xff] }
 0x3de   : > { %v2296_v25 = vadd.f32 %v2295_v18, %v1510_v17  ;;  %v14945_v13 = vld [vmem:[%s12995_s16 + $0x4f1] sm:$0xff] }
 0x3df   : > { %v4447_v23 = vadd.f32 %v4265_v34, %v3397_v16  ;;  %11264 = vmatmul.msk.f32.gmra.mxu0 %vm802_vm0, %v14801_v40 }
 0x3e0   : > { %11392 = vmatmul.msk.f32.gmra.mxu1 %vm802_vm0, %v14798_v39 }
 0x3e1   : > { %v4579_v24 = vadd.f32 %v14741_v59, %v4447_v23  ;;  %11656 = vmatmul.msk.f32.gmra.mxu2 %vm802_vm0, %v14862_v20  ;;  %11920 = vmatmul.msk.f32.gmra.mxu3 %vm802_vm0, %v14865_v21 }
 0x3e3   : > { %v4707_v26 = vmax.f32 %v4579_v24, 0.0 }
 0x3e4   : > { %v3218_v27 = vpop.f32.mrf.mxu2  ;;  %v4268_v28 = vpop.f32.mrf.mxu3 }
 0x3e5   : > { %4836 = vst.msk [vmem:[#allocation2 + $0x3f0] sm:$0xff] %vm4734_vm1, %v4707_v26  ;;  %v3398_v29 = vadd.f32 %v3218_v27, %v2296_v25  ;;  %v1513_v30 = vpop.f32.mrf.mxu0  ;;  %v2298_v31 = vpop.f32.mrf.mxu1  ;;  %v11526_v25 = vld [vmem:[%s12995_s16 + $0x500] sm:$0xff] }
 0x3e6   : > { %v2299_v36 = vadd.f32 %v2298_v31, %v1513_v30  ;;  %v11790_v26 = vld [vmem:[%s12995_s16 + $0x501] sm:$0xff] }
 0x3e7   : > { %v4448_v19 = vadd.f32 %v4268_v28, %v3398_v29  ;;  %11265 = vmatmul.msk.f32.gmra.mxu0 %vm802_vm0, %v14817_v51 }
 0x3e8   : > { %11393 = vmatmul.msk.f32.gmra.mxu1 %vm802_vm0, %v14814_v50 }
 0x3e9   : > { %v4580_v35 = vadd.f32 %v14741_v59, %v4448_v19  ;;  %11657 = vmatmul.msk.f32.gmra.mxu2 %vm802_vm0, %v14878_v32  ;;  %11921 = vmatmul.msk.f32.gmra.mxu3 %vm802_vm0, %v14881_v33 }
 0x3eb   : > { %v4708_v37 = vmax.f32 %v4580_v35, 0.0 }
 0x3ec   : > { %v3221_v38 = vpop.f32.mrf.mxu2  ;;  %v4271_v39 = vpop.f32.mrf.mxu3 }
 0x3ed   : > { %4837 = vst.msk [vmem:[#allocation2 + $0x3f8] sm:$0xff] %vm4734_vm1, %v4708_v37  ;;  %v3399_v40 = vadd.f32 %v3221_v38, %v2299_v36  ;;  %v1516_v41 = vpop.f32.mrf.mxu0  ;;  %v2301_v42 = vpop.f32.mrf.mxu1  ;;  %v11989_v36 = vld [vmem:[%s16542_s3 + $0x28] sm:$0xff] }
 0x3ee   : > { %v2302_v47 = vadd.f32 %v2301_v42, %v1516_v41  ;;  %v11527_v37 = vld [vmem:[%s12995_s16 + $0x508] sm:$0xff]  ;;  %5538 = vmatpush.msra.mxu2 %v11989_v36 }
 0x3ef   : > { %v4449_v45 = vadd.f32 %v4271_v39, %v3399_v40  ;;  %11266 = vmatmul.msk.f32.gmra.mxu0 %vm802_vm0, %v14833_v62  ;;  %v11791_v38 = vld [vmem:[%s12995_s16 + $0x509] sm:$0xff]  ;;  %v11988_v40 = vld [vmem:[%s16542_s3 + $0x20] sm:$0xff] }
 0x3f0   : > { %11394 = vmatmul.msk.f32.gmra.mxu1 %vm802_vm0, %v14830_v61  ;;  %5539 = vmatpush.msra.mxu2 %v11988_v40  ;;  %v4957_v40 = vld [vmem:[#allocation2 + $0x51] ss:$2 sm:$0xff] }
 0x3f1   : > { %v4581_v46 = vadd.f32 %v14741_v59, %v4449_v45  ;;  %11658 = vmatmul.msk.f32.gmra.mxu2 %vm802_vm0, %v14894_v43  ;;  %11922 = vmatmul.msk.f32.gmra.mxu3 %vm802_vm0, %v14897_v44 }
 0x3f3   : > { %v4709_v48 = vmax.f32 %v4581_v46, 0.0 }
 0x3f4   : > { %v3224_v49 = vpop.f32.mrf.mxu2  ;;  %v4274_v50 = vpop.f32.mrf.mxu3 }
 0x3f5   : > { %4838 = vst.msk [vmem:[#allocation2 + $0x400] sm:$0xff] %vm4734_vm1, %v4709_v48  ;;  %v3400_v51 = vadd.f32 %v3224_v49, %v2302_v47  ;;  %v1519_v52 = vpop.f32.mrf.mxu0  ;;  %v2304_v53 = vpop.f32.mrf.mxu1  ;;  %v12139_v49 = vld [vmem:[%s16542_s3 + $0x78] sm:$0xff] }
 0x3f6   : > { %v2305_v58 = vadd.f32 %v2304_v53, %v1519_v52  ;;  %6898 = vmatpush.msra.mxu3 %v12139_v49 }
 0x3f7   : > { %v4450_v56 = vadd.f32 %v4274_v50, %v3400_v51  ;;  %11267 = vmatmul.msk.f32.gmra.mxu0 %vm802_vm0, %v14849_v9  ;;  %v11528_v50 = vld [vmem:[%s12995_s16 + $0x510] sm:$0xff] }
 0x3f8   : > { %11395 = vmatmul.msk.f32.gmra.mxu1 %vm802_vm0, %v14846_v8  ;;  %v11792_v51 = vld [vmem:[%s12995_s16 + $0x511] sm:$0xff] }
 0x3f9   : > { %v4582_v57 = vadd.f32 %v14741_v59, %v4450_v56  ;;  %11659 = vmatmul.msk.f32.gmra.mxu2 %vm802_vm0, %v14910_v54  ;;  %11923 = vmatmul.msk.f32.gmra.mxu3 %vm802_vm0, %v14913_v55 }
 0x3fb   : > { %v4710_v15 = vmax.f32 %v4582_v57, 0.0 }
 0x3fc   : > { %v3227_v60 = vpop.f32.mrf.mxu2  ;;  %v4277_v61 = vpop.f32.mrf.mxu3 }
 0x3fd   : > { %4839 = vst.msk [vmem:[#allocation2 + $0x410] sm:$0xff] %vm4734_vm1, %v4710_v15  ;;  %v3401_v62 = vadd.f32 %v3227_v60, %v2305_v58  ;;  %v1522_v63 = vpop.f32.mrf.mxu0  ;;  %v2307_v0 = vpop.f32.mrf.mxu1 }
 0x3fe   : > { %v2308_v5 = vadd.f32 %v2307_v0, %v1522_v63  ;;  %v11529_v63 = vld [vmem:[%s12995_s16 + $0x518] sm:$0xff] }
 0x3ff   : > { %v4451_v3 = vadd.f32 %v4277_v61, %v3401_v62  ;;  %11268 = vmatmul.msk.f32.gmra.mxu0 %vm802_vm0, %v14865_v21  ;;  %v12079_v61 = vld [vmem:[%s16542_s3 + $0x58] sm:$0xff]  ;;  %v12049_v62 = vld [vmem:[%s16542_s3 + $0x48] sm:$0xff] }
 0x400   : > { %11396 = vmatmul.msk.f32.gmra.mxu1 %vm802_vm0, %v14862_v20  ;;  %v11793_v0 = vld [vmem:[%s12995_s16 + $0x519] sm:$0xff]  ;;  %6082 = vmatpush.msra.mxu0 %v12049_v62 }
 0x401   : > { %v4583_v4 = vadd.f32 %v14741_v59, %v4451_v3  ;;  %11660 = vmatmul.msk.f32.gmra.mxu2 %vm802_vm0, %v14926_v1  ;;  %11924 = vmatmul.msk.f32.gmra.mxu3 %vm802_vm0, %v14929_v2 }
 0x402   : > { %6354 = vmatpush.msra.mxu1 %v12079_v61 }
 0x403   : > { %v4711_v6 = vmax.f32 %v4583_v4, 0.0 }
 0x404   : > { %v3230_v7 = vpop.f32.mrf.mxu2  ;;  %v4280_v8 = vpop.f32.mrf.mxu3 }
 0x405   : > { %4840 = vst.msk [vmem:[#allocation2 + $0x418] sm:$0xff] %vm4734_vm1, %v4711_v6  ;;  %v3402_v9 = vadd.f32 %v3230_v7, %v2308_v5  ;;  %v1525_v10 = vpop.f32.mrf.mxu0  ;;  %v2310_v11 = vpop.f32.mrf.mxu1 }
 0x406   : > { %v2311_v16 = vadd.f32 %v2310_v11, %v1525_v10  ;;  %v4953_v11 = vld [vmem:[#allocation2 + $0x1] ss:$2 sm:$0xff] }
 0x407   : > { %v4452_v14 = vadd.f32 %v4280_v8, %v3402_v9  ;;  %11269 = vmatmul.msk.f32.gmra.mxu0 %vm802_vm0, %v14881_v33 }
 0x408   : > { %11397 = vmatmul.msk.f32.gmra.mxu1 %vm802_vm0, %v14878_v32 }
 0x409   : > { %v4584_v34 = vadd.f32 %v14741_v59, %v4452_v14  ;;  %11661 = vmatmul.msk.f32.gmra.mxu2 %vm802_vm0, %v14942_v12  ;;  %11925 = vmatmul.msk.f32.gmra.mxu3 %vm802_vm0, %v14945_v13 }
 0x40b   : > { %v4712_v17 = vmax.f32 %v4584_v34, 0.0  ;;  %v5654_v34 = vld [vmem:[#allocation2 + $0x3] ss:$2 sm:$0xff] }
 0x40c   : > { %v3233_v18 = vpop.f32.mrf.mxu2  ;;  %v4283_v20 = vpop.f32.mrf.mxu3 }
 0x40d   : > { %4841 = vst.msk [vmem:[#allocation2 + $0x420] sm:$0xff] %vm4734_vm1, %v4712_v17  ;;  %v3403_v21 = vadd.f32 %v3233_v18, %v2311_v16  ;;  %v1528_v23 = vpop.f32.mrf.mxu0  ;;  %v2313_v24 = vpop.f32.mrf.mxu1 }
 0x40e   : > { %v2314_v29 = vadd.f32 %v2313_v24, %v1528_v23 }
 0x40f   : > { %v4453_v27 = vadd.f32 %v4283_v20, %v3403_v21  ;;  %11270 = vmatmul.msk.f32.gmra.mxu0 %vm802_vm0, %v14897_v44 }
 0x410   : > { %11398 = vmatmul.msk.f32.gmra.mxu1 %vm802_vm0, %v14894_v43 }
 0x411   : > { %v4585_v28 = vadd.f32 %v14741_v59, %v4453_v27  ;;  %11662 = vmatmul.msk.f32.gmra.mxu2 %vm802_vm0, %v11526_v25  ;;  %11926 = vmatmul.msk.f32.gmra.mxu3 %vm802_vm0, %v11790_v26  ;;  %v4955_v27 = vld [vmem:[#allocation2 + $0x11] ss:$2 sm:$0xff] }
 0x413   : > { %v4713_v30 = vmax.f32 %v4585_v28, 0.0  ;;  %v4897_v28 = vld [vmem:[#allocation2 + $0x10] ss:$2 sm:$0xff] }
 0x414   : > { %v3236_v31 = vpop.f32.mrf.mxu2  ;;  %v4286_v32 = vpop.f32.mrf.mxu3 }
 0x415   : > { %4842 = vst.msk [vmem:[#allocation2 + $0x428] sm:$0xff] %vm4734_vm1, %v4713_v30  ;;  %v3404_v33 = vadd.f32 %v3236_v31, %v2314_v29  ;;  %v1531_v19 = vpop.f32.mrf.mxu0  ;;  %v2316_v35 = vpop.f32.mrf.mxu1  ;;  %v5382_v29 = vld [vmem:[#allocation2 + $0x2] ss:$2 sm:$0xff]  ;;  %v5656_v30 = vld [vmem:[#allocation2 + $0x13] ss:$2 sm:$0xff] }
 0x416   : > { %v2317_v42 = vadd.f32 %v2316_v35, %v1531_v19 }
 0x417   : > { %v4454_v39 = vadd.f32 %v4286_v32, %v3404_v33  ;;  %11271 = vmatmul.msk.f32.gmra.mxu0 %vm802_vm0, %v14913_v55 }
 0x418   : > { %11399 = vmatmul.msk.f32.gmra.mxu1 %vm802_vm0, %v14910_v54 }
 0x419   : > { %v4586_v41 = vadd.f32 %v14741_v59, %v4454_v39  ;;  %11663 = vmatmul.msk.f32.gmra.mxu2 %vm802_vm0, %v11527_v37  ;;  %11927 = vmatmul.msk.f32.gmra.mxu3 %vm802_vm0, %v11791_v38 }
 0x41b   : > { %v4714_v43 = vmax.f32 %v4586_v41, 0.0  ;;  %v4899_v41 = vld [vmem:[#allocation2 + $0x50] ss:$2 sm:$0xff] }
 0x41c   : > { %v3239_v44 = vpop.f32.mrf.mxu2  ;;  %v4289_v45 = vpop.f32.mrf.mxu3  ;;  %v5007_v14 = vld [vmem:[#allocation2 + $0x421] ss:$2 sm:$0xff] }
 0x41d   : > { %4843 = vst.msk [vmem:[#allocation2 + $0x438] sm:$0xff] %vm4734_vm1, %v4714_v43  ;;  %v3405_v46 = vadd.f32 %v3239_v44, %v2317_v42  ;;  %v1534_v47 = vpop.f32.mrf.mxu0  ;;  %v2319_v48 = vpop.f32.mrf.mxu1  ;;  %v5384_v42 = vld [vmem:[#allocation2 + $0x12] ss:$2 sm:$0xff]  ;;  %v5658_v43 = vld [vmem:[#allocation2 + $0x53] ss:$2 sm:$0xff] }
 0x41e   : > { %v2320_v54 = vadd.f32 %v2319_v48, %v1534_v47 }
 0x41f   : > { %v4455_v52 = vadd.f32 %v4289_v45, %v3405_v46  ;;  %11272 = vmatmul.msk.f32.gmra.mxu0 %vm802_vm0, %v14929_v2 }
 0x420   : > { %11400 = vmatmul.msk.f32.gmra.mxu1 %vm802_vm0, %v14926_v1 }
 0x421   : > { %v4587_v53 = vadd.f32 %v14741_v59, %v4455_v52  ;;  %11664 = vmatmul.msk.f32.gmra.mxu2 %vm802_vm0, %v11528_v50  ;;  %11928 = vmatmul.msk.f32.gmra.mxu3 %vm802_vm0, %v11792_v51 }
 0x423   : > { %v4715_v55 = vmax.f32 %v4587_v53, 0.0  ;;  %v4959_v53 = vld [vmem:[#allocation2 + $0x61] ss:$2 sm:$0xff] }
 0x424   : > { %v3242_v56 = vpop.f32.mrf.mxu2  ;;  %v4292_v57 = vpop.f32.mrf.mxu3 }
 0x425   : > { %4844 = vst.msk [vmem:[#allocation2 + $0x440] sm:$0xff] %vm4734_vm1, %v4715_v55  ;;  %v3406_v58 = vadd.f32 %v3242_v56, %v2320_v54  ;;  %v1537_v15 = vpop.f32.mrf.mxu0  ;;  %v2322_v60 = vpop.f32.mrf.mxu1  ;;  %v4901_v54 = vld [vmem:[#allocation2 + $0x60] ss:$2 sm:$0xff]  ;;  %v5660_v56 = vld [vmem:[#allocation2 + $0x63] ss:$2 sm:$0xff] }
 0x426   : > { %v2323_v3 = vadd.f32 %v2322_v60, %v1537_v15  ;;  %v5386_v55 = vld [vmem:[#allocation2 + $0x52] ss:$2 sm:$0xff] }
 0x427   : > { %v4456_v1 = vadd.f32 %v4292_v57, %v3406_v58  ;;  %11273 = vmatmul.msk.f32.gmra.mxu0 %vm802_vm0, %v14945_v13  ;;  %v4895_v13 = vld [vmem:[#allocation2] ss:$2 sm:$0xff] }
 0x428   : > { %11401 = vmatmul.msk.f32.gmra.mxu1 %vm802_vm0, %v14942_v12  ;;  %v12109_v12 = vld [vmem:[%s16542_s3 + $0x68] sm:$0xff] }
 0x429   : > { %v4588_v2 = vadd.f32 %v14741_v59, %v4456_v1  ;;  %11665 = vmatmul.msk.f32.gmra.mxu2 %vm802_vm0, %v11529_v63  ;;  %11929 = vmatmul.msk.f32.gmra.mxu3 %vm802_vm0, %v11793_v0 }
 0x42b   : > { %v4716_v4 = vmax.f32 %v4588_v2, 0.0  ;;  %v4961_v2 = vld [vmem:[#allocation2 + $0xa1] ss:$2 sm:$0xff] }
 0x42c   : > { %v3245_v5 = vpop.f32.mrf.mxu2  ;;  %v4295_v6 = vpop.f32.mrf.mxu3 }
 0x42d   : > { %4845 = vst.msk [vmem:[#allocation2 + $0x448] sm:$0xff] %vm4734_vm1, %v4716_v4  ;;  %v3407_v7 = vadd.f32 %v3245_v5, %v2323_v3  ;;  %v1540_v8 = vpop.f32.mrf.mxu0  ;;  %v2325_v9 = vpop.f32.mrf.mxu1  ;;  %v4903_v3 = vld [vmem:[#allocation2 + $0xa0] ss:$2 sm:$0xff]  ;;  %v5662_v5 = vld [vmem:[#allocation2 + $0xa3] ss:$2 sm:$0xff] }
 0x42e   : > { %v2326_v17 = vadd.f32 %v2325_v9, %v1540_v8  ;;  %v5388_v4 = vld [vmem:[#allocation2 + $0x62] ss:$2 sm:$0xff] }
 0x42f   : > { %v4457_v10 = vadd.f32 %v4295_v6, %v3407_v7  ;;  %11932 = vmatmul.msk.f32.vlgmr.msrb.gmra.mxu0 %vm4734_vm1, %v4953_v11 }
 0x430   : > { %11960 = vmatmul.msk.f32.vlgmr.msrb.gmra.mxu1 %vm4734_vm1, %v4895_v13 }
 0x431   : > { %v4589_v16 = vadd.f32 %v14741_v59, %v4457_v10  ;;  %11959 = vmatmul.msk.f32.vlgmr.msrb.gmra.mxu2 %vm4734_vm1, %v5007_v14  ;;  %12020 = vmatmul.msk.f32.vlgmr.msrb.gmra.mxu3 %vm4734_vm1, %v5654_v34  ;;  %v4963_v34 = vld [vmem:[#allocation2 + $0xb1] ss:$2 sm:$0xff] }
 0x432   : > { %6626 = vmatpush.msrb.mxu2 %v12109_v12 }
 0x433   : > { %v4717_v18 = vmax.f32 %v4589_v16, 0.0  ;;  %v4905_v16 = vld [vmem:[#allocation2 + $0xb0] ss:$2 sm:$0xff] }
 0x434   : > { %v3248_v20 = vpop.f32.mrf.mxu2  ;;  %v4298_v21 = vpop.f32.mrf.mxu3 }
 0x435   : > { %4846 = vst.msk [vmem:[#allocation2 + $0x450] sm:$0xff] %vm4734_vm1, %v4717_v18  ;;  %v3408_v23 = vadd.f32 %v3248_v20, %v2326_v17  ;;  %v1543_v24 = vpop.f32.mrf.mxu0  ;;  %v2328_v25 = vpop.f32.mrf.mxu1  ;;  %v5390_v17 = vld [vmem:[#allocation2 + $0xa2] ss:$2 sm:$0xff]  ;;  %v5664_v18 = vld [vmem:[#allocation2 + $0xb3] ss:$2 sm:$0xff] }
 0x436   : > { %v2329_v32 = vadd.f32 %v2328_v25, %v1543_v24 }
 0x437   : > { %v4458_v26 = vadd.f32 %v4298_v21, %v3408_v23  ;;  %11933 = vmatmul.msk.f32.gmra.mxu0 %vm4734_vm1, %v4955_v27 }
 0x438   : > { %11961 = vmatmul.msk.f32.gmra.mxu1 %vm4734_vm1, %v4897_v28 }
 0x439   : > { %v4590_v31 = vadd.f32 %v14741_v59, %v4458_v26  ;;  %11990 = vmatmul.msk.f32.vlgmr.msra.gmra.mxu2 %vm4734_vm1, %v5382_v29  ;;  %12021 = vmatmul.msk.f32.gmra.mxu3 %vm4734_vm1, %v5656_v30  ;;  %v4965_v30 = vld [vmem:[#allocation2 + $0xf1] ss:$2 sm:$0xff] }
 0x43b   : > { %v4718_v33 = vmax.f32 %v4590_v31, 0.0  ;;  %v4907_v31 = vld [vmem:[#allocation2 + $0xf0] ss:$2 sm:$0xff] }
 0x43c   : > { %v3251_v19 = vpop.f32.mrf.mxu2  ;;  %v4301_v35 = vpop.f32.mrf.mxu3 }
 0x43d   : > { %4847 = vst.msk [vmem:[#allocation2 + $0x460] sm:$0xff] %vm4734_vm1, %v4718_v33  ;;  %v3409_v36 = vadd.f32 %v3251_v19, %v2329_v32  ;;  %v1546_v37 = vpop.f32.mrf.mxu0  ;;  %v2331_v38 = vpop.f32.mrf.mxu1  ;;  %v5392_v32 = vld [vmem:[#allocation2 + $0xb2] ss:$2 sm:$0xff]  ;;  %v5666_v33 = vld [vmem:[#allocation2 + $0xf3] ss:$2 sm:$0xff] }
 0x43e   : > { %v2332_v45 = vadd.f32 %v2331_v38, %v1546_v37 }
 0x43f   : > { %v4459_v39 = vadd.f32 %v4301_v35, %v3409_v36  ;;  %11934 = vmatmul.msk.f32.gmra.mxu0 %vm4734_vm1, %v4957_v40 }
 0x440   : > { %11962 = vmatmul.msk.f32.gmra.mxu1 %vm4734_vm1, %v4899_v41 }
 0x441   : > { %v4591_v44 = vadd.f32 %v14741_v59, %v4459_v39  ;;  %11991 = vmatmul.msk.f32.gmra.mxu2 %vm4734_vm1, %v5384_v42  ;;  %12022 = vmatmul.msk.f32.gmra.mxu3 %vm4734_vm1, %v5658_v43  ;;  %v4967_v43 = vld [vmem:[#allocation2 + $0x101] ss:$2 sm:$0xff] }
 0x443   : > { %v4719_v46 = vmax.f32 %v4591_v44, 0.0  ;;  %v4909_v44 = vld [vmem:[#allocation2 + $0x100] ss:$2 sm:$0xff] }
 0x444   : > { %v3254_v47 = vpop.f32.mrf.mxu2  ;;  %v4304_v48 = vpop.f32.mrf.mxu3 }
 0x445   : > { %4848 = vst.msk [vmem:[#allocation2 + $0x468] sm:$0xff] %vm4734_vm1, %v4719_v46  ;;  %v3410_v49 = vadd.f32 %v3254_v47, %v2332_v45  ;;  %v1549_v50 = vpop.f32.mrf.mxu0  ;;  %v2334_v51 = vpop.f32.mrf.mxu1  ;;  %v5394_v45 = vld [vmem:[#allocation2 + $0xf2] ss:$2 sm:$0xff]  ;;  %v5668_v46 = vld [vmem:[#allocation2 + $0x103] ss:$2 sm:$0xff] }
 0x446   : > { %v2335_v58 = vadd.f32 %v2334_v51, %v1549_v50 }
 0x447   : > { %v4460_v52 = vadd.f32 %v4304_v48, %v3410_v49  ;;  %11935 = vmatmul.msk.f32.gmra.mxu0 %vm4734_vm1, %v4959_v53 }
 0x448   : > { %11963 = vmatmul.msk.f32.gmra.mxu1 %vm4734_vm1, %v4901_v54 }
 0x449   : > { %v4592_v57 = vadd.f32 %v14741_v59, %v4460_v52  ;;  %11992 = vmatmul.msk.f32.gmra.mxu2 %vm4734_vm1, %v5386_v55  ;;  %12023 = vmatmul.msk.f32.gmra.mxu3 %vm4734_vm1, %v5660_v56  ;;  %v4969_v56 = vld [vmem:[#allocation2 + $0x141] ss:$2 sm:$0xff] }
 0x44b   : > { %v4720_v15 = vmax.f32 %v4592_v57, 0.0  ;;  %v4911_v57 = vld [vmem:[#allocation2 + $0x140] ss:$2 sm:$0xff] }
 0x44c   : > { %v3257_v60 = vpop.f32.mrf.mxu2  ;;  %v4307_v61 = vpop.f32.mrf.mxu3 }
 0x44d   : > { %4849 = vst.msk [vmem:[#allocation2 + $0x470] sm:$0xff] %vm4734_vm1, %v4720_v15  ;;  %v3411_v62 = vadd.f32 %v3257_v60, %v2335_v58  ;;  %v1552_v63 = vpop.f32.mrf.mxu0  ;;  %v2337_v0 = vpop.f32.mrf.mxu1  ;;  %v5396_v58 = vld [vmem:[#allocation2 + $0x102] ss:$2 sm:$0xff]  ;;  %v5670_v15 = vld [vmem:[#allocation2 + $0x143] ss:$2 sm:$0xff] }
 0x44e   : > { %v2338_v7 = vadd.f32 %v2337_v0, %v1552_v63 }
 0x44f   : > { %v4461_v1 = vadd.f32 %v4307_v61, %v3411_v62  ;;  %11936 = vmatmul.msk.f32.gmra.mxu0 %vm4734_vm1, %v4961_v2  ;;  %v4971_v2 = vld [vmem:[#allocation2 + $0x151] ss:$2 sm:$0xff] }
 0x450   : > { %11964 = vmatmul.msk.f32.gmra.mxu1 %vm4734_vm1, %v4903_v3  ;;  %v4913_v3 = vld [vmem:[#allocation2 + $0x150] ss:$2 sm:$0xff] }
 0x451   : > { %v4593_v6 = vadd.f32 %v14741_v59, %v4461_v1  ;;  %11993 = vmatmul.msk.f32.gmra.mxu2 %vm4734_vm1, %v5388_v4  ;;  %12024 = vmatmul.msk.f32.gmra.mxu3 %vm4734_vm1, %v5662_v5  ;;  %v5398_v4 = vld [vmem:[#allocation2 + $0x142] ss:$2 sm:$0xff]  ;;  %v5672_v5 = vld [vmem:[#allocation2 + $0x153] ss:$2 sm:$0xff] }
 0x453   : > { %v4721_v8 = vmax.f32 %v4593_v6, 0.0 }
 0x454   : > { %v3260_v9 = vpop.f32.mrf.mxu2  ;;  %v4310_v10 = vpop.f32.mrf.mxu3 }
 0x455   : > { %4850 = vst.msk [vmem:[#allocation2 + $0x478] sm:$0xff] %vm4734_vm1, %v4721_v8  ;;  %v3412_v11 = vadd.f32 %v3260_v9, %v2338_v7  ;;  %v1555_v13 = vpop.f32.mrf.mxu0  ;;  %v2340_v12 = vpop.f32.mrf.mxu1  ;;  %v4973_v9 = vld [vmem:[#allocation2 + $0x191] ss:$2 sm:$0xff] }
 0x456   : > { %v2341_v21 = vadd.f32 %v2340_v12, %v1555_v13  ;;  %v5674_v13 = vld [vmem:[#allocation2 + $0x193] ss:$2 sm:$0xff] }
 0x457   : > { %v4462_v14 = vadd.f32 %v4310_v10, %v3412_v11  ;;  %11937 = vmatmul.msk.f32.gmra.mxu0 %vm4734_vm1, %v4963_v34  ;;  %v4915_v10 = vld [vmem:[#allocation2 + $0x190] ss:$2 sm:$0xff] }
 0x458   : > { %11965 = vmatmul.msk.f32.gmra.mxu1 %vm4734_vm1, %v4905_v16  ;;  %v5400_v11 = vld [vmem:[#allocation2 + $0x152] ss:$2 sm:$0xff] }
 0x459   : > { %v4594_v20 = vadd.f32 %v14741_v59, %v4462_v14  ;;  %11994 = vmatmul.msk.f32.gmra.mxu2 %vm4734_vm1, %v5390_v17  ;;  %12025 = vmatmul.msk.f32.gmra.mxu3 %vm4734_vm1, %v5664_v18  ;;  %v4975_v17 = vld [vmem:[#allocation2 + $0x1a1] ss:$2 sm:$0xff]  ;;  %v4917_v18 = vld [vmem:[#allocation2 + $0x1a0] ss:$2 sm:$0xff] }
 0x45b   : > { %v4722_v23 = vmax.f32 %v4594_v20, 0.0  ;;  %v5402_v20 = vld [vmem:[#allocation2 + $0x192] ss:$2 sm:$0xff] }
 0x45c   : > { %v3263_v24 = vpop.f32.mrf.mxu2  ;;  %v4313_v25 = vpop.f32.mrf.mxu3 }
 0x45d   : > { %4851 = vst.msk [vmem:[#allocation2 + $0x488] sm:$0xff] %vm4734_vm1, %v4722_v23  ;;  %v3413_v26 = vadd.f32 %v3263_v24, %v2341_v21  ;;  %v1558_v27 = vpop.f32.mrf.mxu0  ;;  %v2343_v28 = vpop.f32.mrf.mxu1  ;;  %v5676_v21 = vld [vmem:[#allocation2 + $0x1a3] ss:$2 sm:$0xff] }
 0x45e   : > { %v2344_v35 = vadd.f32 %v2343_v28, %v1558_v27  ;;  %v12108_v27 = vld [vmem:[%s16542_s3 + $0x60] sm:$0xff]  ;;  %v12138_v28 = vld [vmem:[%s16542_s3 + $0x70] sm:$0xff] }
 0x45f   : > { %v4463_v29 = vadd.f32 %v4313_v25, %v3413_v26  ;;  %11938 = vmatmul.msk.f32.gmra.mxu0 %vm4734_vm1, %v4965_v30  ;;  %6627 = vmatpush.msrb.mxu2 %v12108_v27  ;;  %v4919_v30 = vld [vmem:[#allocation2 + $0x1e0] ss:$2 sm:$0xff] }
 0x460   : > { %11966 = vmatmul.msk.f32.gmra.mxu1 %vm4734_vm1, %v4907_v31  ;;  %6899 = vmatpush.msra.mxu3 %v12138_v28  ;;  %v5404_v31 = vld [vmem:[#allocation2 + $0x1a2] ss:$2 sm:$0xff] }
 0x461   : > { %v4595_v19 = vadd.f32 %v14741_v59, %v4463_v29  ;;  %11995 = vmatmul.msk.f32.gmra.mxu2 %vm4734_vm1, %v5392_v32  ;;  %12026 = vmatmul.msk.f32.gmra.mxu3 %vm4734_vm1, %v5666_v33  ;;  %v4977_v29 = vld [vmem:[#allocation2 + $0x1e1] ss:$2 sm:$0xff] }
 0x462   : > { %v5678_v32 = vld [vmem:[#allocation2 + $0x1e3] ss:$2 sm:$0xff] }
 0x463   : > { %v4723_v36 = vmax.f32 %v4595_v19, 0.0 }
 0x464   : > { %v3266_v37 = vpop.f32.mrf.mxu2  ;;  %v4316_v38 = vpop.f32.mrf.mxu3 }
 0x465   : > { %4852 = vst.msk [vmem:[#allocation2 + $0x490] sm:$0xff] %vm4734_vm1, %v4723_v36  ;;  %v3414_v39 = vadd.f32 %v3266_v37, %v2344_v35  ;;  %v1561_v40 = vpop.f32.mrf.mxu0  ;;  %v2346_v41 = vpop.f32.mrf.mxu1  ;;  %v12078_v37 = vld [vmem:[%s16542_s3 + $0x50] sm:$0xff] }
 0x466   : > { %v2347_v48 = vadd.f32 %v2346_v41, %v1561_v40  ;;  %6355 = vmatpush.msra.mxu1 %v12078_v37  ;;  %v4921_v40 = vld [vmem:[#allocation2 + $0x1f0] ss:$2 sm:$0xff] }
 0x467   : > { %v4464_v42 = vadd.f32 %v4316_v38, %v3414_v39  ;;  %11939 = vmatmul.msk.f32.gmra.mxu0 %vm4734_vm1, %v4967_v43  ;;  %v12048_v38 = vld [vmem:[%s16542_s3 + $0x40] sm:$0xff]  ;;  %v4979_v39 = vld [vmem:[#allocation2 + $0x1f1] ss:$2 sm:$0xff] }
 0x468   : > { %11967 = vmatmul.msk.f32.gmra.mxu1 %vm4734_vm1, %v4909_v44  ;;  %6083 = vmatpush.msra.mxu0 %v12048_v38  ;;  %v5406_v41 = vld [vmem:[#allocation2 + $0x1e2] ss:$2 sm:$0xff] }
 0x469   : > { %v4596_v47 = vadd.f32 %v14741_v59, %v4464_v42  ;;  %11996 = vmatmul.msk.f32.gmra.mxu2 %vm4734_vm1, %v5394_v45  ;;  %12027 = vmatmul.msk.f32.gmra.mxu3 %vm4734_vm1, %v5668_v46  ;;  %v5680_v42 = vld [vmem:[#allocation2 + $0x1f3] ss:$2 sm:$0xff] }
 0x46b   : > { %v4724_v49 = vmax.f32 %v4596_v47, 0.0  ;;  %v4981_v47 = vld [vmem:[#allocation2 + $0x231] ss:$2 sm:$0xff] }
 0x46c   : > { %v3269_v50 = vpop.f32.mrf.mxu2  ;;  %v4319_v51 = vpop.f32.mrf.mxu3 }
 0x46d   : > { %4853 = vst.msk [vmem:[#allocation2 + $0x498] sm:$0xff] %vm4734_vm1, %v4724_v49  ;;  %v3415_v52 = vadd.f32 %v3269_v50, %v2347_v48  ;;  %v1564_v53 = vpop.f32.mrf.mxu0  ;;  %v2349_v54 = vpop.f32.mrf.mxu1  ;;  %v4923_v48 = vld [vmem:[#allocation2 + $0x230] ss:$2 sm:$0xff]  ;;  %v5682_v50 = vld [vmem:[#allocation2 + $0x233] ss:$2 sm:$0xff] }
 0x46e   : > { %v5408_v49 = vld [vmem:[#allocation2 + $0x1f2] ss:$2 sm:$0xff] }
 0x46f   : > { %v4465_v55 = vadd.f32 %v4319_v51, %v3415_v52  ;;  %11940 = vmatmul.msk.f32.gmra.mxu0 %vm4734_vm1, %v4969_v56  ;;  %v4925_v56 = vld [vmem:[#allocation2 + $0x240] ss:$2 sm:$0xff] }
 0x470   : > { %11968 = vmatmul.msk.f32.gmra.mxu1 %vm4734_vm1, %v4911_v57  ;;  %v5410_v57 = vld [vmem:[#allocation2 + $0x232] ss:$2 sm:$0xff] }
 0x471   : > { %v4597_v60 = vadd.f32 %v14741_v59, %v4465_v55  ;;  %11997 = vmatmul.msk.f32.gmra.mxu2 %vm4734_vm1, %v5396_v58  ;;  %12028 = vmatmul.msk.f32.gmra.mxu3 %vm4734_vm1, %v5670_v15  ;;  %v4983_v55 = vld [vmem:[#allocation2 + $0x241] ss:$2 sm:$0xff] }
 0x472   : > { %v5684_v58 = vld [vmem:[#allocation2 + $0x243] ss:$2 sm:$0xff] }
 0x473   : > { %v4725_v61 = vmax.f32 %v4597_v60, 0.0 }
 0x474   : > { %v3272_v62 = vpop.f32.mrf.mxu2  ;;  %v4322_v63 = vpop.f32.mrf.mxu3 }
 0x475   : > { %4854 = vst.msk [vmem:[#allocation2 + $0x4a0] sm:$0xff] %vm4734_vm1, %v4725_v61  ;;  %v1567_v0 = vpop.f32.mrf.mxu0  ;;  %v2352_v1 = vpop.f32.mrf.mxu1  ;;  %v4985_v63 = vld [vmem:[#allocation2 + $0x281] ss:$2 sm:$0xff] }
 0x476   : > { %v4927_v0 = vld [vmem:[#allocation2 + $0x280] ss:$2 sm:$0xff] }
 0x477   : > { %11941 = vmatmul.msk.f32.gmra.mxu0 %vm4734_vm1, %v4971_v2  ;;  %v5412_v1 = vld [vmem:[#allocation2 + $0x242] ss:$2 sm:$0xff]  ;;  %v5686_v2 = vld [vmem:[#allocation2 + $0x283] ss:$2 sm:$0xff] }
 0x478   : > { %11969 = vmatmul.msk.f32.gmra.mxu1 %vm4734_vm1, %v4913_v3 }
 0x479   : > { %11998 = vmatmul.msk.f32.gmra.mxu2 %vm4734_vm1, %v5398_v4  ;;  %12029 = vmatmul.msk.f32.gmra.mxu3 %vm4734_vm1, %v5672_v5 }
 0x47c   : > { %v3275_v59 = vpop.f32.mrf.mxu2  ;;  %v4325_v6 = vpop.f32.mrf.mxu3 }
 0x47d   : > { %v1570_v7 = vpop.f32.mrf.mxu0  ;;  %v2355_v8 = vpop.f32.mrf.mxu1  ;;  %v4987_v6 = vld [vmem:[#allocation2 + $0x291] ss:$2 sm:$0xff] }
 0x47e   : > { %v4929_v7 = vld [vmem:[#allocation2 + $0x290] ss:$2 sm:$0xff] }
 0x47f   : > { %11942 = vmatmul.msk.f32.gmra.mxu0 %vm4734_vm1, %v4973_v9  ;;  %v5414_v8 = vld [vmem:[#allocation2 + $0x282] ss:$2 sm:$0xff]  ;;  %v5688_v9 = vld [vmem:[#allocation2 + $0x293] ss:$2 sm:$0xff] }
 0x480   : > { %11970 = vmatmul.msk.f32.gmra.mxu1 %vm4734_vm1, %v4915_v10 }
 0x481   : > { %11999 = vmatmul.msk.f32.gmra.mxu2 %vm4734_vm1, %v5400_v11  ;;  %12030 = vmatmul.msk.f32.gmra.mxu3 %vm4734_vm1, %v5674_v13 }
 0x484   : > { %v3278_v12 = vpop.f32.mrf.mxu2  ;;  %v4328_v14 = vpop.f32.mrf.mxu3 }
 0x485   : > { %v1573_v34 = vpop.f32.mrf.mxu0  ;;  %v2358_v16 = vpop.f32.mrf.mxu1 }
 0x486   : > { %v4989_v16 = vld [vmem:[#allocation2 + $0x2d1] ss:$2 sm:$0xff] }
 0x487   : > { %11943 = vmatmul.msk.f32.gmra.mxu0 %vm4734_vm1, %v4975_v17  ;;  %v4931_v17 = vld [vmem:[#allocation2 + $0x2d0] ss:$2 sm:$0xff] }
 0x488   : > { %11971 = vmatmul.msk.f32.gmra.mxu1 %vm4734_vm1, %v4917_v18 }
 0x489   : > { %12000 = vmatmul.msk.f32.gmra.mxu2 %vm4734_vm1, %v5402_v20  ;;  %12031 = vmatmul.msk.f32.gmra.mxu3 %vm4734_vm1, %v5676_v21  ;;  %v5416_v20 = vld [vmem:[#allocation2 + $0x292] ss:$2 sm:$0xff]  ;;  %v5690_v21 = vld [vmem:[#allocation2 + $0x2d3] ss:$2 sm:$0xff] }
 0x48c   : > { %v3281_v23 = vpop.f32.mrf.mxu2  ;;  %v4331_v24 = vpop.f32.mrf.mxu3 }
 0x48d   : > { %v1576_v25 = vpop.f32.mrf.mxu0  ;;  %v2361_v26 = vpop.f32.mrf.mxu1 }
 0x48f   : > { %11944 = vmatmul.msk.f32.gmra.mxu0 %vm4734_vm1, %v4977_v29  ;;  %v4991_v29 = vld [vmem:[#allocation2 + $0x2e1] ss:$2 sm:$0xff] }
 0x490   : > { %11972 = vmatmul.msk.f32.gmra.mxu1 %vm4734_vm1, %v4919_v30  ;;  %v4933_v30 = vld [vmem:[#allocation2 + $0x2e0] ss:$2 sm:$0xff] }
 0x491   : > { %12001 = vmatmul.msk.f32.gmra.mxu2 %vm4734_vm1, %v5404_v31  ;;  %12032 = vmatmul.msk.f32.gmra.mxu3 %vm4734_vm1, %v5678_v32  ;;  %v5418_v32 = vld [vmem:[#allocation2 + $0x2d2] ss:$2 sm:$0xff] }
 0x494   : > { %v3284_v33 = vpop.f32.mrf.mxu2  ;;  %v4334_v19 = vpop.f32.mrf.mxu3 }
 0x495   : > { %v1579_v35 = vpop.f32.mrf.mxu0  ;;  %v2364_v36 = vpop.f32.mrf.mxu1  ;;  %v5692_v33 = vld [vmem:[#allocation2 + $0x2e3] ss:$2 sm:$0xff] }
 0x497   : > { %11945 = vmatmul.msk.f32.gmra.mxu0 %vm4734_vm1, %v4979_v39 }
 0x498   : > { %11973 = vmatmul.msk.f32.gmra.mxu1 %vm4734_vm1, %v4921_v40  ;;  %v4993_v40 = vld [vmem:[#allocation2 + $0x321] ss:$2 sm:$0xff] }
 0x499   : > { %12002 = vmatmul.msk.f32.gmra.mxu2 %vm4734_vm1, %v5406_v41  ;;  %12033 = vmatmul.msk.f32.gmra.mxu3 %vm4734_vm1, %v5680_v42  ;;  %v4935_v41 = vld [vmem:[#allocation2 + $0x320] ss:$2 sm:$0xff] }
 0x49c   : > { %v3287_v43 = vpop.f32.mrf.mxu2  ;;  %v4337_v44 = vpop.f32.mrf.mxu3 }
 0x49d   : > { %v1582_v45 = vpop.f32.mrf.mxu0  ;;  %v2367_v46 = vpop.f32.mrf.mxu1  ;;  %v5420_v43 = vld [vmem:[#allocation2 + $0x2e2] ss:$2 sm:$0xff]  ;;  %v5694_v44 = vld [vmem:[#allocation2 + $0x323] ss:$2 sm:$0xff] }
 0x49f   : > { %11946 = vmatmul.msk.f32.gmra.mxu0 %vm4734_vm1, %v4981_v47 }
 0x4a0   : > { %11974 = vmatmul.msk.f32.gmra.mxu1 %vm4734_vm1, %v4923_v48 }
 0x4a1   : > { %12003 = vmatmul.msk.f32.gmra.mxu2 %vm4734_vm1, %v5408_v49  ;;  %12034 = vmatmul.msk.f32.gmra.mxu3 %vm4734_vm1, %v5682_v50 }
 0x4a4   : > { %v3290_v51 = vpop.f32.mrf.mxu2  ;;  %v4340_v52 = vpop.f32.mrf.mxu3 }
 0x4a5   : > { %v1585_v53 = vpop.f32.mrf.mxu0  ;;  %v2370_v54 = vpop.f32.mrf.mxu1  ;;  %v4995_v51 = vld [vmem:[#allocation2 + $0x331] ss:$2 sm:$0xff]  ;;  %v4937_v52 = vld [vmem:[#allocation2 + $0x330] ss:$2 sm:$0xff] }
 0x4a6   : > { %v5422_v54 = vld [vmem:[#allocation2 + $0x322] ss:$2 sm:$0xff] }
 0x4a7   : > { %11947 = vmatmul.msk.f32.gmra.mxu0 %vm4734_vm1, %v4983_v55  ;;  %v5696_v55 = vld [vmem:[#allocation2 + $0x333] ss:$2 sm:$0xff] }
 0x4a8   : > { %11975 = vmatmul.msk.f32.gmra.mxu1 %vm4734_vm1, %v4925_v56 }
 0x4a9   : > { %12004 = vmatmul.msk.f32.gmra.mxu2 %vm4734_vm1, %v5410_v57  ;;  %12035 = vmatmul.msk.f32.gmra.mxu3 %vm4734_vm1, %v5684_v58 }
 0x4ac   : > { %v3293_v15 = vpop.f32.mrf.mxu2  ;;  %v4343_v60 = vpop.f32.mrf.mxu3 }
 0x4ad   : > { %v5112_v61 = vpop.f32.mrf.mxu0  ;;  %v5297_v62 = vpop.f32.mrf.mxu1 }
 0x4ae   : > { %v5298_v10 = vadd.f32 %v5297_v62, %v5112_v61  ;;  %v4997_v62 = vld [vmem:[#allocation2 + $0x371] ss:$2 sm:$0xff] }
 0x4af   : > { %11948 = vmatmul.msk.f32.gmra.mxu0 %vm4734_vm1, %v4985_v63  ;;  %v4939_v63 = vld [vmem:[#allocation2 + $0x370] ss:$2 sm:$0xff] }
 0x4b0   : > { %11976 = vmatmul.msk.f32.gmra.mxu1 %vm4734_vm1, %v4927_v0 }
 0x4b1   : > { %12005 = vmatmul.msk.f32.gmra.mxu2 %vm4734_vm1, %v5412_v1  ;;  %12036 = vmatmul.msk.f32.gmra.mxu3 %vm4734_vm1, %v5686_v2  ;;  %v5424_v1 = vld [vmem:[#allocation2 + $0x332] ss:$2 sm:$0xff]  ;;  %v5698_v2 = vld [vmem:[#allocation2 + $0x373] ss:$2 sm:$0xff] }
 0x4b4   : > { %v5193_v3 = vpop.f32.mrf.mxu2  ;;  %v5813_v4 = vpop.f32.mrf.mxu3 }
 0x4b5   : > { %v5115_v5 = vpop.f32.mrf.mxu0  ;;  %v5300_v59 = vpop.f32.mrf.mxu1 }
 0x4b6   : > { %v5301_v23 = vadd.f32 %v5300_v59, %v5115_v5 }
 0x4b7   : > { %11949 = vmatmul.msk.f32.gmra.mxu0 %vm4734_vm1, %v4987_v6 }
 0x4b8   : > { %11977 = vmatmul.msk.f32.gmra.mxu1 %vm4734_vm1, %v4929_v7 }
 0x4b9   : > { %12006 = vmatmul.msk.f32.gmra.mxu2 %vm4734_vm1, %v5414_v8  ;;  %12037 = vmatmul.msk.f32.gmra.mxu3 %vm4734_vm1, %v5688_v9  ;;  %v4999_v8 = vld [vmem:[#allocation2 + $0x381] ss:$2 sm:$0xff]  ;;  %v4941_v9 = vld [vmem:[#allocation2 + $0x380] ss:$2 sm:$0xff] }
 0x4bc   : > { %v5541_v11 = vpop.f32.mrf.mxu2  ;;  %v5816_v13 = vpop.f32.mrf.mxu3 }
 0x4bd   : > { %v5625_v12 = vadd.f32 %v5541_v11, %v5298_v10  ;;  %v5118_v14 = vpop.f32.mrf.mxu0  ;;  %v5303_v34 = vpop.f32.mrf.mxu1  ;;  %v5426_v11 = vld [vmem:[#allocation2 + $0x372] ss:$2 sm:$0xff] }
 0x4be   : > { %v5304_v19 = vadd.f32 %v5303_v34, %v5118_v14 }
 0x4bf   : > { %v15117_v18 = vadd.f32 %v5813_v4, %v5625_v12  ;;  %11950 = vmatmul.msk.f32.gmra.mxu0 %vm4734_vm1, %v4989_v16 }
 0x4c0   : > { %11978 = vmatmul.msk.f32.gmra.mxu1 %vm4734_vm1, %v4931_v17 }
 0x4c1   : > { %12007 = vmatmul.msk.f32.gmra.mxu2 %vm4734_vm1, %v5416_v20  ;;  %12038 = vmatmul.msk.f32.gmra.mxu3 %vm4734_vm1, %v5690_v21  ;;  %v5001_v21 = vld [vmem:[#allocation2 + $0x3c1] ss:$2 sm:$0xff] }
 0x4c4   : > { %v5544_v24 = vpop.f32.mrf.mxu2  ;;  %v5819_v25 = vpop.f32.mrf.mxu3 }
 0x4c5   : > { %v5626_v26 = vadd.f32 %v5544_v24, %v5301_v23  ;;  %v5121_v27 = vpop.f32.mrf.mxu0  ;;  %v5306_v28 = vpop.f32.mrf.mxu1  ;;  %v4943_v23 = vld [vmem:[#allocation2 + $0x3c0] ss:$2 sm:$0xff] }
 0x4c6   : > { %v5307_v45 = vadd.f32 %v5306_v28, %v5121_v27 }
 0x4c7   : > { %v15123_v31 = vadd.f32 %v5816_v13, %v5626_v26  ;;  %11951 = vmatmul.msk.f32.gmra.mxu0 %vm4734_vm1, %v4991_v29  ;;  %v5700_v13 = vld [vmem:[#allocation2 + $0x383] ss:$2 sm:$0xff] }
 0x4c8   : > { %11979 = vmatmul.msk.f32.gmra.mxu1 %vm4734_vm1, %v4933_v30  ;;  %v5702_v26 = vld [vmem:[#allocation2 + $0x3c3] ss:$2 sm:$0xff] }
 0x4c9   : > { %12008 = vmatmul.msk.f32.gmra.mxu2 %vm4734_vm1, %v5418_v32  ;;  %12039 = vmatmul.msk.f32.gmra.mxu3 %vm4734_vm1, %v5692_v33 }
 0x4cc   : > { %v5547_v35 = vpop.f32.mrf.mxu2  ;;  %v5822_v36 = vpop.f32.mrf.mxu3 }
 0x4cd   : > { %v5627_v37 = vadd.f32 %v5547_v35, %v5304_v19  ;;  %v5124_v38 = vpop.f32.mrf.mxu0  ;;  %v5309_v39 = vpop.f32.mrf.mxu1  ;;  %v5003_v19 = vld [vmem:[#allocation2 + $0x3d1] ss:$2 sm:$0xff]  ;;  %v4945_v35 = vld [vmem:[#allocation2 + $0x3d0] ss:$2 sm:$0xff] }
 0x4ce   : > { %v5310_v56 = vadd.f32 %v5309_v39, %v5124_v38  ;;  %v5704_v38 = vld [vmem:[#allocation2 + $0x3d3] ss:$2 sm:$0xff]  ;;  %v12229_v39 = vld [vmem:[%s16542_s3 + $0xa8] sm:$0xff] }
 0x4cf   : > { %v15129_v42 = vadd.f32 %v5819_v25, %v5627_v37  ;;  %11952 = vmatmul.msk.f32.gmra.mxu0 %vm4734_vm1, %v4993_v40  ;;  %v5428_v25 = vld [vmem:[#allocation2 + $0x382] ss:$2 sm:$0xff]  ;;  %7714 = vmatpush.msra.mxu2 %v12229_v39  ;;  %v6202_v39 = vld [vmem:[#allocation2 + $0x79] ss:$2 sm:$0xff] }
 0x4d0   : > { %11980 = vmatmul.msk.f32.gmra.mxu1 %vm4734_vm1, %v4935_v41  ;;  %v5430_v37 = vld [vmem:[#allocation2 + $0x3c2] ss:$2 sm:$0xff]  ;;  %v12259_v41 = vld [vmem:[%s16542_s3 + $0xb8] sm:$0xff] }
 0x4d1   : > { %12009 = vmatmul.msk.f32.gmra.mxu2 %vm4734_vm1, %v5420_v43  ;;  %12040 = vmatmul.msk.f32.gmra.mxu3 %vm4734_vm1, %v5694_v44  ;;  %v12169_v40 = vld [vmem:[%s16542_s3 + $0x88] sm:$0xff] }
 0x4d2   : > { %7170 = vmatpush.msrb.mxu0 %v12169_v40  ;;  %7986 = vmatpush.msrb.mxu3 %v12259_v41  ;;  %v6472_v41 = vld [vmem:[#allocation2 + $0x3a] ss:$2 sm:$0xff] }
 0x4d4   : > { %v5550_v46 = vpop.f32.mrf.mxu2  ;;  %v5825_v47 = vpop.f32.mrf.mxu3 }
 0x4d5   : > { %v5628_v48 = vadd.f32 %v5550_v46, %v5307_v45  ;;  %v5127_v49 = vpop.f32.mrf.mxu0  ;;  %v5312_v50 = vpop.f32.mrf.mxu1 }
 0x4d6   : > { %v5313_v3 = vadd.f32 %v5312_v50, %v5127_v49  ;;  %v12199_v49 = vld [vmem:[%s16542_s3 + $0x98] sm:$0xff] }
 0x4d7   : > { %v15135_v53 = vadd.f32 %v5822_v36, %v5628_v48  ;;  %11953 = vmatmul.msk.f32.gmra.mxu0 %vm4734_vm1, %v4995_v51  ;;  %7442 = vmatpush.msrb.mxu1 %v12199_v49  ;;  %v5005_v50 = vld [vmem:[#allocation2 + $0x411] ss:$2 sm:$0xff]  ;;  %v4947_v51 = vld [vmem:[#allocation2 + $0x410] ss:$2 sm:$0xff] }
 0x4d8   : > { %11981 = vmatmul.msk.f32.gmra.mxu1 %vm4734_vm1, %v4937_v52 }
 0x4d9   : > { %12010 = vmatmul.msk.f32.gmra.mxu2 %vm4734_vm1, %v5422_v54  ;;  %12041 = vmatmul.msk.f32.gmra.mxu3 %vm4734_vm1, %v5696_v55  ;;  %v5432_v54 = vld [vmem:[#allocation2 + $0x3d2] ss:$2 sm:$0xff]  ;;  %v5706_v55 = vld [vmem:[#allocation2 + $0x413] ss:$2 sm:$0xff] }
 0x4dc   : > { %v5553_v57 = vpop.f32.mrf.mxu2  ;;  %v5828_v58 = vpop.f32.mrf.mxu3 }
 0x4dd   : > { %v5629_v15 = vadd.f32 %v5553_v57, %v5310_v56  ;;  %v5130_v60 = vpop.f32.mrf.mxu0  ;;  %v5315_v61 = vpop.f32.mrf.mxu1 }
 0x4de   : > { %v5316_v12 = vadd.f32 %v5315_v61, %v5130_v60 }
 0x4df   : > { %v15141_v0 = vadd.f32 %v5825_v47, %v5629_v15  ;;  %11954 = vmatmul.msk.f32.gmra.mxu0 %vm4734_vm1, %v4997_v62  ;;  %v4949_v62 = vld [vmem:[#allocation2 + $0x420] ss:$2 sm:$0xff] }
 0x4e0   : > { %11982 = vmatmul.msk.f32.gmra.mxu1 %vm4734_vm1, %v4939_v63  ;;  %v5926_v63 = vld [vmem:[#allocation2 + $0x28] ss:$2 sm:$0xff] }
 0x4e1   : > { %12011 = vmatmul.msk.f32.gmra.mxu2 %vm4734_vm1, %v5424_v1  ;;  %12042 = vmatmul.msk.f32.gmra.mxu3 %vm4734_vm1, %v5698_v2  ;;  %v5434_v2 = vld [vmem:[#allocation2 + $0x412] ss:$2 sm:$0xff] }
 0x4e4   : > { %v5556_v4 = vpop.f32.mrf.mxu2  ;;  %v5831_v5 = vpop.f32.mrf.mxu3 }
 0x4e5   : > { %v5630_v59 = vadd.f32 %v5556_v4, %v5313_v3  ;;  %v5133_v6 = vpop.f32.mrf.mxu0  ;;  %v5318_v7 = vpop.f32.mrf.mxu1  ;;  %v5708_v3 = vld [vmem:[#allocation2 + $0x423] ss:$2 sm:$0xff] }
 0x4e6   : > { %v5319_v27 = vadd.f32 %v5318_v7, %v5133_v6 }
 0x4e7   : > { %v15147_v10 = vadd.f32 %v5828_v58, %v5630_v59  ;;  %11955 = vmatmul.msk.f32.gmra.mxu0 %vm4734_vm1, %v4999_v8 }
 0x4e8   : > { %11983 = vmatmul.msk.f32.gmra.mxu1 %vm4734_vm1, %v4941_v9  ;;  %v5928_v9 = vld [vmem:[#allocation2 + $0x38] ss:$2 sm:$0xff] }
 0x4e9   : > { %12012 = vmatmul.msk.f32.gmra.mxu2 %vm4734_vm1, %v5426_v11  ;;  %12043 = vmatmul.msk.f32.gmra.mxu3 %vm4734_vm1, %v5700_v13  ;;  %v6198_v11 = vld [vmem:[#allocation2 + $0x29] ss:$2 sm:$0xff] }
 0x4ec   : > { %v5559_v14 = vpop.f32.mrf.mxu2  ;;  %v5834_v34 = vpop.f32.mrf.mxu3 }
 0x4ed   : > { %v5631_v16 = vadd.f32 %v5559_v14, %v5316_v12  ;;  %v5136_v17 = vpop.f32.mrf.mxu0  ;;  %v5321_v20 = vpop.f32.mrf.mxu1  ;;  %v5436_v12 = vld [vmem:[#allocation2 + $0x422] ss:$2 sm:$0xff]  ;;  %v6742_v14 = vld [vmem:[#allocation2 + $0x2b] ss:$2 sm:$0xff] }
 0x4ee   : > { %v5322_v43 = vadd.f32 %v5321_v20, %v5136_v17 }
 0x4ef   : > { %v15153_v24 = vadd.f32 %v5831_v5, %v5631_v16  ;;  %11956 = vmatmul.msk.f32.gmra.mxu0 %vm4734_vm1, %v5001_v21 }
 0x4f0   : > { %11984 = vmatmul.msk.f32.gmra.mxu1 %vm4734_vm1, %v4943_v23 }
 0x4f1   : > { %12013 = vmatmul.msk.f32.gmra.mxu2 %vm4734_vm1, %v5428_v25  ;;  %12044 = vmatmul.msk.f32.gmra.mxu3 %vm4734_vm1, %v5702_v26  ;;  %v5930_v25 = vld [vmem:[#allocation2 + $0x78] ss:$2 sm:$0xff]  ;;  %v6200_v26 = vld [vmem:[#allocation2 + $0x39] ss:$2 sm:$0xff] }
 0x4f4   : > { %v5562_v28 = vpop.f32.mrf.mxu2  ;;  %v5837_v29 = vpop.f32.mrf.mxu3 }
 0x4f5   : > { %v5632_v30 = vadd.f32 %v5562_v28, %v5319_v27  ;;  %v5139_v32 = vpop.f32.mrf.mxu0  ;;  %v5324_v33 = vpop.f32.mrf.mxu1  ;;  %v6470_v28 = vld [vmem:[#allocation2 + $0x2a] ss:$2 sm:$0xff] }
 0x4f6   : > { %v5325_v56 = vadd.f32 %v5324_v33, %v5139_v32 }
 0x4f7   : > { %v15159_v36 = vadd.f32 %v5834_v34, %v5632_v30  ;;  %11957 = vmatmul.msk.f32.gmra.mxu0 %vm4734_vm1, %v5003_v19 }
 0x4f8   : > { %11985 = vmatmul.msk.f32.gmra.mxu1 %vm4734_vm1, %v4945_v35 }
 0x4f9   : > { %12014 = vmatmul.msk.f32.gmra.mxu2 %vm4734_vm1, %v5430_v37  ;;  %12045 = vmatmul.msk.f32.gmra.mxu3 %vm4734_vm1, %v5704_v38  ;;  %v5932_v38 = vld [vmem:[#allocation2 + $0x88] ss:$2 sm:$0xff] }
 0x4fc   : > { %v5565_v44 = vpop.f32.mrf.mxu2  ;;  %v5840_v45 = vpop.f32.mrf.mxu3 }
 0x4fd   : > { %v5633_v46 = vadd.f32 %v5565_v44, %v5322_v43  ;;  %v5142_v47 = vpop.f32.mrf.mxu0  ;;  %v5327_v48 = vpop.f32.mrf.mxu1  ;;  %v6746_v43 = vld [vmem:[#allocation2 + $0x7b] ss:$2 sm:$0xff] }
 0x4fe   : > { %v5328_v4 = vadd.f32 %v5327_v48, %v5142_v47 }
 0x4ff   : > { %v15177_v52 = vadd.f32 %v5837_v29, %v5633_v46  ;;  %11958 = vmatmul.msk.f32.gmra.mxu0 %vm4734_vm1, %v5005_v50  ;;  %v6744_v29 = vld [vmem:[#allocation2 + $0x3b] ss:$2 sm:$0xff]  ;;  %v5934_v50 = vld [vmem:[#allocation2 + $0xc8] ss:$2 sm:$0xff] }
 0x500   : > { %11986 = vmatmul.msk.f32.gmra.mxu1 %vm4734_vm1, %v4947_v51  ;;  %v6204_v51 = vld [vmem:[#allocation2 + $0x89] ss:$2 sm:$0xff] }
 0x501   : > { %12015 = vmatmul.msk.f32.gmra.mxu2 %vm4734_vm1, %v5432_v54  ;;  %12046 = vmatmul.msk.f32.gmra.mxu3 %vm4734_vm1, %v5706_v55  ;;  %v6474_v55 = vld [vmem:[#allocation2 + $0x7a] ss:$2 sm:$0xff] }
 0x504   : > { %v5568_v57 = vpop.f32.mrf.mxu2  ;;  %v5843_v58 = vpop.f32.mrf.mxu3 }
 0x505   : > { %v5634_v15 = vadd.f32 %v5568_v57, %v5325_v56  ;;  %v5145_v60 = vpop.f32.mrf.mxu0  ;;  %v5330_v61 = vpop.f32.mrf.mxu1  ;;  %v6748_v56 = vld [vmem:[#allocation2 + $0x8b] ss:$2 sm:$0xff] }
 0x506   : > { %v5331_v34 = vadd.f32 %v5330_v61, %v5145_v60 }
 0x507   : > { %v15183_v1 = vadd.f32 %v5840_v45, %v5634_v15  ;;  %12050 = vmatmul.msk.f32.vlgmr.msra.gmra.mxu0 %vm4734_vm1, %v5926_v63  ;;  %v5936_v63 = vld [vmem:[#allocation2 + $0xd8] ss:$2 sm:$0xff] }
 0x508   : > { %11987 = vmatmul.msk.f32.gmra.mxu1 %vm4734_vm1, %v4949_v62 }
 0x509   : > { %12016 = vmatmul.msk.f32.gmra.mxu2 %vm4734_vm1, %v5434_v2  ;;  %12047 = vmatmul.msk.f32.gmra.mxu3 %vm4734_vm1, %v5708_v3  ;;  %v6206_v2 = vld [vmem:[#allocation2 + $0xc9] ss:$2 sm:$0xff] }
 0x50c   : > { %v5571_v5 = vpop.f32.mrf.mxu2  ;;  %v5846_v59 = vpop.f32.mrf.mxu3 }
 0x50d   : > { %v5635_v6 = vadd.f32 %v5571_v5, %v5328_v4  ;;  %v5148_v7 = vpop.f32.mrf.mxu0  ;;  %v5333_v8 = vpop.f32.mrf.mxu1  ;;  %v6476_v4 = vld [vmem:[#allocation2 + $0x8a] ss:$2 sm:$0xff]  ;;  %v6750_v5 = vld [vmem:[#allocation2 + $0xcb] ss:$2 sm:$0xff] }
 0x50e   : > { %v5334_v30 = vadd.f32 %v5333_v8, %v5148_v7 }
 0x50f   : > { %v15189_v13 = vadd.f32 %v5843_v58, %v5635_v6  ;;  %12051 = vmatmul.msk.f32.gmra.mxu0 %vm4734_vm1, %v5928_v9 }
 0x510   : > { %12080 = vmatmul.msk.f32.vlgmr.msra.gmra.mxu1 %vm4734_vm1, %v6198_v11 }
 0x511   : > { %12017 = vmatmul.msk.f32.gmra.mxu2 %vm4734_vm1, %v5436_v12  ;;  %12140 = vmatmul.msk.f32.vlgmr.msra.gmra.mxu3 %vm4734_vm1, %v6742_v14  ;;  %v5938_v12 = vld [vmem:[#allocation2 + $0x118] ss:$2 sm:$0xff]  ;;  %v6208_v14 = vld [vmem:[#allocation2 + $0xd9] ss:$2 sm:$0xff] }
 0x514   : > { %v5574_v16 = vpop.f32.mrf.mxu2  ;;  %v5849_v17 = vpop.f32.mrf.mxu3 }
 0x515   : > { %v5636_v20 = vadd.f32 %v5574_v16, %v5331_v34  ;;  %v5151_v21 = vpop.f32.mrf.mxu0  ;;  %v5336_v23 = vpop.f32.mrf.mxu1  ;;  %v6478_v16 = vld [vmem:[#allocation2 + $0xca] ss:$2 sm:$0xff] }
 0x516   : > { %v5337_v44 = vadd.f32 %v5336_v23, %v5151_v21 }
 0x517   : > { %v15195_v27 = vadd.f32 %v5846_v59, %v5636_v20  ;;  %12052 = vmatmul.msk.f32.gmra.mxu0 %vm4734_vm1, %v5930_v25 }
 0x518   : > { %12081 = vmatmul.msk.f32.gmra.mxu1 %vm4734_vm1, %v6200_v26 }
 0x519   : > { %12110 = vmatmul.msk.f32.vlgmr.msrb.gmra.mxu2 %vm4734_vm1, %v6470_v28  ;;  %12141 = vmatmul.msk.f32.gmra.mxu3 %vm4734_vm1, %v6744_v29  ;;  %v5940_v29 = vld [vmem:[#allocation2 + $0x128] ss:$2 sm:$0xff] }
 0x51c   : > { %v5577_v32 = vpop.f32.mrf.mxu2  ;;  %v5852_v33 = vpop.f32.mrf.mxu3 }
 0x51d   : > { %v5637_v19 = vadd.f32 %v5577_v32, %v5334_v30  ;;  %v5154_v35 = vpop.f32.mrf.mxu0  ;;  %v5339_v37 = vpop.f32.mrf.mxu1  ;;  %v6210_v30 = vld [vmem:[#allocation2 + $0x119] ss:$2 sm:$0xff] }
 0x51e   : > { %v5340_v57 = vadd.f32 %v5339_v37, %v5154_v35 }
 0x51f   : > { %v15201_v40 = vadd.f32 %v5849_v17, %v5637_v19  ;;  %12053 = vmatmul.msk.f32.gmra.mxu0 %vm4734_vm1, %v5932_v38  ;;  %v6752_v17 = vld [vmem:[#allocation2 + $0xdb] ss:$2 sm:$0xff] }
 0x520   : > { %12082 = vmatmul.msk.f32.gmra.mxu1 %vm4734_vm1, %v6202_v39  ;;  %v6754_v19 = vld [vmem:[#allocation2 + $0x11b] ss:$2 sm:$0xff] }
 0x521   : > { %12111 = vmatmul.msk.f32.gmra.mxu2 %vm4734_vm1, %v6472_v41  ;;  %12142 = vmatmul.msk.f32.gmra.mxu3 %vm4734_vm1, %v6746_v43 }
 0x524   : > { %v5580_v45 = vpop.f32.mrf.mxu2  ;;  %v5855_v46 = vpop.f32.mrf.mxu3 }
 0x525   : > { %v5638_v47 = vadd.f32 %v5580_v45, %v5337_v44  ;;  %v5157_v48 = vpop.f32.mrf.mxu0  ;;  %v5342_v49 = vpop.f32.mrf.mxu1  ;;  %v5942_v44 = vld [vmem:[#allocation2 + $0x168] ss:$2 sm:$0xff]  ;;  %v6212_v45 = vld [vmem:[#allocation2 + $0x129] ss:$2 sm:$0xff] }
 0x526   : > { %v5343_v59 = vadd.f32 %v5342_v49, %v5157_v48  ;;  %v6756_v48 = vld [vmem:[#allocation2 + $0x12b] ss:$2 sm:$0xff] }
 0x527   : > { %v15207_v54 = vadd.f32 %v5852_v33, %v5638_v47  ;;  %12054 = vmatmul.msk.f32.gmra.mxu0 %vm4734_vm1, %v5934_v50  ;;  %v6480_v33 = vld [vmem:[#allocation2 + $0xda] ss:$2 sm:$0xff] }
 0x528   : > { %12083 = vmatmul.msk.f32.gmra.mxu1 %vm4734_vm1, %v6204_v51  ;;  %v6482_v47 = vld [vmem:[#allocation2 + $0x11a] ss:$2 sm:$0xff] }
 0x529   : > { %12112 = vmatmul.msk.f32.gmra.mxu2 %vm4734_vm1, %v6474_v55  ;;  %12143 = vmatmul.msk.f32.gmra.mxu3 %vm4734_vm1, %v6748_v56 }
 0x52c   : > { %v5583_v58 = vpop.f32.mrf.mxu2  ;;  %v5858_v15 = vpop.f32.mrf.mxu3 }
 0x52d   : > { %v5639_v60 = vadd.f32 %v5583_v58, %v5340_v57  ;;  %v5160_v61 = vpop.f32.mrf.mxu0  ;;  %v5345_v62 = vpop.f32.mrf.mxu1  ;;  %v5944_v58 = vld [vmem:[#allocation2 + $0x178] ss:$2 sm:$0xff] }
 0x52e   : > { %v5346_v20 = vadd.f32 %v5345_v62, %v5160_v61  ;;  %v6484_v61 = vld [vmem:[#allocation2 + $0x12a] ss:$2 sm:$0xff]  ;;  %v6758_v62 = vld [vmem:[#allocation2 + $0x16b] ss:$2 sm:$0xff] }
 0x52f   : > { %v15213_v3 = vadd.f32 %v5855_v46, %v5639_v60  ;;  %12055 = vmatmul.msk.f32.gmra.mxu0 %vm4734_vm1, %v5936_v63 }
 0x530   : > { %12084 = vmatmul.msk.f32.gmra.mxu1 %vm4734_vm1, %v6206_v2 }
 0x531   : > { %12113 = vmatmul.msk.f32.gmra.mxu2 %vm4734_vm1, %v6476_v4  ;;  %12144 = vmatmul.msk.f32.gmra.mxu3 %vm4734_vm1, %v6750_v5 }
 0x534   : > { %v5586_v6 = vpop.f32.mrf.mxu2  ;;  %v5861_v7 = vpop.f32.mrf.mxu3 }
 0x535   : > { %v5640_v8 = vadd.f32 %v5586_v6, %v5343_v59  ;;  %v5163_v9 = vpop.f32.mrf.mxu0  ;;  %v5348_v11 = vpop.f32.mrf.mxu1 }
 0x536   : > { %v5349_v35 = vadd.f32 %v5348_v11, %v5163_v9  ;;  %v6486_v11 = vld [vmem:[#allocation2 + $0x16a] ss:$2 sm:$0xff] }
 0x537   : > { %v15219_v34 = vadd.f32 %v5858_v15, %v5640_v8  ;;  %12056 = vmatmul.msk.f32.gmra.mxu0 %vm4734_vm1, %v5938_v12  ;;  %v6214_v15 = vld [vmem:[#allocation2 + $0x169] ss:$2 sm:$0xff]  ;;  %v6216_v8 = vld [vmem:[#allocation2 + $0x179] ss:$2 sm:$0xff] }
 0x538   : > { %12085 = vmatmul.msk.f32.gmra.mxu1 %vm4734_vm1, %v6208_v14  ;;  %v6760_v12 = vld [vmem:[#allocation2 + $0x17b] ss:$2 sm:$0xff] }
 0x539   : > { %12114 = vmatmul.msk.f32.gmra.mxu2 %vm4734_vm1, %v6478_v16  ;;  %12145 = vmatmul.msk.f32.gmra.mxu3 %vm4734_vm1, %v6752_v17 }
 0x53c   : > { %v5589_v21 = vpop.f32.mrf.mxu2  ;;  %v5864_v23 = vpop.f32.mrf.mxu3 }
 0x53d   : > { %v5641_v25 = vadd.f32 %v5589_v21, %v5346_v20  ;;  %v5166_v26 = vpop.f32.mrf.mxu0  ;;  %v5351_v28 = vpop.f32.mrf.mxu1 }
 0x53e   : > { %v5352_v49 = vadd.f32 %v5351_v28, %v5166_v26  ;;  %v6218_v26 = vld [vmem:[#allocation2 + $0x1b9] ss:$2 sm:$0xff] }
 0x53f   : > { %v15225_v32 = vadd.f32 %v5861_v7, %v5641_v25  ;;  %12057 = vmatmul.msk.f32.gmra.mxu0 %vm4734_vm1, %v5940_v29  ;;  %v5946_v7 = vld [vmem:[#allocation2 + $0x1b8] ss:$2 sm:$0xff]  ;;  %v5948_v25 = vld [vmem:[#allocation2 + $0x1c8] ss:$2 sm:$0xff] }
 0x540   : > { %12086 = vmatmul.msk.f32.gmra.mxu1 %vm4734_vm1, %v6210_v30  ;;  %v6488_v29 = vld [vmem:[#allocation2 + $0x17a] ss:$2 sm:$0xff]  ;;  %v6762_v30 = vld [vmem:[#allocation2 + $0x1bb] ss:$2 sm:$0xff] }
 0x541   : > { %12115 = vmatmul.msk.f32.gmra.mxu2 %vm4734_vm1, %v6480_v33  ;;  %12146 = vmatmul.msk.f32.gmra.mxu3 %vm4734_vm1, %v6754_v19 }
 0x544   : > { %v5592_v37 = vpop.f32.mrf.mxu2  ;;  %v5867_v38 = vpop.f32.mrf.mxu3 }
 0x545   : > { %v5642_v39 = vadd.f32 %v5592_v37, %v5349_v35  ;;  %v5169_v41 = vpop.f32.mrf.mxu0  ;;  %v5354_v43 = vpop.f32.mrf.mxu1 }
 0x546   : > { %v5355_v63 = vadd.f32 %v5354_v43, %v5169_v41  ;;  %v5950_v41 = vld [vmem:[#allocation2 + $0x208] ss:$2 sm:$0xff]  ;;  %v6220_v43 = vld [vmem:[#allocation2 + $0x1c9] ss:$2 sm:$0xff] }
 0x547   : > { %v15231_v46 = vadd.f32 %v5864_v23, %v5642_v39  ;;  %12058 = vmatmul.msk.f32.gmra.mxu0 %vm4734_vm1, %v5942_v44 }
 0x548   : > { %12087 = vmatmul.msk.f32.gmra.mxu1 %vm4734_vm1, %v6212_v45  ;;  %v6490_v45 = vld [vmem:[#allocation2 + $0x1ba] ss:$2 sm:$0xff] }
 0x549   : > { %12116 = vmatmul.msk.f32.gmra.mxu2 %vm4734_vm1, %v6482_v47  ;;  %12147 = vmatmul.msk.f32.gmra.mxu3 %vm4734_vm1, %v6756_v48  ;;  %v6764_v47 = vld [vmem:[#allocation2 + $0x1cb] ss:$2 sm:$0xff]  ;;  %v12228_v48 = vld [vmem:[%s16542_s3 + $0xa0] sm:$0xff] }
 0x54a   : > { %7715 = vmatpush.msra.mxu2 %v12228_v48 }
 0x54c   : > { %v5595_v50 = vpop.f32.mrf.mxu2  ;;  %v5870_v51 = vpop.f32.mrf.mxu3 }
 0x54d   : > { %v5643_v55 = vadd.f32 %v5595_v50, %v5352_v49  ;;  %v5172_v56 = vpop.f32.mrf.mxu0  ;;  %v5357_v57 = vpop.f32.mrf.mxu1  ;;  %v12168_v49 = vld [vmem:[%s16542_s3 + $0x80] sm:$0xff]  ;;  %v12258_v50 = vld [vmem:[%s16542_s3 + $0xb0] sm:$0xff] }
 0x54e   : > { %v5358_v14 = vadd.f32 %v5357_v57, %v5172_v56  ;;  %7171 = vmatpush.msrb.mxu0 %v12168_v49  ;;  %7987 = vmatpush.msrb.mxu3 %v12258_v50  ;;  %v5958_v50 = vld [vmem:[#allocation2 + $0x2a8] ss:$2 sm:$0xff] }
 0x54f   : > { %v15237_v60 = vadd.f32 %v5867_v38, %v5643_v55  ;;  %12059 = vmatmul.msk.f32.gmra.mxu0 %vm4734_vm1, %v5944_v58 }
 0x550   : > { %12088 = vmatmul.msk.f32.gmra.mxu1 %vm4734_vm1, %v6214_v15 }
 0x551   : > { %12117 = vmatmul.msk.f32.gmra.mxu2 %vm4734_vm1, %v6484_v61  ;;  %12148 = vmatmul.msk.f32.gmra.mxu3 %vm4734_vm1, %v6758_v62  ;;  %v12198_v61 = vld [vmem:[%s16542_s3 + $0x90] sm:$0xff]  ;;  %v5952_v62 = vld [vmem:[#allocation2 + $0x218] ss:$2 sm:$0xff] }
 0x552   : > { %7443 = vmatpush.msrb.mxu1 %v12198_v61 }
 0x554   : > { %v5598_v2 = vpop.f32.mrf.mxu2  ;;  %v5873_v4 = vpop.f32.mrf.mxu3 }
 0x555   : > { %v5644_v5 = vadd.f32 %v5598_v2, %v5355_v63  ;;  %v5175_v59 = vpop.f32.mrf.mxu0  ;;  %v5360_v6 = vpop.f32.mrf.mxu1  ;;  %v6222_v63 = vld [vmem:[#allocation2 + $0x209] ss:$2 sm:$0xff] }
 0x556   : > { %v5361_v33 = vadd.f32 %v5360_v6, %v5175_v59 }
 0x557   : > { %v15243_v9 = vadd.f32 %v5870_v51, %v5644_v5  ;;  %12060 = vmatmul.msk.f32.gmra.mxu0 %vm4734_vm1, %v5946_v7  ;;  %v6766_v5 = vld [vmem:[#allocation2 + $0x20b] ss:$2 sm:$0xff] }
 0x558   : > { %12089 = vmatmul.msk.f32.gmra.mxu1 %vm4734_vm1, %v6216_v8 }
 0x559   : > { %12118 = vmatmul.msk.f32.gmra.mxu2 %vm4734_vm1, %v6486_v11  ;;  %12149 = vmatmul.msk.f32.gmra.mxu3 %vm4734_vm1, %v6760_v12 }
 0x55c   : > { %v5601_v16 = vpop.f32.mrf.mxu2  ;;  %v5876_v17 = vpop.f32.mrf.mxu3 }
 0x55d   : > { %v5645_v20 = vadd.f32 %v5601_v16, %v5358_v14  ;;  %v5178_v21 = vpop.f32.mrf.mxu0  ;;  %v5363_v23 = vpop.f32.mrf.mxu1  ;;  %v5954_v14 = vld [vmem:[#allocation2 + $0x258] ss:$2 sm:$0xff]  ;;  %v6224_v16 = vld [vmem:[#allocation2 + $0x219] ss:$2 sm:$0xff] }
 0x55e   : > { %v5364_v51 = vadd.f32 %v5363_v23, %v5178_v21  ;;  %v6768_v21 = vld [vmem:[#allocation2 + $0x21b] ss:$2 sm:$0xff] }
 0x55f   : > { %v15249_v28 = vadd.f32 %v5873_v4, %v5645_v20  ;;  %12061 = vmatmul.msk.f32.gmra.mxu0 %vm4734_vm1, %v5948_v25  ;;  %v6492_v4 = vld [vmem:[#allocation2 + $0x1ca] ss:$2 sm:$0xff] }
 0x560   : > { %12090 = vmatmul.msk.f32.gmra.mxu1 %vm4734_vm1, %v6218_v26  ;;  %v6494_v20 = vld [vmem:[#allocation2 + $0x20a] ss:$2 sm:$0xff] }
 0x561   : > { %12119 = vmatmul.msk.f32.gmra.mxu2 %vm4734_vm1, %v6488_v29  ;;  %12150 = vmatmul.msk.f32.gmra.mxu3 %vm4734_vm1, %v6762_v30 }
 0x564   : > { %v5604_v19 = vpop.f32.mrf.mxu2  ;;  %v5879_v35 = vpop.f32.mrf.mxu3 }
 0x565   : > { %v5646_v37 = vadd.f32 %v5604_v19, %v5361_v33  ;;  %v5181_v38 = vpop.f32.mrf.mxu0  ;;  %v5366_v39 = vpop.f32.mrf.mxu1  ;;  %v5956_v19 = vld [vmem:[#allocation2 + $0x268] ss:$2 sm:$0xff] }
 0x566   : > { %v5367_v59 = vadd.f32 %v5366_v39, %v5181_v38  ;;  %v6496_v38 = vld [vmem:[#allocation2 + $0x21a] ss:$2 sm:$0xff]  ;;  %v6770_v39 = vld [vmem:[#allocation2 + $0x25b] ss:$2 sm:$0xff] }
 0x567   : > { %v15255_v44 = vadd.f32 %v5876_v17, %v5646_v37  ;;  %12062 = vmatmul.msk.f32.gmra.mxu0 %vm4734_vm1, %v5950_v41 }
 0x568   : > { %12091 = vmatmul.msk.f32.gmra.mxu1 %vm4734_vm1, %v6220_v43 }
 0x569   : > { %12120 = vmatmul.msk.f32.gmra.mxu2 %vm4734_vm1, %v6490_v45  ;;  %12151 = vmatmul.msk.f32.gmra.mxu3 %vm4734_vm1, %v6764_v47 }
 0x56c   : > { %v5607_v55 = vpop.f32.mrf.mxu2  ;;  %v5882_v56 = vpop.f32.mrf.mxu3 }
 0x56d   : > { %v5647_v57 = vadd.f32 %v5607_v55, %v5364_v51  ;;  %v5184_v58 = vpop.f32.mrf.mxu0  ;;  %v5369_v15 = vpop.f32.mrf.mxu1  ;;  %v6228_v51 = vld [vmem:[#allocation2 + $0x269] ss:$2 sm:$0xff] }
 0x56e   : > { %v5370_v23 = vadd.f32 %v5369_v15, %v5184_v58 }
 0x56f   : > { %v15273_v2 = vadd.f32 %v5879_v35, %v5647_v57  ;;  %12063 = vmatmul.msk.f32.gmra.mxu0 %vm4734_vm1, %v5952_v62  ;;  %v6226_v35 = vld [vmem:[#allocation2 + $0x259] ss:$2 sm:$0xff] }
 0x570   : > { %12092 = vmatmul.msk.f32.gmra.mxu1 %vm4734_vm1, %v6222_v63  ;;  %v6772_v57 = vld [vmem:[#allocation2 + $0x26b] ss:$2 sm:$0xff]  ;;  %v5960_v63 = vld [vmem:[#allocation2 + $0x2b8] ss:$2 sm:$0xff] }
 0x571   : > { %12121 = vmatmul.msk.f32.gmra.mxu2 %vm4734_vm1, %v6492_v4  ;;  %12152 = vmatmul.msk.f32.gmra.mxu3 %vm4734_vm1, %v6766_v5  ;;  %v6230_v4 = vld [vmem:[#allocation2 + $0x2a9] ss:$2 sm:$0xff]  ;;  %v6500_v5 = vld [vmem:[#allocation2 + $0x26a] ss:$2 sm:$0xff] }
 0x574   : > { %v5610_v6 = vpop.f32.mrf.mxu2  ;;  %v5885_v7 = vpop.f32.mrf.mxu3 }
 0x575   : > { %v5648_v8 = vadd.f32 %v5610_v6, %v5367_v59  ;;  %v5187_v11 = vpop.f32.mrf.mxu0  ;;  %v5372_v12 = vpop.f32.mrf.mxu1  ;;  %v6774_v59 = vld [vmem:[#allocation2 + $0x2ab] ss:$2 sm:$0xff] }
 0x576   : > { %v5373_v41 = vadd.f32 %v5372_v12, %v5187_v11  ;;  %v5962_v12 = vld [vmem:[#allocation2 + $0x2f8] ss:$2 sm:$0xff] }
 0x577   : > { %v15279_v17 = vadd.f32 %v5882_v56, %v5648_v8  ;;  %12064 = vmatmul.msk.f32.gmra.mxu0 %vm4734_vm1, %v5954_v14  ;;  %v6498_v56 = vld [vmem:[#allocation2 + $0x25a] ss:$2 sm:$0xff]  ;;  %v6232_v14 = vld [vmem:[#allocation2 + $0x2b9] ss:$2 sm:$0xff] }
 0x578   : > { %12093 = vmatmul.msk.f32.gmra.mxu1 %vm4734_vm1, %v6224_v16  ;;  %v6502_v16 = vld [vmem:[#allocation2 + $0x2aa] ss:$2 sm:$0xff] }
 0x579   : > { %12122 = vmatmul.msk.f32.gmra.mxu2 %vm4734_vm1, %v6494_v20  ;;  %12153 = vmatmul.msk.f32.gmra.mxu3 %vm4734_vm1, %v6768_v21  ;;  %v6776_v20 = vld [vmem:[#allocation2 + $0x2bb] ss:$2 sm:$0xff] }
 0x57c   : > { %v5613_v25 = vpop.f32.mrf.mxu2  ;;  %v5888_v26 = vpop.f32.mrf.mxu3 }
 0x57d   : > { %v5649_v29 = vadd.f32 %v5613_v25, %v5370_v23  ;;  %v5190_v30 = vpop.f32.mrf.mxu0  ;;  %v5375_v33 = vpop.f32.mrf.mxu1 }
 0x57f   : > { %v15285_v37 = vadd.f32 %v5885_v7, %v5649_v29  ;;  %12065 = vmatmul.msk.f32.gmra.mxu0 %vm4734_vm1, %v5956_v19  ;;  %v5964_v19 = vld [vmem:[#allocation2 + $0x308] ss:$2 sm:$0xff] }
 0x580   : > { %12094 = vmatmul.msk.f32.gmra.mxu1 %vm4734_vm1, %v6226_v35  ;;  %v6234_v35 = vld [vmem:[#allocation2 + $0x2f9] ss:$2 sm:$0xff] }
 0x581   : > { %12123 = vmatmul.msk.f32.gmra.mxu2 %vm4734_vm1, %v6496_v38  ;;  %12154 = vmatmul.msk.f32.gmra.mxu3 %vm4734_vm1, %v6770_v39  ;;  %v6504_v39 = vld [vmem:[#allocation2 + $0x2ba] ss:$2 sm:$0xff] }
 0x584   : > { %v5616_v43 = vpop.f32.mrf.mxu2  ;;  %v5891_v45 = vpop.f32.mrf.mxu3 }
 0x585   : > { %v5650_v47 = vadd.f32 %v5616_v43, %v5373_v41  ;;  %v5378_v48 = vpop.f32.mrf.mxu1  ;;  %v6085_v49 = vpop.f32.mrf.mxu0 }
 0x586   : > { %v6169_v21 = vadd.f32 %v6085_v49, %v15117_v18  ;;  %v6778_v18 = vld [vmem:[#allocation2 + $0x2fb] ss:$2 sm:$0xff] }
 0x587   : > { %v15291_v55 = vadd.f32 %v5888_v26, %v5650_v47  ;;  %12066 = vmatmul.msk.f32.gmra.mxu0 %vm4734_vm1, %v5958_v50 }
 0x588   : > { %12095 = vmatmul.msk.f32.gmra.mxu1 %vm4734_vm1, %v6228_v51  ;;  %v5966_v51 = vld [vmem:[#allocation2 + $0x348] ss:$2 sm:$0xff] }
 0x589   : > { %12124 = vmatmul.msk.f32.gmra.mxu2 %vm4734_vm1, %v6498_v56  ;;  %12155 = vmatmul.msk.f32.gmra.mxu3 %vm4734_vm1, %v6772_v57  ;;  %v6236_v56 = vld [vmem:[#allocation2 + $0x309] ss:$2 sm:$0xff] }
 0x58c   : > { %v5619_v58 = vpop.f32.mrf.mxu2  ;;  %v5894_v15 = vpop.f32.mrf.mxu3 }
 0x58d   : > { %v6088_v61 = vpop.f32.mrf.mxu0  ;;  %v6357_v62 = vpop.f32.mrf.mxu1  ;;  %v6506_v58 = vld [vmem:[#allocation2 + $0x2fa] ss:$2 sm:$0xff] }
 0x58e   : > { %v6441_v23 = vadd.f32 %v6357_v62, %v6169_v21  ;;  %v6170_v41 = vadd.f32 %v6088_v61, %v15123_v31  ;;  %v6780_v31 = vld [vmem:[#allocation2 + $0x30b] ss:$2 sm:$0xff] }
 0x58f   : > { %12067 = vmatmul.msk.f32.gmra.mxu0 %vm4734_vm1, %v5960_v63 }
 0x590   : > { %12096 = vmatmul.msk.f32.gmra.mxu1 %vm4734_vm1, %v6230_v4 }
 0x591   : > { %12125 = vmatmul.msk.f32.gmra.mxu2 %vm4734_vm1, %v6500_v5  ;;  %12156 = vmatmul.msk.f32.gmra.mxu3 %vm4734_vm1, %v6774_v59 }
 0x594   : > { %v5622_v6 = vpop.f32.mrf.mxu2  ;;  %v6901_v7 = vpop.f32.mrf.mxu3 }
 0x595   : > { %v6091_v8 = vpop.f32.mrf.mxu0  ;;  %v6360_v11 = vpop.f32.mrf.mxu1  ;;  %v5968_v6 = vld [vmem:[#allocation2 + $0x358] ss:$2 sm:$0xff] }
 0x596   : > { %v6442_v43 = vadd.f32 %v6360_v11, %v6170_v41  ;;  %v6171_v15 = vadd.f32 %v6091_v8, %v15129_v42  ;;  %v6782_v42 = vld [vmem:[#allocation2 + $0x34b] ss:$2 sm:$0xff] }
 0x597   : > { %12068 = vmatmul.msk.f32.gmra.mxu0 %vm4734_vm1, %v5962_v12  ;;  %v6508_v12 = vld [vmem:[#allocation2 + $0x30a] ss:$2 sm:$0xff] }
 0x598   : > { %12097 = vmatmul.msk.f32.gmra.mxu1 %vm4734_vm1, %v6232_v14 }
 0x599   : > { %12126 = vmatmul.msk.f32.gmra.mxu2 %vm4734_vm1, %v6502_v16  ;;  %12157 = vmatmul.msk.f32.gmra.mxu3 %vm4734_vm1, %v6776_v20 }
 0x59c   : > { %v6629_v25 = vpop.f32.mrf.mxu2  ;;  %v6904_v26 = vpop.f32.mrf.mxu3 }
 0x59d   : > { %v6713_v29 = vadd.f32 %v6629_v25, %v6441_v23  ;;  %v6094_v30 = vpop.f32.mrf.mxu0  ;;  %v6363_v33 = vpop.f32.mrf.mxu1 }
 0x59e   : > { %v6443_v61 = vadd.f32 %v6363_v33, %v6171_v15  ;;  %v6172_v8 = vadd.f32 %v6094_v30, %v15135_v53  ;;  %v6784_v53 = vld [vmem:[#allocation2 + $0x35b] ss:$2 sm:$0xff] }
 0x59f   : > { %v15306_v38 = vadd.f32 %v6901_v7, %v6713_v29  ;;  %12069 = vmatmul.msk.f32.gmra.mxu0 %vm4734_vm1, %v5964_v19  ;;  %v6238_v7 = vld [vmem:[#allocation2 + $0x349] ss:$2 sm:$0xff]  ;;  %v6240_v29 = vld [vmem:[#allocation2 + $0x359] ss:$2 sm:$0xff]  ;;  %v6510_v19 = vld [vmem:[#allocation2 + $0x34a] ss:$2 sm:$0xff] }
 0x5a0   : > { %12098 = vmatmul.msk.f32.gmra.mxu1 %vm4734_vm1, %v6234_v35 }
 0x5a1   : > { %12127 = vmatmul.msk.f32.gmra.mxu2 %vm4734_vm1, %v6504_v39  ;;  %12158 = vmatmul.msk.f32.gmra.mxu3 %vm4734_vm1, %v6778_v18 }
 0x5a4   : > { %v6632_v45 = vpop.f32.mrf.mxu2  ;;  %v6907_v47 = vpop.f32.mrf.mxu3 }
 0x5a5   : > { %v6714_v48 = vadd.f32 %v6632_v45, %v6442_v43  ;;  %v6097_v49 = vpop.f32.mrf.mxu0  ;;  %v6366_v50 = vpop.f32.mrf.mxu1 }
 0x5a6   : > { %v6444_v14 = vadd.f32 %v6366_v50, %v6172_v8  ;;  %v6173_v30 = vadd.f32 %v6097_v49, %v15141_v0  ;;  %v6786_v0 = vld [vmem:[#allocation2 + $0x39b] ss:$2 sm:$0xff] }
 0x5a7   : > { %v15313_v57 = vadd.f32 %v6904_v26, %v6714_v48  ;;  %12070 = vmatmul.msk.f32.gmra.mxu0 %vm4734_vm1, %v5966_v51  ;;  %v5970_v26 = vld [vmem:[#allocation2 + $0x398] ss:$2 sm:$0xff]  ;;  %v6242_v48 = vld [vmem:[#allocation2 + $0x399] ss:$2 sm:$0xff] }
 0x5a8   : > { %12099 = vmatmul.msk.f32.gmra.mxu1 %vm4734_vm1, %v6236_v56  ;;  %v6512_v51 = vld [vmem:[#allocation2 + $0x35a] ss:$2 sm:$0xff] }
 0x5a9   : > { %12128 = vmatmul.msk.f32.gmra.mxu2 %vm4734_vm1, %v6506_v58  ;;  %12159 = vmatmul.msk.f32.gmra.mxu3 %vm4734_vm1, %v6780_v31 }
 0x5ac   : > { %v6635_v62 = vpop.f32.mrf.mxu2  ;;  %v6910_v63 = vpop.f32.mrf.mxu3 }
 0x5ad   : > { %v6715_v4 = vadd.f32 %v6635_v62, %v6443_v61  ;;  %v6100_v5 = vpop.f32.mrf.mxu0  ;;  %v6369_v59 = vpop.f32.mrf.mxu1 }
 0x5ae   : > { %v6445_v35 = vadd.f32 %v6369_v59, %v6173_v30  ;;  %v6174_v49 = vadd.f32 %v6100_v5, %v15147_v10  ;;  %v6788_v10 = vld [vmem:[#allocation2 + $0x3ab] ss:$2 sm:$0xff] }
 0x5af   : > { %v15320_v11 = vadd.f32 %v6907_v47, %v6715_v4  ;;  %12071 = vmatmul.msk.f32.gmra.mxu0 %vm4734_vm1, %v5968_v6  ;;  %v5972_v47 = vld [vmem:[#allocation2 + $0x3a8] ss:$2 sm:$0xff]  ;;  %v6244_v4 = vld [vmem:[#allocation2 + $0x3a9] ss:$2 sm:$0xff] }
 0x5b0   : > { %12100 = vmatmul.msk.f32.gmra.mxu1 %vm4734_vm1, %v6238_v7  ;;  %v6514_v6 = vld [vmem:[#allocation2 + $0x39a] ss:$2 sm:$0xff] }
 0x5b1   : > { %12129 = vmatmul.msk.f32.gmra.mxu2 %vm4734_vm1, %v6508_v12  ;;  %12160 = vmatmul.msk.f32.gmra.mxu3 %vm4734_vm1, %v6782_v42 }
 0x5b4   : > { %v6638_v16 = vpop.f32.mrf.mxu2  ;;  %v6913_v20 = vpop.f32.mrf.mxu3 }
 0x5b5   : > { %v6716_v21 = vadd.f32 %v6638_v16, %v6444_v14  ;;  %v6103_v23 = vpop.f32.mrf.mxu0  ;;  %v6372_v25 = vpop.f32.mrf.mxu1 }
 0x5b6   : > { %v6446_v56 = vadd.f32 %v6372_v25, %v6174_v49  ;;  %v6175_v5 = vadd.f32 %v6103_v23, %v15153_v24  ;;  %v6790_v24 = vld [vmem:[#allocation2 + $0x3eb] ss:$2 sm:$0xff] }
 0x5b7   : > { %v15327_v33 = vadd.f32 %v6910_v63, %v6716_v21  ;;  %12072 = vmatmul.msk.f32.gmra.mxu0 %vm4734_vm1, %v5970_v26  ;;  %v5974_v63 = vld [vmem:[#allocation2 + $0x3e8] ss:$2 sm:$0xff]  ;;  %v6246_v21 = vld [vmem:[#allocation2 + $0x3e9] ss:$2 sm:$0xff] }
 0x5b8   : > { %12101 = vmatmul.msk.f32.gmra.mxu1 %vm4734_vm1, %v6240_v29  ;;  %v6516_v26 = vld [vmem:[#allocation2 + $0x3aa] ss:$2 sm:$0xff] }
 0x5b9   : > { %12130 = vmatmul.msk.f32.gmra.mxu2 %vm4734_vm1, %v6510_v19  ;;  %12161 = vmatmul.msk.f32.gmra.mxu3 %vm4734_vm1, %v6784_v53 }
 0x5bc   : > { %v6641_v39 = vpop.f32.mrf.mxu2  ;;  %v6916_v18 = vpop.f32.mrf.mxu3 }
 0x5bd   : > { %v6717_v41 = vadd.f32 %v6641_v39, %v6445_v35  ;;  %v6106_v43 = vpop.f32.mrf.mxu0  ;;  %v6375_v45 = vpop.f32.mrf.mxu1 }
 0x5be   : > { %v6447_v7 = vadd.f32 %v6375_v45, %v6175_v5  ;;  %v6176_v23 = vadd.f32 %v6106_v43, %v15159_v36  ;;  %v6792_v36 = vld [vmem:[#allocation2 + $0x3fb] ss:$2 sm:$0xff] }
 0x5bf   : > { %v15334_v50 = vadd.f32 %v6913_v20, %v6717_v41  ;;  %12073 = vmatmul.msk.f32.gmra.mxu0 %vm4734_vm1, %v5972_v47  ;;  %v5976_v20 = vld [vmem:[#allocation2 + $0x3f8] ss:$2 sm:$0xff]  ;;  %v6248_v41 = vld [vmem:[#allocation2 + $0x3f9] ss:$2 sm:$0xff] }
 0x5c0   : > { %12102 = vmatmul.msk.f32.gmra.mxu1 %vm4734_vm1, %v6242_v48  ;;  %v6518_v47 = vld [vmem:[#allocation2 + $0x3ea] ss:$2 sm:$0xff] }
 0x5c1   : > { %12131 = vmatmul.msk.f32.gmra.mxu2 %vm4734_vm1, %v6512_v51  ;;  %12162 = vmatmul.msk.f32.gmra.mxu3 %vm4734_vm1, %v6786_v0  ;;  %v12349_v48 = vld [vmem:[%s16542_s3 + $0xe8] sm:$0xff]  ;;  %v12379_v0 = vld [vmem:[%s16542_s3 + $0xf8] sm:$0xff] }
 0x5c2   : > { %v12289_v51 = vld [vmem:[%s16542_s3 + $0xc8] sm:$0xff]  ;;  %8802 = vmatpush.msrb.mxu2 %v12349_v48  ;;  %9074 = vmatpush.msra.mxu3 %v12379_v0 }
 0x5c3   : > { %8258 = vmatpush.msra.mxu0 %v12289_v51 }
 0x5c4   : > { %v6644_v58 = vpop.f32.mrf.mxu2  ;;  %v6919_v31 = vpop.f32.mrf.mxu3 }
 0x5c5   : > { %v6718_v15 = vadd.f32 %v6644_v58, %v6446_v56  ;;  %v6109_v61 = vpop.f32.mrf.mxu0  ;;  %v6378_v62 = vpop.f32.mrf.mxu1 }
 0x5c6   : > { %v6448_v29 = vadd.f32 %v6378_v62, %v6176_v23  ;;  %v6177_v43 = vadd.f32 %v6109_v61, %v15177_v52  ;;  %v12319_v61 = vld [vmem:[%s16542_s3 + $0xd8] sm:$0xff]  ;;  %v5980_v62 = vld [vmem:[#allocation2 + $0x448] ss:$2 sm:$0xff] }
 0x5c7   : > { %v15341_v59 = vadd.f32 %v6916_v18, %v6718_v15  ;;  %12074 = vmatmul.msk.f32.gmra.mxu0 %vm4734_vm1, %v5974_v63  ;;  %v5978_v18 = vld [vmem:[#allocation2 + $0x438] ss:$2 sm:$0xff]  ;;  %8530 = vmatpush.msra.mxu1 %v12319_v61  ;;  %v6250_v63 = vld [vmem:[#allocation2 + $0x439] ss:$2 sm:$0xff] }
 0x5c8   : > { %12103 = vmatmul.msk.f32.gmra.mxu1 %vm4734_vm1, %v6244_v4  ;;  %v6522_v23 = vld [vmem:[#allocation2 + $0x43a] ss:$2 sm:$0xff] }
 0x5c9   : > { %12132 = vmatmul.msk.f32.gmra.mxu2 %vm4734_vm1, %v6514_v6  ;;  %12163 = vmatmul.msk.f32.gmra.mxu3 %vm4734_vm1, %v6788_v10  ;;  %v6520_v6 = vld [vmem:[#allocation2 + $0x3fa] ss:$2 sm:$0xff]  ;;  %v6794_v10 = vld [vmem:[#allocation2 + $0x43b] ss:$2 sm:$0xff] }
 0x5cc   : > { %v6647_v12 = vpop.f32.mrf.mxu2  ;;  %v6922_v42 = vpop.f32.mrf.mxu3 }
 0x5cd   : > { %v6719_v8 = vadd.f32 %v6647_v12, %v6447_v7  ;;  %v6112_v14 = vpop.f32.mrf.mxu0  ;;  %v6381_v16 = vpop.f32.mrf.mxu1 }
 0x5ce   : > { %v6449_v49 = vadd.f32 %v6381_v16, %v6177_v43  ;;  %v6178_v5 = vadd.f32 %v6112_v14, %v15183_v1  ;;  %v6524_v43 = vld [vmem:[#allocation2 + $0x44a] ss:$2 sm:$0xff] }
 0x5cf   : > { %v15348_v25 = vadd.f32 %v6919_v31, %v6719_v8  ;;  %12075 = vmatmul.msk.f32.gmra.mxu0 %vm4734_vm1, %v5976_v20 }
 0x5d0   : > { %12104 = vmatmul.msk.f32.gmra.mxu1 %vm4734_vm1, %v6246_v21  ;;  %v6252_v21 = vld [vmem:[#allocation2 + $0x449] ss:$2 sm:$0xff] }
 0x5d1   : > { %12133 = vmatmul.msk.f32.gmra.mxu2 %vm4734_vm1, %v6516_v26  ;;  %12164 = vmatmul.msk.f32.gmra.mxu3 %vm4734_vm1, %v6790_v24  ;;  %v7014_v26 = vld [vmem:[#allocation2 + $0x50] ss:$2 sm:$0xff] }
 0x5d4   : > { %v6650_v19 = vpop.f32.mrf.mxu2  ;;  %v6925_v53 = vpop.f32.mrf.mxu3 }
 0x5d5   : > { %v6720_v30 = vadd.f32 %v6650_v19, %v6448_v29  ;;  %v6115_v35 = vpop.f32.mrf.mxu0  ;;  %v6384_v39 = vpop.f32.mrf.mxu1  ;;  %v6796_v29 = vld [vmem:[#allocation2 + $0x44b] ss:$2 sm:$0xff] }
 0x5d6   : > { %v6450_v7 = vadd.f32 %v6384_v39, %v6178_v5  ;;  %v6179_v1 = vadd.f32 %v6115_v35, %v15189_v13  ;;  %v7830_v13 = vld [vmem:[#allocation2 + $0x53] ss:$2 sm:$0xff] }
 0x5d7   : > { %v15355_v45 = vadd.f32 %v6922_v42, %v6720_v30  ;;  %12076 = vmatmul.msk.f32.gmra.mxu0 %vm4734_vm1, %v5978_v18 }
 0x5d8   : > { %12105 = vmatmul.msk.f32.gmra.mxu1 %vm4734_vm1, %v6248_v41  ;;  %v7016_v41 = vld [vmem:[#allocation2 + $0x60] ss:$2 sm:$0xff] }
 0x5d9   : > { %12134 = vmatmul.msk.f32.gmra.mxu2 %vm4734_vm1, %v6518_v47  ;;  %12165 = vmatmul.msk.f32.gmra.mxu3 %vm4734_vm1, %v6792_v36  ;;  %v7286_v47 = vld [vmem:[#allocation2 + $0x51] ss:$2 sm:$0xff] }
 0x5dc   : > { %v6653_v52 = vpop.f32.mrf.mxu2  ;;  %v6928_v56 = vpop.f32.mrf.mxu3 }
 0x5dd   : > { %v6721_v58 = vadd.f32 %v6653_v52, %v6449_v49  ;;  %v6118_v31 = vpop.f32.mrf.mxu0  ;;  %v6387_v15 = vpop.f32.mrf.mxu1 }
 0x5de   : > { %v6451_v14 = vadd.f32 %v6387_v15, %v6179_v1  ;;  %v6180_v35 = vadd.f32 %v6118_v31, %v15195_v27  ;;  %v7288_v15 = vld [vmem:[#allocation2 + $0x61] ss:$2 sm:$0xff] }
 0x5df   : > { %v15374_v4 = vadd.f32 %v6925_v53, %v6721_v58  ;;  %12077 = vmatmul.msk.f32.gmra.mxu0 %vm4734_vm1, %v5980_v62  ;;  %v7018_v58 = vld [vmem:[#allocation2 + $0xa0] ss:$2 sm:$0xff]  ;;  %v7832_v27 = vld [vmem:[#allocation2 + $0x63] ss:$2 sm:$0xff] }
 0x5e0   : > { %12106 = vmatmul.msk.f32.gmra.mxu1 %vm4734_vm1, %v6250_v63  ;;  %v7558_v62 = vld [vmem:[#allocation2 + $0x52] ss:$2 sm:$0xff] }
 0x5e1   : > { %12135 = vmatmul.msk.f32.gmra.mxu2 %vm4734_vm1, %v6520_v6  ;;  %12166 = vmatmul.msk.f32.gmra.mxu3 %vm4734_vm1, %v6794_v10 }
 0x5e4   : > { %v6656_v12 = vpop.f32.mrf.mxu2  ;;  %v6931_v42 = vpop.f32.mrf.mxu3 }
 0x5e5   : > { %v6722_v8 = vadd.f32 %v6656_v12, %v6450_v7  ;;  %v6121_v16 = vpop.f32.mrf.mxu0  ;;  %v6390_v20 = vpop.f32.mrf.mxu1 }
 0x5e6   : > { %v6452_v48 = vadd.f32 %v6390_v20, %v6180_v35  ;;  %v6181_v31 = vadd.f32 %v6121_v16, %v15201_v40  ;;  %v7834_v40 = vld [vmem:[#allocation2 + $0xa3] ss:$2 sm:$0xff] }
 0x5e7   : > { %v15381_v24 = vadd.f32 %v6928_v56, %v6722_v8  ;;  %12170 = vmatmul.msk.f32.vlgmr.msrb.gmra.mxu0 %vm4734_vm1, %v7014_v26  ;;  %v7290_v8 = vld [vmem:[#allocation2 + $0xa1] ss:$2 sm:$0xff] }
 0x5e8   : > { %12107 = vmatmul.msk.f32.gmra.mxu1 %vm4734_vm1, %v6252_v21  ;;  %v7560_v21 = vld [vmem:[#allocation2 + $0x62] ss:$2 sm:$0xff] }
 0x5e9   : > { %12136 = vmatmul.msk.f32.gmra.mxu2 %vm4734_vm1, %v6522_v23  ;;  %12167 = vmatmul.msk.f32.gmra.mxu3 %vm4734_vm1, %v6796_v29 }
 0x5ec   : > { %v6659_v19 = vpop.f32.mrf.mxu2  ;;  %v6934_v53 = vpop.f32.mrf.mxu3 }
 0x5ed   : > { %v6723_v30 = vadd.f32 %v6659_v19, %v6451_v14  ;;  %v6124_v39 = vpop.f32.mrf.mxu0  ;;  %v6393_v18 = vpop.f32.mrf.mxu1 }
 0x5ee   : > { %v6453_v63 = vadd.f32 %v6393_v18, %v6181_v31  ;;  %v6182_v16 = vadd.f32 %v6124_v39, %v15207_v54  ;;  %v7836_v54 = vld [vmem:[#allocation2 + $0xb3] ss:$2 sm:$0xff] }
 0x5ef   : > { %v15388_v36 = vadd.f32 %v6931_v42, %v6723_v30  ;;  %12171 = vmatmul.msk.f32.gmra.mxu0 %vm4734_vm1, %v7016_v41  ;;  %v7020_v42 = vld [vmem:[#allocation2 + $0xb0] ss:$2 sm:$0xff]  ;;  %v7292_v30 = vld [vmem:[#allocation2 + $0xb1] ss:$2 sm:$0xff] }
 0x5f0   : > { %12200 = vmatmul.msk.f32.vlgmr.msrb.gmra.mxu1 %vm4734_vm1, %v7286_v47  ;;  %v7562_v41 = vld [vmem:[#allocation2 + $0xa2] ss:$2 sm:$0xff] }
 0x5f1   : > { %12137 = vmatmul.msk.f32.gmra.mxu2 %vm4734_vm1, %v6524_v43  ;;  %12260 = vmatmul.msk.f32.vlgmr.msrb.gmra.mxu3 %vm4734_vm1, %v7830_v13 }
 0x5f4   : > { %v6662_v51 = vpop.f32.mrf.mxu2  ;;  %v6937_v0 = vpop.f32.mrf.mxu3 }
 0x5f5   : > { %v6724_v49 = vadd.f32 %v6662_v51, %v6452_v48  ;;  %v6127_v52 = vpop.f32.mrf.mxu0  ;;  %v6396_v56 = vpop.f32.mrf.mxu1 }
 0x5f6   : > { %v6454_v26 = vadd.f32 %v6396_v56, %v6182_v16  ;;  %v6183_v39 = vadd.f32 %v6127_v52, %v15213_v3  ;;  %v7838_v3 = vld [vmem:[#allocation2 + $0xf3] ss:$2 sm:$0xff] }
 0x5f7   : > { %v15395_v61 = vadd.f32 %v6934_v53, %v6724_v49  ;;  %12172 = vmatmul.msk.f32.gmra.mxu0 %vm4734_vm1, %v7018_v58  ;;  %v7022_v53 = vld [vmem:[#allocation2 + $0xf0] ss:$2 sm:$0xff]  ;;  %v7294_v49 = vld [vmem:[#allocation2 + $0xf1] ss:$2 sm:$0xff] }
 0x5f8   : > { %12201 = vmatmul.msk.f32.gmra.mxu1 %vm4734_vm1, %v7288_v15  ;;  %v7564_v58 = vld [vmem:[#allocation2 + $0xb2] ss:$2 sm:$0xff] }
 0x5f9   : > { %12230 = vmatmul.msk.f32.vlgmr.msra.gmra.mxu2 %vm4734_vm1, %v7558_v62  ;;  %12261 = vmatmul.msk.f32.gmra.mxu3 %vm4734_vm1, %v7832_v27 }
 0x5fc   : > { %v6665_v6 = vpop.f32.mrf.mxu2  ;;  %v6940_v10 = vpop.f32.mrf.mxu3 }
 0x5fd   : > { %v6725_v5 = vadd.f32 %v6665_v6, %v6453_v63  ;;  %v6130_v7 = vpop.f32.mrf.mxu0  ;;  %v6399_v12 = vpop.f32.mrf.mxu1 }
 0x5fe   : > { %v6455_v47 = vadd.f32 %v6399_v12, %v6183_v39  ;;  %v6184_v52 = vadd.f32 %v6130_v7, %v15219_v34  ;;  %v7840_v34 = vld [vmem:[#allocation2 + $0x103] ss:$2 sm:$0xff] }
 0x5ff   : > { %v15402_v20 = vadd.f32 %v6937_v0, %v6725_v5  ;;  %12173 = vmatmul.msk.f32.gmra.mxu0 %vm4734_vm1, %v7020_v42  ;;  %v7024_v0 = vld [vmem:[#allocation2 + $0x100] ss:$2 sm:$0xff]  ;;  %v7296_v5 = vld [vmem:[#allocation2 + $0x101] ss:$2 sm:$0xff] }
 0x600   : > { %12202 = vmatmul.msk.f32.gmra.mxu1 %vm4734_vm1, %v7290_v8  ;;  %v7566_v42 = vld [vmem:[#allocation2 + $0xf2] ss:$2 sm:$0xff] }
 0x601   : > { %12231 = vmatmul.msk.f32.gmra.mxu2 %vm4734_vm1, %v7560_v21  ;;  %12262 = vmatmul.msk.f32.gmra.mxu3 %vm4734_vm1, %v7834_v40 }
 0x604   : > { %v6668_v23 = vpop.f32.mrf.mxu2  ;;  %v6943_v29 = vpop.f32.mrf.mxu3 }
 0x605   : > { %v6726_v1 = vadd.f32 %v6668_v23, %v6454_v26  ;;  %v6133_v14 = vpop.f32.mrf.mxu0  ;;  %v6402_v19 = vpop.f32.mrf.mxu1 }
 0x606   : > { %v6456_v15 = vadd.f32 %v6402_v19, %v6184_v52  ;;  %v6185_v7 = vadd.f32 %v6133_v14, %v15225_v32  ;;  %v7842_v32 = vld [vmem:[#allocation2 + $0x143] ss:$2 sm:$0xff] }
 0x607   : > { %v15409_v18 = vadd.f32 %v6940_v10, %v6726_v1  ;;  %12174 = vmatmul.msk.f32.gmra.mxu0 %vm4734_vm1, %v7022_v53  ;;  %v7026_v10 = vld [vmem:[#allocation2 + $0x140] ss:$2 sm:$0xff]  ;;  %v7298_v1 = vld [vmem:[#allocation2 + $0x141] ss:$2 sm:$0xff] }
 0x608   : > { %12203 = vmatmul.msk.f32.gmra.mxu1 %vm4734_vm1, %v7292_v30  ;;  %v7568_v53 = vld [vmem:[#allocation2 + $0x102] ss:$2 sm:$0xff] }
 0x609   : > { %12232 = vmatmul.msk.f32.gmra.mxu2 %vm4734_vm1, %v7562_v41  ;;  %12263 = vmatmul.msk.f32.gmra.mxu3 %vm4734_vm1, %v7836_v54 }
 0x60c   : > { %v6671_v43 = vpop.f32.mrf.mxu2  ;;  %v6946_v13 = vpop.f32.mrf.mxu3 }
 0x60d   : > { %v6727_v35 = vadd.f32 %v6671_v43, %v6455_v47  ;;  %v6136_v48 = vpop.f32.mrf.mxu0  ;;  %v6405_v51 = vpop.f32.mrf.mxu1 }
 0x60e   : > { %v6457_v8 = vadd.f32 %v6405_v51, %v6185_v7  ;;  %v6186_v14 = vadd.f32 %v6136_v48, %v15231_v46  ;;  %v7844_v46 = vld [vmem:[#allocation2 + $0x153] ss:$2 sm:$0xff] }
 0x60f   : > { %v15416_v56 = vadd.f32 %v6943_v29, %v6727_v35  ;;  %12175 = vmatmul.msk.f32.gmra.mxu0 %vm4734_vm1, %v7024_v0  ;;  %v7028_v29 = vld [vmem:[#allocation2 + $0x150] ss:$2 sm:$0xff]  ;;  %v7300_v35 = vld [vmem:[#allocation2 + $0x151] ss:$2 sm:$0xff] }
 0x610   : > { %12204 = vmatmul.msk.f32.gmra.mxu1 %vm4734_vm1, %v7294_v49  ;;  %v7570_v0 = vld [vmem:[#allocation2 + $0x142] ss:$2 sm:$0xff] }
 0x611   : > { %12233 = vmatmul.msk.f32.gmra.mxu2 %vm4734_vm1, %v7564_v58  ;;  %12264 = vmatmul.msk.f32.gmra.mxu3 %vm4734_vm1, %v7838_v3 }
 0x614   : > { %v6674_v62 = vpop.f32.mrf.mxu2  ;;  %v6949_v27 = vpop.f32.mrf.mxu3 }
 0x615   : > { %v6728_v31 = vadd.f32 %v6674_v62, %v6456_v15  ;;  %v6139_v63 = vpop.f32.mrf.mxu0  ;;  %v6408_v6 = vpop.f32.mrf.mxu1 }
 0x616   : > { %v6458_v30 = vadd.f32 %v6408_v6, %v6186_v14  ;;  %v6187_v48 = vadd.f32 %v6139_v63, %v15237_v60  ;;  %v7846_v60 = vld [vmem:[#allocation2 + $0x193] ss:$2 sm:$0xff] }
 0x617   : > { %v15423_v12 = vadd.f32 %v6946_v13, %v6728_v31  ;;  %12176 = vmatmul.msk.f32.gmra.mxu0 %vm4734_vm1, %v7026_v10  ;;  %v7030_v13 = vld [vmem:[#allocation2 + $0x190] ss:$2 sm:$0xff]  ;;  %v7302_v31 = vld [vmem:[#allocation2 + $0x191] ss:$2 sm:$0xff] }
 0x618   : > { %12205 = vmatmul.msk.f32.gmra.mxu1 %vm4734_vm1, %v7296_v5  ;;  %v7572_v10 = vld [vmem:[#allocation2 + $0x152] ss:$2 sm:$0xff] }
 0x619   : > { %12234 = vmatmul.msk.f32.gmra.mxu2 %vm4734_vm1, %v7566_v42  ;;  %12265 = vmatmul.msk.f32.gmra.mxu3 %vm4734_vm1, %v7840_v34 }
 0x61c   : > { %v6677_v21 = vpop.f32.mrf.mxu2  ;;  %v6952_v40 = vpop.f32.mrf.mxu3 }
 0x61d   : > { %v6729_v16 = vadd.f32 %v6677_v21, %v6457_v8  ;;  %v6142_v26 = vpop.f32.mrf.mxu0  ;;  %v6411_v23 = vpop.f32.mrf.mxu1 }
 0x61e   : > { %v6459_v49 = vadd.f32 %v6411_v23, %v6187_v48  ;;  %v6188_v63 = vadd.f32 %v6142_v26, %v15243_v9  ;;  %v7848_v9 = vld [vmem:[#allocation2 + $0x1a3] ss:$2 sm:$0xff] }
 0x61f   : > { %v15430_v19 = vadd.f32 %v6949_v27, %v6729_v16  ;;  %12177 = vmatmul.msk.f32.gmra.mxu0 %vm4734_vm1, %v7028_v29  ;;  %v7032_v27 = vld [vmem:[#allocation2 + $0x1a0] ss:$2 sm:$0xff]  ;;  %v7304_v16 = vld [vmem:[#allocation2 + $0x1a1] ss:$2 sm:$0xff] }
 0x620   : > { %12206 = vmatmul.msk.f32.gmra.mxu1 %vm4734_vm1, %v7298_v1  ;;  %v7574_v29 = vld [vmem:[#allocation2 + $0x192] ss:$2 sm:$0xff] }
 0x621   : > { %12235 = vmatmul.msk.f32.gmra.mxu2 %vm4734_vm1, %v7568_v53  ;;  %12266 = vmatmul.msk.f32.gmra.mxu3 %vm4734_vm1, %v7842_v32 }
 0x624   : > { %v6680_v41 = vpop.f32.mrf.mxu2  ;;  %v6955_v54 = vpop.f32.mrf.mxu3 }
 0x625   : > { %v6730_v39 = vadd.f32 %v6680_v41, %v6458_v30  ;;  %v6145_v47 = vpop.f32.mrf.mxu0  ;;  %v6414_v43 = vpop.f32.mrf.mxu1 }
 0x626   : > { %v6460_v5 = vadd.f32 %v6414_v43, %v6188_v63  ;;  %v6189_v26 = vadd.f32 %v6145_v47, %v15249_v28  ;;  %v7850_v28 = vld [vmem:[#allocation2 + $0x1e3] ss:$2 sm:$0xff] }
 0x627   : > { %v15437_v51 = vadd.f32 %v6952_v40, %v6730_v39  ;;  %12178 = vmatmul.msk.f32.gmra.mxu0 %vm4734_vm1, %v7030_v13  ;;  %v7034_v40 = vld [vmem:[#allocation2 + $0x1e0] ss:$2 sm:$0xff]  ;;  %v7306_v39 = vld [vmem:[#allocation2 + $0x1e1] ss:$2 sm:$0xff] }
 0x628   : > { %12207 = vmatmul.msk.f32.gmra.mxu1 %vm4734_vm1, %v7300_v35  ;;  %v7576_v13 = vld [vmem:[#allocation2 + $0x1a2] ss:$2 sm:$0xff] }
 0x629   : > { %12236 = vmatmul.msk.f32.gmra.mxu2 %vm4734_vm1, %v7570_v0  ;;  %12267 = vmatmul.msk.f32.gmra.mxu3 %vm4734_vm1, %v7844_v46 }
 0x62c   : > { %v6683_v58 = vpop.f32.mrf.mxu2  ;;  %v6958_v3 = vpop.f32.mrf.mxu3 }
 0x62d   : > { %v6731_v52 = vadd.f32 %v6683_v58, %v6459_v49  ;;  %v6148_v15 = vpop.f32.mrf.mxu0  ;;  %v6417_v62 = vpop.f32.mrf.mxu1 }
 0x62e   : > { %v6461_v1 = vadd.f32 %v6417_v62, %v6189_v26  ;;  %v6190_v47 = vadd.f32 %v6148_v15, %v15255_v44  ;;  %v7852_v44 = vld [vmem:[#allocation2 + $0x1f3] ss:$2 sm:$0xff] }
 0x62f   : > { %v15444_v6 = vadd.f32 %v6955_v54, %v6731_v52  ;;  %12179 = vmatmul.msk.f32.gmra.mxu0 %vm4734_vm1, %v7032_v27  ;;  %v7036_v54 = vld [vmem:[#allocation2 + $0x1f0] ss:$2 sm:$0xff]  ;;  %v7308_v52 = vld [vmem:[#allocation2 + $0x1f1] ss:$2 sm:$0xff] }
 0x630   : > { %12208 = vmatmul.msk.f32.gmra.mxu1 %vm4734_vm1, %v7302_v31  ;;  %v7578_v27 = vld [vmem:[#allocation2 + $0x1e2] ss:$2 sm:$0xff] }
 0x631   : > { %12237 = vmatmul.msk.f32.gmra.mxu2 %vm4734_vm1, %v7572_v10  ;;  %12268 = vmatmul.msk.f32.gmra.mxu3 %vm4734_vm1, %v7846_v60  ;;  %v12348_v31 = vld [vmem:[%s16542_s3 + $0xe0] sm:$0xff]  ;;  %v12378_v60 = vld [vmem:[%s16542_s3 + $0xf0] sm:$0xff] }
 0x632   : > { %v12288_v10 = vld [vmem:[%s16542_s3 + $0xc0] sm:$0xff]  ;;  %8803 = vmatpush.msrb.mxu2 %v12348_v31  ;;  %9075 = vmatpush.msra.mxu3 %v12378_v60 }
 0x633   : > { %8259 = vmatpush.msra.mxu0 %v12288_v10 }
 0x634   : > { %v6686_v42 = vpop.f32.mrf.mxu2  ;;  %v6961_v34 = vpop.f32.mrf.mxu3 }
 0x635   : > { %v6732_v7 = vadd.f32 %v6686_v42, %v6460_v5  ;;  %v6151_v8 = vpop.f32.mrf.mxu0  ;;  %v6420_v21 = vpop.f32.mrf.mxu1 }
 0x636   : > { %v6462_v35 = vadd.f32 %v6420_v21, %v6190_v47  ;;  %v6191_v15 = vadd.f32 %v6151_v8, %v15273_v2  ;;  %v12318_v8 = vld [vmem:[%s16542_s3 + $0xd0] sm:$0xff]  ;;  %v7040_v21 = vld [vmem:[#allocation2 + $0x240] ss:$2 sm:$0xff] }
 0x637   : > { %v15451_v23 = vadd.f32 %v6958_v3, %v6732_v7  ;;  %12180 = vmatmul.msk.f32.gmra.mxu0 %vm4734_vm1, %v7034_v40  ;;  %v7038_v3 = vld [vmem:[#allocation2 + $0x230] ss:$2 sm:$0xff]  ;;  %8531 = vmatpush.msra.mxu1 %v12318_v8  ;;  %v7310_v40 = vld [vmem:[#allocation2 + $0x231] ss:$2 sm:$0xff] }
 0x638   : > { %12209 = vmatmul.msk.f32.gmra.mxu1 %vm4734_vm1, %v7304_v16  ;;  %v7582_v47 = vld [vmem:[#allocation2 + $0x232] ss:$2 sm:$0xff] }
 0x639   : > { %12238 = vmatmul.msk.f32.gmra.mxu2 %vm4734_vm1, %v7574_v29  ;;  %12269 = vmatmul.msk.f32.gmra.mxu3 %vm4734_vm1, %v7848_v9  ;;  %v7580_v29 = vld [vmem:[#allocation2 + $0x1f2] ss:$2 sm:$0xff]  ;;  %v7854_v9 = vld [vmem:[#allocation2 + $0x233] ss:$2 sm:$0xff] }
 0x63c   : > { %v6689_v53 = vpop.f32.mrf.mxu2  ;;  %v6964_v32 = vpop.f32.mrf.mxu3 }
 0x63d   : > { %v6733_v14 = vadd.f32 %v6689_v53, %v6461_v1  ;;  %v6154_v30 = vpop.f32.mrf.mxu0  ;;  %v6423_v41 = vpop.f32.mrf.mxu1 }
 0x63e   : > { %v6463_v63 = vadd.f32 %v6423_v41, %v6191_v15  ;;  %v6192_v26 = vadd.f32 %v6154_v30, %v15279_v17  ;;  %v7856_v17 = vld [vmem:[#allocation2 + $0x243] ss:$2 sm:$0xff]  ;;  %v7584_v15 = vld [vmem:[#allocation2 + $0x242] ss:$2 sm:$0xff] }
 0x63f   : > { %v15458_v43 = vadd.f32 %v6961_v34, %v6733_v14  ;;  %12181 = vmatmul.msk.f32.gmra.mxu0 %vm4734_vm1, %v7036_v54 }
 0x640   : > { %12210 = vmatmul.msk.f32.gmra.mxu1 %vm4734_vm1, %v7306_v39  ;;  %v7042_v39 = vld [vmem:[#allocation2 + $0x280] ss:$2 sm:$0xff] }
 0x641   : > { %12239 = vmatmul.msk.f32.gmra.mxu2 %vm4734_vm1, %v7576_v13  ;;  %12270 = vmatmul.msk.f32.gmra.mxu3 %vm4734_vm1, %v7850_v28  ;;  %v7312_v13 = vld [vmem:[#allocation2 + $0x241] ss:$2 sm:$0xff] }
 0x644   : > { %v6692_v0 = vpop.f32.mrf.mxu2  ;;  %v6967_v46 = vpop.f32.mrf.mxu3 }
 0x645   : > { %v6734_v48 = vadd.f32 %v6692_v0, %v6462_v35  ;;  %v6157_v49 = vpop.f32.mrf.mxu0  ;;  %v6426_v58 = vpop.f32.mrf.mxu1 }
 0x646   : > { %v6464_v1 = vadd.f32 %v6426_v58, %v6192_v26  ;;  %v6193_v30 = vadd.f32 %v6157_v49, %v15285_v37  ;;  %v7858_v37 = vld [vmem:[#allocation2 + $0x283] ss:$2 sm:$0xff]  ;;  %v7048_v26 = vld [vmem:[#allocation2 + $0x2e0] ss:$2 sm:$0xff] }
 0x647   : > { %v15465_v62 = vadd.f32 %v6964_v32, %v6734_v48  ;;  %12182 = vmatmul.msk.f32.gmra.mxu0 %vm4734_vm1, %v7038_v3 }
 0x648   : > { %12211 = vmatmul.msk.f32.gmra.mxu1 %vm4734_vm1, %v7308_v52  ;;  %v7044_v52 = vld [vmem:[#allocation2 + $0x290] ss:$2 sm:$0xff] }
 0x649   : > { %12240 = vmatmul.msk.f32.gmra.mxu2 %vm4734_vm1, %v7578_v27  ;;  %12271 = vmatmul.msk.f32.gmra.mxu3 %vm4734_vm1, %v7852_v44  ;;  %v7314_v27 = vld [vmem:[#allocation2 + $0x281] ss:$2 sm:$0xff] }
 0x64c   : > { %v6695_v2 = vpop.f32.mrf.mxu2  ;;  %v6970_v5 = vpop.f32.mrf.mxu3 }
 0x64d   : > { %v6735_v42 = vadd.f32 %v6695_v2, %v6463_v63  ;;  %v6160_v34 = vpop.f32.mrf.mxu0  ;;  %v6429_v7 = vpop.f32.mrf.mxu1 }
 0x64e   : > { %v6465_v35 = vadd.f32 %v6429_v7, %v6193_v30  ;;  %v6194_v49 = vadd.f32 %v6160_v34, %v15291_v55  ;;  %v7316_v7 = vld [vmem:[#allocation2 + $0x291] ss:$2 sm:$0xff] }
 0x64f   : > { %v15484_v16 = vadd.f32 %v6967_v46, %v6735_v42  ;;  %12183 = vmatmul.msk.f32.gmra.mxu0 %vm4734_vm1, %v7040_v21  ;;  %v7046_v42 = vld [vmem:[#allocation2 + $0x2d0] ss:$2 sm:$0xff]  ;;  %v7860_v55 = vld [vmem:[#allocation2 + $0x293] ss:$2 sm:$0xff]  ;;  %v7864_v30 = vld [vmem:[#allocation2 + $0x2e3] ss:$2 sm:$0xff] }
 0x650   : > { %12212 = vmatmul.msk.f32.gmra.mxu1 %vm4734_vm1, %v7310_v40  ;;  %v7586_v21 = vld [vmem:[#allocation2 + $0x282] ss:$2 sm:$0xff] }
 0x651   : > { %12241 = vmatmul.msk.f32.gmra.mxu2 %vm4734_vm1, %v7580_v29  ;;  %12272 = vmatmul.msk.f32.gmra.mxu3 %vm4734_vm1, %v7854_v9 }
 0x654   : > { %v6698_v53 = vpop.f32.mrf.mxu2  ;;  %v6973_v32 = vpop.f32.mrf.mxu3 }
 0x655   : > { %v6736_v14 = vadd.f32 %v6698_v53, %v6464_v1  ;;  %v6163_v41 = vpop.f32.mrf.mxu0  ;;  %v6432_v54 = vpop.f32.mrf.mxu1  ;;  %v7318_v1 = vld [vmem:[#allocation2 + $0x2d1] ss:$2 sm:$0xff]  ;;  %v7588_v53 = vld [vmem:[#allocation2 + $0x292] ss:$2 sm:$0xff] }
 0x656   : > { %v6466_v31 = vadd.f32 %v6432_v54, %v6194_v49  ;;  %v7592_v49 = vld [vmem:[#allocation2 + $0x2e2] ss:$2 sm:$0xff] }
 0x657   : > { %v15491_v28 = vadd.f32 %v6970_v5, %v6736_v14  ;;  %12184 = vmatmul.msk.f32.gmra.mxu0 %vm4734_vm1, %v7042_v39 }
 0x658   : > { %12213 = vmatmul.msk.f32.gmra.mxu1 %vm4734_vm1, %v7312_v13  ;;  %v7050_v13 = vld [vmem:[#allocation2 + $0x320] ss:$2 sm:$0xff] }
 0x659   : > { %12242 = vmatmul.msk.f32.gmra.mxu2 %vm4734_vm1, %v7582_v47  ;;  %12273 = vmatmul.msk.f32.gmra.mxu3 %vm4734_vm1, %v7856_v17  ;;  %v7320_v47 = vld [vmem:[#allocation2 + $0x2e1] ss:$2 sm:$0xff]  ;;  %v7590_v17 = vld [vmem:[#allocation2 + $0x2d2] ss:$2 sm:$0xff] }
 0x65c   : > { %v6701_v0 = vpop.f32.mrf.mxu2  ;;  %v6976_v46 = vpop.f32.mrf.mxu3 }
 0x65d   : > { %v6737_v48 = vadd.f32 %v6701_v0, %v6465_v35  ;;  %v6166_v58 = vpop.f32.mrf.mxu0  ;;  %v6435_v3 = vpop.f32.mrf.mxu1 }
 0x65f   : > { %v15498_v44 = vadd.f32 %v6973_v32, %v6737_v48  ;;  %12185 = vmatmul.msk.f32.gmra.mxu0 %vm4734_vm1, %v7044_v52  ;;  %v7862_v32 = vld [vmem:[#allocation2 + $0x2d3] ss:$2 sm:$0xff] }
 0x660   : > { %12214 = vmatmul.msk.f32.gmra.mxu1 %vm4734_vm1, %v7314_v27  ;;  %v7052_v27 = vld [vmem:[#allocation2 + $0x330] ss:$2 sm:$0xff] }
 0x661   : > { %12243 = vmatmul.msk.f32.gmra.mxu2 %vm4734_vm1, %v7584_v15  ;;  %12274 = vmatmul.msk.f32.gmra.mxu3 %vm4734_vm1, %v7858_v37  ;;  %v7322_v15 = vld [vmem:[#allocation2 + $0x321] ss:$2 sm:$0xff] }
 0x664   : > { %v6704_v10 = vpop.f32.mrf.mxu2  ;;  %v6979_v60 = vpop.f32.mrf.mxu3 }
 0x665   : > { %v6738_v63 = vadd.f32 %v6704_v10, %v6466_v31  ;;  %v6438_v2 = vpop.f32.mrf.mxu1  ;;  %v7173_v5 = vpop.f32.mrf.mxu0 }
 0x666   : > { %v7257_v35 = vadd.f32 %v7173_v5, %v15306_v38  ;;  %v7866_v38 = vld [vmem:[#allocation2 + $0x323] ss:$2 sm:$0xff] }
 0x667   : > { %v15505_v8 = vadd.f32 %v6976_v46, %v6738_v63  ;;  %12186 = vmatmul.msk.f32.gmra.mxu0 %vm4734_vm1, %v7046_v42 }
 0x668   : > { %12215 = vmatmul.msk.f32.gmra.mxu1 %vm4734_vm1, %v7316_v7  ;;  %v7054_v7 = vld [vmem:[#allocation2 + $0x370] ss:$2 sm:$0xff] }
 0x669   : > { %12244 = vmatmul.msk.f32.gmra.mxu2 %vm4734_vm1, %v7586_v21  ;;  %12275 = vmatmul.msk.f32.gmra.mxu3 %vm4734_vm1, %v7860_v55  ;;  %v7324_v21 = vld [vmem:[#allocation2 + $0x331] ss:$2 sm:$0xff] }
 0x66c   : > { %v6707_v34 = vpop.f32.mrf.mxu2  ;;  %v6982_v40 = vpop.f32.mrf.mxu3 }
 0x66d   : > { %v7176_v29 = vpop.f32.mrf.mxu0  ;;  %v7445_v9 = vpop.f32.mrf.mxu1  ;;  %v7594_v34 = vld [vmem:[#allocation2 + $0x322] ss:$2 sm:$0xff] }
 0x66e   : > { %v7529_v0 = vadd.f32 %v7445_v9, %v7257_v35  ;;  %v7258_v31 = vadd.f32 %v7176_v29, %v15313_v57  ;;  %v7868_v57 = vld [vmem:[#allocation2 + $0x333] ss:$2 sm:$0xff] }
 0x66f   : > { %12187 = vmatmul.msk.f32.gmra.mxu0 %vm4734_vm1, %v7048_v26 }
 0x670   : > { %12216 = vmatmul.msk.f32.gmra.mxu1 %vm4734_vm1, %v7318_v1 }
 0x671   : > { %12245 = vmatmul.msk.f32.gmra.mxu2 %vm4734_vm1, %v7588_v53  ;;  %12276 = vmatmul.msk.f32.gmra.mxu3 %vm4734_vm1, %v7862_v32 }
 0x674   : > { %v6710_v14 = vpop.f32.mrf.mxu2  ;;  %v7989_v41 = vpop.f32.mrf.mxu3 }
 0x675   : > { %v7179_v54 = vpop.f32.mrf.mxu0  ;;  %v7448_v39 = vpop.f32.mrf.mxu1  ;;  %v7056_v14 = vld [vmem:[#allocation2 + $0x380] ss:$2 sm:$0xff] }
 0x676   : > { %v7530_v10 = vadd.f32 %v7448_v39, %v7258_v31  ;;  %v7259_v40 = vadd.f32 %v7179_v54, %v15320_v11  ;;  %v7870_v11 = vld [vmem:[#allocation2 + $0x373] ss:$2 sm:$0xff] }
 0x677   : > { %12188 = vmatmul.msk.f32.gmra.mxu0 %vm4734_vm1, %v7050_v13  ;;  %v7596_v13 = vld [vmem:[#allocation2 + $0x332] ss:$2 sm:$0xff] }
 0x678   : > { %12217 = vmatmul.msk.f32.gmra.mxu1 %vm4734_vm1, %v7320_v47 }
 0x679   : > { %12246 = vmatmul.msk.f32.gmra.mxu2 %vm4734_vm1, %v7590_v17  ;;  %12277 = vmatmul.msk.f32.gmra.mxu3 %vm4734_vm1, %v7864_v30 }
 0x67c   : > { %v7717_v46 = vpop.f32.mrf.mxu2  ;;  %v7992_v48 = vpop.f32.mrf.mxu3 }
 0x67d   : > { %v7801_v58 = vadd.f32 %v7717_v46, %v7529_v0  ;;  %v7182_v3 = vpop.f32.mrf.mxu0  ;;  %v7451_v52 = vpop.f32.mrf.mxu1 }
 0x67e   : > { %v7531_v29 = vadd.f32 %v7451_v52, %v7259_v40  ;;  %v7260_v54 = vadd.f32 %v7182_v3, %v15327_v33  ;;  %v7872_v33 = vld [vmem:[#allocation2 + $0x383] ss:$2 sm:$0xff] }
 0x67f   : > { %v15520_v37 = vadd.f32 %v7989_v41, %v7801_v58  ;;  %12189 = vmatmul.msk.f32.gmra.mxu0 %vm4734_vm1, %v7052_v27  ;;  %v7326_v41 = vld [vmem:[#allocation2 + $0x371] ss:$2 sm:$0xff]  ;;  %v7328_v58 = vld [vmem:[#allocation2 + $0x381] ss:$2 sm:$0xff]  ;;  %v7598_v27 = vld [vmem:[#allocation2 + $0x372] ss:$2 sm:$0xff] }
 0x680   : > { %12218 = vmatmul.msk.f32.gmra.mxu1 %vm4734_vm1, %v7322_v15 }
 0x681   : > { %12247 = vmatmul.msk.f32.gmra.mxu2 %vm4734_vm1, %v7592_v49  ;;  %12278 = vmatmul.msk.f32.gmra.mxu3 %vm4734_vm1, %v7866_v38 }
 0x684   : > { %v7720_v60 = vpop.f32.mrf.mxu2  ;;  %v7995_v63 = vpop.f32.mrf.mxu3 }
 0x685   : > { %v7802_v2 = vadd.f32 %v7720_v60, %v7530_v10  ;;  %v7185_v5 = vpop.f32.mrf.mxu0  ;;  %v7454_v42 = vpop.f32.mrf.mxu1 }
 0x686   : > { %v7532_v47 = vadd.f32 %v7454_v42, %v7260_v54  ;;  %v7261_v3 = vadd.f32 %v7185_v5, %v15334_v50  ;;  %v7874_v50 = vld [vmem:[#allocation2 + $0x3c3] ss:$2 sm:$0xff] }
 0x687   : > { %v15527_v55 = vadd.f32 %v7992_v48, %v7802_v2  ;;  %12190 = vmatmul.msk.f32.gmra.mxu0 %vm4734_vm1, %v7054_v7  ;;  %v7058_v48 = vld [vmem:[#allocation2 + $0x3c0] ss:$2 sm:$0xff]  ;;  %v7330_v2 = vld [vmem:[#allocation2 + $0x3c1] ss:$2 sm:$0xff] }
 0x688   : > { %12219 = vmatmul.msk.f32.gmra.mxu1 %vm4734_vm1, %v7324_v21  ;;  %v7600_v7 = vld [vmem:[#allocation2 + $0x382] ss:$2 sm:$0xff] }
 0x689   : > { %12248 = vmatmul.msk.f32.gmra.mxu2 %vm4734_vm1, %v7594_v34  ;;  %12279 = vmatmul.msk.f32.gmra.mxu3 %vm4734_vm1, %v7868_v57 }
 0x68c   : > { %v7723_v9 = vpop.f32.mrf.mxu2  ;;  %v7998_v26 = vpop.f32.mrf.mxu3 }
 0x68d   : > { %v7803_v1 = vadd.f32 %v7723_v9, %v7531_v29  ;;  %v7188_v53 = vpop.f32.mrf.mxu0  ;;  %v7457_v32 = vpop.f32.mrf.mxu1 }
 0x68e   : > { %v7533_v15 = vadd.f32 %v7457_v32, %v7261_v3  ;;  %v7262_v5 = vadd.f32 %v7188_v53, %v15341_v59  ;;  %v7876_v59 = vld [vmem:[#allocation2 + $0x3d3] ss:$2 sm:$0xff] }
 0x68f   : > { %v15534_v39 = vadd.f32 %v7995_v63, %v7803_v1  ;;  %12191 = vmatmul.msk.f32.gmra.mxu0 %vm4734_vm1, %v7056_v14  ;;  %v7060_v63 = vld [vmem:[#allocation2 + $0x3d0] ss:$2 sm:$0xff]  ;;  %v7332_v1 = vld [vmem:[#allocation2 + $0x3d1] ss:$2 sm:$0xff] }
 0x690   : > { %12220 = vmatmul.msk.f32.gmra.mxu1 %vm4734_vm1, %v7326_v41  ;;  %v7602_v14 = vld [vmem:[#allocation2 + $0x3c2] ss:$2 sm:$0xff] }
 0x691   : > { %12249 = vmatmul.msk.f32.gmra.mxu2 %vm4734_vm1, %v7596_v13  ;;  %12280 = vmatmul.msk.f32.gmra.mxu3 %vm4734_vm1, %v7870_v11 }
 0x694   : > { %v7726_v17 = vpop.f32.mrf.mxu2  ;;  %v8001_v30 = vpop.f32.mrf.mxu3 }
 0x695   : > { %v7804_v35 = vadd.f32 %v7726_v17, %v7532_v47  ;;  %v7191_v0 = vpop.f32.mrf.mxu0  ;;  %v7460_v46 = vpop.f32.mrf.mxu1 }
 0x696   : > { %v7534_v21 = vadd.f32 %v7460_v46, %v7262_v5  ;;  %v7263_v53 = vadd.f32 %v7191_v0, %v15348_v25  ;;  %v7878_v25 = vld [vmem:[#allocation2 + $0x413] ss:$2 sm:$0xff] }
 0x697   : > { %v15541_v52 = vadd.f32 %v7998_v26, %v7804_v35  ;;  %12192 = vmatmul.msk.f32.gmra.mxu0 %vm4734_vm1, %v7058_v48  ;;  %v7062_v26 = vld [vmem:[#allocation2 + $0x410] ss:$2 sm:$0xff]  ;;  %v7334_v35 = vld [vmem:[#allocation2 + $0x411] ss:$2 sm:$0xff] }
 0x698   : > { %12221 = vmatmul.msk.f32.gmra.mxu1 %vm4734_vm1, %v7328_v58  ;;  %v7604_v48 = vld [vmem:[#allocation2 + $0x3d2] ss:$2 sm:$0xff] }
 0x699   : > { %12250 = vmatmul.msk.f32.gmra.mxu2 %vm4734_vm1, %v7598_v27  ;;  %12281 = vmatmul.msk.f32.gmra.mxu3 %vm4734_vm1, %v7872_v33 }
 0x69c   : > { %v7729_v49 = vpop.f32.mrf.mxu2  ;;  %v8004_v38 = vpop.f32.mrf.mxu3 }
 0x69d   : > { %v7805_v31 = vadd.f32 %v7729_v49, %v7533_v15  ;;  %v7194_v10 = vpop.f32.mrf.mxu0  ;;  %v7463_v60 = vpop.f32.mrf.mxu1 }
 0x69e   : > { %v7535_v41 = vadd.f32 %v7463_v60, %v7263_v53  ;;  %v7264_v0 = vadd.f32 %v7194_v10, %v15355_v45  ;;  %v7880_v45 = vld [vmem:[#allocation2 + $0x423] ss:$2 sm:$0xff] }
 0x69f   : > { %v15548_v42 = vadd.f32 %v8001_v30, %v7805_v31  ;;  %12193 = vmatmul.msk.f32.gmra.mxu0 %vm4734_vm1, %v7060_v63  ;;  %v7064_v30 = vld [vmem:[#allocation2 + $0x420] ss:$2 sm:$0xff]  ;;  %v7336_v31 = vld [vmem:[#allocation2 + $0x421] ss:$2 sm:$0xff] }
 0x6a0   : > { %12222 = vmatmul.msk.f32.gmra.mxu1 %vm4734_vm1, %v7330_v2  ;;  %v7606_v63 = vld [vmem:[#allocation2 + $0x412] ss:$2 sm:$0xff] }
 0x6a1   : > { %12251 = vmatmul.msk.f32.gmra.mxu2 %vm4734_vm1, %v7600_v7  ;;  %12282 = vmatmul.msk.f32.gmra.mxu3 %vm4734_vm1, %v7874_v50 }
 0x6a4   : > { %v7732_v34 = vpop.f32.mrf.mxu2  ;;  %v8007_v57 = vpop.f32.mrf.mxu3 }
 0x6a5   : > { %v7806_v40 = vadd.f32 %v7732_v34, %v7534_v21  ;;  %v7197_v29 = vpop.f32.mrf.mxu0  ;;  %v7466_v9 = vpop.f32.mrf.mxu1 }
 0x6a6   : > { %v7536_v58 = vadd.f32 %v7466_v9, %v7264_v0  ;;  %v7265_v10 = vadd.f32 %v7197_v29, %v15374_v4  ;;  %v7882_v4 = vld [vmem:[#allocation2 + $0x463] ss:$2 sm:$0xff] }
 0x6a7   : > { %v15555_v32 = vadd.f32 %v8004_v38, %v7806_v40  ;;  %12194 = vmatmul.msk.f32.gmra.mxu0 %vm4734_vm1, %v7062_v26  ;;  %v7066_v38 = vld [vmem:[#allocation2 + $0x460] ss:$2 sm:$0xff]  ;;  %v7338_v40 = vld [vmem:[#allocation2 + $0x461] ss:$2 sm:$0xff] }
 0x6a8   : > { %12223 = vmatmul.msk.f32.gmra.mxu1 %vm4734_vm1, %v7332_v1  ;;  %v7608_v26 = vld [vmem:[#allocation2 + $0x422] ss:$2 sm:$0xff] }
 0x6a9   : > { %12252 = vmatmul.msk.f32.gmra.mxu2 %vm4734_vm1, %v7602_v14  ;;  %12283 = vmatmul.msk.f32.gmra.mxu3 %vm4734_vm1, %v7876_v59 }
 0x6ac   : > { %v7735_v13 = vpop.f32.mrf.mxu2  ;;  %v8010_v11 = vpop.f32.mrf.mxu3 }
 0x6ad   : > { %v7807_v54 = vadd.f32 %v7735_v13, %v7535_v41  ;;  %v7200_v47 = vpop.f32.mrf.mxu0  ;;  %v7469_v17 = vpop.f32.mrf.mxu1 }
 0x6ae   : > { %v7537_v2 = vadd.f32 %v7469_v17, %v7265_v10  ;;  %v7266_v29 = vadd.f32 %v7200_v47, %v15381_v24 }
 0x6af   : > { %v15562_v46 = vadd.f32 %v8007_v57, %v7807_v54  ;;  %12195 = vmatmul.msk.f32.gmra.mxu0 %vm4734_vm1, %v7064_v30  ;;  %v7068_v57 = vld [vmem:[#allocation2 + $0x470] ss:$2 sm:$0xff] }
 0x6b0   : > { %12224 = vmatmul.msk.f32.gmra.mxu1 %vm4734_vm1, %v7334_v35  ;;  %v8102_v54 = vld [vmem:[#allocation2 + $0x78] ss:$2 sm:$0xff]  ;;  %v7884_v35 = vld [vmem:[#allocation2 + $0x473] ss:$2 sm:$0xff] }
 0x6b1   : > { %12253 = vmatmul.msk.f32.gmra.mxu2 %vm4734_vm1, %v7604_v48  ;;  %12284 = vmatmul.msk.f32.gmra.mxu3 %vm4734_vm1, %v7878_v25  ;;  %v7610_v30 = vld [vmem:[#allocation2 + $0x462] ss:$2 sm:$0xff] }
 0x6b4   : > { %v7738_v27 = vpop.f32.mrf.mxu2  ;;  %v8013_v33 = vpop.f32.mrf.mxu3 }
 0x6b5   : > { %v7808_v3 = vadd.f32 %v7738_v27, %v7536_v58  ;;  %v7203_v15 = vpop.f32.mrf.mxu0  ;;  %v7472_v49 = vpop.f32.mrf.mxu1 }
 0x6b6   : > { %v7538_v1 = vadd.f32 %v7472_v49, %v7266_v29  ;;  %v7267_v24 = vadd.f32 %v7203_v15, %v15388_v36  ;;  %v8918_v36 = vld [vmem:[#allocation2 + $0x7b] ss:$2 sm:$0xff] }
 0x6b7   : > { %v15569_v60 = vadd.f32 %v8010_v11, %v7808_v3  ;;  %12196 = vmatmul.msk.f32.gmra.mxu0 %vm4734_vm1, %v7066_v38  ;;  %v7340_v11 = vld [vmem:[#allocation2 + $0x471] ss:$2 sm:$0xff]  ;;  %v7612_v38 = vld [vmem:[#allocation2 + $0x472] ss:$2 sm:$0xff] }
 0x6b8   : > { %12225 = vmatmul.msk.f32.gmra.mxu1 %vm4734_vm1, %v7336_v31  ;;  %v8374_v3 = vld [vmem:[#allocation2 + $0x79] ss:$2 sm:$0xff] }
 0x6b9   : > { %12254 = vmatmul.msk.f32.gmra.mxu2 %vm4734_vm1, %v7606_v63  ;;  %12285 = vmatmul.msk.f32.gmra.mxu3 %vm4734_vm1, %v7880_v45 }
 0x6bc   : > { %v7741_v7 = vpop.f32.mrf.mxu2  ;;  %v8016_v50 = vpop.f32.mrf.mxu3 }
 0x6bd   : > { %v7809_v5 = vadd.f32 %v7741_v7, %v7537_v2  ;;  %v7206_v21 = vpop.f32.mrf.mxu0  ;;  %v7475_v34 = vpop.f32.mrf.mxu1 }
 0x6be   : > { %v7539_v47 = vadd.f32 %v7475_v34, %v7267_v24  ;;  %v7268_v15 = vadd.f32 %v7206_v21, %v15395_v61  ;;  %v8920_v61 = vld [vmem:[#allocation2 + $0x8b] ss:$2 sm:$0xff] }
 0x6bf   : > { %v15576_v9 = vadd.f32 %v8013_v33, %v7809_v5  ;;  %12197 = vmatmul.msk.f32.gmra.mxu0 %vm4734_vm1, %v7068_v57  ;;  %v8104_v33 = vld [vmem:[#allocation2 + $0x88] ss:$2 sm:$0xff]  ;;  %v8376_v5 = vld [vmem:[#allocation2 + $0x89] ss:$2 sm:$0xff] }
 0x6c0   : > { %12226 = vmatmul.msk.f32.gmra.mxu1 %vm4734_vm1, %v7338_v40  ;;  %v8646_v57 = vld [vmem:[#allocation2 + $0x7a] ss:$2 sm:$0xff] }
 0x6c1   : > { %12255 = vmatmul.msk.f32.gmra.mxu2 %vm4734_vm1, %v7608_v26  ;;  %12286 = vmatmul.msk.f32.gmra.mxu3 %vm4734_vm1, %v7882_v4 }
 0x6c4   : > { %v7744_v14 = vpop.f32.mrf.mxu2  ;;  %v8019_v59 = vpop.f32.mrf.mxu3 }
 0x6c5   : > { %v7810_v53 = vadd.f32 %v7744_v14, %v7538_v1  ;;  %v7209_v41 = vpop.f32.mrf.mxu0  ;;  %v7478_v13 = vpop.f32.mrf.mxu1 }
 0x6c6   : > { %v7540_v31 = vadd.f32 %v7478_v13, %v7268_v15  ;;  %v7269_v21 = vadd.f32 %v7209_v41, %v15402_v20  ;;  %v8922_v20 = vld [vmem:[#allocation2 + $0xcb] ss:$2 sm:$0xff] }
 0x6c7   : > { %v15583_v17 = vadd.f32 %v8016_v50, %v7810_v53  ;;  %12290 = vmatmul.msk.f32.vlgmr.msra.gmra.mxu0 %vm4734_vm1, %v8102_v54  ;;  %v8106_v50 = vld [vmem:[#allocation2 + $0xc8] ss:$2 sm:$0xff]  ;;  %v8378_v53 = vld [vmem:[#allocation2 + $0xc9] ss:$2 sm:$0xff] }
 0x6c8   : > { %12227 = vmatmul.msk.f32.gmra.mxu1 %vm4734_vm1, %v7340_v11  ;;  %v8648_v11 = vld [vmem:[#allocation2 + $0x8a] ss:$2 sm:$0xff] }
 0x6c9   : > { %12256 = vmatmul.msk.f32.gmra.mxu2 %vm4734_vm1, %v7610_v30  ;;  %12287 = vmatmul.msk.f32.gmra.mxu3 %vm4734_vm1, %v7884_v35 }
 0x6cc   : > { %v7747_v48 = vpop.f32.mrf.mxu2  ;;  %v8022_v25 = vpop.f32.mrf.mxu3 }
 0x6cd   : > { %v7811_v0 = vadd.f32 %v7747_v48, %v7539_v47  ;;  %v7212_v58 = vpop.f32.mrf.mxu0  ;;  %v7481_v27 = vpop.f32.mrf.mxu1 }
 0x6ce   : > { %v7541_v40 = vadd.f32 %v7481_v27, %v7269_v21  ;;  %v7270_v41 = vadd.f32 %v7212_v58, %v15409_v18  ;;  %v8924_v18 = vld [vmem:[#allocation2 + $0xdb] ss:$2 sm:$0xff] }
 0x6cf   : > { %v15590_v49 = vadd.f32 %v8019_v59, %v7811_v0  ;;  %12291 = vmatmul.msk.f32.gmra.mxu0 %vm4734_vm1, %v8104_v33  ;;  %v8108_v59 = vld [vmem:[#allocation2 + $0xd8] ss:$2 sm:$0xff]  ;;  %v8380_v0 = vld [vmem:[#allocation2 + $0xd9] ss:$2 sm:$0xff] }
 0x6d0   : > { %12320 = vmatmul.msk.f32.vlgmr.msra.gmra.mxu1 %vm4734_vm1, %v8374_v3  ;;  %v8650_v33 = vld [vmem:[#allocation2 + $0xca] ss:$2 sm:$0xff] }
 0x6d1   : > { %12257 = vmatmul.msk.f32.gmra.mxu2 %vm4734_vm1, %v7612_v38  ;;  %12380 = vmatmul.msk.f32.vlgmr.msra.gmra.mxu3 %vm4734_vm1, %v8918_v36 }
 0x6d4   : > { %v7750_v63 = vpop.f32.mrf.mxu2  ;;  %v8025_v45 = vpop.f32.mrf.mxu3 }
 0x6d5   : > { %v7812_v10 = vadd.f32 %v7750_v63, %v7540_v31  ;;  %v7215_v2 = vpop.f32.mrf.mxu0  ;;  %v7484_v7 = vpop.f32.mrf.mxu1 }
 0x6d6   : > { %v7542_v54 = vadd.f32 %v7484_v7, %v7270_v41  ;;  %v7271_v58 = vadd.f32 %v7215_v2, %v15416_v56  ;;  %v8382_v7 = vld [vmem:[#allocation2 + $0x119] ss:$2 sm:$0xff]  ;;  %v8652_v56 = vld [vmem:[#allocation2 + $0xda] ss:$2 sm:$0xff] }
 0x6d7   : > { %v15597_v34 = vadd.f32 %v8022_v25, %v7812_v10  ;;  %12292 = vmatmul.msk.f32.gmra.mxu0 %vm4734_vm1, %v8106_v50  ;;  %v8110_v25 = vld [vmem:[#allocation2 + $0x118] ss:$2 sm:$0xff]  ;;  %v8112_v10 = vld [vmem:[#allocation2 + $0x128] ss:$2 sm:$0xff]  ;;  %v8926_v2 = vld [vmem:[#allocation2 + $0x11b] ss:$2 sm:$0xff] }
 0x6d8   : > { %12321 = vmatmul.msk.f32.gmra.mxu1 %vm4734_vm1, %v8376_v5 }
 0x6d9   : > { %12350 = vmatmul.msk.f32.vlgmr.msrb.gmra.mxu2 %vm4734_vm1, %v8646_v57  ;;  %12381 = vmatmul.msk.f32.gmra.mxu3 %vm4734_vm1, %v8920_v61 }
 0x6dc   : > { %v7753_v26 = vpop.f32.mrf.mxu2  ;;  %v8028_v4 = vpop.f32.mrf.mxu3 }
 0x6dd   : > { %v7813_v29 = vadd.f32 %v7753_v26, %v7541_v40  ;;  %v7218_v1 = vpop.f32.mrf.mxu0  ;;  %v7487_v14 = vpop.f32.mrf.mxu1 }
 0x6de   : > { %v7543_v3 = vadd.f32 %v7487_v14, %v7271_v58  ;;  %v7272_v5 = vadd.f32 %v7218_v1, %v15423_v12  ;;  %v8384_v14 = vld [vmem:[#allocation2 + $0x129] ss:$2 sm:$0xff] }
 0x6df   : > { %v15604_v13 = vadd.f32 %v8025_v45, %v7813_v29  ;;  %12293 = vmatmul.msk.f32.gmra.mxu0 %vm4734_vm1, %v8108_v59  ;;  %v12411_v45 = vld [vmem:[%s16544_s5 + $0x38] sm:$0xff]  ;;  %v8114_v29 = vld [vmem:[#allocation2 + $0x168] ss:$2 sm:$0xff] }
 0x6e0   : > { %12322 = vmatmul.msk.f32.gmra.mxu1 %vm4734_vm1, %v8378_v53  ;;  %9363 = vmatpush.msrb.mxu0 %v12411_v45  ;;  %v8654_v53 = vld [vmem:[#allocation2 + $0x11a] ss:$2 sm:$0xff]  ;;  %v8928_v12 = vld [vmem:[#allocation2 + $0x12b] ss:$2 sm:$0xff] }
 0x6e1   : > { %12351 = vmatmul.msk.f32.gmra.mxu2 %vm4734_vm1, %v8648_v11  ;;  %12382 = vmatmul.msk.f32.gmra.mxu3 %vm4734_vm1, %v8922_v20 }
 0x6e4   : > { %v7756_v30 = vpop.f32.mrf.mxu2  ;;  %v8031_v35 = vpop.f32.mrf.mxu3 }
 0x6e5   : > { %v7814_v24 = vadd.f32 %v7756_v30, %v7542_v54  ;;  %v7221_v47 = vpop.f32.mrf.mxu0  ;;  %v7490_v48 = vpop.f32.mrf.mxu1 }
 0x6e6   : > { %v7544_v57 = vadd.f32 %v7490_v48, %v7272_v5  ;;  %v7273_v1 = vadd.f32 %v7221_v47, %v15430_v19  ;;  %v8386_v48 = vld [vmem:[#allocation2 + $0x169] ss:$2 sm:$0xff] }
 0x6e7   : > { %v15611_v27 = vadd.f32 %v8028_v4, %v7814_v24  ;;  %12294 = vmatmul.msk.f32.gmra.mxu0 %vm4734_vm1, %v8110_v25  ;;  %v8116_v24 = vld [vmem:[#allocation2 + $0x178] ss:$2 sm:$0xff]  ;;  %v8930_v19 = vld [vmem:[#allocation2 + $0x16b] ss:$2 sm:$0xff] }
 0x6e8   : > { %12323 = vmatmul.msk.f32.gmra.mxu1 %vm4734_vm1, %v8380_v0  ;;  %v8656_v0 = vld [vmem:[#allocation2 + $0x12a] ss:$2 sm:$0xff] }
 0x6e9   : > { %12352 = vmatmul.msk.f32.gmra.mxu2 %vm4734_vm1, %v8650_v33  ;;  %12383 = vmatmul.msk.f32.gmra.mxu3 %vm4734_vm1, %v8924_v18 }
 0x6ec   : > { %v7759_v38 = vpop.f32.mrf.mxu2  ;;  %v8034_v36 = vpop.f32.mrf.mxu3 }
 0x6ed   : > { %v7815_v15 = vadd.f32 %v7759_v38, %v7543_v3  ;;  %v7224_v31 = vpop.f32.mrf.mxu0  ;;  %v7493_v63 = vpop.f32.mrf.mxu1 }
 0x6ee   : > { %v7545_v11 = vadd.f32 %v7493_v63, %v7273_v1  ;;  %v7274_v47 = vadd.f32 %v7224_v31, %v15437_v51  ;;  %v8388_v63 = vld [vmem:[#allocation2 + $0x179] ss:$2 sm:$0xff] }
 0x6ef   : > { %v15621_v50 = vadd.f32 %v8031_v35, %v7815_v15  ;;  %12295 = vmatmul.msk.f32.gmra.mxu0 %vm4734_vm1, %v8112_v10  ;;  %v8118_v15 = vld [vmem:[#allocation2 + $0x1b8] ss:$2 sm:$0xff]  ;;  %v8932_v51 = vld [vmem:[#allocation2 + $0x17b] ss:$2 sm:$0xff] }
 0x6f0   : > { %12324 = vmatmul.msk.f32.gmra.mxu1 %vm4734_vm1, %v8382_v7  ;;  %v8658_v10 = vld [vmem:[#allocation2 + $0x16a] ss:$2 sm:$0xff] }
 0x6f1   : > { %12353 = vmatmul.msk.f32.gmra.mxu2 %vm4734_vm1, %v8652_v56  ;;  %12384 = vmatmul.msk.f32.gmra.mxu3 %vm4734_vm1, %v8926_v2 }
 0x6f4   : > { %v7762_v61 = vpop.f32.mrf.mxu2  ;;  %v8037_v21 = vpop.f32.mrf.mxu3 }
 0x6f5   : > { %v7816_v40 = vadd.f32 %v7762_v61, %v7544_v57  ;;  %v7227_v26 = vpop.f32.mrf.mxu0  ;;  %v7496_v4 = vpop.f32.mrf.mxu1 }
 0x6f6   : > { %v7546_v33 = vadd.f32 %v7496_v4, %v7274_v47  ;;  %v7275_v31 = vadd.f32 %v7227_v26, %v15444_v6  ;;  %v8934_v6 = vld [vmem:[#allocation2 + $0x1bb] ss:$2 sm:$0xff] }
 0x6f7   : > { %v15628_v59 = vadd.f32 %v8034_v36, %v7816_v40  ;;  %12296 = vmatmul.msk.f32.gmra.mxu0 %vm4734_vm1, %v8114_v29  ;;  %v8390_v40 = vld [vmem:[#allocation2 + $0x1b9] ss:$2 sm:$0xff]  ;;  %v8660_v29 = vld [vmem:[#allocation2 + $0x17a] ss:$2 sm:$0xff] }
 0x6f8   : > { %12325 = vmatmul.msk.f32.gmra.mxu1 %vm4734_vm1, %v8384_v14  ;;  %v12427_v14 = vld [vmem:[%s16544_s5 + $0x58] sm:$0xff] }
 0x6f9   : > { %12354 = vmatmul.msk.f32.gmra.mxu2 %vm4734_vm1, %v8654_v53  ;;  %12385 = vmatmul.msk.f32.gmra.mxu3 %vm4734_vm1, %v8928_v12 }
 0x6fa   : > { %9486 = vmatpush.msra.mxu2 %v12427_v14 }
 0x6fc   : > { %v7765_v20 = vpop.f32.mrf.mxu2  ;;  %v8040_v41 = vpop.f32.mrf.mxu3 }
 0x6fd   : > { %v7817_v54 = vadd.f32 %v7765_v20, %v7545_v11  ;;  %v7230_v30 = vpop.f32.mrf.mxu0  ;;  %v7499_v35 = vpop.f32.mrf.mxu1 }
 0x6fe   : > { %v7547_v7 = vadd.f32 %v7499_v35, %v7275_v31  ;;  %v7276_v26 = vadd.f32 %v7230_v30, %v15451_v23  ;;  %v9315_v23 = vld [vmem:[%s16544_s5 + $0x18] sm:$0xff]  ;;  %v8122_v30 = vld [vmem:[#allocation2 + $0x208] ss:$2 sm:$0xff]  ;;  %v8392_v35 = vld [vmem:[#allocation2 + $0x1c9] ss:$2 sm:$0xff] }
 0x6ff   : > { %v15635_v25 = vadd.f32 %v8037_v21, %v7817_v54  ;;  %12297 = vmatmul.msk.f32.gmra.mxu0 %vm4734_vm1, %v8116_v24  ;;  %v8120_v21 = vld [vmem:[#allocation2 + $0x1c8] ss:$2 sm:$0xff]  ;;  %v12437_v54 = vld [vmem:[%s16544_s5 + $0x78] sm:$0xff]  ;;  %9416 = vmatpush.msrb.mxu1 %v9315_v23 }
 0x700   : > { %12326 = vmatmul.msk.f32.gmra.mxu1 %vm4734_vm1, %v8386_v48  ;;  %9562 = vmatpush.msrb.mxu3 %v12437_v54  ;;  %v8662_v48 = vld [vmem:[#allocation2 + $0x1ba] ss:$2 sm:$0xff]  ;;  %v8398_v23 = vld [vmem:[#allocation2 + $0x259] ss:$2 sm:$0xff] }
 0x701   : > { %12355 = vmatmul.msk.f32.gmra.mxu2 %vm4734_vm1, %v8656_v0  ;;  %12386 = vmatmul.msk.f32.gmra.mxu3 %vm4734_vm1, %v8930_v19  ;;  %v8936_v0 = vld [vmem:[#allocation2 + $0x1cb] ss:$2 sm:$0xff]  ;;  %v8128_v54 = vld [vmem:[#allocation2 + $0x268] ss:$2 sm:$0xff] }
 0x704   : > { %v7768_v18 = vpop.f32.mrf.mxu2  ;;  %v8043_v58 = vpop.f32.mrf.mxu3 }
 0x705   : > { %v7818_v3 = vadd.f32 %v7768_v18, %v7546_v33  ;;  %v7233_v38 = vpop.f32.mrf.mxu0  ;;  %v7502_v36 = vpop.f32.mrf.mxu1 }
 0x706   : > { %v7548_v53 = vadd.f32 %v7502_v36, %v7276_v26  ;;  %v7277_v19 = vadd.f32 %v7233_v38, %v15458_v43  ;;  %v8938_v43 = vld [vmem:[#allocation2 + $0x20b] ss:$2 sm:$0xff] }
 0x707   : > { %v15642_v45 = vadd.f32 %v8040_v41, %v7818_v3  ;;  %12298 = vmatmul.msk.f32.gmra.mxu0 %vm4734_vm1, %v8118_v15  ;;  %v8124_v15 = vld [vmem:[#allocation2 + $0x218] ss:$2 sm:$0xff] }
 0x708   : > { %12327 = vmatmul.msk.f32.gmra.mxu1 %vm4734_vm1, %v8388_v63  ;;  %v8394_v63 = vld [vmem:[#allocation2 + $0x209] ss:$2 sm:$0xff] }
 0x709   : > { %12356 = vmatmul.msk.f32.gmra.mxu2 %vm4734_vm1, %v8658_v10  ;;  %12387 = vmatmul.msk.f32.gmra.mxu3 %vm4734_vm1, %v8932_v51  ;;  %v8664_v51 = vld [vmem:[#allocation2 + $0x1ca] ss:$2 sm:$0xff] }
 0x70c   : > { %v7771_v56 = vpop.f32.mrf.mxu2  ;;  %v8046_v2 = vpop.f32.mrf.mxu3 }
 0x70d   : > { %v7819_v5 = vadd.f32 %v7771_v56, %v7547_v7  ;;  %v7236_v57 = vpop.f32.mrf.mxu0  ;;  %v7505_v61 = vpop.f32.mrf.mxu1 }
 0x70e   : > { %v7549_v47 = vadd.f32 %v7505_v61, %v7277_v19  ;;  %v7278_v38 = vadd.f32 %v7236_v57, %v15465_v62  ;;  %v8666_v62 = vld [vmem:[#allocation2 + $0x20a] ss:$2 sm:$0xff]  ;;  %v8940_v57 = vld [vmem:[#allocation2 + $0x21b] ss:$2 sm:$0xff] }
 0x70f   : > { %v15649_v4 = vadd.f32 %v8043_v58, %v7819_v5  ;;  %12299 = vmatmul.msk.f32.gmra.mxu0 %vm4734_vm1, %v8120_v21  ;;  %v12410_v21 = vld [vmem:[%s16544_s5 + $0x30] sm:$0xff] }
 0x710   : > { %12328 = vmatmul.msk.f32.gmra.mxu1 %vm4734_vm1, %v8390_v40  ;;  %9364 = vmatpush.msrb.mxu0 %v12410_v21  ;;  %v8126_v40 = vld [vmem:[#allocation2 + $0x258] ss:$2 sm:$0xff] }
 0x711   : > { %12357 = vmatmul.msk.f32.gmra.mxu2 %vm4734_vm1, %v8660_v29  ;;  %12388 = vmatmul.msk.f32.gmra.mxu3 %vm4734_vm1, %v8934_v6  ;;  %v8396_v29 = vld [vmem:[#allocation2 + $0x219] ss:$2 sm:$0xff] }
 0x714   : > { %v7774_v12 = vpop.f32.mrf.mxu2  ;;  %v8049_v1 = vpop.f32.mrf.mxu3 }
 0x715   : > { %v7820_v11 = vadd.f32 %v7774_v12, %v7548_v53  ;;  %v7239_v20 = vpop.f32.mrf.mxu0  ;;  %v7508_v41 = vpop.f32.mrf.mxu1 }
 0x716   : > { %v7550_v31 = vadd.f32 %v7508_v41, %v7278_v38  ;;  %v7279_v26 = vadd.f32 %v7239_v20, %v15484_v16  ;;  %v8942_v16 = vld [vmem:[#allocation2 + $0x25b] ss:$2 sm:$0xff] }
 0x717   : > { %v15665_v24 = vadd.f32 %v8046_v2, %v7820_v11  ;;  %12300 = vmatmul.msk.f32.gmra.mxu0 %vm4734_vm1, %v8122_v30 }
 0x718   : > { %12329 = vmatmul.msk.f32.gmra.mxu1 %vm4734_vm1, %v8392_v35  ;;  %v8668_v35 = vld [vmem:[#allocation2 + $0x21a] ss:$2 sm:$0xff] }
 0x719   : > { %12358 = vmatmul.msk.f32.gmra.mxu2 %vm4734_vm1, %v8662_v48  ;;  %12389 = vmatmul.msk.f32.gmra.mxu3 %vm4734_vm1, %v8936_v0 }
 0x71c   : > { %v7777_v33 = vpop.f32.mrf.mxu2  ;;  %v8052_v18 = vpop.f32.mrf.mxu3 }
 0x71d   : > { %v7821_v58 = vadd.f32 %v7777_v33, %v7549_v47  ;;  %v7242_v3 = vpop.f32.mrf.mxu0  ;;  %v7511_v36 = vpop.f32.mrf.mxu1 }
 0x71e   : > { %v7551_v14 = vadd.f32 %v7511_v36, %v7279_v26  ;;  %v7280_v20 = vadd.f32 %v7242_v3, %v15491_v28  ;;  %v8400_v36 = vld [vmem:[#allocation2 + $0x269] ss:$2 sm:$0xff] }
 0x71f   : > { %v15672_v10 = vadd.f32 %v8049_v1, %v7821_v58  ;;  %12301 = vmatmul.msk.f32.gmra.mxu0 %vm4734_vm1, %v8124_v15  ;;  %v8130_v58 = vld [vmem:[#allocation2 + $0x2a8] ss:$2 sm:$0xff]  ;;  %v8944_v28 = vld [vmem:[#allocation2 + $0x26b] ss:$2 sm:$0xff] }
 0x720   : > { %12330 = vmatmul.msk.f32.gmra.mxu1 %vm4734_vm1, %v8394_v63  ;;  %v8670_v63 = vld [vmem:[#allocation2 + $0x25a] ss:$2 sm:$0xff] }
 0x721   : > { %12359 = vmatmul.msk.f32.gmra.mxu2 %vm4734_vm1, %v8664_v51  ;;  %12390 = vmatmul.msk.f32.gmra.mxu3 %vm4734_vm1, %v8938_v43 }
 0x724   : > { %v7780_v7 = vpop.f32.mrf.mxu2  ;;  %v8055_v56 = vpop.f32.mrf.mxu3 }
 0x725   : > { %v7822_v2 = vadd.f32 %v7780_v7, %v7550_v31  ;;  %v7245_v5 = vpop.f32.mrf.mxu0  ;;  %v7514_v61 = vpop.f32.mrf.mxu1 }
 0x726   : > { %v7552_v48 = vadd.f32 %v7514_v61, %v7280_v20  ;;  %v7281_v3 = vadd.f32 %v7245_v5, %v15498_v44  ;;  %v8402_v61 = vld [vmem:[#allocation2 + $0x2a9] ss:$2 sm:$0xff] }
 0x727   : > { %v15682_v6 = vadd.f32 %v8052_v18, %v7822_v2  ;;  %12302 = vmatmul.msk.f32.gmra.mxu0 %vm4734_vm1, %v8126_v40  ;;  %v8132_v2 = vld [vmem:[#allocation2 + $0x2b8] ss:$2 sm:$0xff]  ;;  %v8946_v44 = vld [vmem:[#allocation2 + $0x2ab] ss:$2 sm:$0xff] }
 0x728   : > { %12331 = vmatmul.msk.f32.gmra.mxu1 %vm4734_vm1, %v8396_v29  ;;  %v8672_v40 = vld [vmem:[#allocation2 + $0x26a] ss:$2 sm:$0xff] }
 0x729   : > { %12360 = vmatmul.msk.f32.gmra.mxu2 %vm4734_vm1, %v8666_v62  ;;  %12391 = vmatmul.msk.f32.gmra.mxu3 %vm4734_vm1, %v8940_v57  ;;  %v12426_v20 = vld [vmem:[%s16544_s5 + $0x50] sm:$0xff] }
 0x72a   : > { %9487 = vmatpush.msra.mxu2 %v12426_v20  ;;  %v8412_v20 = vld [vmem:[#allocation2 + $0x359] ss:$2 sm:$0xff] }
 0x72c   : > { %v7783_v53 = vpop.f32.mrf.mxu2  ;;  %v8058_v12 = vpop.f32.mrf.mxu3 }
 0x72d   : > { %v7823_v1 = vadd.f32 %v7783_v53, %v7551_v14  ;;  %v7248_v11 = vpop.f32.mrf.mxu0  ;;  %v7517_v41 = vpop.f32.mrf.mxu1 }
 0x72e   : > { %v7553_v51 = vadd.f32 %v7517_v41, %v7281_v3  ;;  %v7282_v5 = vadd.f32 %v7248_v11, %v15505_v8  ;;  %v8674_v8 = vld [vmem:[#allocation2 + $0x2aa] ss:$2 sm:$0xff]  ;;  %v8948_v11 = vld [vmem:[#allocation2 + $0x2bb] ss:$2 sm:$0xff] }
 0x72f   : > { %v15689_v30 = vadd.f32 %v8055_v56, %v7823_v1  ;;  %12303 = vmatmul.msk.f32.gmra.mxu0 %vm4734_vm1, %v8128_v54  ;;  %v8404_v1 = vld [vmem:[#allocation2 + $0x2b9] ss:$2 sm:$0xff]  ;;  %v8138_v3 = vld [vmem:[#allocation2 + $0x348] ss:$2 sm:$0xff] }
 0x730   : > { %12332 = vmatmul.msk.f32.gmra.mxu1 %vm4734_vm1, %v8398_v23 }
 0x731   : > { %12361 = vmatmul.msk.f32.gmra.mxu2 %vm4734_vm1, %v8668_v35  ;;  %12392 = vmatmul.msk.f32.gmra.mxu3 %vm4734_vm1, %v8942_v16 }
 0x734   : > { %v7786_v0 = vpop.f32.mrf.mxu2  ;;  %v8061_v19 = vpop.f32.mrf.mxu3 }
 0x735   : > { %v7824_v47 = vadd.f32 %v7786_v0, %v7552_v48  ;;  %v7251_v33 = vpop.f32.mrf.mxu0  ;;  %v7520_v18 = vpop.f32.mrf.mxu1  ;;  %v8136_v48 = vld [vmem:[#allocation2 + $0x308] ss:$2 sm:$0xff]  ;;  %v8406_v0 = vld [vmem:[#allocation2 + $0x2f9] ss:$2 sm:$0xff] }
 0x736   : > { %v7554_v29 = vadd.f32 %v7520_v18, %v7282_v5 }
 0x737   : > { %v15696_v15 = vadd.f32 %v8058_v12, %v7824_v47  ;;  %12304 = vmatmul.msk.f32.gmra.mxu0 %vm4734_vm1, %v8130_v58  ;;  %v8134_v12 = vld [vmem:[#allocation2 + $0x2f8] ss:$2 sm:$0xff]  ;;  %v8950_v47 = vld [vmem:[#allocation2 + $0x2fb] ss:$2 sm:$0xff] }
 0x738   : > { %12333 = vmatmul.msk.f32.gmra.mxu1 %vm4734_vm1, %v8400_v36 }
 0x739   : > { %12362 = vmatmul.msk.f32.gmra.mxu2 %vm4734_vm1, %v8670_v63  ;;  %12393 = vmatmul.msk.f32.gmra.mxu3 %vm4734_vm1, %v8944_v28  ;;  %v12436_v63 = vld [vmem:[%s16544_s5 + $0x70] sm:$0xff] }
 0x73a   : > { %v9314_v28 = vld [vmem:[%s16544_s5 + $0x10] sm:$0xff]  ;;  %9563 = vmatpush.msrb.mxu3 %v12436_v63 }
 0x73b   : > { %9417 = vmatpush.msrb.mxu1 %v9314_v28 }
 0x73c   : > { %v7789_v43 = vpop.f32.mrf.mxu2  ;;  %v8064_v38 = vpop.f32.mrf.mxu3 }
 0x73d   : > { %v7825_v31 = vadd.f32 %v7789_v43, %v7553_v51  ;;  %v7254_v7 = vpop.f32.mrf.mxu0  ;;  %v7523_v56 = vpop.f32.mrf.mxu1  ;;  %v8408_v51 = vld [vmem:[#allocation2 + $0x309] ss:$2 sm:$0xff]  ;;  %v8678_v43 = vld [vmem:[#allocation2 + $0x2fa] ss:$2 sm:$0xff] }
 0x73f   : > { %v15703_v21 = vadd.f32 %v8061_v19, %v7825_v31  ;;  %12305 = vmatmul.msk.f32.gmra.mxu0 %vm4734_vm1, %v8132_v2  ;;  %v8676_v19 = vld [vmem:[#allocation2 + $0x2ba] ss:$2 sm:$0xff] }
 0x740   : > { %12334 = vmatmul.msk.f32.gmra.mxu1 %vm4734_vm1, %v8402_v61  ;;  %v15763_v61 = vld [vmem:[%s16543_s4] ss:$0 sm:$0xff] }
 0x741   : > { %12363 = vmatmul.msk.f32.gmra.mxu2 %vm4734_vm1, %v8672_v40  ;;  %12394 = vmatmul.msk.f32.gmra.mxu3 %vm4734_vm1, %v8946_v44 }
 0x744   : > { %v7792_v62 = vpop.f32.mrf.mxu2  ;;  %v8067_v57 = vpop.f32.mrf.mxu3 }
 0x745   : > { %v7826_v26 = vadd.f32 %v7792_v62, %v7554_v29  ;;  %v7526_v14 = vpop.f32.mrf.mxu1  ;;  %v8261_v53 = vpop.f32.mrf.mxu0  ;;  %v8140_v29 = vld [vmem:[#allocation2 + $0x358] ss:$2 sm:$0xff]  ;;  %v8410_v62 = vld [vmem:[#allocation2 + $0x349] ss:$2 sm:$0xff] }
 0x746   : > { %v8345_v31 = vadd.f32 %v8261_v53, %v15520_v37  ;;  %v8680_v37 = vld [vmem:[#allocation2 + $0x30a] ss:$2 sm:$0xff]  ;;  %v8954_v57 = vld [vmem:[#allocation2 + $0x34b] ss:$2 sm:$0xff] }
 0x747   : > { %v15710_v41 = vadd.f32 %v8064_v38, %v7826_v26  ;;  %12306 = vmatmul.msk.f32.gmra.mxu0 %vm4734_vm1, %v8134_v12  ;;  %v8952_v38 = vld [vmem:[#allocation2 + $0x30b] ss:$2 sm:$0xff] }
 0x748   : > { %12335 = vmatmul.msk.f32.gmra.mxu1 %vm4734_vm1, %v8404_v1 }
 0x749   : > { %12364 = vmatmul.msk.f32.gmra.mxu2 %vm4734_vm1, %v8674_v8  ;;  %12395 = vmatmul.msk.f32.gmra.mxu3 %vm4734_vm1, %v8948_v11 }
 0x74c   : > { %v7795_v54 = vpop.f32.mrf.mxu2  ;;  %v8070_v23 = vpop.f32.mrf.mxu3 }
 0x74d   : > { %v8264_v35 = vpop.f32.mrf.mxu0  ;;  %v8533_v16 = vpop.f32.mrf.mxu1 }
 0x74e   : > { %v8617_v7 = vadd.f32 %v8533_v16, %v8345_v31  ;;  %v8346_v26 = vadd.f32 %v8264_v35, %v15527_v55  ;;  %v12409_v16 = vld [vmem:[%s16544_s5 + $0x28] sm:$0xff]  ;;  %v8142_v35 = vld [vmem:[#allocation2 + $0x398] ss:$2 sm:$0xff]  ;;  %v8414_v31 = vld [vmem:[#allocation2 + $0x399] ss:$2 sm:$0xff] }
 0x74f   : > { %12307 = vmatmul.msk.f32.gmra.mxu0 %vm4734_vm1, %v8136_v48  ;;  %v8682_v48 = vld [vmem:[#allocation2 + $0x34a] ss:$2 sm:$0xff] }
 0x750   : > { %12336 = vmatmul.msk.f32.gmra.mxu1 %vm4734_vm1, %v8406_v0  ;;  %9365 = vmatpush.msrb.mxu0 %v12409_v16  ;;  %v8956_v0 = vld [vmem:[#allocation2 + $0x35b] ss:$2 sm:$0xff] }
 0x751   : > { %12365 = vmatmul.msk.f32.gmra.mxu2 %vm4734_vm1, %v8676_v19  ;;  %12396 = vmatmul.msk.f32.gmra.mxu3 %vm4734_vm1, %v8950_v47 }
 0x754   : > { %v7798_v33 = vpop.f32.mrf.mxu2  ;;  %v9077_v18 = vpop.f32.mrf.mxu3 }
 0x755   : > { %v8267_v58 = vpop.f32.mrf.mxu0  ;;  %v8536_v36 = vpop.f32.mrf.mxu1 }
 0x756   : > { %v8618_v53 = vadd.f32 %v8536_v36, %v8346_v26  ;;  %v8347_v19 = vadd.f32 %v8267_v58, %v15534_v39  ;;  %v8684_v39 = vld [vmem:[#allocation2 + $0x35a] ss:$2 sm:$0xff]  ;;  %v8958_v58 = vld [vmem:[#allocation2 + $0x39b] ss:$2 sm:$0xff] }
 0x757   : > { %12308 = vmatmul.msk.f32.gmra.mxu0 %vm4734_vm1, %v8138_v3  ;;  %v8146_v26 = vld [vmem:[#allocation2 + $0x3e8] ss:$2 sm:$0xff] }
 0x758   : > { %12337 = vmatmul.msk.f32.gmra.mxu1 %vm4734_vm1, %v8408_v51 }
 0x759   : > { %12366 = vmatmul.msk.f32.gmra.mxu2 %vm4734_vm1, %v8678_v43  ;;  %12397 = vmatmul.msk.f32.gmra.mxu3 %vm4734_vm1, %v8952_v38  ;;  %v8144_v38 = vld [vmem:[#allocation2 + $0x3a8] ss:$2 sm:$0xff] }
 0x75c   : > { %v8805_v56 = vpop.f32.mrf.mxu2  ;;  %v9080_v2 = vpop.f32.mrf.mxu3 }
 0x75d   : > { %v8889_v22 = vadd.f32 %v8805_v56, %v8617_v7  ;;  %v8270_v40 = vpop.f32.mrf.mxu0  ;;  %v8539_v44 = vpop.f32.mrf.mxu1 }
 0x75e   : > { %v8619_v33 = vadd.f32 %v8539_v44, %v8347_v19  ;;  %v8348_v7 = vadd.f32 %v8270_v40, %v15541_v52  ;;  %v8686_v52 = vld [vmem:[#allocation2 + $0x39a] ss:$2 sm:$0xff]  ;;  %v8960_v40 = vld [vmem:[#allocation2 + $0x3ab] ss:$2 sm:$0xff] }
 0x75f   : > { %v9161_v5 = vadd.f32 %v9077_v18, %v8889_v22  ;;  %12309 = vmatmul.msk.f32.gmra.mxu0 %vm4734_vm1, %v8140_v29 }
 0x760   : > { %12338 = vmatmul.msk.f32.gmra.mxu1 %vm4734_vm1, %v8410_v62 }
 0x761   : > { %v9193_v14 = vadd.f32 %v15763_v61, %v9161_v5  ;;  %12367 = vmatmul.msk.f32.gmra.mxu2 %vm4734_vm1, %v8680_v37  ;;  %12398 = vmatmul.msk.f32.gmra.mxu3 %vm4734_vm1, %v8954_v57 }
 0x763   : > { %v9221_v12 = vmax.f32 %v9193_v14, 0.0  ;;  %v8416_v14 = vld [vmem:[#allocation2 + $0x3a9] ss:$2 sm:$0xff] }
 0x764   : > { %v8808_v1 = vpop.f32.mrf.mxu2  ;;  %v9083_v8 = vpop.f32.mrf.mxu3 }
 0x765   : > { %9250 = vst.msk [vmem:[#allocation3] sm:$0xff] %vm9249_vm2, %v9221_v12  ;;  %v8890_v11 = vadd.f32 %v8808_v1, %v8618_v53  ;;  %v8273_v54 = vpop.f32.mrf.mxu0  ;;  %v8542_v23 = vpop.f32.mrf.mxu1 }
 0x766   : > { %v8349_v53 = vadd.f32 %v8273_v54, %v15548_v42  ;;  %v8688_v42 = vld [vmem:[#allocation2 + $0x3aa] ss:$2 sm:$0xff]  ;;  %v8962_v54 = vld [vmem:[#allocation2 + $0x3eb] ss:$2 sm:$0xff] }
 0x767   : > { %v9162_v55 = vadd.f32 %v9080_v2, %v8890_v11  ;;  %12310 = vmatmul.msk.f32.gmra.mxu0 %vm4734_vm1, %v8142_v35  ;;  %v8620_v2 = vadd.f32 %v8542_v23, %v8348_v7 }
 0x768   : > { %12339 = vmatmul.msk.f32.gmra.mxu1 %vm4734_vm1, %v8412_v20 }
 0x769   : > { %v9194_v47 = vadd.f32 %v15763_v61, %v9162_v55  ;;  %12368 = vmatmul.msk.f32.gmra.mxu2 %vm4734_vm1, %v8682_v48  ;;  %12399 = vmatmul.msk.f32.gmra.mxu3 %vm4734_vm1, %v8956_v0  ;;  %v8148_v48 = vld [vmem:[#allocation2 + $0x3f8] ss:$2 sm:$0xff]  ;;  %v8418_v0 = vld [vmem:[#allocation2 + $0x3e9] ss:$2 sm:$0xff] }
 0x76b   : > { %v9222_v18 = vmax.f32 %v9194_v47, 0.0 }
 0x76c   : > { %v8811_v36 = vpop.f32.mrf.mxu2  ;;  %v9086_v63 = vpop.f32.mrf.mxu3 }
 0x76d   : > { %9251 = vst.msk [vmem:[#allocation3 + $0x8] sm:$0xff] %vm9249_vm2, %v9222_v18  ;;  %v8891_v28 = vadd.f32 %v8811_v36, %v8619_v33  ;;  %v8276_v3 = vpop.f32.mrf.mxu0  ;;  %v8545_v51 = vpop.f32.mrf.mxu1 }
 0x76e   : > { %v8621_v1 = vadd.f32 %v8545_v51, %v8349_v53  ;;  %v8350_v19 = vadd.f32 %v8276_v3, %v15555_v32  ;;  %v8150_v3 = vld [vmem:[#allocation2 + $0x438] ss:$2 sm:$0xff] }
 0x76f   : > { %v9163_v43 = vadd.f32 %v9083_v8, %v8891_v28  ;;  %12311 = vmatmul.msk.f32.gmra.mxu0 %vm4734_vm1, %v8144_v38  ;;  %v12425_v38 = vld [vmem:[%s16544_s5 + $0x48] sm:$0xff] }
 0x770   : > { %12340 = vmatmul.msk.f32.gmra.mxu1 %vm4734_vm1, %v8414_v31  ;;  %9488 = vmatpush.msra.mxu2 %v12425_v38  ;;  %v8420_v31 = vld [vmem:[#allocation2 + $0x3f9] ss:$2 sm:$0xff]  ;;  %v8692_v53 = vld [vmem:[#allocation2 + $0x3fa] ss:$2 sm:$0xff] }
 0x771   : > { %v9195_v56 = vadd.f32 %v15763_v61, %v9163_v43  ;;  %12369 = vmatmul.msk.f32.gmra.mxu2 %vm4734_vm1, %v8684_v39  ;;  %12400 = vmatmul.msk.f32.gmra.mxu3 %vm4734_vm1, %v8958_v58  ;;  %v8690_v39 = vld [vmem:[#allocation2 + $0x3ea] ss:$2 sm:$0xff]  ;;  %v8964_v58 = vld [vmem:[#allocation2 + $0x3fb] ss:$2 sm:$0xff] }
 0x773   : > { %v9223_v22 = vmax.f32 %v9195_v56, 0.0 }
 0x774   : > { %v8814_v44 = vpop.f32.mrf.mxu2  ;;  %v9089_v5 = vpop.f32.mrf.mxu3 }
 0x775   : > { %9252 = vst.msk [vmem:[#allocation3 + $0x18] sm:$0xff] %vm9249_vm2, %v9223_v22  ;;  %v8892_v29 = vadd.f32 %v8814_v44, %v8620_v2  ;;  %v8279_v62 = vpop.f32.mrf.mxu0  ;;  %v8548_v37 = vpop.f32.mrf.mxu1  ;;  %v12408_v2 = vld [vmem:[%s16544_s5 + $0x20] sm:$0xff] }
 0x776   : > { %v8622_v33 = vadd.f32 %v8548_v37, %v8350_v19  ;;  %v8351_v7 = vadd.f32 %v8279_v62, %v15562_v46  ;;  %9366 = vmatpush.msrb.mxu0 %v12408_v2  ;;  %v12435_v62 = vld [vmem:[%s16544_s5 + $0x68] sm:$0xff] }
 0x777   : > { %v9164_v57 = vadd.f32 %v9086_v63, %v8892_v29  ;;  %12312 = vmatmul.msk.f32.gmra.mxu0 %vm4734_vm1, %v8146_v26  ;;  %v9313_v26 = vld [vmem:[%s16544_s5 + $0x8] sm:$0xff]  ;;  %9564 = vmatpush.msrb.mxu3 %v12435_v62 }
 0x778   : > { %12341 = vmatmul.msk.f32.gmra.mxu1 %vm4734_vm1, %v8416_v14  ;;  %v8424_v19 = vld [vmem:[#allocation2 + $0x449] ss:$2 sm:$0xff] }
 0x779   : > { %v9196_v12 = vadd.f32 %v15763_v61, %v9164_v57  ;;  %12370 = vmatmul.msk.f32.gmra.mxu2 %vm4734_vm1, %v8686_v52  ;;  %12401 = vmatmul.msk.f32.gmra.mxu3 %vm4734_vm1, %v8960_v40  ;;  %v8152_v52 = vld [vmem:[#allocation2 + $0x448] ss:$2 sm:$0xff]  ;;  %v8422_v40 = vld [vmem:[#allocation2 + $0x439] ss:$2 sm:$0xff] }
 0x77a   : > { %9418 = vmatpush.msrb.mxu1 %v9313_v26 }
 0x77b   : > { %v9224_v8 = vmax.f32 %v9196_v12, 0.0  ;;  %v8966_v12 = vld [vmem:[#allocation2 + $0x43b] ss:$2 sm:$0xff] }
 0x77c   : > { %v8817_v11 = vpop.f32.mrf.mxu2  ;;  %v9092_v23 = vpop.f32.mrf.mxu3 }
 0x77d   : > { %9253 = vst.msk [vmem:[#allocation3 + $0x20] sm:$0xff] %vm9249_vm2, %v9224_v8  ;;  %v8893_v16 = vadd.f32 %v8817_v11, %v8621_v1  ;;  %v8282_v55 = vpop.f32.mrf.mxu0  ;;  %v8551_v35 = vpop.f32.mrf.mxu1  ;;  %v9312_v11 = vld [vmem:[%s16544_s5] sm:$0xff] }
 0x77e   : > { %v8623_v22 = vadd.f32 %v8551_v35, %v8351_v7  ;;  %v8352_v1 = vadd.f32 %v8282_v55, %v15569_v60  ;;  %9419 = vmatpush.msrb.mxu1 %v9312_v11  ;;  %v8696_v7 = vld [vmem:[#allocation2 + $0x44a] ss:$2 sm:$0xff] }
 0x77f   : > { %v9165_v20 = vadd.f32 %v9089_v5, %v8893_v16  ;;  %12313 = vmatmul.msk.f32.gmra.mxu0 %vm4734_vm1, %v8148_v48 }
 0x780   : > { %12342 = vmatmul.msk.f32.gmra.mxu1 %vm4734_vm1, %v8418_v0 }
 0x781   : > { %v9197_v47 = vadd.f32 %v15763_v61, %v9165_v20  ;;  %12371 = vmatmul.msk.f32.gmra.mxu2 %vm4734_vm1, %v8688_v42  ;;  %12402 = vmatmul.msk.f32.gmra.mxu3 %vm4734_vm1, %v8962_v54  ;;  %v8154_v54 = vld [vmem:[#allocation2 + $0x488] ss:$2 sm:$0xff] }
 0x783   : > { %v9225_v18 = vmax.f32 %v9197_v47, 0.0  ;;  %v8694_v47 = vld [vmem:[#allocation2 + $0x43a] ss:$2 sm:$0xff] }
 0x784   : > { %v8820_v36 = vpop.f32.mrf.mxu2  ;;  %v9095_v63 = vpop.f32.mrf.mxu3 }
 0x785   : > { %9254 = vst.msk [vmem:[#allocation3 + $0x30] sm:$0xff] %vm9249_vm2, %v9225_v18  ;;  %v8894_v28 = vadd.f32 %v8820_v36, %v8622_v33  ;;  %v8285_v51 = vpop.f32.mrf.mxu0  ;;  %v8554_v43 = vpop.f32.mrf.mxu1  ;;  %v8968_v33 = vld [vmem:[#allocation2 + $0x44b] ss:$2 sm:$0xff] }
 0x786   : > { %v8624_v16 = vadd.f32 %v8554_v43, %v8352_v1  ;;  %v8353_v18 = vadd.f32 %v8285_v51, %v15576_v9 }
 0x787   : > { %v9166_v32 = vadd.f32 %v9092_v23, %v8894_v28  ;;  %12314 = vmatmul.msk.f32.gmra.mxu0 %vm4734_vm1, %v8150_v3  ;;  %v12434_v23 = vld [vmem:[%s16544_s5 + $0x60] sm:$0xff] }
 0x788   : > { %12343 = vmatmul.msk.f32.gmra.mxu1 %vm4734_vm1, %v8420_v31  ;;  %9565 = vmatpush.msrb.mxu3 %v12434_v23 }
 0x789   : > { %v9198_v56 = vadd.f32 %v15763_v61, %v9166_v32  ;;  %12372 = vmatmul.msk.f32.gmra.mxu2 %vm4734_vm1, %v8690_v39  ;;  %12403 = vmatmul.msk.f32.gmra.mxu3 %vm4734_vm1, %v8964_v58  ;;  %v8156_v39 = vld [vmem:[#allocation2 + $0x498] ss:$2 sm:$0xff]  ;;  %v8426_v58 = vld [vmem:[#allocation2 + $0x489] ss:$2 sm:$0xff] }
 0x78b   : > { %v9226_v44 = vmax.f32 %v9198_v56, 0.0  ;;  %v8970_v56 = vld [vmem:[#allocation2 + $0x48b] ss:$2 sm:$0xff] }
 0x78c   : > { %v8823_v5 = vpop.f32.mrf.mxu2  ;;  %v9098_v29 = vpop.f32.mrf.mxu3 }
 0x78d   : > { %9255 = vst.msk [vmem:[#allocation3 + $0x38] sm:$0xff] %vm9249_vm2, %v9226_v44  ;;  %v8895_v37 = vadd.f32 %v8823_v5, %v8623_v22  ;;  %v8288_v57 = vpop.f32.mrf.mxu0  ;;  %v8557_v46 = vpop.f32.mrf.mxu1 }
 0x78e   : > { %v8625_v28 = vadd.f32 %v8557_v46, %v8353_v18  ;;  %v8354_v2 = vadd.f32 %v8288_v57, %v15583_v17  ;;  %v8698_v17 = vld [vmem:[#allocation2 + $0x48a] ss:$2 sm:$0xff]  ;;  %v8972_v57 = vld [vmem:[#allocation2 + $0x49b] ss:$2 sm:$0xff] }
 0x78f   : > { %v9167_v14 = vadd.f32 %v9095_v63, %v8895_v37  ;;  %12315 = vmatmul.msk.f32.gmra.mxu0 %vm4734_vm1, %v8152_v52  ;;  %v12424_v63 = vld [vmem:[%s16544_s5 + $0x40] sm:$0xff] }
 0x790   : > { %12344 = vmatmul.msk.f32.gmra.mxu1 %vm4734_vm1, %v8422_v40  ;;  %9489 = vmatpush.msra.mxu2 %v12424_v63  ;;  %v8428_v52 = vld [vmem:[#allocation2 + $0x499] ss:$2 sm:$0xff] }
 0x791   : > { %v9199_v8 = vadd.f32 %v15763_v61, %v9167_v14  ;;  %12373 = vmatmul.msk.f32.gmra.mxu2 %vm4734_vm1, %v8692_v53  ;;  %12404 = vmatmul.msk.f32.gmra.mxu3 %vm4734_vm1, %v8966_v12  ;;  %v9317_v40 = vld [vmem:[#allocation3 + $0x1] ss:$2 sm:$0xff] }
 0x793   : > { %v9227_v35 = vmax.f32 %v9199_v8, 0.0 }
 0x794   : > { %v8826_v20 = vpop.f32.mrf.mxu2  ;;  %v9101_v60 = vpop.f32.mrf.mxu3 }
 0x795   : > { %9256 = vst.msk [vmem:[#allocation3 + $0x48] sm:$0xff] %vm9249_vm2, %v9227_v35  ;;  %v8896_v55 = vadd.f32 %v8826_v20, %v8624_v16  ;;  %v8291_v48 = vpop.f32.mrf.mxu0  ;;  %v8560_v0 = vpop.f32.mrf.mxu1 }
 0x796   : > { %v8626_v44 = vadd.f32 %v8560_v0, %v8354_v2  ;;  %v8355_v53 = vadd.f32 %v8291_v48, %v15590_v49  ;;  %v9301_v0 = vld [vmem:[#allocation3] ss:$2 sm:$0xff] }
 0x797   : > { %v9168_v42 = vadd.f32 %v9098_v29, %v8896_v55  ;;  %12316 = vmatmul.msk.f32.gmra.mxu0 %vm4734_vm1, %v8154_v54  ;;  %v9319_v55 = vld [vmem:[#allocation3 + $0x31] ss:$2 sm:$0xff]  ;;  %v9516_v49 = vld [vmem:[#allocation3 + $0x18] ss:$2 sm:$0xff] }
 0x798   : > { %12345 = vmatmul.msk.f32.gmra.mxu1 %vm4734_vm1, %v8424_v19 }
 0x799   : > { %v9200_v36 = vadd.f32 %v15763_v61, %v9168_v42  ;;  %12374 = vmatmul.msk.f32.gmra.mxu2 %vm4734_vm1, %v8694_v47  ;;  %12405 = vmatmul.msk.f32.gmra.mxu3 %vm4734_vm1, %v8968_v33  ;;  %v8700_v42 = vld [vmem:[#allocation2 + $0x49a] ss:$2 sm:$0xff] }
 0x79b   : > { %v9228_v43 = vmax.f32 %v9200_v36, 0.0 }
 0x79c   : > { %v8829_v38 = vpop.f32.mrf.mxu2  ;;  %v9104_v32 = vpop.f32.mrf.mxu3 }
 0x79d   : > { %9257 = vst.msk [vmem:[#allocation3 + $0x50] sm:$0xff] %vm9249_vm2, %v9228_v43  ;;  %v8897_v3 = vadd.f32 %v8829_v38, %v8625_v28  ;;  %v8294_v31 = vpop.f32.mrf.mxu0  ;;  %v8563_v9 = vpop.f32.mrf.mxu1 }
 0x79e   : > { %v8627_v1 = vadd.f32 %v8563_v9, %v8355_v53  ;;  %v8356_v48 = vadd.f32 %v8294_v31, %v15597_v34  ;;  %v9440_v34 = vld [vmem:[#allocation3 + $0x2] ss:$2 sm:$0xff] }
 0x79f   : > { %v9169_v51 = vadd.f32 %v9101_v60, %v8897_v3  ;;  %12317 = vmatmul.msk.f32.gmra.mxu0 %vm4734_vm1, %v8156_v39 }
 0x7a0   : > { %12346 = vmatmul.msk.f32.gmra.mxu1 %vm4734_vm1, %v8426_v58 }
 0x7a1   : > { %v9201_v22 = vadd.f32 %v15763_v61, %v9169_v51  ;;  %12375 = vmatmul.msk.f32.gmra.mxu2 %vm4734_vm1, %v8696_v7  ;;  %12406 = vmatmul.msk.f32.gmra.mxu3 %vm4734_vm1, %v8970_v56 }
 0x7a3   : > { %v9229_v5 = vmax.f32 %v9201_v22, 0.0 }
 0x7a4   : > { %v8832_v29 = vpop.f32.mrf.mxu2  ;;  %v9107_v37 = vpop.f32.mrf.mxu3  ;;  %v9518_v3 = vld [vmem:[#allocation3 + $0x48] ss:$2 sm:$0xff] }
 0x7a5   : > { %9258 = vst.msk [vmem:[#allocation3 + $0x60] sm:$0xff] %vm9249_vm2, %v9229_v5  ;;  %v8898_v46 = vadd.f32 %v8832_v29, %v8626_v44  ;;  %v8297_v62 = vpop.f32.mrf.mxu0  ;;  %v8566_v26 = vpop.f32.mrf.mxu1 }
 0x7a6   : > { %v8628_v19 = vadd.f32 %v8566_v26, %v8356_v48  ;;  %v8357_v31 = vadd.f32 %v8297_v62, %v15604_v13  ;;  %v9442_v13 = vld [vmem:[#allocation3 + $0x32] ss:$2 sm:$0xff] }
 0x7a7   : > { %v9170_v14 = vadd.f32 %v9104_v32, %v8898_v46  ;;  %12412 = vmatmul.msk.f32.vlgmr.msrb.gmra.mxu0 %vm9249_vm2, %v9317_v40  ;;  %v9303_v32 = vld [vmem:[#allocation3 + $0x30] ss:$2 sm:$0xff] }
 0x7a8   : > { %12347 = vmatmul.msk.f32.gmra.mxu1 %vm4734_vm1, %v8428_v52 }
 0x7a9   : > { %v9202_v12 = vadd.f32 %v15763_v61, %v9170_v14  ;;  %12376 = vmatmul.msk.f32.gmra.mxu2 %vm4734_vm1, %v8698_v17  ;;  %12407 = vmatmul.msk.f32.gmra.mxu3 %vm4734_vm1, %v8972_v57 }
 0x7ab   : > { %v9230_v8 = vmax.f32 %v9202_v12, 0.0 }
 0x7ac   : > { %v8835_v11 = vpop.f32.mrf.mxu2  ;;  %v9110_v23 = vpop.f32.mrf.mxu3 }
 0x7ad   : > { %9259 = vst.msk [vmem:[#allocation3 + $0x68] sm:$0xff] %vm9249_vm2, %v9230_v8  ;;  %v8899_v16 = vadd.f32 %v8835_v11, %v8627_v1  ;;  %v8300_v35 = vpop.f32.mrf.mxu0  ;;  %v8569_v20 = vpop.f32.mrf.mxu1 }
 0x7ae   : > { %v8629_v51 = vadd.f32 %v8569_v20, %v8357_v31  ;;  %v8358_v29 = vadd.f32 %v8300_v35, %v15611_v27 }
 0x7af   : > { %v9171_v60 = vadd.f32 %v9107_v37, %v8899_v16  ;;  %12413 = vmatmul.msk.f32.gmra.mxu0 %vm9249_vm2, %v9319_v55 }
 0x7b0   : > { %12418 = vmatmul.msk.f32.vlgmr.msrb.gmra.mxu1 %vm9249_vm2, %v9301_v0 }
 0x7b1   : > { %v9203_v54 = vadd.f32 %v15763_v61, %v9171_v60  ;;  %12377 = vmatmul.msk.f32.gmra.mxu2 %vm4734_vm1, %v8700_v42  ;;  %12438 = vmatmul.msk.f32.vlgmr.msrb.gmra.mxu3 %vm9249_vm2, %v9516_v49 }
 0x7b3   : > { %v9231_v47 = vmax.f32 %v9203_v54, 0.0 }
 0x7b4   : > { %v8838_v33 = vpop.f32.mrf.mxu2  ;;  %v9113_v18 = vpop.f32.mrf.mxu3  ;;  %v9321_v38 = vld [vmem:[#allocation3 + $0x61] ss:$2 sm:$0xff]  ;;  %v9305_v5 = vld [vmem:[#allocation3 + $0x60] ss:$2 sm:$0xff] }
 0x7b5   : > { %9260 = vst.msk [vmem:[#allocation3 + $0x78] sm:$0xff] %vm9249_vm2, %v9231_v47  ;;  %v8900_v36 = vadd.f32 %v8838_v33, %v8628_v19  ;;  %v8303_v63 = vpop.f32.mrf.mxu0  ;;  %v8572_v28 = vpop.f32.mrf.mxu1  ;;  %v9444_v12 = vld [vmem:[#allocation3 + $0x62] ss:$2 sm:$0xff] }
 0x7b6   : > { %v8630_v46 = vadd.f32 %v8572_v28, %v8358_v29  ;;  %v8359_v27 = vadd.f32 %v8303_v63, %v15621_v50 }
 0x7b7   : > { %v9172_v43 = vadd.f32 %v9110_v23, %v8900_v36  ;;  %12414 = vmatmul.msk.f32.gmra.mxu0 %vm9249_vm2, %v9321_v38 }
 0x7b8   : > { %12419 = vmatmul.msk.f32.gmra.mxu1 %vm9249_vm2, %v9303_v32 }
 0x7b9   : > { %v9204_v9 = vadd.f32 %v15763_v61, %v9172_v43  ;;  %12428 = vmatmul.msk.f32.vlgmr.msra.gmra.mxu2 %vm9249_vm2, %v9440_v34  ;;  %12439 = vmatmul.msk.f32.gmra.mxu3 %vm9249_vm2, %v9518_v3 }
 0x7bb   : > { %v9232_v39 = vmax.f32 %v9204_v9, 0.0 }
 0x7bc   : > { %v8841_v58 = vpop.f32.mrf.mxu2  ;;  %v9116_v7 = vpop.f32.mrf.mxu3 }
 0x7bd   : > { %9261 = vst.msk [vmem:[#allocation3 + $0x80] sm:$0xff] %vm9249_vm2, %v9232_v39  ;;  %v8901_v56 = vadd.f32 %v8841_v58, %v8629_v51  ;;  %v8306_v2 = vpop.f32.mrf.mxu0  ;;  %v8575_v22 = vpop.f32.mrf.mxu1  ;;  %v12446_v58 = vld [vmem:[%s16544_s5 + $0x90] sm:$0xff] }
 0x7be   : > { %v8631_v8 = vadd.f32 %v8575_v22, %v8359_v27  ;;  %v8360_v0 = vadd.f32 %v8306_v2, %v15628_v59  ;;  %v12447_v59 = vld [vmem:[%s16544_s5 + $0x98] sm:$0xff] }
 0x7bf   : > { %v9173_v44 = vadd.f32 %v9113_v18, %v8901_v56  ;;  %9638 = vmatpush.msra.mxu0 %v12447_v59 }
 0x7c0   : > { %12420 = vmatmul.msk.f32.gmra.mxu1 %vm9249_vm2, %v9305_v5 }
 0x7c1   : > { %v9205_v37 = vadd.f32 %v15763_v61, %v9173_v44  ;;  %12429 = vmatmul.msk.f32.gmra.mxu2 %vm9249_vm2, %v9442_v13  ;;  %9639 = vmatpush.msra.mxu0 %v12446_v58 }
 0x7c3   : > { %v9233_v62 = vmax.f32 %v9205_v37, 0.0 }
 0x7c4   : > { %v8844_v26 = vpop.f32.mrf.mxu2  ;;  %v9119_v14 = vpop.f32.mrf.mxu3  ;;  %v9520_v52 = vld [vmem:[#allocation3 + $0x78] ss:$2 sm:$0xff] }
 0x7c5   : > { %9262 = vst.msk [vmem:[#allocation3 + $0x90] sm:$0xff] %vm9249_vm2, %v9233_v62  ;;  %v8902_v40 = vadd.f32 %v8844_v26, %v8630_v46  ;;  %12440 = vmatmul.msk.f32.gmra.mxu3 %vm9249_vm2, %v9520_v52  ;;  %v8309_v17 = vpop.f32.mrf.mxu0  ;;  %v8578_v57 = vpop.f32.mrf.mxu1 }
 0x7c6   : > { %v8632_v49 = vadd.f32 %v8578_v57, %v8360_v0  ;;  %v8361_v43 = vadd.f32 %v8309_v17, %v15635_v25 }
 0x7c7   : > { %v9174_v53 = vadd.f32 %v9116_v7, %v8902_v40 }
 0x7c9   : > { %v9206_v1 = vadd.f32 %v15763_v61, %v9174_v53  ;;  %12430 = vmatmul.msk.f32.gmra.mxu2 %vm9249_vm2, %v9444_v12  ;;  %v12445_v12 = vld [vmem:[%s16544_s5 + $0x88] sm:$0xff] }
 0x7ca   : > { %9640 = vmatpush.msra.mxu0 %v12445_v12 }
 0x7cb   : > { %v9234_v11 = vmax.f32 %v9206_v1, 0.0 }
 0x7cc   : > { %v8847_v23 = vpop.f32.mrf.mxu2  ;;  %v9122_v16 = vpop.f32.mrf.mxu3 }
 0x7cd   : > { %9263 = vst.msk [vmem:[#allocation3 + $0x98] sm:$0xff] %vm9249_vm2, %v9234_v11  ;;  %v8903_v35 = vadd.f32 %v8847_v23, %v8631_v8  ;;  %v8312_v20 = vpop.f32.mrf.mxu0  ;;  %v8581_v60 = vpop.f32.mrf.mxu1 }
 0x7ce   : > { %v8633_v32 = vadd.f32 %v8581_v60, %v8361_v43  ;;  %v8362_v56 = vadd.f32 %v8312_v20, %v15642_v45  ;;  %v12465_v43 = vld [vmem:[%s16544_s5 + $0xc8] sm:$0xff] }
 0x7cf   : > { %v9175_v55 = vadd.f32 %v9119_v14, %v8903_v35 }
 0x7d1   : > { %v9207_v42 = vadd.f32 %v15763_v61, %v9175_v55 }
 0x7d3   : > { %v9235_v50 = vmax.f32 %v9207_v42, 0.0 }
 0x7d4   : > { %v8850_v48 = vpop.f32.mrf.mxu2  ;;  %v9125_v54 = vpop.f32.mrf.mxu3  ;;  %v9323_v19 = vld [vmem:[#allocation3 + $0x91] ss:$2 sm:$0xff]  ;;  %v9307_v47 = vld [vmem:[#allocation3 + $0x90] ss:$2 sm:$0xff] }
 0x7d5   : > { %v9446_v33 = vld [vmem:[#allocation3 + $0x92] ss:$2 sm:$0xff]  ;;  %9264 = vst.msk [vmem:[#allocation3 + $0xa8] sm:$0xff] %vm9249_vm2, %v9235_v50  ;;  %v8904_v18 = vadd.f32 %v8850_v48, %v8632_v49  ;;  %12415 = vmatmul.msk.f32.gmra.mxu0 %vm9249_vm2, %v9323_v19  ;;  %12421 = vmatmul.msk.f32.gmra.mxu1 %vm9249_vm2, %v9307_v47  ;;  %v8315_v36 = vpop.f32.mrf.mxu0  ;;  %v8584_v63 = vpop.f32.mrf.mxu1 }
 0x7d6   : > { %12431 = vmatmul.msk.f32.gmra.mxu2 %vm9249_vm2, %v9446_v33  ;;  %v8634_v2 = vadd.f32 %v8584_v63, %v8362_v56  ;;  %v8363_v26 = vadd.f32 %v8315_v36, %v15649_v4  ;;  %v12467_v49 = vld [vmem:[%s16544_s5 + $0xd8] sm:$0xff]  ;;  %v12456_v47 = vld [vmem:[%s16544_s5 + $0xb0] sm:$0xff] }
 0x7d7   : > { %v9176_v28 = vadd.f32 %v9122_v16, %v8904_v18  ;;  %9790 = vmatpush.msrb.mxu2 %v12467_v49  ;;  %v12457_v48 = vld [vmem:[%s16544_s5 + $0xb8] sm:$0xff]  ;;  %v12466_v33 = vld [vmem:[%s16544_s5 + $0xd0] sm:$0xff] }
 0x7d8   : > { %9714 = vmatpush.msra.mxu1 %v12457_v48 }
 0x7d9   : > { %v9208_v38 = vadd.f32 %v15763_v61, %v9176_v28  ;;  %9791 = vmatpush.msrb.mxu2 %v12466_v33  ;;  %v9744_v33 = vld [vmem:[#allocation3 + $0x30] ss:$2 sm:$0xff] }
 0x7da   : > { %9715 = vmatpush.msra.mxu1 %v12456_v47 }
 0x7db   : > { %v9236_v34 = vmax.f32 %v9208_v38, 0.0  ;;  %9792 = vmatpush.msrb.mxu2 %v12465_v43 }
 0x7dc   : > { %v8853_v3 = vpop.f32.mrf.mxu2  ;;  %v9128_v31 = vpop.f32.mrf.mxu3 }
 0x7dd   : > { %9265 = vst.msk [vmem:[#allocation3 + $0xb0] sm:$0xff] %vm9249_vm2, %v9236_v34  ;;  %v8905_v9 = vadd.f32 %v8853_v3, %v8633_v32  ;;  %v8318_v51 = vpop.f32.mrf.mxu0  ;;  %v8587_v39 = vpop.f32.mrf.mxu1  ;;  %v12477_v32 = vld [vmem:[%s16544_s5 + $0xf8] sm:$0xff]  ;;  %v12454_v3 = vld [vmem:[%s16544_s5 + $0xa0] sm:$0xff] }
 0x7de   : > { %v8635_v45 = vadd.f32 %v8587_v39, %v8363_v26  ;;  %v8364_v1 = vadd.f32 %v8318_v51, %v15665_v24  ;;  %v12444_v24 = vld [vmem:[%s16544_s5 + $0x80] sm:$0xff]  ;;  %9866 = vmatpush.msra.mxu3 %v12477_v32 }
 0x7df   : > { %v9177_v7 = vadd.f32 %v9125_v54, %v8905_v9  ;;  %9641 = vmatpush.msra.mxu0 %v12444_v24 }
 0x7e1   : > { %v9209_v25 = vadd.f32 %v15763_v61, %v9177_v7 }
 0x7e3   : > { %v9237_v22 = vmax.f32 %v9209_v25, 0.0 }
 0x7e4   : > { %v8856_v44 = vpop.f32.mrf.mxu2  ;;  %v9131_v5 = vpop.f32.mrf.mxu3  ;;  %v9522_v13 = vld [vmem:[#allocation3 + $0xa8] ss:$2 sm:$0xff] }
 0x7e5   : > { %9266 = vst.msk [vmem:[#allocation3 + $0xc0] sm:$0xff] %vm9249_vm2, %v9237_v22  ;;  %v8906_v29 = vadd.f32 %v8856_v44, %v8634_v2  ;;  %12441 = vmatmul.msk.f32.gmra.mxu3 %vm9249_vm2, %v9522_v13  ;;  %v8590_v37 = vpop.f32.mrf.mxu1  ;;  %v8321_v62 = vpop.f32.mrf.mxu0  ;;  %v12487_v44 = vld [vmem:[%s16544_s5 + $0x118] sm:$0xff] }
 0x7e6   : > { %v8636_v11 = vadd.f32 %v8590_v37, %v8364_v1  ;;  %v8365_v54 = vadd.f32 %v8321_v62, %v15672_v10  ;;  %v12455_v10 = vld [vmem:[%s16544_s5 + $0xa8] sm:$0xff]  ;;  %9942 = vmatpush.msrb.mxu0 %v12487_v44 }
 0x7e7   : > { %v9178_v46 = vadd.f32 %v9128_v31, %v8906_v29  ;;  %9716 = vmatpush.msra.mxu1 %v12455_v10  ;;  %v12464_v31 = vld [vmem:[%s16544_s5 + $0xc0] sm:$0xff] }
 0x7e8   : > { %9793 = vmatpush.msrb.mxu2 %v12464_v31  ;;  %v9672_v44 = vld [vmem:[#allocation3 + $0x7a] ss:$2 sm:$0xff] }
 0x7e9   : > { %v9210_v14 = vadd.f32 %v15763_v61, %v9178_v46  ;;  %9717 = vmatpush.msra.mxu1 %v12454_v3  ;;  %v9594_v3 = vld [vmem:[#allocation3 + $0x49] ss:$2 sm:$0xff] }
 0x7eb   : > { %v9238_v52 = vmax.f32 %v9210_v14, 0.0 }
 0x7ec   : > { %v8859_v40 = vpop.f32.mrf.mxu2  ;;  %v9134_v17 = vpop.f32.mrf.mxu3 }
 0x7ed   : > { %9267 = vst.msk [vmem:[#allocation3 + $0xc8] sm:$0xff] %vm9249_vm2, %v9238_v52  ;;  %v8907_v57 = vadd.f32 %v8859_v40, %v8635_v45  ;;  %v8593_v53 = vpop.f32.mrf.mxu1  ;;  %v8324_v8 = vpop.f32.mrf.mxu0  ;;  %v12475_v45 = vld [vmem:[%s16544_s5 + $0xe8] sm:$0xff]  ;;  %v12486_v40 = vld [vmem:[%s16544_s5 + $0x110] sm:$0xff] }
 0x7ee   : > { %v8637_v18 = vadd.f32 %v8593_v53, %v8365_v54  ;;  %v8366_v51 = vadd.f32 %v8324_v8, %v15682_v6  ;;  %v12476_v6 = vld [vmem:[%s16544_s5 + $0xf0] sm:$0xff]  ;;  %9943 = vmatpush.msrb.mxu0 %v12486_v40  ;;  %v9592_v54 = vld [vmem:[#allocation3 + $0x19] ss:$2 sm:$0xff] }
 0x7ef   : > { %v9179_v27 = vadd.f32 %v9131_v5, %v8907_v57  ;;  %9867 = vmatpush.msra.mxu3 %v12476_v6  ;;  %v9748_v6 = vld [vmem:[#allocation3 + $0x90] ss:$2 sm:$0xff] }
 0x7f1   : > { %v9211_v4 = vadd.f32 %v15763_v61, %v9179_v27  ;;  %9868 = vmatpush.msra.mxu3 %v12475_v45  ;;  %v9824_v45 = vld [vmem:[#allocation3 + $0x91] ss:$2 sm:$0xff] }
 0x7f3   : > { %v9239_v23 = vmax.f32 %v9211_v4, 0.0 }
 0x7f4   : > { %v8862_v16 = vpop.f32.mrf.mxu2  ;;  %v9137_v35 = vpop.f32.mrf.mxu3  ;;  %v9325_v20 = vld [vmem:[#allocation3 + $0xc1] ss:$2 sm:$0xff]  ;;  %v9309_v60 = vld [vmem:[#allocation3 + $0xc0] ss:$2 sm:$0xff] }
 0x7f5   : > { %v9448_v55 = vld [vmem:[#allocation3 + $0xc2] ss:$2 sm:$0xff]  ;;  %9268 = vst.msk [vmem:[#allocation3 + $0xd8] sm:$0xff] %vm9249_vm2, %v9239_v23  ;;  %v8908_v0 = vadd.f32 %v8862_v16, %v8636_v11  ;;  %12416 = vmatmul.msk.f32.gmra.mxu0 %vm9249_vm2, %v9325_v20  ;;  %12422 = vmatmul.msk.f32.gmra.mxu1 %vm9249_vm2, %v9309_v60  ;;  %v8596_v42 = vpop.f32.mrf.mxu1  ;;  %v8327_v63 = vpop.f32.mrf.mxu0 }
 0x7f6   : > { %12432 = vmatmul.msk.f32.gmra.mxu2 %vm9249_vm2, %v9448_v55  ;;  %v8638_v58 = vadd.f32 %v8596_v42, %v8366_v51  ;;  %v8367_v37 = vadd.f32 %v8327_v63, %v15689_v30  ;;  %v12474_v30 = vld [vmem:[%s16544_s5 + $0xe0] sm:$0xff] }
 0x7f7   : > { %v9180_v50 = vadd.f32 %v9134_v17, %v8908_v0  ;;  %9869 = vmatpush.msra.mxu3 %v12474_v30  ;;  %v9746_v51 = vld [vmem:[#allocation3 + $0x60] ss:$2 sm:$0xff]  ;;  %v9826_v30 = vld [vmem:[#allocation3 + $0xc1] ss:$2 sm:$0xff] }
 0x7f9   : > { %v9212_v19 = vadd.f32 %v15763_v61, %v9180_v50 }
 0x7fb   : > { %v9240_v36 = vmax.f32 %v9212_v19, 0.0  ;;  %v9668_v19 = vld [vmem:[#allocation3 + $0x1a] ss:$2 sm:$0xff] }
 0x7fc   : > { %v8865_v59 = vpop.f32.mrf.mxu2  ;;  %v9140_v28 = vpop.f32.mrf.mxu3 }
 0x7fd   : > { %9269 = vst.msk [vmem:[#allocation3 + $0xe0] sm:$0xff] %vm9249_vm2, %v9240_v36  ;;  %v8909_v38 = vadd.f32 %v8865_v59, %v8637_v18  ;;  %v8599_v34 = vpop.f32.mrf.mxu1  ;;  %v8330_v5 = vpop.f32.mrf.mxu0  ;;  %v12484_v18 = vld [vmem:[%s16544_s5 + $0x100] sm:$0xff] }
 0x7fe   : > { %v8639_v62 = vadd.f32 %v8599_v34, %v8367_v37  ;;  %v8368_v12 = vadd.f32 %v8330_v5, %v15696_v15  ;;  %v9822_v37 = vld [vmem:[#allocation3 + $0x61] ss:$2 sm:$0xff] }
 0x7ff   : > { %v9181_v9 = vadd.f32 %v9137_v35, %v8909_v38 }
 0x801   : > { %v9213_v39 = vadd.f32 %v15763_v61, %v9181_v9  ;;  %v9670_v9 = vld [vmem:[#allocation3 + $0x4a] ss:$2 sm:$0xff] }
 0x803   : > { %v9241_v7 = vmax.f32 %v9213_v39, 0.0 }
 0x804   : > { %v8868_v56 = vpop.f32.mrf.mxu2  ;;  %v9143_v25 = vpop.f32.mrf.mxu3  ;;  %v9524_v2 = vld [vmem:[#allocation3 + $0xd8] ss:$2 sm:$0xff] }
 0x805   : > { %9270 = vst.msk [vmem:[#allocation3 + $0xf0] sm:$0xff] %vm9249_vm2, %v9241_v7  ;;  %v8910_v22 = vadd.f32 %v8868_v56, %v8638_v58  ;;  %12442 = vmatmul.msk.f32.gmra.mxu3 %vm9249_vm2, %v9524_v2  ;;  %v8602_v29 = vpop.f32.mrf.mxu1  ;;  %v8333_v53 = vpop.f32.mrf.mxu0  ;;  %v9596_v2 = vld [vmem:[#allocation3 + $0x79] ss:$2 sm:$0xff] }
 0x806   : > { %v8640_v4 = vadd.f32 %v8602_v29, %v8368_v12  ;;  %v8369_v55 = vadd.f32 %v8333_v53, %v15703_v21  ;;  %v12485_v21 = vld [vmem:[%s16544_s5 + $0x108] sm:$0xff] }
 0x807   : > { %v9182_v13 = vadd.f32 %v9140_v28, %v8910_v22  ;;  %9944 = vmatpush.msrb.mxu0 %v12485_v21  ;;  %v9820_v22 = vld [vmem:[#allocation3 + $0x31] ss:$2 sm:$0xff] }
 0x808   : > { %v9598_v29 = vld [vmem:[#allocation3 + $0xa9] ss:$2 sm:$0xff] }
 0x809   : > { %v9214_v46 = vadd.f32 %v15763_v61, %v9182_v13  ;;  %9945 = vmatpush.msrb.mxu0 %v12484_v18  ;;  %v10025_v21 = vld [vmem:[%s16546_s7 + $0x30] sm:$0xff] }
 0x80b   : > { %v9242_v26 = vmax.f32 %v9214_v46, 0.0  ;;  %v9674_v46 = vld [vmem:[#allocation3 + $0xaa] ss:$2 sm:$0xff] }
 0x80c   : > { %v8871_v14 = vpop.f32.mrf.mxu2  ;;  %v9146_v17 = vpop.f32.mrf.mxu3 }
 0x80d   : > { %9271 = vst.msk [vmem:[#allocation3 + $0xf8] sm:$0xff] %vm9249_vm2, %v9242_v26  ;;  %v8911_v52 = vadd.f32 %v8871_v14, %v8639_v62  ;;  %v8605_v1 = vpop.f32.mrf.mxu1  ;;  %v8336_v42 = vpop.f32.mrf.mxu0  ;;  %v9750_v62 = vld [vmem:[#allocation3 + $0xc0] ss:$2 sm:$0xff]  ;;  %v9600_v14 = vld [vmem:[#allocation3 + $0xd9] ss:$2 sm:$0xff] }
 0x80e   : > { %v8641_v24 = vadd.f32 %v8605_v1, %v8369_v55  ;;  %v8370_v63 = vadd.f32 %v8336_v42, %v15710_v41 }
 0x80f   : > { %v9183_v57 = vadd.f32 %v9143_v25, %v8911_v52  ;;  %v9676_v52 = vld [vmem:[#allocation3 + $0xda] ss:$2 sm:$0xff] }
 0x811   : > { %v9215_v27 = vadd.f32 %v15763_v61, %v9183_v57 }
 0x813   : > { %v9243_v8 = vmax.f32 %v9215_v27, 0.0  ;;  %v9896_v27 = vld [vmem:[#allocation3 + $0x32] ss:$2 sm:$0xff] }
 0x814   : > { %v8874_v11 = vpop.f32.mrf.mxu2  ;;  %v9327_v23 = vld [vmem:[#allocation3 + $0xf1] ss:$2 sm:$0xff]  ;;  %v9311_v16 = vld [vmem:[#allocation3 + $0xf0] ss:$2 sm:$0xff]  ;;  %v9149_v15 = vpop.f32.mrf.mxu3 }
 0x815   : > { %v9450_v35 = vld [vmem:[#allocation3 + $0xf2] ss:$2 sm:$0xff]  ;;  %9272 = vst.msk [vmem:[#allocation3 + $0x108] sm:$0xff] %vm9249_vm2, %v9243_v8  ;;  %v8912_v20 = vadd.f32 %v8874_v11, %v8640_v4  ;;  %12417 = vmatmul.msk.f32.gmra.mxu0 %vm9249_vm2, %v9327_v23  ;;  %12423 = vmatmul.msk.f32.gmra.mxu1 %vm9249_vm2, %v9311_v16  ;;  %v8608_v50 = vpop.f32.mrf.mxu1  ;;  %v8339_v38 = vpop.f32.mrf.mxu0  ;;  %v9828_v12 = vld [vmem:[#allocation3 + $0xf1] ss:$2 sm:$0xff] }
 0x816   : > { %12433 = vmatmul.msk.f32.gmra.mxu2 %vm9249_vm2, %v9450_v35  ;;  %v8642_v10 = vadd.f32 %v8608_v50, %v8370_v63  ;;  %v9752_v40 = vld [vmem:[#allocation3 + $0xf0] ss:$2 sm:$0xff]  ;;  %v12511_v38 = vld [vmem:[%s16546_s7 + $0xa8] sm:$0xff] }
 0x817   : > { %v9184_v60 = vadd.f32 %v9146_v17, %v8912_v20  ;;  %v9898_v4 = vld [vmem:[#allocation3 + $0x62] ss:$2 sm:$0xff]  ;;  %v9900_v8 = vld [vmem:[#allocation3 + $0x92] ss:$2 sm:$0xff] }
 0x818   : > { %v9902_v11 = vld [vmem:[#allocation3 + $0xc2] ss:$2 sm:$0xff]  ;;  %v9904_v16 = vld [vmem:[#allocation3 + $0xf2] ss:$2 sm:$0xff] }
 0x819   : > { %v9216_v0 = vadd.f32 %v15763_v61, %v9184_v60 }
 0x81b   : > { %v9244_v49 = vmax.f32 %v9216_v0, 0.0 }
 0x81c   : > { %v8877_v48 = vpop.f32.mrf.mxu2  ;;  %v9152_v28 = vpop.f32.mrf.mxu3 }
 0x81d   : > { %9273 = vst.msk [vmem:[#allocation3 + $0x110] sm:$0xff] %vm9249_vm2, %v9244_v49  ;;  %v8913_v47 = vadd.f32 %v8877_v48, %v8641_v24  ;;  %12448 = vmatmul.msk.f32.vlgmr.msra.gmra.mxu0 %vm9249_vm2, %v9592_v54  ;;  %12458 = vmatmul.msk.f32.vlgmr.msra.gmra.mxu1 %vm9249_vm2, %v9668_v19  ;;  %v8611_v39 = vpop.f32.mrf.mxu1  ;;  %v8342_v5 = vpop.f32.mrf.mxu0  ;;  %v10026_v19 = vld [vmem:[%s16546_s7 + $0x38] sm:$0xff] }
 0x81e   : > { %12468 = vmatmul.msk.f32.vlgmr.msrb.gmra.mxu2 %vm9249_vm2, %v9744_v33  ;;  %v12501_v33 = vld [vmem:[%s16546_s7 + $0x78] sm:$0xff]  ;;  %v12510_v39 = vld [vmem:[%s16546_s7 + $0xa0] sm:$0xff] }
 0x81f   : > { %v9185_v36 = vadd.f32 %v9149_v15, %v8913_v47  ;;  %10083 = vmatpush.msra.mxu2 %v10026_v19  ;;  %v12513_v47 = vld [vmem:[%s16546_s7 + $0xb8] sm:$0xff]  ;;  %10054 = vmatpush.msrb.mxu1 %v12501_v33  ;;  %v12542_v19 = vld [vmem:[%s16546_s7 + $0x170] sm:$0xff] }
 0x820   : > { %10125 = vmatpush.msrb.mxu3 %v12513_v47  ;;  %v12497_v5 = vld [vmem:[%s16546_s7 + $0x58] sm:$0xff] }
 0x821   : > { %v9217_v59 = vadd.f32 %v15763_v61, %v9185_v36  ;;  %10084 = vmatpush.msra.mxu2 %v10025_v21  ;;  %v16169_v21 = vld [vmem:[%s16545_s6] ss:$0 sm:$0xff] }
 0x823   : > { %v9245_v43 = vmax.f32 %v9217_v59, 0.0 }
 0x824   : > { %v8880_v32 = vpop.f32.mrf.mxu2  ;;  %v9526_v34 = vld [vmem:[#allocation3 + $0x108] ss:$2 sm:$0xff]  ;;  %v9155_v56 = vpop.f32.mrf.mxu3  ;;  %v9602_v17 = vld [vmem:[#allocation3 + $0x109] ss:$2 sm:$0xff] }
 0x825   : > { %9274 = vst.msk [vmem:[#allocation3 + $0x120] sm:$0xff] %vm9249_vm2, %v9245_v43  ;;  %v8914_v31 = vadd.f32 %v8880_v32, %v8642_v10  ;;  %12443 = vmatmul.msk.f32.gmra.mxu3 %vm9249_vm2, %v9526_v34  ;;  %12449 = vmatmul.msk.f32.gmra.mxu0 %vm9249_vm2, %v9594_v3  ;;  %v8614_v13 = vpop.f32.mrf.mxu1  ;;  %v9678_v57 = vld [vmem:[#allocation3 + $0x10a] ss:$2 sm:$0xff]  ;;  %v16018_v23 = vpop.f32.mrf.mxu0 }
 0x826   : > { %12459 = vmatmul.msk.f32.gmra.mxu1 %vm9249_vm2, %v9670_v9  ;;  %12469 = vmatmul.msk.f32.gmra.mxu2 %vm9249_vm2, %v9746_v51  ;;  %v12500_v10 = vld [vmem:[%s16546_s7 + $0x70] sm:$0xff]  ;;  %v10024_v43 = vld [vmem:[%s16546_s7 + $0x28] sm:$0xff]  ;;  %v10023_v51 = vld [vmem:[%s16546_s7 + $0x20] sm:$0xff] }
 0x827   : > { %v9186_v41 = vadd.f32 %v9152_v28, %v8914_v31  ;;  %v12512_v28 = vld [vmem:[%s16546_s7 + $0xb0] sm:$0xff]  ;;  %10055 = vmatpush.msrb.mxu1 %v12500_v10  ;;  %10085 = vmatpush.msra.mxu2 %v10024_v43  ;;  %v12499_v9 = vld [vmem:[%s16546_s7 + $0x68] sm:$0xff] }
 0x828   : > { %10126 = vmatpush.msrb.mxu3 %v12512_v28  ;;  %v10021_v13 = vld [vmem:[%s16546_s7 + $0x10] sm:$0xff]  ;;  %v12521_v28 = vld [vmem:[%s16546_s7 + $0xe8] sm:$0xff] }
 0x829   : > { %v9218_v58 = vadd.f32 %v15763_v61, %v9186_v41  ;;  %10056 = vmatpush.msrb.mxu1 %v12499_v9  ;;  %v12498_v41 = vld [vmem:[%s16546_s7 + $0x60] sm:$0xff]  ;;  %10086 = vmatpush.msra.mxu2 %v10023_v51 }
 0x82a   : > { %10127 = vmatpush.msrb.mxu3 %v12511_v38  ;;  %v12530_v9 = vld [vmem:[%s16546_s7 + $0x120] sm:$0xff] }
 0x82b   : > { %v9246_v7 = vmax.f32 %v9218_v58, 0.0  ;;  %10057 = vmatpush.msrb.mxu1 %v12498_v41  ;;  %v12520_v51 = vld [vmem:[%s16546_s7 + $0xe0] sm:$0xff] }
 0x82c   : > { %v8883_v25 = vpop.f32.mrf.mxu2  ;;  %v9158_v26 = vpop.f32.mrf.mxu3  ;;  %10128 = vmatpush.msrb.mxu3 %v12510_v39  ;;  %v12540_v39 = vld [vmem:[%s16546_s7 + $0x160] sm:$0xff] }
 0x82d   : > { %9275 = vst.msk [vmem:[#allocation3 + $0x128] sm:$0xff] %vm9249_vm2, %v9246_v7  ;;  %12450 = vmatmul.msk.f32.gmra.mxu0 %vm9249_vm2, %v9596_v2  ;;  %12478 = vmatmul.msk.f32.vlgmr.msra.gmra.mxu3 %vm9249_vm2, %v9820_v22  ;;  %v16021_v35 = vpop.f32.mrf.mxu0  ;;  %v16028_v55 = vpop.f32.mrf.mxu1  ;;  %v10022_v2 = vld [vmem:[%s16546_s7 + $0x18] sm:$0xff]  ;;  %v12495_v26 = vld [vmem:[%s16546_s7 + $0x48] sm:$0xff] }
 0x82e   : > { %12460 = vmatmul.msk.f32.gmra.mxu1 %vm9249_vm2, %v9672_v44  ;;  %12470 = vmatmul.msk.f32.gmra.mxu2 %vm9249_vm2, %v9748_v6  ;;  %v12509_v6 = vld [vmem:[%s16546_s7 + $0x98] sm:$0xff] }
 0x82f   : > { %10087 = vmatpush.msra.mxu2 %v10022_v2  ;;  %10129 = vmatpush.msrb.mxu3 %v12509_v6  ;;  %v12519_v2 = vld [vmem:[%s16546_s7 + $0xd8] sm:$0xff] }
 0x830   : > { %10058 = vmatpush.msrb.mxu1 %v12497_v5 }
 0x831   : > { %10088 = vmatpush.msra.mxu2 %v10021_v13 }
 0x834   : > { %v8886_v61 = vpop.f32.mrf.mxu2  ;;  %v9754_v53 = vld [vmem:[#allocation3 + $0x120] ss:$2 sm:$0xff]  ;;  %v9830_v1 = vld [vmem:[#allocation3 + $0x121] ss:$2 sm:$0xff]  ;;  %v16032_v42 = vpop.f32.mrf.mxu3 }
 0x835   : > { %12451 = vmatmul.msk.f32.gmra.mxu0 %vm9249_vm2, %v9598_v29  ;;  %12479 = vmatmul.msk.f32.gmra.mxu3 %vm9249_vm2, %v9822_v37  ;;  %v9906_v20 = vld [vmem:[#allocation3 + $0x122] ss:$2 sm:$0xff]  ;;  %v16024_v60 = vpop.f32.mrf.mxu0  ;;  %v16036_v49 = vpop.f32.mrf.mxu1 }
 0x836   : > { %12461 = vmatmul.msk.f32.gmra.mxu1 %vm9249_vm2, %v9674_v46  ;;  %12471 = vmatmul.msk.f32.gmra.mxu2 %vm9249_vm2, %v9750_v62  ;;  %v12508_v37 = vld [vmem:[%s16546_s7 + $0x90] sm:$0xff]  ;;  %v10020_v62 = vld [vmem:[%s16546_s7 + $0x8] sm:$0xff] }
 0x837   : > { %10130 = vmatpush.msrb.mxu3 %v12508_v37  ;;  %v12496_v46 = vld [vmem:[%s16546_s7 + $0x50] sm:$0xff]  ;;  %10089 = vmatpush.msra.mxu2 %v10020_v62 }
 0x838   : > { %10059 = vmatpush.msrb.mxu1 %v12496_v46  ;;  %v12538_v37 = vld [vmem:[%s16546_s7 + $0x150] sm:$0xff] }
 0x83a   : > { %10060 = vmatpush.msrb.mxu1 %v12495_v26 }
 0x83c   : > { %v16030_v0 = vpop.f32.mrf.mxu2  ;;  %v16040_v48 = vpop.f32.mrf.mxu3 }
 0x83d   : > { %12452 = vmatmul.msk.f32.gmra.mxu0 %vm9249_vm2, %v9600_v14  ;;  %12480 = vmatmul.msk.f32.gmra.mxu3 %vm9249_vm2, %v9824_v45  ;;  %v16054_v18 = vpop.f32.mrf.mxu1  ;;  %v12507_v14 = vld [vmem:[%s16546_s7 + $0x88] sm:$0xff]  ;;  %v9422_v45 = vadd.f32 %v16028_v55, %v16018_v23 }
 0x83e   : > { %12462 = vmatmul.msk.f32.gmra.mxu1 %vm9249_vm2, %v9676_v52  ;;  %12472 = vmatmul.msk.f32.gmra.mxu2 %vm9249_vm2, %v9752_v40  ;;  %v12494_v40 = vld [vmem:[%s16546_s7 + $0x40] sm:$0xff]  ;;  %v9428_v10 = vadd.f32 %v16054_v18, %v16024_v60  ;;  %v12529_v60 = vld [vmem:[%s16546_s7 + $0x118] sm:$0xff] }
 0x83f   : > { %10131 = vmatpush.msrb.mxu3 %v12507_v14  ;;  %10061 = vmatpush.msrb.mxu1 %v12494_v40  ;;  %v12537_v40 = vld [vmem:[%s16546_s7 + $0x148] sm:$0xff] }
 0x844   : > { %v16038_v50 = vpop.f32.mrf.mxu2 }
 0x845   : > { %12453 = vmatmul.msk.f32.gmra.mxu0 %vm9249_vm2, %v9602_v17  ;;  %12481 = vmatmul.msk.f32.gmra.mxu3 %vm9249_vm2, %v9826_v30  ;;  %v10019_v17 = vld [vmem:[%s16546_s7] sm:$0xff] }
 0x846   : > { %12463 = vmatmul.msk.f32.gmra.mxu1 %vm9249_vm2, %v9678_v57  ;;  %12473 = vmatmul.msk.f32.gmra.mxu2 %vm9249_vm2, %v9754_v53  ;;  %v12506_v30 = vld [vmem:[%s16546_s7 + $0x80] sm:$0xff] }
 0x847   : > { %10090 = vmatpush.msra.mxu2 %v10019_v17  ;;  %10132 = vmatpush.msrb.mxu3 %v12506_v30  ;;  %v12526_v30 = vld [vmem:[%s16546_s7 + $0x100] sm:$0xff] }
 0x848   : > { %v16058_v63 = vpop.f32.mrf.mxu3 }
 0x84c   : > { %v16056_v36 = vpop.f32.mrf.mxu2 }
 0x84d   : > { %12482 = vmatmul.msk.f32.gmra.mxu3 %vm9249_vm2, %v9828_v12  ;;  %12488 = vmatmul.msk.f32.vlgmr.msrb.gmra.mxu0 %vm9249_vm2, %v9896_v27  ;;  %v9509_v12 = vadd.f32 %v16030_v0, %v9422_v45  ;;  %v12523_v0 = vld [vmem:[%s16546_s7 + $0xf8] sm:$0xff]  ;;  %v9511_v18 = vadd.f32 %v16056_v36, %v9428_v10  ;;  %v12528_v36 = vld [vmem:[%s16546_s7 + $0x110] sm:$0xff]  ;;  %v12527_v45 = vld [vmem:[%s16546_s7 + $0x108] sm:$0xff] }
 0x84e   : > { %10169 = vmatpush.msra.mxu1 %v12523_v0  ;;  %v12563_v0 = vld [vmem:[%s16546_s7 + $0x1f8] sm:$0xff]  ;;  %v12551_v10 = vld [vmem:[%s16546_s7 + $0x1a8] sm:$0xff] }
 0x84f   : > { %v9587_v62 = vadd.f32 %v16058_v63, %v9511_v18  ;;  %v12559_v18 = vld [vmem:[%s16546_s7 + $0x1d8] sm:$0xff] }
 0x852   : > { %v16026_v15 = vpop.f32.mrf.mxu0  ;;  %v16072_v32 = vpop.f32.mrf.mxu1 }
 0x855   : > { %12483 = vmatmul.msk.f32.gmra.mxu3 %vm9249_vm2, %v9830_v1  ;;  %12489 = vmatmul.msk.f32.gmra.mxu0 %vm9249_vm2, %v9898_v4  ;;  %v9585_v1 = vadd.f32 %v16032_v42, %v9509_v12  ;;  %v9425_v4 = vadd.f32 %v16036_v49, %v16021_v35  ;;  %v12543_v42 = vld [vmem:[%s16546_s7 + $0x178] sm:$0xff]  ;;  %v12536_v12 = vld [vmem:[%s16546_s7 + $0x140] sm:$0xff] }
 0x856   : > { %10257 = vmatpush.msra.mxu3 %v12543_v42 }
 0x858   : > { %10258 = vmatpush.msra.mxu3 %v12542_v19 }
 0x859   : > { %v16074_v34 = vpop.f32.mrf.mxu2 }
 0x85d   : > { %12490 = vmatmul.msk.f32.gmra.mxu0 %vm9249_vm2, %v9900_v8 }
 0x865   : > { %12491 = vmatmul.msk.f32.gmra.mxu0 %vm9249_vm2, %v9902_v11  ;;  %v12533_v11 = vld [vmem:[%s16546_s7 + $0x138] sm:$0xff] }
 0x866   : > { %10213 = vmatpush.msrb.mxu2 %v12533_v11 }
 0x868   : > { %v16076_v3 = vpop.f32.mrf.mxu3 }
 0x86d   : > { %12492 = vmatmul.msk.f32.gmra.mxu0 %vm9249_vm2, %v9904_v16  ;;  %v9510_v16 = vadd.f32 %v16038_v50, %v9425_v4  ;;  %v12522_v50 = vld [vmem:[%s16546_s7 + $0xf0] sm:$0xff] }
 0x86e   : > { %10170 = vmatpush.msra.mxu1 %v12522_v50  ;;  %v12562_v50 = vld [vmem:[%s16546_s7 + $0x1f0] sm:$0xff] }
 0x86f   : > { %v9586_v33 = vadd.f32 %v16040_v48, %v9510_v16  ;;  %v12541_v48 = vld [vmem:[%s16546_s7 + $0x168] sm:$0xff] }
 0x870   : > { %10171 = vmatpush.msra.mxu1 %v12521_v28  ;;  %10259 = vmatpush.msra.mxu3 %v12541_v48  ;;  %v12561_v48 = vld [vmem:[%s16546_s7 + $0x1e8] sm:$0xff] }
 0x872   : > { %v16034_v24 = vpop.f32.mrf.mxu0  ;;  %v16092_v58 = vpop.f32.mrf.mxu1  ;;  %10172 = vmatpush.msra.mxu1 %v12520_v51  ;;  %10260 = vmatpush.msra.mxu3 %v12540_v39  ;;  %v12550_v51 = vld [vmem:[%s16546_s7 + $0x1a0] sm:$0xff] }
 0x873   : > { %v12570_v39 = vld [vmem:[%s16546_s7 + $0x220] sm:$0xff] }
 0x874   : > { %10173 = vmatpush.msra.mxu1 %v12519_v2  ;;  %v12569_v2 = vld [vmem:[%s16546_s7 + $0x218] sm:$0xff] }
 0x875   : > { %12493 = vmatmul.msk.f32.gmra.mxu0 %vm9249_vm2, %v9906_v20 }
 0x879   : > { %v16094_v7 = vpop.f32.mrf.mxu2 }
 0x888   : > { %v16096_v56 = vpop.f32.mrf.mxu3 }
 0x892   : > { %v9383_v54 = vpop.f32.mrf.mxu0  ;;  %v9436_v22 = vpop.f32.mrf.mxu1 }
 0x893   : > { %v12532_v54 = vld [vmem:[%s16546_s7 + $0x130] sm:$0xff]  ;;  %v12539_v22 = vld [vmem:[%s16546_s7 + $0x158] sm:$0xff] }
 0x894   : > { %10214 = vmatpush.msrb.mxu2 %v12532_v54  ;;  %10261 = vmatpush.msra.mxu3 %v12539_v22 }
 0x896   : > { %10262 = vmatpush.msra.mxu3 %v12538_v37  ;;  %v12557_v37 = vld [vmem:[%s16546_s7 + $0x1c8] sm:$0xff] }
 0x898   : > { %10263 = vmatpush.msra.mxu3 %v12537_v40 }
 0x899   : > { %v9506_v44 = vpop.f32.mrf.mxu2 }
 0x89a   : > { %v9643_v59 = vpop.f32.mrf.mxu0  ;;  %v9719_v52 = vpop.f32.mrf.mxu1  ;;  %10264 = vmatpush.msra.mxu3 %v12536_v12 }
 0x89b   : > { %v9661_v8 = vadd.f32 %v9643_v59, %v9585_v1  ;;  %v12531_v59 = vld [vmem:[%s16546_s7 + $0x128] sm:$0xff] }
 0x89c   : > { %10215 = vmatpush.msrb.mxu2 %v12531_v59  ;;  %v9434_v59 = vadd.f32 %v16092_v58, %v16034_v24  ;;  %v12560_v58 = vld [vmem:[%s16546_s7 + $0x1e0] sm:$0xff] }
 0x89d   : > { %v9737_v35 = vadd.f32 %v9719_v52, %v9661_v8  ;;  %v12517_v52 = vld [vmem:[%s16546_s7 + $0xc8] sm:$0xff] }
 0x89e   : > { %10216 = vmatpush.msrb.mxu2 %v12530_v9 }
 0x8a0   : > { %10217 = vmatpush.msrb.mxu2 %v12529_v60 }
 0x8a1   : > { %v9795_v57 = vpop.f32.mrf.mxu2 }
 0x8a2   : > { %v16078_v31 = vpop.f32.mrf.mxu0  ;;  %v9813_v47 = vadd.f32 %v9795_v57, %v9737_v35  ;;  %10218 = vmatpush.msrb.mxu2 %v12528_v36  ;;  %v12516_v57 = vld [vmem:[%s16546_s7 + $0xc0] sm:$0xff]  ;;  %v12548_v36 = vld [vmem:[%s16546_s7 + $0x190] sm:$0xff] }
 0x8a3   : > { %v9722_v20 = vpop.f32.mrf.mxu1  ;;  %v9662_v43 = vadd.f32 %v16078_v31, %v9586_v33  ;;  %v12572_v33 = vld [vmem:[%s16546_s7 + $0x230] sm:$0xff] }
 0x8a4   : > { %10219 = vmatpush.msrb.mxu2 %v12527_v45 }
 0x8a5   : > { %v9738_v44 = vadd.f32 %v9722_v20, %v9662_v43  ;;  %v12571_v43 = vld [vmem:[%s16546_s7 + $0x228] sm:$0xff] }
 0x8a6   : > { %10220 = vmatpush.msrb.mxu2 %v12526_v30  ;;  %v12566_v30 = vld [vmem:[%s16546_s7 + $0x200] sm:$0xff] }
 0x8a8   : > { %v9582_v61 = vpop.f32.mrf.mxu3 }
 0x8a9   : > { %v9798_v55 = vpop.f32.mrf.mxu2  ;;  %v12518_v61 = vld [vmem:[%s16546_s7 + $0xd0] sm:$0xff] }
 0x8aa   : > { %v16098_v25 = vpop.f32.mrf.mxu0  ;;  %v9814_v46 = vadd.f32 %v9798_v55, %v9738_v44  ;;  %10174 = vmatpush.msra.mxu1 %v12518_v61 }
 0x8ab   : > { %v9725_v6 = vpop.f32.mrf.mxu1  ;;  %v9663_v17 = vadd.f32 %v16098_v25, %v9587_v62  ;;  %v9431_v25 = vadd.f32 %v16072_v32, %v16026_v15  ;;  %v12553_v15 = vld [vmem:[%s16546_s7 + $0x1b8] sm:$0xff]  ;;  %v12547_v62 = vld [vmem:[%s16546_s7 + $0x188] sm:$0xff] }
 0x8ac   : > { %10175 = vmatpush.msra.mxu1 %v12517_v52  ;;  %v12573_v32 = vld [vmem:[%s16546_s7 + $0x238] sm:$0xff]  ;;  %v12556_v52 = vld [vmem:[%s16546_s7 + $0x1c0] sm:$0xff] }
 0x8ad   : > { %v9512_v4 = vadd.f32 %v16074_v34, %v9431_v25  ;;  %v9739_v8 = vadd.f32 %v9725_v6, %v9663_v17  ;;  %v12558_v6 = vld [vmem:[%s16546_s7 + $0x1d0] sm:$0xff] }
 0x8ae   : > { %10176 = vmatpush.msra.mxu1 %v12516_v57 }
 0x8b0   : > { %v9871_v27 = vpop.f32.mrf.mxu3 }
 0x8b1   : > { %v9889_v38 = vadd.f32 %v9871_v27, %v9813_v47  ;;  %v9801_v13 = vpop.f32.mrf.mxu2 }
 0x8b2   : > { %v16112_v29 = vpop.f32.mrf.mxu0  ;;  %v9815_v16 = vadd.f32 %v9801_v13, %v9739_v8 }
 0x8b3   : > { %v9728_v20 = vpop.f32.mrf.mxu1 }
 0x8b8   : > { %v9874_v49 = vpop.f32.mrf.mxu3 }
 0x8b9   : > { %v9890_v63 = vadd.f32 %v9874_v49, %v9814_v46  ;;  %v9804_v34 = vpop.f32.mrf.mxu2 }
 0x8ba   : > { %v16140_v53 = vpop.f32.mrf.mxu0 }
 0x8c0   : > { %v9877_v14 = vpop.f32.mrf.mxu3 }
 0x8c1   : > { %v9891_v54 = vadd.f32 %v9877_v14, %v9815_v16 }
 0x8c2   : > { %v9658_v23 = vpop.f32.mrf.mxu0 }
 0x8c3   : > { %v9588_v23 = vadd.f32 %v16076_v3, %v9512_v4 }
 0x8c5   : > { %v9664_v3 = vadd.f32 %v16112_v29, %v9588_v23  ;;  %v12552_v29 = vld [vmem:[%s16546_s7 + $0x1b0] sm:$0xff] }
 0x8c7   : > { %v9740_v9 = vadd.f32 %v9728_v20, %v9664_v3 }
 0x8c8   : > { %v9880_v19 = vpop.f32.mrf.mxu3 }
 0x8ca   : > { %v9947_v41 = vpop.f32.mrf.mxu0 }
 0x8cb   : > { %v9965_v31 = vadd.f32 %v9947_v41, %v9889_v38  ;;  %v9513_v38 = vadd.f32 %v16094_v7, %v9434_v59  ;;  %v9816_v41 = vadd.f32 %v9804_v34, %v9740_v9  ;;  %v12580_v59 = vld [vmem:[%s16548_s9 + $0x60] sm:$0xff] }
 0x8cd   : > { %v9975_v5 = vadd.f32 %v16169_v21, %v9965_v31  ;;  %v9589_v7 = vadd.f32 %v16096_v56, %v9513_v38  ;;  %v12549_v31 = vld [vmem:[%s16546_s7 + $0x198] sm:$0xff]  ;;  %v9731_v56 = vpop.f32.mrf.mxu1  ;;  %v9892_v44 = vadd.f32 %v9880_v19, %v9816_v41  ;;  %v10419_v38 = vld [vmem:[%s16548_s9 + $0x28] sm:$0xff]  ;;  %v12592_v41 = vld [vmem:[%s16548_s9 + $0xb0] sm:$0xff] }
 0x8cf   : > { %v9981_v26 = vmax.f32 %v9975_v5, 0.0  ;;  %v9665_v22 = vadd.f32 %v16140_v53, %v9589_v7  ;;  %v9807_v5 = vpop.f32.mrf.mxu2  ;;  %v12568_v53 = vld [vmem:[%s16546_s7 + $0x210] sm:$0xff]  ;;  %v10417_v7 = vld [vmem:[%s16548_s9 + $0x18] sm:$0xff] }
 0x8d0   : > { %v9883_v46 = vpop.f32.mrf.mxu3 }
 0x8d1   : > { %9987 = vst.msk [vmem:[#allocation4] sm:$0xff] %vm802_vm0, %v9981_v26  ;;  %v12567_v26 = vld [vmem:[%s16546_s7 + $0x208] sm:$0xff]  ;;  %v9741_v14 = vadd.f32 %v9731_v56, %v9665_v22  ;;  %v12601_v56 = vld [vmem:[%s16548_s9 + $0xf0] sm:$0xff] }
 0x8d2   : > { %v9950_v27 = vpop.f32.mrf.mxu0  ;;  %v12591_v22 = vld [vmem:[%s16548_s9 + $0xa8] sm:$0xff] }
 0x8d3   : > { %v9966_v1 = vadd.f32 %v9950_v27, %v9890_v63  ;;  %v9817_v40 = vadd.f32 %v9807_v5, %v9741_v14  ;;  %v12546_v63 = vld [vmem:[%s16546_s7 + $0x180] sm:$0xff]  ;;  %v12598_v14 = vld [vmem:[%s16548_s9 + $0xd8] sm:$0xff] }
 0x8d4   : > { %v12590_v5 = vld [vmem:[%s16548_s9 + $0xa0] sm:$0xff] }
 0x8d5   : > { %v9976_v11 = vadd.f32 %v16169_v21, %v9966_v1  ;;  %v9893_v25 = vadd.f32 %v9883_v46, %v9817_v40  ;;  %v9734_v8 = vpop.f32.mrf.mxu1  ;;  %v12599_v46 = vld [vmem:[%s16548_s9 + $0xe0] sm:$0xff]  ;;  %v12597_v40 = vld [vmem:[%s16548_s9 + $0xd0] sm:$0xff] }
 0x8d7   : > { %v9982_v55 = vmax.f32 %v9976_v11, 0.0  ;;  %v9810_v11 = vpop.f32.mrf.mxu2 }
 0x8d8   : > { %v10028_v42 = vld [vmem:[#allocation4 + $0x1] ss:$2 sm:$0xff]  ;;  %v10016_v35 = vld [vmem:[#allocation4] ss:$2 sm:$0xff]  ;;  %v9886_v16 = vpop.f32.mrf.mxu3 }
 0x8d9   : > { %v10099_v49 = vld [vmem:[#allocation4 + $0x2] ss:$2 sm:$0xff]  ;;  %9988 = vst.msk [vmem:[#allocation4 + $0x18] sm:$0xff] %vm802_vm0, %v9982_v55  ;;  %12502 = vmatmul.msk.f32.vlgmr.msrb.gmra.mxu1 %vm802_vm0, %v10028_v42  ;;  %12504 = vmatmul.msk.f32.vlgmr.msra.gmra.mxu2 %vm802_vm0, %v10016_v35 }
 0x8da   : > { %12514 = vmatmul.msk.f32.vlgmr.msrb.gmra.mxu3 %vm802_vm0, %v10099_v49  ;;  %v9953_v47 = vpop.f32.mrf.mxu0  ;;  %10345 = vmatpush.msra.mxu2 %v12563_v0 }
 0x8db   : > { %v9967_v28 = vadd.f32 %v9953_v47, %v9891_v54  ;;  %10301 = vmatpush.msrb.mxu1 %v12553_v15  ;;  %10389 = vmatpush.msrb.mxu3 %v12573_v32  ;;  %v12583_v47 = vld [vmem:[%s16548_s9 + $0x78] sm:$0xff] }
 0x8dc   : > { %10346 = vmatpush.msra.mxu2 %v12562_v50  ;;  %10443 = vmatpush.msra.mxu0 %v12583_v47 }
 0x8dd   : > { %v9977_v24 = vadd.f32 %v16169_v21, %v9967_v28  ;;  %10302 = vmatpush.msrb.mxu1 %v12552_v29  ;;  %10390 = vmatpush.msrb.mxu3 %v12572_v33  ;;  %v12582_v29 = vld [vmem:[%s16548_s9 + $0x70] sm:$0xff]  ;;  %v12581_v33 = vld [vmem:[%s16548_s9 + $0x68] sm:$0xff] }
 0x8de   : > { %10347 = vmatpush.msra.mxu2 %v12561_v48  ;;  %10444 = vmatpush.msra.mxu0 %v12582_v29  ;;  %v10421_v48 = vld [vmem:[%s16548_s9 + $0x38] sm:$0xff] }
 0x8df   : > { %v9983_v60 = vmax.f32 %v9977_v24, 0.0  ;;  %10303 = vmatpush.msrb.mxu1 %v12551_v10  ;;  %10391 = vmatpush.msrb.mxu3 %v12571_v43  ;;  %v10420_v10 = vld [vmem:[%s16548_s9 + $0x30] sm:$0xff]  ;;  %v12579_v43 = vld [vmem:[%s16548_s9 + $0x58] sm:$0xff] }
 0x8e0   : > { %10348 = vmatpush.msra.mxu2 %v12560_v58  ;;  %v10143_v55 = vld [vmem:[#allocation4 + $0x18] ss:$2 sm:$0xff]  ;;  %v10187_v0 = vld [vmem:[#allocation4 + $0x19] ss:$2 sm:$0xff]  ;;  %10445 = vmatpush.msra.mxu0 %v12581_v33 }
 0x8e1   : > { %9989 = vst.msk [vmem:[#allocation4 + $0x30] sm:$0xff] %vm802_vm0, %v9983_v60  ;;  %10304 = vmatpush.msrb.mxu1 %v12550_v51  ;;  %10392 = vmatpush.msrb.mxu3 %v12570_v39  ;;  %v10231_v15 = vld [vmem:[#allocation4 + $0x1a] ss:$2 sm:$0xff] }
 0x8e2   : > { %v9956_v13 = vpop.f32.mrf.mxu0  ;;  %10349 = vmatpush.msra.mxu2 %v12559_v18  ;;  %10446 = vmatpush.msra.mxu0 %v12580_v59  ;;  %v10418_v51 = vld [vmem:[%s16548_s9 + $0x20] sm:$0xff]  ;;  %v12593_v39 = vld [vmem:[%s16548_s9 + $0xb8] sm:$0xff]  ;;  %v10416_v18 = vld [vmem:[%s16548_s9 + $0x10] sm:$0xff] }
 0x8e3   : > { %v9968_v61 = vadd.f32 %v9956_v13, %v9892_v44  ;;  %10305 = vmatpush.msrb.mxu1 %v12549_v31  ;;  %10393 = vmatpush.msrb.mxu3 %v12569_v2  ;;  %v12602_v60 = vld [vmem:[%s16548_s9 + $0xf8] sm:$0xff]  ;;  %v12578_v2 = vld [vmem:[%s16548_s9 + $0x50] sm:$0xff]  ;;  %v12600_v13 = vld [vmem:[%s16548_s9 + $0xe8] sm:$0xff] }
 0x8e4   : > { %10350 = vmatpush.msra.mxu2 %v12558_v6  ;;  %10447 = vmatpush.msra.mxu0 %v12579_v43  ;;  %v10415_v6 = vld [vmem:[%s16548_s9 + $0x8] sm:$0xff] }
 0x8e5   : > { %v9978_v45 = vadd.f32 %v16169_v21, %v9968_v61  ;;  %10306 = vmatpush.msrb.mxu1 %v12548_v36  ;;  %10394 = vmatpush.msrb.mxu3 %v12568_v53  ;;  %v12577_v53 = vld [vmem:[%s16548_s9 + $0x48] sm:$0xff]  ;;  %v10414_v61 = vld [vmem:[%s16548_s9] sm:$0xff] }
 0x8e6   : > { %10351 = vmatpush.msra.mxu2 %v12557_v37  ;;  %10448 = vmatpush.msra.mxu0 %v12578_v2  ;;  %v12589_v37 = vld [vmem:[%s16548_s9 + $0x98] sm:$0xff] }
 0x8e7   : > { %v9984_v17 = vmax.f32 %v9978_v45, 0.0  ;;  %10307 = vmatpush.msrb.mxu1 %v12547_v62  ;;  %10395 = vmatpush.msrb.mxu3 %v12567_v26  ;;  %v12576_v62 = vld [vmem:[%s16548_s9 + $0x40] sm:$0xff]  ;;  %v12588_v26 = vld [vmem:[%s16548_s9 + $0x90] sm:$0xff] }
 0x8e8   : > { %v10030_v57 = vld [vmem:[#allocation4 + $0x31] ss:$2 sm:$0xff]  ;;  %v10018_v12 = vld [vmem:[#allocation4 + $0x30] ss:$2 sm:$0xff]  ;;  %10352 = vmatpush.msra.mxu2 %v12556_v52  ;;  %10449 = vmatpush.msra.mxu0 %v12577_v53  ;;  %v12587_v52 = vld [vmem:[%s16548_s9 + $0x88] sm:$0xff] }
 0x8e9   : > { %v10101_v27 = vld [vmem:[#allocation4 + $0x32] ss:$2 sm:$0xff]  ;;  %9990 = vst.msk [vmem:[#allocation4 + $0x48] sm:$0xff] %vm802_vm0, %v9984_v17  ;;  %12503 = vmatmul.msk.f32.gmra.mxu1 %vm802_vm0, %v10030_v57  ;;  %12505 = vmatmul.msk.f32.gmra.mxu2 %vm802_vm0, %v10018_v12  ;;  %v10319_v49 = vld [vmem:[#allocation4 + $0x31] ss:$2 sm:$0xff]  ;;  %v12596_v57 = vld [vmem:[%s16548_s9 + $0xc8] sm:$0xff] }
 0x8ea   : > { %12515 = vmatmul.msk.f32.gmra.mxu3 %vm802_vm0, %v10101_v27  ;;  %v9959_v1 = vpop.f32.mrf.mxu0  ;;  %10308 = vmatpush.msrb.mxu1 %v12546_v63  ;;  %v10275_v35 = vld [vmem:[#allocation4 + $0x30] ss:$2 sm:$0xff]  ;;  %v12595_v27 = vld [vmem:[%s16548_s9 + $0xc0] sm:$0xff] }
 0x8eb   : > { %v9969_v4 = vadd.f32 %v9959_v1, %v9893_v25  ;;  %10396 = vmatpush.msrb.mxu3 %v12566_v30  ;;  %v10363_v3 = vld [vmem:[#allocation4 + $0x32] ss:$2 sm:$0xff]  ;;  %10450 = vmatpush.msra.mxu0 %v12576_v62 }
 0x8ec   : > { %v12586_v30 = vld [vmem:[%s16548_s9 + $0x80] sm:$0xff] }
 0x8ed   : > { %v9979_v23 = vadd.f32 %v16169_v21, %v9969_v4  ;;  %v10563_v53 = vld [vmem:[%s16550_s11] sm:$0xff] }
 0x8ef   : > { %v9985_v20 = vmax.f32 %v9979_v23, 0.0 }
 0x8f0   : > { %v10145_v34 = vld [vmem:[#allocation4 + $0x48] ss:$2 sm:$0xff]  ;;  %v10189_v42 = vld [vmem:[#allocation4 + $0x49] ss:$2 sm:$0xff] }
 0x8f1   : > { %9991 = vst.msk [vmem:[#allocation4 + $0x60] sm:$0xff] %vm802_vm0, %v9985_v20  ;;  %12524 = vmatmul.msk.f32.vlgmr.msra.gmra.mxu1 %vm802_vm0, %v10143_v55  ;;  %12534 = vmatmul.msk.f32.vlgmr.msrb.gmra.mxu2 %vm802_vm0, %v10187_v0  ;;  %v10233_v21 = vld [vmem:[#allocation4 + $0x4a] ss:$2 sm:$0xff] }
 0x8f2   : > { %12544 = vmatmul.msk.f32.vlgmr.msra.gmra.mxu3 %vm802_vm0, %v10231_v15  ;;  %v9962_v32 = vpop.f32.mrf.mxu0  ;;  %10465 = vmatpush.msra.mxu1 %v10421_v48 }
 0x8f3   : > { %10497 = vmatpush.msrb.mxu2 %v12593_v39  ;;  %10530 = vmatpush.msra.mxu3 %v12602_v60 }
 0x8f4   : > { %10466 = vmatpush.msra.mxu1 %v10420_v10 }
 0x8f5   : > { %10498 = vmatpush.msrb.mxu2 %v12592_v41  ;;  %10531 = vmatpush.msra.mxu3 %v12601_v56  ;;  %v10543_v41 = vld [vmem:[%s16549_s10] sm:$0x1]  ;;  %v10569_v56 = vld [vmem:[%s16550_s11 + $0x30] sm:$0xff] }
 0x8f6   : > { %10467 = vmatpush.msra.mxu1 %v10419_v38 }
 0x8f7   : > { %10499 = vmatpush.msrb.mxu2 %v12591_v22  ;;  %10532 = vmatpush.msra.mxu3 %v12600_v13  ;;  %v10570_v22 = vld [vmem:[%s16550_s11 + $0x38] sm:$0xff]  ;;  %v10565_v13 = vld [vmem:[%s16550_s11 + $0x10] sm:$0xff] }
 0x8f8   : > { %v10277_v54 = vld [vmem:[#allocation4 + $0x60] ss:$2 sm:$0xff]  ;;  %v10321_v50 = vld [vmem:[#allocation4 + $0x61] ss:$2 sm:$0xff]  ;;  %10468 = vmatpush.msra.mxu1 %v10418_v51  ;;  %10583 = vmatpush.msrb.mxu0 %v10570_v22 }
 0x8f9   : > { %12525 = vmatmul.msk.f32.gmra.mxu1 %vm802_vm0, %v10145_v34  ;;  %12535 = vmatmul.msk.f32.gmra.mxu2 %vm802_vm0, %v10189_v42  ;;  %v10365_v19 = vld [vmem:[#allocation4 + $0x62] ss:$2 sm:$0xff] }
 0x8fa   : > { %12545 = vmatmul.msk.f32.gmra.mxu3 %vm802_vm0, %v10233_v21  ;;  %10469 = vmatpush.msra.mxu1 %v10417_v7 }
 0x8fb   : > { %10500 = vmatpush.msrb.mxu2 %v12590_v5  ;;  %10533 = vmatpush.msra.mxu3 %v12599_v46  ;;  %v10566_v5 = vld [vmem:[%s16550_s11 + $0x18] sm:$0xff] }
 0x8fc   : > { %10470 = vmatpush.msra.mxu1 %v10416_v18  ;;  %10584 = vmatpush.msrb.mxu0 %v10569_v56 }
 0x8fd   : > { %10501 = vmatpush.msrb.mxu2 %v12589_v37  ;;  %10534 = vmatpush.msra.mxu3 %v12598_v14 }
 0x8fe   : > { %10471 = vmatpush.msra.mxu1 %v10415_v6  ;;  %v10567_v6 = vld [vmem:[%s16550_s11 + $0x20] sm:$0xff] }
 0x8ff   : > { %10502 = vmatpush.msrb.mxu2 %v12588_v26  ;;  %10535 = vmatpush.msra.mxu3 %v12597_v40 }
 0x900   : > { %10472 = vmatpush.msra.mxu1 %v10414_v61  ;;  %v10597_v61 = vld [vmem:[%s16552_s13 + $0x8] sm:$0xff] }
 0x901   : > { %12554 = vmatmul.msk.f32.vlgmr.msrb.gmra.mxu1 %vm802_vm0, %v10275_v35  ;;  %12564 = vmatmul.msk.f32.vlgmr.msra.gmra.mxu2 %vm802_vm0, %v10319_v49  ;;  %v12660_v35 = vld [vmem:[%s16547_s8] ss:$0 sm:$0xff] }
 0x902   : > { %12574 = vmatmul.msk.f32.vlgmr.msrb.gmra.mxu3 %vm802_vm0, %v10363_v3  ;;  %10503 = vmatpush.msrb.mxu2 %v12587_v52 }
 0x903   : > { %10536 = vmatpush.msra.mxu3 %v12596_v57  ;;  %10616 = vmatpush.msrb.mxu1 %v10597_v61  ;;  %v10571_v57 = vld [vmem:[%s16551_s12] sm:$0x1] }
 0x904   : > { %10504 = vmatpush.msrb.mxu2 %v12586_v30  ;;  %v10596_v30 = vld [vmem:[%s16552_s13] sm:$0xff] }
 0x905   : > { %10537 = vmatpush.msra.mxu3 %v12595_v27  ;;  %10617 = vmatpush.msrb.mxu1 %v10596_v30 }
 0x909   : > { %12555 = vmatmul.msk.f32.gmra.mxu1 %vm802_vm0, %v10277_v54  ;;  %12565 = vmatmul.msk.f32.gmra.mxu2 %vm802_vm0, %v10321_v50 }
 0x90a   : > { %12575 = vmatmul.msk.f32.gmra.mxu3 %vm802_vm0, %v10365_v19 }
 0x956   : > { %v10063_v28 = vpop.f32.mrf.mxu1 }
 0x95c   : > { %v10092_v9 = vpop.f32.mrf.mxu2 }
 0x95d   : > { %v10134_v24 = vpop.f32.mrf.mxu3  ;;  %v10093_v17 = vadd.f32 %v10092_v9, %v10063_v28 }
 0x95f   : > { %v10140_v25 = vadd.f32 %v10134_v24, %v10093_v17 }
 0x966   : > { %v10066_v58 = vpop.f32.mrf.mxu1 }
 0x96c   : > { %v10095_v31 = vpop.f32.mrf.mxu2 }
 0x96d   : > { %v10137_v44 = vpop.f32.mrf.mxu3  ;;  %v10096_v8 = vadd.f32 %v10095_v31, %v10066_v58 }
 0x96e   : > { %v10178_v36 = vpop.f32.mrf.mxu1 }
 0x96f   : > { %v10184_v1 = vadd.f32 %v10178_v36, %v10140_v25  ;;  %v10141_v20 = vadd.f32 %v10137_v44, %v10096_v8  ;;  %v10568_v44 = vld [vmem:[%s16550_s11 + $0x28] sm:$0xff] }
 0x970   : > { %10585 = vmatpush.msrb.mxu0 %v10568_v44  ;;  %v10564_v36 = vld [vmem:[%s16550_s11 + $0x8] sm:$0xff] }
 0x972   : > { %10586 = vmatpush.msrb.mxu0 %v10567_v6 }
 0x974   : > { %v10222_v45 = vpop.f32.mrf.mxu2  ;;  %10587 = vmatpush.msrb.mxu0 %v10566_v5 }
 0x975   : > { %v10266_v63 = vpop.f32.mrf.mxu3  ;;  %v10228_v11 = vadd.f32 %v10222_v45, %v10184_v1 }
 0x976   : > { %v10181_v12 = vpop.f32.mrf.mxu1  ;;  %10588 = vmatpush.msrb.mxu0 %v10565_v13 }
 0x977   : > { %v10272_v55 = vadd.f32 %v10266_v63, %v10228_v11  ;;  %v10185_v0 = vadd.f32 %v10181_v12, %v10141_v20 }
 0x978   : > { %10589 = vmatpush.msrb.mxu0 %v10564_v36 }
 0x97a   : > { %10590 = vmatpush.msrb.mxu0 %v10563_v53 }
 0x97c   : > { %v10225_v4 = vpop.f32.mrf.mxu2 }
 0x97d   : > { %v10269_v23 = vpop.f32.mrf.mxu3  ;;  %v10229_v34 = vadd.f32 %v10225_v4, %v10185_v0 }
 0x97e   : > { %v10310_v16 = vpop.f32.mrf.mxu1 }
 0x97f   : > { %v10316_v15 = vadd.f32 %v10310_v16, %v10272_v55  ;;  %v10273_v54 = vadd.f32 %v10269_v23, %v10229_v34 }
 0x984   : > { %v10354_v32 = vpop.f32.mrf.mxu2 }
 0x985   : > { %v10360_v42 = vadd.f32 %v10354_v32, %v10316_v15  ;;  %v10398_v21 = vpop.f32.mrf.mxu3 }
 0x986   : > { %v10313_v3 = vpop.f32.mrf.mxu1 }
 0x987   : > { %v10404_v49 = vadd.f32 %v10398_v21, %v10360_v42  ;;  %v10317_v47 = vadd.f32 %v10313_v3, %v10273_v54 }
 0x989   : > { %v10410_v50 = vadd.f32 %v12660_v35, %v10404_v49 }
 0x98b   : > { %v10412_v19 = vmax.f32 %v10410_v50, 0.0 }
 0x98c   : > { %v10357_v29 = vpop.f32.mrf.mxu2 }
 0x98d   : > { %v10432_v33 = vrot.slane %v10412_v19, 1  ;;  %v10361_v59 = vadd.f32 %v10357_v29, %v10317_v47  ;;  %12585 = vmatmul.msk.f32.vlgmr.msra.gmra.mxu1 %vm802_vm0, %v10412_v19  ;;  %v10401_v28 = vpop.f32.mrf.mxu3 }
 0x98f   : > { %v10405_v48 = vadd.f32 %v10401_v28, %v10361_v59  ;;  %12584 = vmatmul.msk.f32.vlgmr.msra.gmra.mxu0 %vm802_vm0, %v10432_v33 }
 0x991   : > { %v10411_v10 = vadd.f32 %v12660_v35, %v10405_v48 }
 0x993   : > { %v10413_v43 = vmax.f32 %v10411_v10, 0.0 }
 0x995   : > { %v10519_v38 = vrot.slane %v10413_v43, 1  ;;  %12594 = vmatmul.msk.f32.vlgmr.msrb.gmra.mxu2 %vm802_vm0, %v10413_v43 }
 0x997   : > { %12603 = vmatmul.msk.f32.vlgmr.msra.gmra.mxu3 %vm802_vm0, %v10519_v38 }
 0xa0a   : > { %v10474_v24 = vpop.f32.mrf.mxu1 }
 0xa0c   : > { %v10452_v9 = vpop.f32.mrf.mxu0 }
 0xa0d   : > { %v10475_v58 = vadd.f32 %v10474_v24, %v10452_v9 }
 0xa18   : > { %v10506_v51 = vpop.f32.mrf.mxu2 }
 0xa19   : > { %v10509_v39 = vadd.f32 %v10506_v51, %v10475_v58 }
 0xa1a   : > { %v10539_v7 = vpop.f32.mrf.mxu3 }
 0xa1b   : > { %v10542_v60 = vadd.f32 %v10539_v7, %v10509_v39 }
 0xa1d   : > { %v10544_v18 = vadd.f32 %v10543_v41, %v10542_v60 }
 0xa1f   : > { %v10545_v31 = vmul.f32 %v10544_v18, %v10544_v18 }
 0xa21   : > { %v10547_v2 = vsel %vm10546_vm3, %v10545_v31, 0.0 }
 0xa22   : > { %10548 = vadd.xlane.f32.xlu0 %v10547_v2 }
 0xa95   : > { %v10549_v37 = vpop.xlane.xlu0 %10548 }
 0xa96   : > { %v10550_v46 = vmax.f32 %v10549_v37, 1e-24 }
 0xa98   : > { %12661 = vrsqrt.f32 %v10550_v46  ;;  %vm10557_vm5 = vweird.f32 %v10550_v46 }
 0xa9e   : > { %v12662_v62 = vpop.eup %12661 }
 0xa9f   : > { %v10552_v26 = vmul.f32 %v12662_v62, %v10550_v46  ;;  %vm10558_vm4 = vweird.f32 %v12662_v62 }
 0xaa0   : > { %vm10559_vm6 = vmor %vm10557_vm5, %vm10558_vm4 }
 0xaa1   : > { %v10553_v14 = vmul.f32 %v12662_v62, %v10552_v26 }
 0xaa3   : > { %v10554_v45 = vmul.f32 0.5, %v10553_v14 }
 0xaa5   : > { %v10555_v52 = vsub.f32 1.5, %v10554_v45 }
 0xaa7   : > { %v10556_v40 = vmul.f32 %v12662_v62, %v10555_v52 }
 0xaa9   : > { %v10560_v17 = vsel %vm10559_vm6, %v12662_v62, %v10556_v40 }
 0xaaa   : > { %v10561_v63 = vmul.f32 %v10560_v17, %v10544_v18 }
 0xaac   : > { %12604 = vmatmul.msk.f32.vlgmr.msrb.gmra.mxu0 %vm802_vm0, %v10561_v63  ;;  %10562 = vst.msk [vmem:[%s517_s17] sm:$0x1] %vm10546_vm3, %v10561_v63 }
 0xb29   : > { %v10592_v12 = vpop.f32.mrf.mxu0 }
 0xb2a   : > { %v10593_v27 = vadd.f32 %v10592_v12, %v10571_v57 }
 0xb2c   : > { %v10595_v25 = vmax.f32 %v10593_v27, 0.0 }
 0xb2e   : > { %12605 = vmatmul.msk.f32.vlgmr.msrb.gmra.mxu1 %vm4734_vm1, %v10595_v25 }
 0xb2f   : > { %12698 = shalt.err (!%p12695_p3)
}
 0xb30   : > { %12612 = dma.vmem_to_hbm [thread:$0]  (%p12891_p5), %s10659_s20, 16, %s10661_s23, %s10644_s30   ;;  %v10598_v1 = vld [vmem:[%s16553_s14] sm:$0x1]  ;;  %vm10641_vm10 = vcmask 57344  }
 0xb31   : > { %s16578_s29 = sld [smem:[#allocation20_spill]]  ;;  %s523_s20 = scalar_lea.vmem [#allocation7], %s16476_s19 }
 0xb32   : > { %s10671_s23 = sshll.u32 %s523_s20, 4  ;;  %s10672_s23 = int_to_ptr.vmem [resolvable:$true] %s10671_s23 }
 0xb37   : > { %s10669_s24 = scalar_lea.hbm %s16578_s29, %s12874_s25  ;;  %s10648_s25 = scalar_lea.sflag [#allocation8], %s16476_s19 }
 0xb38   : > { %s10673_s30 = sshll.u32 %s10669_s24, 4  ;;  %s12719_s21 = scalar_lea.hbm %s16578_s29, 2  ;;  %s10674_s30 = int_to_ptr.hbm [resolvable:$true] %s10673_s30 }
 0xb39   : > { %s12713_s18 = sshra.s32 %s10674_s30, 4  ;;  %s12714_s18 = int_to_ptr.hbm [resolvable:$true] %s12713_s18 }
 0xb3a   : > { %s12715_s27 = scalar_lea.hbm %s12714_s18, 1  ;;  %p12720_p9 = scmp.lt.s32.totalorder %s12714_s18, %s16578_s29 }
 0xb3b   : > { %p12716_p4 = scmp.ne.s32.totalorder %s12714_s18, %s12715_s27  ;;  %p12721_p10 = scmp.lt.s32.totalorder %s12719_s21, %s12715_s27 }
 0xb3d   : > { %p12717_p7 = pnand %p12716_p4, %p12891_p5  ;;  %p12722_p11 = por %p12721_p10, %p12720_p9 }
 0xb3f   : > { %p12718_p8 = pneg %p12717_p7 }
 0xb41   : > { %p12723_p12 = pnand %p12722_p11, %p12718_p8 }
 0xbab   : > { %v10619_v4 = vpop.f32.mrf.mxu1 }
 0xbac   : > { %v10620_v8 = vadd.f32 %v10619_v4, %v10598_v1 }
 0xbae   : > { %v12606_v11 = vmul.f32 -1.442695, %v10620_v8 }
 0xbb0   : > { %12663 = vpow2.f32 %v12606_v11 }
 0xbb6   : > { %v12664_v23 = vpop.eup %12663 }
 0xbb7   : > { %v10625_v16 = vadd.f32 1.0, %v12664_v23 }
 0xbb9   : > { %12665 = vrcp.f32 %v10625_v16  ;;  %v10637_v15 = vand.u32 2147483648, %v10625_v16  ;;  %v10635_v34 = vand.u32 2147483647, %v10625_v16  ;;  %vm10631_vm8 = vweird.f32 %v10625_v16 }
 0xbbb   : > { %v10638_v21 = vor.u32 1.1754944e-38, %v10637_v15  ;;  %vm10636_vm11 = vcmp.eq.f32.partialorder %v10635_v34, 8.507059e+37 }
 0xbbf   : > { %v12666_v20 = vpop.eup %12665 }
 0xbc0   : > { %v10627_v55 = vmul.f32 %v12666_v20, %v10625_v16  ;;  %vm10632_vm7 = vweird.f32 %v12666_v20 }
 0xbc1   : > { %vm10633_vm9 = vmor %vm10631_vm8, %vm10632_vm7 }
 0xbc2   : > { %v10628_v0 = vsub.f32 1.0, %v10627_v55 }
 0xbc4   : > { %v10629_v32 = vmul.f32 %v12666_v20, %v10628_v0 }
 0xbc6   : > { %v10630_v42 = vadd.f32 %v12666_v20, %v10629_v32 }
 0xbc8   : > { %v10634_v35 = vsel %vm10633_vm9, %v12666_v20, %v10630_v42 }
 0xbc9   : > { %v10639_v49 = vsel %vm10636_vm11, %v10638_v21, %v10634_v35 }
 0xbca   : > { %10642 = vst.msk [vmem:[%s523_s20] sm:$0x1] %vm10641_vm10, %v10639_v49 }
 0xbcb   : > { %12726 = shalt.err (!%p12723_p12)
}
 0xbcc   : > { %12613 = dma.vmem_to_hbm [thread:$0]  (%p12891_p5), %s10672_s23, 16, %s10674_s30, %s10648_s25  }
 0xbcd PF: > { %s16579_s19 = sld [smem:[#allocation13_spill]] }
 0xbce   : > { %s16580_s1 = sld [smem:[#allocation11_spill]] }
 0xbd3   : > { %p12623_p13 = scmp.ge.s32.totalorder %s16579_s19, 2 }
 0xbd4   : > { %s10685_s24 = sand.u32 1, %s16580_s1  }
 0xbd5   : > { %p12617_p0 = pnand %p12623_p13, %p12895_p6  ;;  %s10686_s20 = scalar_lea.sflag [#allocation6], %s10685_s24 }
 0xbd7   : > { %p12618_p1 = pneg %p12617_p0 }
 0xbd9   : > { %12744 = dma.done.wait (%p12618_p1), %s10686_s20, 16  }
 0xbda   : > { %12746 = vsyncadd (%p12618_p1), %s10686_s20, 4294967280  ;;  %s10695_s18 = scalar_lea.sflag [#allocation8], %s10685_s24 }
 0xbdb   : > { %12748 = dma.done.wait (%p12618_p1), %s10695_s18, 16  }
 0xbdc   : > { %12750 = vsyncadd (%p12618_p1), %s10695_s18, 4294967280  ;;  %s16582_s24 = sld [smem:[#allocation14_spill]]  ;;  %s16585_s21 = smov %s12757_s22 }
 0xbdd   : > { %s16583_s27 = sld [smem:[#allocation12_spill]] }
 0xbde   : > { %s16584_s23 = sld [smem:[#allocation15_spill]] }
 0xbe2   : > { %p30_p5 = scmp.ge.s32.totalorder %s16582_s24, 4  }
 0xbe3   : > { %s16586_s22 = smov %s16583_s27 }
 0xbe4   :  { %32 = sbr.rel (!%p30_p5) target bundleno = 10 (0xa), region = 689 }
 0xbe9   :  { %10700 = vsyncpa [#allocation6], 1 }
 0xbea   :  { %10702 = vsyncpa [#allocation6 + $0x1], 1 }
 0xbeb   :  { %10703 = vsyncpa [#allocation8], 1 }
 0xbec   :  { %10705 = vsyncpa [#allocation8 + $0x1], 1 }

</bundles_post_ra>
